<compile_context>
chip_gen: v5e
topology: v5e:2x2
jax: 0.10.0
libtpu: 0.0.40
codegen_flags: <defaults>
</compile_context>

<pallas_src>
import jax
import jax.numpy as jnp
from jax.experimental import pallas as pl
from jax.experimental.pallas import tpu as pltpu

# ---------------- model hyper-parameters (small but faithful to the module) ----------
B = 2                # batch
NCH = 8              # n_channels (EEG electrodes)
T = 128              # input_window_size
NCLS = 4             # n_classes
F1 = 8
D = 2
F2 = 16
KL = 64              # temporal kernel_length ('same' padding)
KG = 8               # GraphTemporalConvolution temporal kernel ('same' padding)
KS = 16              # separable depthwise kernel (explicit padding = 8)
T4 = T // 4                          # 32  after AvgPool2d((1, 4))
TSEP = T4 + 2 * (KS // 2) - KS + 1   # 33  depthwise output width
T8 = TSEP // 8                       # 4   after AvgPool2d((1, 8)), floor mode
FEAT = F2 * T8                       # 64  flattened classifier input
BN_EPS = 1e-3
PAD1_L = (KL - 1) // 2               # 31  torch 'same' even kernel: left pad
PADG_L = (KG - 1) // 2               # 3
PADG_R = KG - 1 - PADG_L             # 4
GR = F1 * NCH                        # 64  graph-stage rows (feature, channel)
CD = F1 * D                          # 16  channels after the spatial conv
NBT = B * T                          # 256 lane-stacked batch*time


def _elu(z):  # nn.ELU(alpha=1.0)
    return jnp.where(z > 0, z, jnp.exp(jnp.minimum(z, 0.0)) - 1.0)


# ----------------------------------- fused kernel ------------------------------------
def gcn_eegnet_kernel(xs_ref, b1w_ref, mstack_ref, w256_ref, wsmall_ref, fslab_ref,
                      out_ref):
    f32, bf16 = jnp.float32, jnp.bfloat16

    # --- Conv2d(1,F1,(1,KL),'same') + BN(F1): one wide MXU matmul, then vreg-aligned
    #     (8,128) block moves to the (feature, channel) x (batch, time) layout.
    y = jnp.dot(xs_ref[...].astype(bf16), b1w_ref[...],
                preferred_element_type=f32)                           # (B*NCH, F1*T)
    h = jnp.concatenate(
        [jnp.concatenate([y[b * NCH:(b + 1) * NCH, f * T:(f + 1) * T]
                          for b in range(B)], axis=1)
         for f in range(F1)], axis=0)                                 # (GR, NBT)
    h = h + fslab_ref[:, 0:1]

    # per-tap validity masks for the 'same' (left 3 / right 4) graph temporal conv
    tj = jax.lax.broadcasted_iota(jnp.int32, (1, NBT), 1) & (T - 1)   # time within sample
    gmask = {}
    for k in range(KG):
        if k == PADG_L:
            continue
        lo = PADG_L - k if k < PADG_L else 0
        hi = T - (k - PADG_L) if k > PADG_L else T
        gmask[k] = ((tj >= lo) & (tj < hi)).astype(f32)               # (1, NBT)

    # --- 3 x [GraphTemporalConvolution + BN + ELU]: one M=512 matmul per layer against
    #     the host-folded per-tap weights, then aligned slice + lane roll + mask per tap.
    for i in range(3):
        ystack = jnp.dot(mstack_ref[i], h.astype(bf16),
                         preferred_element_type=f32)                  # (KG*GR, NBT)
        acc = ystack[PADG_L * GR:(PADG_L + 1) * GR, :]                # tap k=3: shift 0
        for k in range(KG):
            if k == PADG_L:
                continue
            yk = ystack[k * GR:(k + 1) * GR, :]                       # sublane-aligned
            rolled = pltpu.roll(yk, shift=(PADG_L - k) % NBT, axis=1)
            acc = acc + rolled * gmask[k]
        h = _elu(acc + fslab_ref[:, 1 + i:2 + i])

    # --- Conv2dWithConstraint (grouped spatial conv) + BN + ELU
    s = _elu(jnp.dot(wsmall_ref[:, 0:GR], h.astype(bf16),
                     preferred_element_type=f32) + fslab_ref[0:CD, 4:5])   # (CD, NBT)

    # --- AvgPool(1,4) + per-sample zero-pad placement for the depthwise conv
    pp = jnp.dot(s.astype(bf16), w256_ref[:, 0:NBT],
                 preferred_element_type=f32)                          # (CD, NBT)

    # --- separable conv: depthwise(1,KS) via lane rolls (no masks needed: valid output
    #     columns never cross a 128-lane sample block), pointwise + BN + ELU.
    wd = fslab_ref[0:CD, 8:8 + KS]                                    # (CD, KS) f32
    acc2 = pp * wd[:, 0:1]
    for k in range(1, KS):
        acc2 = acc2 + pltpu.roll(pp, shift=(NBT - k) % NBT, axis=1) * wd[:, k:k + 1]
    z2 = _elu(jnp.dot(wsmall_ref[:, 128:128 + CD], acc2.astype(bf16),
                      preferred_element_type=f32) + fslab_ref[0:F2, 5:6])  # (F2, NBT)

    # --- AvgPool(1,8) floor mode (drops column 32, kills the garbage lanes >= 33)
    o5 = jnp.dot(z2.astype(bf16), w256_ref[:, NBT:NBT + B * T8],
                 preferred_element_type=f32)                          # (F2, B*T8)

    # --- classifier: Flatten + Linear + LogSoftmax, flatten-free algebra producing a
    #     (NCLS, B) tile (transposed to (B, NCLS) in the wrapper).
    c = jnp.dot(wsmall_ref[:, 256:256 + F2], o5.astype(bf16),
                preferred_element_type=f32)                           # (NCLS*T8, B*T8)
    cm = c * fslab_ref[0:NCLS * T8, 24:32]                            # keep t == t'
    dsum = jnp.dot(cm.astype(bf16), wsmall_ref[0:B * T8, 512:512 + B],
                   preferred_element_type=f32)                        # (NCLS*T8, B)
    logits = jnp.dot(wsmall_ref[0:NCLS, 384:384 + NCLS * T8], dsum.astype(bf16),
                     preferred_element_type=f32) + fslab_ref[0:NCLS, 6:7]  # (NCLS, B)
    m = jnp.max(logits, axis=0, keepdims=True)
    lse = jnp.log(jnp.sum(jnp.exp(logits - m), axis=0, keepdims=True)) + m
    out_ref[...] = logits - lse


# ------------------------------ pallas_call wrapper ----------------------------------
@jax.jit
def gcn_eegnet_forward(x, kp):
    xs = x.reshape(B * NCH, T)                       # rows ordered (b, c); free reshape
    out_t = pl.pallas_call(
        gcn_eegnet_kernel,
        grid=(1,),
        in_specs=[
            pl.BlockSpec((B * NCH, T), lambda i: (0, 0)),
            pl.BlockSpec((T, F1 * T), lambda i: (0, 0)),
            pl.BlockSpec((3, KG * GR, GR), lambda i: (0, 0, 0)),
            pl.BlockSpec((NBT, 3 * T), lambda i: (0, 0)),
            pl.BlockSpec((CD, 5 * 128), lambda i: (0, 0)),
            pl.BlockSpec((GR, 32), lambda i: (0, 0)),
        ],
        out_specs=pl.BlockSpec((NCLS, B), lambda i: (0, 0)),
        out_shape=jax.ShapeDtypeStruct((NCLS, B), jnp.float32),
        compiler_params=pltpu.CompilerParams(dimension_semantics=("arbitrary",)),
    )(xs, kp["b1w"], kp["mstack"], kp["w256"], kp["wsmall"], kp["fslab"])
    return out_t.T                                   # (B, NCLS); 4x2 transpose in XLA


# ----------------------------------- parameters --------------------------------------
def _fold_bn(n):
    gamma = jnp.ones((n,), jnp.float32)
    beta = jnp.zeros((n,), jnp.float32)
    mean = jnp.zeros((n,), jnp.float32)
    var = jnp.ones((n,), jnp.float32)
    scale = gamma / jnp.sqrt(var + BN_EPS)
    shift = beta - mean * scale
    return scale, shift


def init_raw_params(key):
    ks = jax.random.split(key, 12)
    raw = {}
    raw["w1"] = 0.1 * jax.random.normal(ks[0], (F1, KL), jnp.float32)
    raw["bn1"] = _fold_bn(F1)

    # TODO(synk): get_adjacency_matrix(n_channels, 'DG') is not provided; use a
    # deterministic tridiagonal (neighbour + self-loop) adjacency instead.
    idx = jnp.arange(NCH)
    adj = (jnp.abs(idx[:, None] - idx[None, :]) <= 1).astype(jnp.float32)

    raw["aimp"], raw["wg"], raw["bng"] = [], [], []
    for i in range(3):
        imp = jax.random.normal(ks[1 + i], (F1, NCH, NCH), jnp.float32)  # torch.randn
        raw["aimp"].append(adj[None] * imp)
        raw["wg"].append(0.1 * jax.random.normal(ks[4 + i], (F1, F1, KG), jnp.float32))
        raw["bng"].append(_fold_bn(F1))

    ws = 0.1 * jax.random.normal(ks[7], (CD, NCH), jnp.float32)
    nrm = jnp.sqrt(jnp.sum(ws * ws, axis=1, keepdims=True))
    raw["ws"] = ws * jnp.minimum(1.0, 1.0 / jnp.maximum(nrm, 1e-7))  # renorm(p=2, max=1)
    raw["bns"] = _fold_bn(CD)

    raw["wd"] = 0.1 * jax.random.normal(ks[8], (CD, KS), jnp.float32)
    raw["wp"] = 0.1 * jax.random.normal(ks[9], (F2, CD), jnp.float32)
    raw["bnp"] = _fold_bn(F2)

    raw["wl"] = 0.1 * jax.random.normal(ks[10], (NCLS, FEAT), jnp.float32)
    raw["bl"] = 0.01 * jax.random.normal(ks[11], (NCLS,), jnp.float32)
    return raw


def fold_kernel_params(raw):
    f32, bf16 = jnp.float32, jnp.bfloat16

    # stage 1: banded temporal-conv matrices ('same', left pad 31), BN scale folded,
    # lane-concatenated into one (T, F1*T) operand.
    scale1, shift1 = raw["bn1"]
    s_idx = jnp.arange(T)[:, None]
    t_idx = jnp.arange(T)[None, :]
    tap = s_idx - t_idx + PAD1_L
    valid = (tap >= 0) & (tap < KL)
    band = jnp.where(valid[None], raw["w1"][:, jnp.clip(tap, 0, KL - 1)], 0.0)
    band = band * scale1[:, None, None]                                # (F1, T, T)
    b1w = jnp.concatenate([band[f] for f in range(F1)], axis=1)        # (T, F1*T)

    # graph layers: M_k = (BN-scaled Wk block-diag) @ (adjacency*importance block-diag),
    # stacked over taps into (KG*GR, GR) per layer.
    mstacks, shiftg = [], []
    for i in range(3):
        sg, hg = raw["bng"][i]
        wgs = raw["wg"][i] * sg[:, None, None]                         # (F1o, F1i, KG)
        mks = [jnp.einsum("oi,icd->ocid", wgs[:, :, k], raw["aimp"][i]).reshape(GR, GR)
               for k in range(KG)]
        mstacks.append(jnp.concatenate(mks, axis=0))
        shiftg.append(jnp.repeat(hg, NCH))
    mstack = jnp.stack(mstacks).astype(bf16)                           # (3, KG*GR, GR)

    # grouped spatial conv as one block-diagonal matrix (BN scale folded)
    ss, hs = raw["bns"]
    ws3 = raw["ws"].reshape(F1, D, NCH) * ss.reshape(F1, D, 1)
    wsblk = jnp.einsum("fdc,fg->fdgc", ws3, jnp.eye(F1, dtype=f32)).reshape(CD, GR)

    # AvgPool(1,4) + zero-pad placement (per-sample block of 48 at each 128-lane block)
    jin = jnp.arange(NBT)
    b_in, t_in = jin // T, jin % T
    jout = jnp.arange(NBT)
    b_out, t_out = jout // T, jout % T
    p4pad = jnp.where((b_in[:, None] == b_out[None, :]) &
                      (t_out[None, :] == KS // 2 + t_in[:, None] // 4), 0.25, 0.0)

    # AvgPool(1,8) floor mode, producing the (F2, B*T8) classifier layout
    q = jnp.arange(B * T8)
    b_q, t_q = q // T8, q % T8
    p8cls = jnp.where((b_in[:, None] == b_q[None, :]) & (t_in[:, None] < 8 * T8) &
                      (t_in[:, None] // 8 == t_q[None, :]), 0.125, 0.0)

    w256 = jnp.zeros((NBT, 3 * T), f32)
    w256 = w256.at[:, :NBT].set(p4pad).at[:, NBT:NBT + B * T8].set(p8cls).astype(bf16)

    # pointwise conv (BN scale folded)
    sp_, hp_ = raw["bnp"]
    wp_s = raw["wp"] * sp_[:, None]

    # classifier (Flatten + Linear) reorganised so no sublane->lane reshape is needed
    wl3 = raw["wl"].reshape(NCLS, F2, T8)
    cls_lhs = jnp.transpose(wl3, (0, 2, 1)).reshape(NCLS * T8, F2)     # [n*T8+t, f]
    rr = jnp.arange(NCLS * T8)
    cc = jnp.arange(B * T8)
    cmask = (rr[:, None] % T8 == cc[None, :] % T8).astype(f32)         # keep t == t'
    colsel = (cc[:, None] // T8 == jnp.arange(B)[None, :]).astype(f32) # (B*T8, B)
    rowsel = (jnp.arange(NCLS)[:, None] == rr[None, :] // T8).astype(f32)  # (NCLS, NCLS*T8)

    # small bf16 matrices packed into one slab, each at a 128-lane-aligned slot
    wsmall = jnp.zeros((CD, 5 * 128), f32)
    wsmall = wsmall.at[:, 0:GR].set(wsblk)
    wsmall = wsmall.at[0:F2, 128:128 + CD].set(wp_s)
    wsmall = wsmall.at[0:NCLS * T8, 256:256 + F2].set(cls_lhs)
    wsmall = wsmall.at[0:NCLS, 384:384 + NCLS * T8].set(rowsel)
    wsmall = wsmall.at[0:B * T8, 512:512 + B].set(colsel)
    wsmall = wsmall.astype(bf16)

    # small f32 slab: BN shifts, biases, depthwise taps, classifier diag mask
    fslab = jnp.zeros((GR, 32), f32)
    fslab = fslab.at[:, 0].set(jnp.repeat(shift1, NCH))
    for i in range(3):
        fslab = fslab.at[:, 1 + i].set(shiftg[i])
    fslab = fslab.at[0:CD, 4].set(hs)
    fslab = fslab.at[0:F2, 5].set(hp_)
    fslab = fslab.at[0:NCLS, 6].set(raw["bl"])
    fslab = fslab.at[0:CD, 8:8 + KS].set(raw["wd"])
    fslab = fslab.at[0:NCLS * T8, 24:32].set(cmask)

    return {"b1w": b1w.astype(bf16), "mstack": mstack, "w256": w256,
            "wsmall": wsmall, "fslab": fslab}


# ---------------------------- pure-JAX reference forward -----------------------------
def reference_forward(x, raw):
    hp = "highest"
    scale1, shift1 = raw["bn1"]
    xpad = jnp.pad(x, ((0, 0), (0, 0), (PAD1_L, KL - 1 - PAD1_L)))
    h = jnp.zeros((x.shape[0], F1, NCH, T), jnp.float32)
    for k in range(KL):
        h = h + raw["w1"][:, k][None, :, None, None] * xpad[:, None, :, k:k + T]
    h = h * scale1[None, :, None, None] + shift1[None, :, None, None]
    for i in range(3):
        z = jnp.einsum("fcd,bfdt->bfct", raw["aimp"][i], h, precision=hp)
        zp = jnp.pad(z, ((0, 0), (0, 0), (0, 0), (PADG_L, PADG_R)))
        h2 = jnp.zeros_like(h)
        for k in range(KG):
            h2 = h2 + jnp.einsum("oi,bict->boct", raw["wg"][i][:, :, k],
                                 zp[..., k:k + T], precision=hp)
        sg, hg = raw["bng"][i]
        h = _elu(h2 * sg[None, :, None, None] + hg[None, :, None, None])
    ss, hs = raw["bns"]
    s = jnp.einsum("fdc,bfct->bfdt", raw["ws"].reshape(F1, D, NCH), h,
                   precision=hp).reshape(-1, CD, T)
    s = _elu(s * ss[None, :, None] + hs[None, :, None])
    p = jnp.mean(s.reshape(-1, CD, T4, 4), axis=-1)
    ppad = jnp.pad(p, ((0, 0), (0, 0), (KS // 2, KS // 2)))
    dw = jnp.zeros((x.shape[0], CD, TSEP), jnp.float32)
    for k in range(KS):
        dw = dw + raw["wd"][:, k][None, :, None] * ppad[:, :, k:k + TSEP]
    sp_, hp_ = raw["bnp"]
    pw = _elu(jnp.einsum("oc,bct->bot", raw["wp"], dw, precision=hp)
              * sp_[None, :, None] + hp_[None, :, None])
    o5 = jnp.mean(pw[:, :, :T8 * 8].reshape(-1, F2, T8, 8), axis=-1)
    feat = o5.reshape(-1, FEAT)
    logits = jnp.dot(feat, raw["wl"].T, precision=hp) + raw["bl"][None, :]
    return jax.nn.log_softmax(logits, axis=1)


# --------------------------------------- main ----------------------------------------
if __name__ == "__main__":
    key = jax.random.PRNGKey(0)
    pkey, xkey = jax.random.split(key)
    raw = init_raw_params(pkey)
    kp = fold_kernel_params(raw)
    x = jax.random.normal(xkey, (B, NCH, T), jnp.float32)   # (batch, eeg channels, time)

    out = jax.block_until_ready(gcn_eegnet_forward(x, kp))

    assert out.shape == (B, NCLS), out.shape
    assert bool(jnp.all(jnp.isfinite(out)))
    # rows of a log-softmax must exponentiate-sum to 1
    assert bool(jnp.allclose(jnp.sum(jnp.exp(out), axis=1), 1.0, atol=1e-3))
    # compare against a straightforward pure-JAX (f32) reference of the same forward
    # pass; tolerance accounts for the bf16 weights / matmul inputs in the kernel.
    ref = reference_forward(x, raw)
    assert bool(jnp.allclose(out, ref, rtol=4e-2, atol=4e-2)), (out, ref)
    print("KERNEL_OK")
</pallas_src>

<mosaic_0001>
module attributes {stable_mosaic.version = 11 : i64} {
  func.func @gcn_eegnet_kernel(%arg0: i32, %arg1: memref<16x128xf32, #tpu.memory_space<vmem>>, %arg2: memref<128x1024xbf16, #tpu.memory_space<vmem>>, %arg3: memref<3x512x64xbf16, #tpu.memory_space<vmem>>, %arg4: memref<256x384xbf16, #tpu.memory_space<vmem>>, %arg5: memref<16x640xbf16, #tpu.memory_space<vmem>>, %arg6: memref<64x32xf32, #tpu.memory_space<vmem>>, %arg7: memref<4x2xf32, #tpu.memory_space<vmem>>) attributes {dimension_semantics = [#tpu.dimension_semantics<arbitrary>], iteration_bounds = array<i64: 1>, scalar_prefetch = 0 : i64, scratch_operands = 0 : i64, tpu.core_type = #tpu.core_type<tc>, window_params = [{pipeline_mode = #tpu.pipeline_mode<synchronous>, transform_indices = @transform_0, window_bounds = array<i64: 16, 128>}, {pipeline_mode = #tpu.pipeline_mode<synchronous>, transform_indices = @transform_1, window_bounds = array<i64: 128, 1024>}, {pipeline_mode = #tpu.pipeline_mode<synchronous>, transform_indices = @transform_2, window_bounds = array<i64: 3, 512, 64>}, {pipeline_mode = #tpu.pipeline_mode<synchronous>, transform_indices = @transform_3, window_bounds = array<i64: 256, 384>}, {pipeline_mode = #tpu.pipeline_mode<synchronous>, transform_indices = @transform_4, window_bounds = array<i64: 16, 640>}, {pipeline_mode = #tpu.pipeline_mode<synchronous>, transform_indices = @transform_5, window_bounds = array<i64: 64, 32>}, {pipeline_mode = #tpu.pipeline_mode<synchronous>, transform_indices = @transform_6, window_bounds = array<i64: 4, 2>}]} {
    %c0 = arith.constant 0 : index
    %c0_0 = arith.constant 0 : index
    %0 = vector.load %arg1[%c0, %c0_0] : memref<16x128xf32, #tpu.memory_space<vmem>>, vector<16x128xf32>
    %1 = arith.truncf %0 : vector<16x128xf32> to vector<16x128xbf16>
    %c0_1 = arith.constant 0 : index
    %c0_2 = arith.constant 0 : index
    %2 = vector.load %arg2[%c0_1, %c0_2] : memref<128x1024xbf16, #tpu.memory_space<vmem>>, vector<128x1024xbf16>
    %cst = arith.constant dense<0.000000e+00> : vector<16x1024xf32>
    %3 = tpu.matmul %1, %2, %cst {dimension_numbers = #tpu.dot_dimension_numbers<[1], [0], [0], [1], [0, 0, 1, 1], [], []>} : vector<16x128xbf16>, vector<128x1024xbf16>, vector<16x1024xf32> -> vector<16x1024xf32>
    %4 = vector.extract_strided_slice %3 {offsets = [0, 0], sizes = [8, 128], strides = [1, 1]} : vector<16x1024xf32> to vector<8x128xf32>
    %5 = vector.extract_strided_slice %3 {offsets = [8, 0], sizes = [8, 128], strides = [1, 1]} : vector<16x1024xf32> to vector<8x128xf32>
    %6 = tpu.concatenate %4, %5 in 1 : vector<8x128xf32>, vector<8x128xf32> -> vector<8x256xf32>
    %7 = vector.extract_strided_slice %3 {offsets = [0, 128], sizes = [8, 128], strides = [1, 1]} : vector<16x1024xf32> to vector<8x128xf32>
    %8 = vector.extract_strided_slice %3 {offsets = [8, 128], sizes = [8, 128], strides = [1, 1]} : vector<16x1024xf32> to vector<8x128xf32>
    %9 = tpu.concatenate %7, %8 in 1 : vector<8x128xf32>, vector<8x128xf32> -> vector<8x256xf32>
    %10 = vector.extract_strided_slice %3 {offsets = [0, 256], sizes = [8, 128], strides = [1, 1]} : vector<16x1024xf32> to vector<8x128xf32>
    %11 = vector.extract_strided_slice %3 {offsets = [8, 256], sizes = [8, 128], strides = [1, 1]} : vector<16x1024xf32> to vector<8x128xf32>
    %12 = tpu.concatenate %10, %11 in 1 : vector<8x128xf32>, vector<8x128xf32> -> vector<8x256xf32>
    %13 = vector.extract_strided_slice %3 {offsets = [0, 384], sizes = [8, 128], strides = [1, 1]} : vector<16x1024xf32> to vector<8x128xf32>
    %14 = vector.extract_strided_slice %3 {offsets = [8, 384], sizes = [8, 128], strides = [1, 1]} : vector<16x1024xf32> to vector<8x128xf32>
    %15 = tpu.concatenate %13, %14 in 1 : vector<8x128xf32>, vector<8x128xf32> -> vector<8x256xf32>
    %16 = vector.extract_strided_slice %3 {offsets = [0, 512], sizes = [8, 128], strides = [1, 1]} : vector<16x1024xf32> to vector<8x128xf32>
    %17 = vector.extract_strided_slice %3 {offsets = [8, 512], sizes = [8, 128], strides = [1, 1]} : vector<16x1024xf32> to vector<8x128xf32>
    %18 = tpu.concatenate %16, %17 in 1 : vector<8x128xf32>, vector<8x128xf32> -> vector<8x256xf32>
    %19 = vector.extract_strided_slice %3 {offsets = [0, 640], sizes = [8, 128], strides = [1, 1]} : vector<16x1024xf32> to vector<8x128xf32>
    %20 = vector.extract_strided_slice %3 {offsets = [8, 640], sizes = [8, 128], strides = [1, 1]} : vector<16x1024xf32> to vector<8x128xf32>
    %21 = tpu.concatenate %19, %20 in 1 : vector<8x128xf32>, vector<8x128xf32> -> vector<8x256xf32>
    %22 = vector.extract_strided_slice %3 {offsets = [0, 768], sizes = [8, 128], strides = [1, 1]} : vector<16x1024xf32> to vector<8x128xf32>
    %23 = vector.extract_strided_slice %3 {offsets = [8, 768], sizes = [8, 128], strides = [1, 1]} : vector<16x1024xf32> to vector<8x128xf32>
    %24 = tpu.concatenate %22, %23 in 1 : vector<8x128xf32>, vector<8x128xf32> -> vector<8x256xf32>
    %25 = vector.extract_strided_slice %3 {offsets = [0, 896], sizes = [8, 128], strides = [1, 1]} : vector<16x1024xf32> to vector<8x128xf32>
    %26 = vector.extract_strided_slice %3 {offsets = [8, 896], sizes = [8, 128], strides = [1, 1]} : vector<16x1024xf32> to vector<8x128xf32>
    %27 = tpu.concatenate %25, %26 in 1 : vector<8x128xf32>, vector<8x128xf32> -> vector<8x256xf32>
    %28 = tpu.concatenate %6, %9, %12, %15, %18, %21, %24, %27 in 0 : vector<8x256xf32>, vector<8x256xf32>, vector<8x256xf32>, vector<8x256xf32>, vector<8x256xf32>, vector<8x256xf32>, vector<8x256xf32>, vector<8x256xf32> -> vector<64x256xf32>
    %c0_3 = arith.constant 0 : index
    %c0_4 = arith.constant 0 : index
    %29 = vector.load %arg6[%c0_3, %c0_4] : memref<64x32xf32, #tpu.memory_space<vmem>>, vector<64x1xf32>
    %30 = vector.broadcast %29 : vector<64x1xf32> to vector<64x256xf32>
    %31 = arith.addf %28, %30 : vector<64x256xf32>
    %32 = tpu.iota {dimensions = array<i32: 1>} : vector<1x256xi32>
    %c127_i32 = arith.constant 127 : i32
    %33 = vector.broadcast %c127_i32 : i32 to vector<1x256xi32>
    %34 = arith.andi %32, %33 : vector<1x256xi32>
    %c3_i32 = arith.constant 3 : i32
    %35 = vector.broadcast %c3_i32 : i32 to vector<1x256xi32>
    %36 = arith.cmpi sge, %34, %35 : vector<1x256xi32>
    %c128_i32 = arith.constant 128 : i32
    %37 = vector.broadcast %c128_i32 : i32 to vector<1x256xi32>
    %38 = arith.cmpi slt, %34, %37 : vector<1x256xi32>
    %39 = arith.andi %36, %38 : vector<1x256xi1>
    %40 = arith.extui %39 : vector<1x256xi1> to vector<1x256xi32>
    %41 = arith.sitofp %40 : vector<1x256xi32> to vector<1x256xf32>
    %c2_i32 = arith.constant 2 : i32
    %42 = vector.broadcast %c2_i32 : i32 to vector<1x256xi32>
    %43 = arith.cmpi sge, %34, %42 : vector<1x256xi32>
    %c128_i32_5 = arith.constant 128 : i32
    %44 = vector.broadcast %c128_i32_5 : i32 to vector<1x256xi32>
    %45 = arith.cmpi slt, %34, %44 : vector<1x256xi32>
    %46 = arith.andi %43, %45 : vector<1x256xi1>
    %47 = arith.extui %46 : vector<1x256xi1> to vector<1x256xi32>
    %48 = arith.sitofp %47 : vector<1x256xi32> to vector<1x256xf32>
    %c1_i32 = arith.constant 1 : i32
    %49 = vector.broadcast %c1_i32 : i32 to vector<1x256xi32>
    %50 = arith.cmpi sge, %34, %49 : vector<1x256xi32>
    %c128_i32_6 = arith.constant 128 : i32
    %51 = vector.broadcast %c128_i32_6 : i32 to vector<1x256xi32>
    %52 = arith.cmpi slt, %34, %51 : vector<1x256xi32>
    %53 = arith.andi %50, %52 : vector<1x256xi1>
    %54 = arith.extui %53 : vector<1x256xi1> to vector<1x256xi32>
    %55 = arith.sitofp %54 : vector<1x256xi32> to vector<1x256xf32>
    %c0_i32 = arith.constant 0 : i32
    %56 = vector.broadcast %c0_i32 : i32 to vector<1x256xi32>
    %57 = arith.cmpi sge, %34, %56 : vector<1x256xi32>
    %c127_i32_7 = arith.constant 127 : i32
    %58 = vector.broadcast %c127_i32_7 : i32 to vector<1x256xi32>
    %59 = arith.cmpi slt, %34, %58 : vector<1x256xi32>
    %60 = arith.andi %57, %59 : vector<1x256xi1>
    %61 = arith.extui %60 : vector<1x256xi1> to vector<1x256xi32>
    %62 = arith.sitofp %61 : vector<1x256xi32> to vector<1x256xf32>
    %c0_i32_8 = arith.constant 0 : i32
    %63 = vector.broadcast %c0_i32_8 : i32 to vector<1x256xi32>
    %64 = arith.cmpi sge, %34, %63 : vector<1x256xi32>
    %c126_i32 = arith.constant 126 : i32
    %65 = vector.broadcast %c126_i32 : i32 to vector<1x256xi32>
    %66 = arith.cmpi slt, %34, %65 : vector<1x256xi32>
    %67 = arith.andi %64, %66 : vector<1x256xi1>
    %68 = arith.extui %67 : vector<1x256xi1> to vector<1x256xi32>
    %69 = arith.sitofp %68 : vector<1x256xi32> to vector<1x256xf32>
    %c0_i32_9 = arith.constant 0 : i32
    %70 = vector.broadcast %c0_i32_9 : i32 to vector<1x256xi32>
    %71 = arith.cmpi sge, %34, %70 : vector<1x256xi32>
    %c125_i32 = arith.constant 125 : i32
    %72 = vector.broadcast %c125_i32 : i32 to vector<1x256xi32>
    %73 = arith.cmpi slt, %34, %72 : vector<1x256xi32>
    %74 = arith.andi %71, %73 : vector<1x256xi1>
    %75 = arith.extui %74 : vector<1x256xi1> to vector<1x256xi32>
    %76 = arith.sitofp %75 : vector<1x256xi32> to vector<1x256xf32>
    %c0_i32_10 = arith.constant 0 : i32
    %77 = vector.broadcast %c0_i32_10 : i32 to vector<1x256xi32>
    %78 = arith.cmpi sge, %34, %77 : vector<1x256xi32>
    %c124_i32 = arith.constant 124 : i32
    %79 = vector.broadcast %c124_i32 : i32 to vector<1x256xi32>
    %80 = arith.cmpi slt, %34, %79 : vector<1x256xi32>
    %81 = arith.andi %78, %80 : vector<1x256xi1>
    %82 = arith.extui %81 : vector<1x256xi1> to vector<1x256xi32>
    %83 = arith.sitofp %82 : vector<1x256xi32> to vector<1x256xf32>
    %c0_11 = arith.constant 0 : index
    %c0_12 = arith.constant 0 : index
    %c0_13 = arith.constant 0 : index
    %84 = vector.load %arg3[%c0_11, %c0_12, %c0_13] : memref<3x512x64xbf16, #tpu.memory_space<vmem>>, vector<1x512x64xbf16>
    %85 = vector.shape_cast %84 : vector<1x512x64xbf16> to vector<512x64xbf16>
    %86 = arith.truncf %31 : vector<64x256xf32> to vector<64x256xbf16>
    %cst_14 = arith.constant dense<0.000000e+00> : vector<512x256xf32>
    %87 = tpu.matmul %85, %86, %cst_14 {dimension_numbers = #tpu.dot_dimension_numbers<[1], [0], [0], [1], [0, 0, 1, 1], [], []>} : vector<512x64xbf16>, vector<64x256xbf16>, vector<512x256xf32> -> vector<512x256xf32>
    %88 = vector.extract_strided_slice %87 {offsets = [192, 0], sizes = [64, 256], strides = [1, 1]} : vector<512x256xf32> to vector<64x256xf32>
    %89 = vector.extract_strided_slice %87 {offsets = [0, 0], sizes = [64, 256], strides = [1, 1]} : vector<512x256xf32> to vector<64x256xf32>
    %c3_i32_15 = arith.constant 3 : i32
    %90 = tpu.dynamic_rotate %89 by %c3_i32_15 dim 1 : vector<64x256xf32>, i32 -> vector<64x256xf32>
    %91 = vector.broadcast %41 : vector<1x256xf32> to vector<64x256xf32>
    %92 = arith.mulf %90, %91 : vector<64x256xf32>
    %93 = arith.addf %88, %92 : vector<64x256xf32>
    %94 = vector.extract_strided_slice %87 {offsets = [64, 0], sizes = [64, 256], strides = [1, 1]} : vector<512x256xf32> to vector<64x256xf32>
    %c2_i32_16 = arith.constant 2 : i32
    %95 = tpu.dynamic_rotate %94 by %c2_i32_16 dim 1 : vector<64x256xf32>, i32 -> vector<64x256xf32>
    %96 = vector.broadcast %48 : vector<1x256xf32> to vector<64x256xf32>
    %97 = arith.mulf %95, %96 : vector<64x256xf32>
    %98 = arith.addf %93, %97 : vector<64x256xf32>
    %99 = vector.extract_strided_slice %87 {offsets = [128, 0], sizes = [64, 256], strides = [1, 1]} : vector<512x256xf32> to vector<64x256xf32>
    %c1_i32_17 = arith.constant 1 : i32
    %100 = tpu.dynamic_rotate %99 by %c1_i32_17 dim 1 : vector<64x256xf32>, i32 -> vector<64x256xf32>
    %101 = vector.broadcast %55 : vector<1x256xf32> to vector<64x256xf32>
    %102 = arith.mulf %100, %101 : vector<64x256xf32>
    %103 = arith.addf %98, %102 : vector<64x256xf32>
    %104 = vector.extract_strided_slice %87 {offsets = [256, 0], sizes = [64, 256], strides = [1, 1]} : vector<512x256xf32> to vector<64x256xf32>
    %c255_i32 = arith.constant 255 : i32
    %105 = tpu.dynamic_rotate %104 by %c255_i32 dim 1 : vector<64x256xf32>, i32 -> vector<64x256xf32>
    %106 = vector.broadcast %62 : vector<1x256xf32> to vector<64x256xf32>
    %107 = arith.mulf %105, %106 : vector<64x256xf32>
    %108 = arith.addf %103, %107 : vector<64x256xf32>
    %109 = vector.extract_strided_slice %87 {offsets = [320, 0], sizes = [64, 256], strides = [1, 1]} : vector<512x256xf32> to vector<64x256xf32>
    %c254_i32 = arith.constant 254 : i32
    %110 = tpu.dynamic_rotate %109 by %c254_i32 dim 1 : vector<64x256xf32>, i32 -> vector<64x256xf32>
    %111 = vector.broadcast %69 : vector<1x256xf32> to vector<64x256xf32>
    %112 = arith.mulf %110, %111 : vector<64x256xf32>
    %113 = arith.addf %108, %112 : vector<64x256xf32>
    %114 = vector.extract_strided_slice %87 {offsets = [384, 0], sizes = [64, 256], strides = [1, 1]} : vector<512x256xf32> to vector<64x256xf32>
    %c253_i32 = arith.constant 253 : i32
    %115 = tpu.dynamic_rotate %114 by %c253_i32 dim 1 : vector<64x256xf32>, i32 -> vector<64x256xf32>
    %116 = vector.broadcast %76 : vector<1x256xf32> to vector<64x256xf32>
    %117 = arith.mulf %115, %116 : vector<64x256xf32>
    %118 = arith.addf %113, %117 : vector<64x256xf32>
    %119 = vector.extract_strided_slice %87 {offsets = [448, 0], sizes = [64, 256], strides = [1, 1]} : vector<512x256xf32> to vector<64x256xf32>
    %c252_i32 = arith.constant 252 : i32
    %120 = tpu.dynamic_rotate %119 by %c252_i32 dim 1 : vector<64x256xf32>, i32 -> vector<64x256xf32>
    %121 = vector.broadcast %83 : vector<1x256xf32> to vector<64x256xf32>
    %122 = arith.mulf %120, %121 : vector<64x256xf32>
    %123 = arith.addf %118, %122 : vector<64x256xf32>
    %c0_18 = arith.constant 0 : index
    %c1 = arith.constant 1 : index
    %124 = vector.load %arg6[%c0_18, %c1] : memref<64x32xf32, #tpu.memory_space<vmem>>, vector<64x1xf32>
    %125 = vector.broadcast %124 : vector<64x1xf32> to vector<64x256xf32>
    %126 = arith.addf %123, %125 : vector<64x256xf32>
    %cst_19 = arith.constant 0.000000e+00 : f32
    %127 = vector.broadcast %cst_19 : f32 to vector<64x256xf32>
    %128 = arith.cmpf ogt, %126, %127 : vector<64x256xf32>
    %cst_20 = arith.constant 0.000000e+00 : f32
    %129 = vector.broadcast %cst_20 : f32 to vector<64x256xf32>
    %130 = arith.minimumf %126, %129 : vector<64x256xf32>
    %131 = math.exp %130 : vector<64x256xf32>
    %cst_21 = arith.constant 1.000000e+00 : f32
    %132 = vector.broadcast %cst_21 : f32 to vector<64x256xf32>
    %133 = arith.subf %131, %132 : vector<64x256xf32>
    %134 = arith.select %128, %126, %133 : vector<64x256xi1>, vector<64x256xf32>
    %c1_22 = arith.constant 1 : index
    %c0_23 = arith.constant 0 : index
    %c0_24 = arith.constant 0 : index
    %135 = vector.load %arg3[%c1_22, %c0_23, %c0_24] : memref<3x512x64xbf16, #tpu.memory_space<vmem>>, vector<1x512x64xbf16>
    %136 = vector.shape_cast %135 : vector<1x512x64xbf16> to vector<512x64xbf16>
    %137 = arith.truncf %134 : vector<64x256xf32> to vector<64x256xbf16>
    %cst_25 = arith.constant dense<0.000000e+00> : vector<512x256xf32>
    %138 = tpu.matmul %136, %137, %cst_25 {dimension_numbers = #tpu.dot_dimension_numbers<[1], [0], [0], [1], [0, 0, 1, 1], [], []>} : vector<512x64xbf16>, vector<64x256xbf16>, vector<512x256xf32> -> vector<512x256xf32>
    %139 = vector.extract_strided_slice %138 {offsets = [192, 0], sizes = [64, 256], strides = [1, 1]} : vector<512x256xf32> to vector<64x256xf32>
    %140 = vector.extract_strided_slice %138 {offsets = [0, 0], sizes = [64, 256], strides = [1, 1]} : vector<512x256xf32> to vector<64x256xf32>
    %c3_i32_26 = arith.constant 3 : i32
    %141 = tpu.dynamic_rotate %140 by %c3_i32_26 dim 1 : vector<64x256xf32>, i32 -> vector<64x256xf32>
    %142 = vector.broadcast %41 : vector<1x256xf32> to vector<64x256xf32>
    %143 = arith.mulf %141, %142 : vector<64x256xf32>
    %144 = arith.addf %139, %143 : vector<64x256xf32>
    %145 = vector.extract_strided_slice %138 {offsets = [64, 0], sizes = [64, 256], strides = [1, 1]} : vector<512x256xf32> to vector<64x256xf32>
    %c2_i32_27 = arith.constant 2 : i32
    %146 = tpu.dynamic_rotate %145 by %c2_i32_27 dim 1 : vector<64x256xf32>, i32 -> vector<64x256xf32>
    %147 = vector.broadcast %48 : vector<1x256xf32> to vector<64x256xf32>
    %148 = arith.mulf %146, %147 : vector<64x256xf32>
    %149 = arith.addf %144, %148 : vector<64x256xf32>
    %150 = vector.extract_strided_slice %138 {offsets = [128, 0], sizes = [64, 256], strides = [1, 1]} : vector<512x256xf32> to vector<64x256xf32>
    %c1_i32_28 = arith.constant 1 : i32
    %151 = tpu.dynamic_rotate %150 by %c1_i32_28 dim 1 : vector<64x256xf32>, i32 -> vector<64x256xf32>
    %152 = vector.broadcast %55 : vector<1x256xf32> to vector<64x256xf32>
    %153 = arith.mulf %151, %152 : vector<64x256xf32>
    %154 = arith.addf %149, %153 : vector<64x256xf32>
    %155 = vector.extract_strided_slice %138 {offsets = [256, 0], sizes = [64, 256], strides = [1, 1]} : vector<512x256xf32> to vector<64x256xf32>
    %c255_i32_29 = arith.constant 255 : i32
    %156 = tpu.dynamic_rotate %155 by %c255_i32_29 dim 1 : vector<64x256xf32>, i32 -> vector<64x256xf32>
    %157 = vector.broadcast %62 : vector<1x256xf32> to vector<64x256xf32>
    %158 = arith.mulf %156, %157 : vector<64x256xf32>
    %159 = arith.addf %154, %158 : vector<64x256xf32>
    %160 = vector.extract_strided_slice %138 {offsets = [320, 0], sizes = [64, 256], strides = [1, 1]} : vector<512x256xf32> to vector<64x256xf32>
    %c254_i32_30 = arith.constant 254 : i32
    %161 = tpu.dynamic_rotate %160 by %c254_i32_30 dim 1 : vector<64x256xf32>, i32 -> vector<64x256xf32>
    %162 = vector.broadcast %69 : vector<1x256xf32> to vector<64x256xf32>
    %163 = arith.mulf %161, %162 : vector<64x256xf32>
    %164 = arith.addf %159, %163 : vector<64x256xf32>
    %165 = vector.extract_strided_slice %138 {offsets = [384, 0], sizes = [64, 256], strides = [1, 1]} : vector<512x256xf32> to vector<64x256xf32>
    %c253_i32_31 = arith.constant 253 : i32
    %166 = tpu.dynamic_rotate %165 by %c253_i32_31 dim 1 : vector<64x256xf32>, i32 -> vector<64x256xf32>
    %167 = vector.broadcast %76 : vector<1x256xf32> to vector<64x256xf32>
    %168 = arith.mulf %166, %167 : vector<64x256xf32>
    %169 = arith.addf %164, %168 : vector<64x256xf32>
    %170 = vector.extract_strided_slice %138 {offsets = [448, 0], sizes = [64, 256], strides = [1, 1]} : vector<512x256xf32> to vector<64x256xf32>
    %c252_i32_32 = arith.constant 252 : i32
    %171 = tpu.dynamic_rotate %170 by %c252_i32_32 dim 1 : vector<64x256xf32>, i32 -> vector<64x256xf32>
    %172 = vector.broadcast %83 : vector<1x256xf32> to vector<64x256xf32>
    %173 = arith.mulf %171, %172 : vector<64x256xf32>
    %174 = arith.addf %169, %173 : vector<64x256xf32>
    %c0_33 = arith.constant 0 : index
    %c2 = arith.constant 2 : index
    %175 = vector.load %arg6[%c0_33, %c2] : memref<64x32xf32, #tpu.memory_space<vmem>>, vector<64x1xf32>
    %176 = vector.broadcast %175 : vector<64x1xf32> to vector<64x256xf32>
    %177 = arith.addf %174, %176 : vector<64x256xf32>
    %cst_34 = arith.constant 0.000000e+00 : f32
    %178 = vector.broadcast %cst_34 : f32 to vector<64x256xf32>
    %179 = arith.cmpf ogt, %177, %178 : vector<64x256xf32>
    %cst_35 = arith.constant 0.000000e+00 : f32
    %180 = vector.broadcast %cst_35 : f32 to vector<64x256xf32>
    %181 = arith.minimumf %177, %180 : vector<64x256xf32>
    %182 = math.exp %181 : vector<64x256xf32>
    %cst_36 = arith.constant 1.000000e+00 : f32
    %183 = vector.broadcast %cst_36 : f32 to vector<64x256xf32>
    %184 = arith.subf %182, %183 : vector<64x256xf32>
    %185 = arith.select %179, %177, %184 : vector<64x256xi1>, vector<64x256xf32>
    %c2_37 = arith.constant 2 : index
    %c0_38 = arith.constant 0 : index
    %c0_39 = arith.constant 0 : index
    %186 = vector.load %arg3[%c2_37, %c0_38, %c0_39] : memref<3x512x64xbf16, #tpu.memory_space<vmem>>, vector<1x512x64xbf16>
    %187 = vector.shape_cast %186 : vector<1x512x64xbf16> to vector<512x64xbf16>
    %188 = arith.truncf %185 : vector<64x256xf32> to vector<64x256xbf16>
    %cst_40 = arith.constant dense<0.000000e+00> : vector<512x256xf32>
    %189 = tpu.matmul %187, %188, %cst_40 {dimension_numbers = #tpu.dot_dimension_numbers<[1], [0], [0], [1], [0, 0, 1, 1], [], []>} : vector<512x64xbf16>, vector<64x256xbf16>, vector<512x256xf32> -> vector<512x256xf32>
    %190 = vector.extract_strided_slice %189 {offsets = [192, 0], sizes = [64, 256], strides = [1, 1]} : vector<512x256xf32> to vector<64x256xf32>
    %191 = vector.extract_strided_slice %189 {offsets = [0, 0], sizes = [64, 256], strides = [1, 1]} : vector<512x256xf32> to vector<64x256xf32>
    %c3_i32_41 = arith.constant 3 : i32
    %192 = tpu.dynamic_rotate %191 by %c3_i32_41 dim 1 : vector<64x256xf32>, i32 -> vector<64x256xf32>
    %193 = vector.broadcast %41 : vector<1x256xf32> to vector<64x256xf32>
    %194 = arith.mulf %192, %193 : vector<64x256xf32>
    %195 = arith.addf %190, %194 : vector<64x256xf32>
    %196 = vector.extract_strided_slice %189 {offsets = [64, 0], sizes = [64, 256], strides = [1, 1]} : vector<512x256xf32> to vector<64x256xf32>
    %c2_i32_42 = arith.constant 2 : i32
    %197 = tpu.dynamic_rotate %196 by %c2_i32_42 dim 1 : vector<64x256xf32>, i32 -> vector<64x256xf32>
    %198 = vector.broadcast %48 : vector<1x256xf32> to vector<64x256xf32>
    %199 = arith.mulf %197, %198 : vector<64x256xf32>
    %200 = arith.addf %195, %199 : vector<64x256xf32>
    %201 = vector.extract_strided_slice %189 {offsets = [128, 0], sizes = [64, 256], strides = [1, 1]} : vector<512x256xf32> to vector<64x256xf32>
    %c1_i32_43 = arith.constant 1 : i32
    %202 = tpu.dynamic_rotate %201 by %c1_i32_43 dim 1 : vector<64x256xf32>, i32 -> vector<64x256xf32>
    %203 = vector.broadcast %55 : vector<1x256xf32> to vector<64x256xf32>
    %204 = arith.mulf %202, %203 : vector<64x256xf32>
    %205 = arith.addf %200, %204 : vector<64x256xf32>
    %206 = vector.extract_strided_slice %189 {offsets = [256, 0], sizes = [64, 256], strides = [1, 1]} : vector<512x256xf32> to vector<64x256xf32>
    %c255_i32_44 = arith.constant 255 : i32
    %207 = tpu.dynamic_rotate %206 by %c255_i32_44 dim 1 : vector<64x256xf32>, i32 -> vector<64x256xf32>
    %208 = vector.broadcast %62 : vector<1x256xf32> to vector<64x256xf32>
    %209 = arith.mulf %207, %208 : vector<64x256xf32>
    %210 = arith.addf %205, %209 : vector<64x256xf32>
    %211 = vector.extract_strided_slice %189 {offsets = [320, 0], sizes = [64, 256], strides = [1, 1]} : vector<512x256xf32> to vector<64x256xf32>
    %c254_i32_45 = arith.constant 254 : i32
    %212 = tpu.dynamic_rotate %211 by %c254_i32_45 dim 1 : vector<64x256xf32>, i32 -> vector<64x256xf32>
    %213 = vector.broadcast %69 : vector<1x256xf32> to vector<64x256xf32>
    %214 = arith.mulf %212, %213 : vector<64x256xf32>
    %215 = arith.addf %210, %214 : vector<64x256xf32>
    %216 = vector.extract_strided_slice %189 {offsets = [384, 0], sizes = [64, 256], strides = [1, 1]} : vector<512x256xf32> to vector<64x256xf32>
    %c253_i32_46 = arith.constant 253 : i32
    %217 = tpu.dynamic_rotate %216 by %c253_i32_46 dim 1 : vector<64x256xf32>, i32 -> vector<64x256xf32>
    %218 = vector.broadcast %76 : vector<1x256xf32> to vector<64x256xf32>
    %219 = arith.mulf %217, %218 : vector<64x256xf32>
    %220 = arith.addf %215, %219 : vector<64x256xf32>
    %221 = vector.extract_strided_slice %189 {offsets = [448, 0], sizes = [64, 256], strides = [1, 1]} : vector<512x256xf32> to vector<64x256xf32>
    %c252_i32_47 = arith.constant 252 : i32
    %222 = tpu.dynamic_rotate %221 by %c252_i32_47 dim 1 : vector<64x256xf32>, i32 -> vector<64x256xf32>
    %223 = vector.broadcast %83 : vector<1x256xf32> to vector<64x256xf32>
    %224 = arith.mulf %222, %223 : vector<64x256xf32>
    %225 = arith.addf %220, %224 : vector<64x256xf32>
    %c0_48 = arith.constant 0 : index
    %c3 = arith.constant 3 : index
    %226 = vector.load %arg6[%c0_48, %c3] : memref<64x32xf32, #tpu.memory_space<vmem>>, vector<64x1xf32>
    %227 = vector.broadcast %226 : vector<64x1xf32> to vector<64x256xf32>
    %228 = arith.addf %225, %227 : vector<64x256xf32>
    %cst_49 = arith.constant 0.000000e+00 : f32
    %229 = vector.broadcast %cst_49 : f32 to vector<64x256xf32>
    %230 = arith.cmpf ogt, %228, %229 : vector<64x256xf32>
    %cst_50 = arith.constant 0.000000e+00 : f32
    %231 = vector.broadcast %cst_50 : f32 to vector<64x256xf32>
    %232 = arith.minimumf %228, %231 : vector<64x256xf32>
    %233 = math.exp %232 : vector<64x256xf32>
    %cst_51 = arith.constant 1.000000e+00 : f32
    %234 = vector.broadcast %cst_51 : f32 to vector<64x256xf32>
    %235 = arith.subf %233, %234 : vector<64x256xf32>
    %236 = arith.select %230, %228, %235 : vector<64x256xi1>, vector<64x256xf32>
    %c0_52 = arith.constant 0 : index
    %c0_53 = arith.constant 0 : index
    %237 = vector.load %arg5[%c0_52, %c0_53] : memref<16x640xbf16, #tpu.memory_space<vmem>>, vector<16x64xbf16>
    %238 = arith.truncf %236 : vector<64x256xf32> to vector<64x256xbf16>
    %cst_54 = arith.constant dense<0.000000e+00> : vector<16x256xf32>
    %239 = tpu.matmul %237, %238, %cst_54 {dimension_numbers = #tpu.dot_dimension_numbers<[1], [0], [0], [1], [0, 0, 1, 1], [], []>} : vector<16x64xbf16>, vector<64x256xbf16>, vector<16x256xf32> -> vector<16x256xf32>
    %c0_55 = arith.constant 0 : index
    %c4 = arith.constant 4 : index
    %240 = vector.load %arg6[%c0_55, %c4] : memref<64x32xf32, #tpu.memory_space<vmem>>, vector<16x1xf32>
    %241 = vector.broadcast %240 : vector<16x1xf32> to vector<16x256xf32>
    %242 = arith.addf %239, %241 : vector<16x256xf32>
    %cst_56 = arith.constant 0.000000e+00 : f32
    %243 = vector.broadcast %cst_56 : f32 to vector<16x256xf32>
    %244 = arith.cmpf ogt, %242, %243 : vector<16x256xf32>
    %cst_57 = arith.constant 0.000000e+00 : f32
    %245 = vector.broadcast %cst_57 : f32 to vector<16x256xf32>
    %246 = arith.minimumf %242, %245 : vector<16x256xf32>
    %247 = math.exp %246 : vector<16x256xf32>
    %cst_58 = arith.constant 1.000000e+00 : f32
    %248 = vector.broadcast %cst_58 : f32 to vector<16x256xf32>
    %249 = arith.subf %247, %248 : vector<16x256xf32>
    %250 = arith.select %244, %242, %249 : vector<16x256xi1>, vector<16x256xf32>
    %251 = arith.truncf %250 : vector<16x256xf32> to vector<16x256xbf16>
    %c0_59 = arith.constant 0 : index
    %c0_60 = arith.constant 0 : index
    %252 = vector.load %arg4[%c0_59, %c0_60] : memref<256x384xbf16, #tpu.memory_space<vmem>>, vector<256x256xbf16>
    %cst_61 = arith.constant dense<0.000000e+00> : vector<16x256xf32>
    %253 = tpu.matmul %251, %252, %cst_61 {dimension_numbers = #tpu.dot_dimension_numbers<[1], [0], [0], [1], [0, 0, 1, 1], [], []>} : vector<16x256xbf16>, vector<256x256xbf16>, vector<16x256xf32> -> vector<16x256xf32>
    %c0_62 = arith.constant 0 : index
    %c8 = arith.constant 8 : index
    %254 = vector.load %arg6[%c0_62, %c8] : memref<64x32xf32, #tpu.memory_space<vmem>>, vector<16x16xf32>
    %255 = vector.extract_strided_slice %254 {offsets = [0, 0], sizes = [16, 1], strides = [1, 1]} : vector<16x16xf32> to vector<16x1xf32>
    %256 = vector.broadcast %255 : vector<16x1xf32> to vector<16x256xf32>
    %257 = arith.mulf %253, %256 : vector<16x256xf32>
    %c255_i32_63 = arith.constant 255 : i32
    %258 = tpu.dynamic_rotate %253 by %c255_i32_63 dim 1 : vector<16x256xf32>, i32 -> vector<16x256xf32>
    %259 = vector.extract_strided_slice %254 {offsets = [0, 1], sizes = [16, 1], strides = [1, 1]} : vector<16x16xf32> to vector<16x1xf32>
    %260 = vector.broadcast %259 : vector<16x1xf32> to vector<16x256xf32>
    %261 = arith.mulf %258, %260 : vector<16x256xf32>
    %262 = arith.addf %257, %261 : vector<16x256xf32>
    %c254_i32_64 = arith.constant 254 : i32
    %263 = tpu.dynamic_rotate %253 by %c254_i32_64 dim 1 : vector<16x256xf32>, i32 -> vector<16x256xf32>
    %264 = vector.extract_strided_slice %254 {offsets = [0, 2], sizes = [16, 1], strides = [1, 1]} : vector<16x16xf32> to vector<16x1xf32>
    %265 = vector.broadcast %264 : vector<16x1xf32> to vector<16x256xf32>
    %266 = arith.mulf %263, %265 : vector<16x256xf32>
    %267 = arith.addf %262, %266 : vector<16x256xf32>
    %c253_i32_65 = arith.constant 253 : i32
    %268 = tpu.dynamic_rotate %253 by %c253_i32_65 dim 1 : vector<16x256xf32>, i32 -> vector<16x256xf32>
    %269 = vector.extract_strided_slice %254 {offsets = [0, 3], sizes = [16, 1], strides = [1, 1]} : vector<16x16xf32> to vector<16x1xf32>
    %270 = vector.broadcast %269 : vector<16x1xf32> to vector<16x256xf32>
    %271 = arith.mulf %268, %270 : vector<16x256xf32>
    %272 = arith.addf %267, %271 : vector<16x256xf32>
    %c252_i32_66 = arith.constant 252 : i32
    %273 = tpu.dynamic_rotate %253 by %c252_i32_66 dim 1 : vector<16x256xf32>, i32 -> vector<16x256xf32>
    %274 = vector.extract_strided_slice %254 {offsets = [0, 4], sizes = [16, 1], strides = [1, 1]} : vector<16x16xf32> to vector<16x1xf32>
    %275 = vector.broadcast %274 : vector<16x1xf32> to vector<16x256xf32>
    %276 = arith.mulf %273, %275 : vector<16x256xf32>
    %277 = arith.addf %272, %276 : vector<16x256xf32>
    %c251_i32 = arith.constant 251 : i32
    %278 = tpu.dynamic_rotate %253 by %c251_i32 dim 1 : vector<16x256xf32>, i32 -> vector<16x256xf32>
    %279 = vector.extract_strided_slice %254 {offsets = [0, 5], sizes = [16, 1], strides = [1, 1]} : vector<16x16xf32> to vector<16x1xf32>
    %280 = vector.broadcast %279 : vector<16x1xf32> to vector<16x256xf32>
    %281 = arith.mulf %278, %280 : vector<16x256xf32>
    %282 = arith.addf %277, %281 : vector<16x256xf32>
    %c250_i32 = arith.constant 250 : i32
    %283 = tpu.dynamic_rotate %253 by %c250_i32 dim 1 : vector<16x256xf32>, i32 -> vector<16x256xf32>
    %284 = vector.extract_strided_slice %254 {offsets = [0, 6], sizes = [16, 1], strides = [1, 1]} : vector<16x16xf32> to vector<16x1xf32>
    %285 = vector.broadcast %284 : vector<16x1xf32> to vector<16x256xf32>
    %286 = arith.mulf %283, %285 : vector<16x256xf32>
    %287 = arith.addf %282, %286 : vector<16x256xf32>
    %c249_i32 = arith.constant 249 : i32
    %288 = tpu.dynamic_rotate %253 by %c249_i32 dim 1 : vector<16x256xf32>, i32 -> vector<16x256xf32>
    %289 = vector.extract_strided_slice %254 {offsets = [0, 7], sizes = [16, 1], strides = [1, 1]} : vector<16x16xf32> to vector<16x1xf32>
    %290 = vector.broadcast %289 : vector<16x1xf32> to vector<16x256xf32>
    %291 = arith.mulf %288, %290 : vector<16x256xf32>
    %292 = arith.addf %287, %291 : vector<16x256xf32>
    %c248_i32 = arith.constant 248 : i32
    %293 = tpu.dynamic_rotate %253 by %c248_i32 dim 1 : vector<16x256xf32>, i32 -> vector<16x256xf32>
    %294 = vector.extract_strided_slice %254 {offsets = [0, 8], sizes = [16, 1], strides = [1, 1]} : vector<16x16xf32> to vector<16x1xf32>
    %295 = vector.broadcast %294 : vector<16x1xf32> to vector<16x256xf32>
    %296 = arith.mulf %293, %295 : vector<16x256xf32>
    %297 = arith.addf %292, %296 : vector<16x256xf32>
    %c247_i32 = arith.constant 247 : i32
    %298 = tpu.dynamic_rotate %253 by %c247_i32 dim 1 : vector<16x256xf32>, i32 -> vector<16x256xf32>
    %299 = vector.extract_strided_slice %254 {offsets = [0, 9], sizes = [16, 1], strides = [1, 1]} : vector<16x16xf32> to vector<16x1xf32>
    %300 = vector.broadcast %299 : vector<16x1xf32> to vector<16x256xf32>
    %301 = arith.mulf %298, %300 : vector<16x256xf32>
    %302 = arith.addf %297, %301 : vector<16x256xf32>
    %c246_i32 = arith.constant 246 : i32
    %303 = tpu.dynamic_rotate %253 by %c246_i32 dim 1 : vector<16x256xf32>, i32 -> vector<16x256xf32>
    %304 = vector.extract_strided_slice %254 {offsets = [0, 10], sizes = [16, 1], strides = [1, 1]} : vector<16x16xf32> to vector<16x1xf32>
    %305 = vector.broadcast %304 : vector<16x1xf32> to vector<16x256xf32>
    %306 = arith.mulf %303, %305 : vector<16x256xf32>
    %307 = arith.addf %302, %306 : vector<16x256xf32>
    %c245_i32 = arith.constant 245 : i32
    %308 = tpu.dynamic_rotate %253 by %c245_i32 dim 1 : vector<16x256xf32>, i32 -> vector<16x256xf32>
    %309 = vector.extract_strided_slice %254 {offsets = [0, 11], sizes = [16, 1], strides = [1, 1]} : vector<16x16xf32> to vector<16x1xf32>
    %310 = vector.broadcast %309 : vector<16x1xf32> to vector<16x256xf32>
    %311 = arith.mulf %308, %310 : vector<16x256xf32>
    %312 = arith.addf %307, %311 : vector<16x256xf32>
    %c244_i32 = arith.constant 244 : i32
    %313 = tpu.dynamic_rotate %253 by %c244_i32 dim 1 : vector<16x256xf32>, i32 -> vector<16x256xf32>
    %314 = vector.extract_strided_slice %254 {offsets = [0, 12], sizes = [16, 1], strides = [1, 1]} : vector<16x16xf32> to vector<16x1xf32>
    %315 = vector.broadcast %314 : vector<16x1xf32> to vector<16x256xf32>
    %316 = arith.mulf %313, %315 : vector<16x256xf32>
    %317 = arith.addf %312, %316 : vector<16x256xf32>
    %c243_i32 = arith.constant 243 : i32
    %318 = tpu.dynamic_rotate %253 by %c243_i32 dim 1 : vector<16x256xf32>, i32 -> vector<16x256xf32>
    %319 = vector.extract_strided_slice %254 {offsets = [0, 13], sizes = [16, 1], strides = [1, 1]} : vector<16x16xf32> to vector<16x1xf32>
    %320 = vector.broadcast %319 : vector<16x1xf32> to vector<16x256xf32>
    %321 = arith.mulf %318, %320 : vector<16x256xf32>
    %322 = arith.addf %317, %321 : vector<16x256xf32>
    %c242_i32 = arith.constant 242 : i32
    %323 = tpu.dynamic_rotate %253 by %c242_i32 dim 1 : vector<16x256xf32>, i32 -> vector<16x256xf32>
    %324 = vector.extract_strided_slice %254 {offsets = [0, 14], sizes = [16, 1], strides = [1, 1]} : vector<16x16xf32> to vector<16x1xf32>
    %325 = vector.broadcast %324 : vector<16x1xf32> to vector<16x256xf32>
    %326 = arith.mulf %323, %325 : vector<16x256xf32>
    %327 = arith.addf %322, %326 : vector<16x256xf32>
    %c241_i32 = arith.constant 241 : i32
    %328 = tpu.dynamic_rotate %253 by %c241_i32 dim 1 : vector<16x256xf32>, i32 -> vector<16x256xf32>
    %329 = vector.extract_strided_slice %254 {offsets = [0, 15], sizes = [16, 1], strides = [1, 1]} : vector<16x16xf32> to vector<16x1xf32>
    %330 = vector.broadcast %329 : vector<16x1xf32> to vector<16x256xf32>
    %331 = arith.mulf %328, %330 : vector<16x256xf32>
    %332 = arith.addf %327, %331 : vector<16x256xf32>
    %c0_67 = arith.constant 0 : index
    %c128 = arith.constant 128 : index
    %333 = vector.load %arg5[%c0_67, %c128] : memref<16x640xbf16, #tpu.memory_space<vmem>>, vector<16x16xbf16>
    %334 = arith.truncf %332 : vector<16x256xf32> to vector<16x256xbf16>
    %cst_68 = arith.constant dense<0.000000e+00> : vector<16x256xf32>
    %335 = tpu.matmul %333, %334, %cst_68 {dimension_numbers = #tpu.dot_dimension_numbers<[1], [0], [0], [1], [0, 0, 1, 1], [], []>} : vector<16x16xbf16>, vector<16x256xbf16>, vector<16x256xf32> -> vector<16x256xf32>
    %c0_69 = arith.constant 0 : index
    %c5 = arith.constant 5 : index
    %336 = vector.load %arg6[%c0_69, %c5] : memref<64x32xf32, #tpu.memory_space<vmem>>, vector<16x1xf32>
    %337 = vector.broadcast %336 : vector<16x1xf32> to vector<16x256xf32>
    %338 = arith.addf %335, %337 : vector<16x256xf32>
    %cst_70 = arith.constant 0.000000e+00 : f32
    %339 = vector.broadcast %cst_70 : f32 to vector<16x256xf32>
    %340 = arith.cmpf ogt, %338, %339 : vector<16x256xf32>
    %cst_71 = arith.constant 0.000000e+00 : f32
    %341 = vector.broadcast %cst_71 : f32 to vector<16x256xf32>
    %342 = arith.minimumf %338, %341 : vector<16x256xf32>
    %343 = math.exp %342 : vector<16x256xf32>
    %cst_72 = arith.constant 1.000000e+00 : f32
    %344 = vector.broadcast %cst_72 : f32 to vector<16x256xf32>
    %345 = arith.subf %343, %344 : vector<16x256xf32>
    %346 = arith.select %340, %338, %345 : vector<16x256xi1>, vector<16x256xf32>
    %347 = arith.truncf %346 : vector<16x256xf32> to vector<16x256xbf16>
    %c0_73 = arith.constant 0 : index
    %c256 = arith.constant 256 : index
    %348 = vector.load %arg4[%c0_73, %c256] : memref<256x384xbf16, #tpu.memory_space<vmem>>, vector<256x8xbf16>
    %cst_74 = arith.constant dense<0.000000e+00> : vector<16x8xf32>
    %349 = tpu.matmul %347, %348, %cst_74 {dimension_numbers = #tpu.dot_dimension_numbers<[1], [0], [0], [1], [0, 0, 1, 1], [], []>} : vector<16x256xbf16>, vector<256x8xbf16>, vector<16x8xf32> -> vector<16x8xf32>
    %c0_75 = arith.constant 0 : index
    %c256_76 = arith.constant 256 : index
    %350 = vector.load %arg5[%c0_75, %c256_76] : memref<16x640xbf16, #tpu.memory_space<vmem>>, vector<16x16xbf16>
    %351 = arith.truncf %349 : vector<16x8xf32> to vector<16x8xbf16>
    %cst_77 = arith.constant dense<0.000000e+00> : vector<16x8xf32>
    %352 = tpu.matmul %350, %351, %cst_77 {dimension_numbers = #tpu.dot_dimension_numbers<[1], [0], [0], [1], [0, 0, 1, 1], [], []>} : vector<16x16xbf16>, vector<16x8xbf16>, vector<16x8xf32> -> vector<16x8xf32>
    %c0_78 = arith.constant 0 : index
    %c24 = arith.constant 24 : index
    %353 = vector.load %arg6[%c0_78, %c24] : memref<64x32xf32, #tpu.memory_space<vmem>>, vector<16x8xf32>
    %354 = arith.mulf %352, %353 : vector<16x8xf32>
    %355 = arith.truncf %354 : vector<16x8xf32> to vector<16x8xbf16>
    %c0_79 = arith.constant 0 : index
    %c512 = arith.constant 512 : index
    %356 = vector.load %arg5[%c0_79, %c512] : memref<16x640xbf16, #tpu.memory_space<vmem>>, vector<8x2xbf16>
    %cst_80 = arith.constant dense<0.000000e+00> : vector<16x2xf32>
    %357 = tpu.matmul %355, %356, %cst_80 {dimension_numbers = #tpu.dot_dimension_numbers<[1], [0], [0], [1], [0, 0, 1, 1], [], []>} : vector<16x8xbf16>, vector<8x2xbf16>, vector<16x2xf32> -> vector<16x2xf32>
    %c0_81 = arith.constant 0 : index
    %c384 = arith.constant 384 : index
    %358 = vector.load %arg5[%c0_81, %c384] : memref<16x640xbf16, #tpu.memory_space<vmem>>, vector<4x16xbf16>
    %359 = arith.truncf %357 : vector<16x2xf32> to vector<16x2xbf16>
    %cst_82 = arith.constant dense<0.000000e+00> : vector<4x2xf32>
    %360 = tpu.matmul %358, %359, %cst_82 {dimension_numbers = #tpu.dot_dimension_numbers<[1], [0], [0], [1], [0, 0, 1, 1], [], []>} : vector<4x16xbf16>, vector<16x2xbf16>, vector<4x2xf32> -> vector<4x2xf32>
    %c0_83 = arith.constant 0 : index
    %c6 = arith.constant 6 : index
    %361 = vector.load %arg6[%c0_83, %c6] : memref<64x32xf32, #tpu.memory_space<vmem>>, vector<4x1xf32>
    %362 = vector.broadcast %361 : vector<4x1xf32> to vector<4x2xf32>
    %363 = arith.addf %360, %362 : vector<4x2xf32>
    %cst_84 = arith.constant dense<0xFF800000> : vector<2xf32>
    %364 = vector.multi_reduction <maximumf>, %363, %cst_84 [0] : vector<4x2xf32> to vector<2xf32>
    %365 = vector.shape_cast %364 : vector<2xf32> to vector<1x2xf32>
    %366 = vector.broadcast %365 : vector<1x2xf32> to vector<4x2xf32>
    %367 = arith.subf %363, %366 : vector<4x2xf32>
    %368 = math.exp %367 : vector<4x2xf32>
    %cst_85 = arith.constant dense<0.000000e+00> : vector<2xf32>
    %369 = vector.multi_reduction <add>, %368, %cst_85 [0] : vector<4x2xf32> to vector<2xf32>
    %370 = vector.shape_cast %369 : vector<2xf32> to vector<1x2xf32>
    %371 = math.log %370 : vector<1x2xf32>
    %372 = arith.addf %371, %365 : vector<1x2xf32>
    %373 = vector.broadcast %372 : vector<1x2xf32> to vector<4x2xf32>
    %374 = arith.subf %363, %373 : vector<4x2xf32>
    %c0_86 = arith.constant 0 : index
    %c0_87 = arith.constant 0 : index
    %375 = vector.load %arg7[%c0_86, %c0_87] : memref<4x2xf32, #tpu.memory_space<vmem>>, vector<4x2xf32>
    tpu.vector_store %arg7[%c0_86, %c0_87], %374 {strides = array<i32>} : memref<4x2xf32, #tpu.memory_space<vmem>>, vector<4x2xf32>,
    return
  }
  func.func @transform_0(%arg0: i32) -> (i32, i32) {
    %c0_i32 = arith.constant 0 : i32
    %c0_i32_0 = arith.constant 0 : i32
    %c0_i32_1 = arith.constant 0 : i32
    return %c0_i32, %c0_i32_0 : i32, i32
  }
  func.func @transform_1(%arg0: i32) -> (i32, i32) {
    %c0_i32 = arith.constant 0 : i32
    %c0_i32_0 = arith.constant 0 : i32
    %c0_i32_1 = arith.constant 0 : i32
    return %c0_i32, %c0_i32_0 : i32, i32
  }
  func.func @transform_2(%arg0: i32) -> (i32, i32, i32) {
    %c0_i32 = arith.constant 0 : i32
    %c0_i32_0 = arith.constant 0 : i32
    %c0_i32_1 = arith.constant 0 : i32
    %c0_i32_2 = arith.constant 0 : i32
    return %c0_i32, %c0_i32_0, %c0_i32_1 : i32, i32, i32
  }
  func.func @transform_3(%arg0: i32) -> (i32, i32) {
    %c0_i32 = arith.constant 0 : i32
    %c0_i32_0 = arith.constant 0 : i32
    %c0_i32_1 = arith.constant 0 : i32
    return %c0_i32, %c0_i32_0 : i32, i32
  }
  func.func @transform_4(%arg0: i32) -> (i32, i32) {
    %c0_i32 = arith.constant 0 : i32
    %c0_i32_0 = arith.constant 0 : i32
    %c0_i32_1 = arith.constant 0 : i32
    return %c0_i32, %c0_i32_0 : i32, i32
  }
  func.func @transform_5(%arg0: i32) -> (i32, i32) {
    %c0_i32 = arith.constant 0 : i32
    %c0_i32_0 = arith.constant 0 : i32
    %c0_i32_1 = arith.constant 0 : i32
    return %c0_i32, %c0_i32_0 : i32, i32
  }
  func.func @transform_6(%arg0: i32) -> (i32, i32) {
    %c0_i32 = arith.constant 0 : i32
    %c0_i32_0 = arith.constant 0 : i32
    %c0_i32_1 = arith.constant 0 : i32
    return %c0_i32, %c0_i32_0 : i32, i32
  }
}

</mosaic_0001>

<bundles_post_ra>
// kernel: gcn_eegnet_forward.1
= control target key start
LH: loop header
LB: loop body
LE: loop exit
PB: predicated region body
PF: predicated region fallthrough
CT: control target
= control target key end

     0   :  { %vm884_vm0 = vcmask 523264   ;;  %s7579_s10 = smov 3   ;;  %s7580_s13 = smov 126   ;;  %s12936_s1 = inlined_call_operand.vmem [shape: bf16[128,1024], index: 1, kind: input, shape index: {}]   ;;  %s12937_s0 = inlined_call_operand.vmem [shape: f32[16,128], index: 0, kind: input, shape index: {}]   ;;  %s12938_s5 = inlined_call_operand.vmem [shape: f32[64,32], index: 5, kind: input, shape index: {}]   ;;  %s12939_s2 = inlined_call_operand.vmem [shape: bf16[3,512,64], index: 2, kind: input, shape index: {}]   ;;  %s12940_s3 = inlined_call_operand.vmem [shape: bf16[256,384], index: 3, kind: input, shape index: {}]   ;;  %s12941_s4 = inlined_call_operand.vmem [shape: bf16[16,640], index: 4, kind: input, shape index: {}]   ;;  %s12942_s6 = inlined_call_operand.vmem [shape: f32[4,2], index: 6, kind: output, shape index: {}]  }
   0x1   :  { %v6112_v0 = vld [vmem:[%s12936_s1 + $0x1c0] sm:$0xf]  ;;  %v7183_v2 = vld [vmem:[%s12936_s1 + $0x1c4] sm:$0xf]  ;;  %v6120_v5 = vld [vmem:[%s12936_s1 + $0x1c8] sm:$0xf] }
   0x2   :  { %v7187_v1 = vld [vmem:[%s12936_s1 + $0x1dc] sm:$0xf0]  ;;  %v6114_v4 = vld [vmem:[%s12936_s1 + $0x1e0] sm:$0xf0]  ;;  %v7188_v6 = vld [vmem:[%s12936_s1 + $0x1e4] sm:$0xf0] }
   0x3   :  { %v6113_v3 = vor.u32 %v7187_v1, %v6112_v0  ;;  %v6117_v7 = vor.u32 %v7183_v2, %v6114_v4  ;;  %v6121_v8 = vor.u32 %v7188_v6, %v6120_v5  ;;  %v7184_v9 = vld [vmem:[%s12936_s1 + $0x1cc] sm:$0xf]  ;;  %v6080_v11 = vld [vmem:[%s12936_s1 + $0x180] sm:$0xf]  ;;  %v7175_v14 = vld [vmem:[%s12936_s1 + $0x184] sm:$0xf] }
   0x4   :  { %v6122_v10 = vld [vmem:[%s12936_s1 + $0x1e8] sm:$0xf0]  ;;  %v7179_v13 = vld [vmem:[%s12936_s1 + $0x19c] sm:$0xf0]  ;;  %v6082_v15 = vld [vmem:[%s12936_s1 + $0x1a0] sm:$0xf0] }
   0x5   :  { %411 = vmatpush.bf16.msra.mxu0 %v6113_v3  ;;  %v6125_v12 = vor.u32 %v7184_v9, %v6122_v10  ;;  %425 = vmatpush.bf16.msra.mxu1 %v6117_v7  ;;  %v6081_v16 = vor.u32 %v7179_v13, %v6080_v11  ;;  %v6085_v17 = vor.u32 %v7175_v14, %v6082_v15  ;;  %v6088_v18 = vld [vmem:[%s12936_s1 + $0x188] sm:$0xf]  ;;  %v7176_v20 = vld [vmem:[%s12936_s1 + $0x18c] sm:$0xf]  ;;  %v6048_v23 = vld [vmem:[%s12936_s1 + $0x140] sm:$0xf] }
   0x6   :  { %439 = vmatpush.bf16.msra.mxu2 %v6121_v8  ;;  %v7180_v19 = vld [vmem:[%s12936_s1 + $0x1a4] sm:$0xf0]  ;;  %v6090_v22 = vld [vmem:[%s12936_s1 + $0x1a8] sm:$0xf0]  ;;  %v7171_v24 = vld [vmem:[%s12936_s1 + $0x15c] sm:$0xf0] }
   0x7   :  { %453 = vmatpush.bf16.msra.mxu3 %v6125_v12  ;;  %v6089_v21 = vor.u32 %v7180_v19, %v6088_v18  ;;  %v6093_v25 = vor.u32 %v7176_v20, %v6090_v22  ;;  %v7167_v26 = vld [vmem:[%s12936_s1 + $0x144] sm:$0xf]  ;;  %v6056_v28 = vld [vmem:[%s12936_s1 + $0x148] sm:$0xf]  ;;  %v6049_v29 = vor.u32 %v7171_v24, %v6048_v23  ;;  %v7168_v31 = vld [vmem:[%s12936_s1 + $0x14c] sm:$0xf] }
   0x8   :  { %v6050_v27 = vld [vmem:[%s12936_s1 + $0x160] sm:$0xf0]  ;;  %v7172_v30 = vld [vmem:[%s12936_s1 + $0x164] sm:$0xf0]  ;;  %v6058_v32 = vld [vmem:[%s12936_s1 + $0x168] sm:$0xf0] }
   0x9   :  { %412 = vmatpush.bf16.msra.mxu0 %v6081_v16  ;;  %426 = vmatpush.bf16.msra.mxu1 %v6085_v17  ;;  %v6053_v33 = vor.u32 %v7167_v26, %v6050_v27  ;;  %v6057_v34 = vor.u32 %v7172_v30, %v6056_v28  ;;  %v6016_v35 = vld [vmem:[%s12936_s1 + $0x100] sm:$0xf]  ;;  %v7159_v37 = vld [vmem:[%s12936_s1 + $0x104] sm:$0xf]  ;;  %v6061_v38 = vor.u32 %v7168_v31, %v6058_v32  ;;  %v6024_v40 = vld [vmem:[%s12936_s1 + $0x108] sm:$0xf] }
   0xa   :  { %440 = vmatpush.bf16.msra.mxu2 %v6089_v21  ;;  %v7163_v36 = vld [vmem:[%s12936_s1 + $0x11c] sm:$0xf0]  ;;  %v6018_v39 = vld [vmem:[%s12936_s1 + $0x120] sm:$0xf0]  ;;  %v7164_v41 = vld [vmem:[%s12936_s1 + $0x124] sm:$0xf0] }
   0xb   :  { %454 = vmatpush.bf16.msra.mxu3 %v6093_v25  ;;  %v7160_v42 = vld [vmem:[%s12936_s1 + $0x10c] sm:$0xf]  ;;  %v6017_v44 = vor.u32 %v7163_v36, %v6016_v35  ;;  %v6021_v45 = vor.u32 %v7159_v37, %v6018_v39  ;;  %v6025_v46 = vor.u32 %v7164_v41, %v6024_v40  ;;  %v5984_v47 = vld [vmem:[%s12936_s1 + $0xc0] sm:$0xf]  ;;  %v7151_v49 = vld [vmem:[%s12936_s1 + $0xc4] sm:$0xf] }
   0xc   :  { %v6026_v43 = vld [vmem:[%s12936_s1 + $0x128] sm:$0xf0]  ;;  %v7155_v48 = vld [vmem:[%s12936_s1 + $0xdc] sm:$0xf0]  ;;  %v5986_v51 = vld [vmem:[%s12936_s1 + $0xe0] sm:$0xf0] }
   0xd   :  { %413 = vmatpush.bf16.msra.mxu0 %v6049_v29  ;;  %427 = vmatpush.bf16.msra.mxu1 %v6053_v33  ;;  %v6029_v50 = vor.u32 %v7160_v42, %v6026_v43  ;;  %v5992_v52 = vld [vmem:[%s12936_s1 + $0xc8] sm:$0xf]  ;;  %v7152_v54 = vld [vmem:[%s12936_s1 + $0xcc] sm:$0xf]  ;;  %v5985_v56 = vor.u32 %v7155_v48, %v5984_v47  ;;  %v5989_v57 = vor.u32 %v7151_v49, %v5986_v51  ;;  %v5952_v59 = vld [vmem:[%s12936_s1 + $0x80] sm:$0xf] }
   0xe   :  { %441 = vmatpush.bf16.msra.mxu2 %v6057_v34  ;;  %v7156_v53 = vld [vmem:[%s12936_s1 + $0xe4] sm:$0xf0]  ;;  %v5994_v55 = vld [vmem:[%s12936_s1 + $0xe8] sm:$0xf0]  ;;  %v7147_v60 = vld [vmem:[%s12936_s1 + $0x9c] sm:$0xf0] }
   0xf   :  { %455 = vmatpush.bf16.msra.mxu3 %v6061_v38  ;;  %v5993_v58 = vor.u32 %v7156_v53, %v5992_v52  ;;  %v7143_v61 = vld [vmem:[%s12936_s1 + $0x84] sm:$0xf]  ;;  %v5997_v62 = vor.u32 %v7152_v54, %v5994_v55  ;;  %v5960_v0 = vld [vmem:[%s12936_s1 + $0x88] sm:$0xf]  ;;  %v7144_v2 = vld [vmem:[%s12936_s1 + $0x8c] sm:$0xf]  ;;  %v5953_v4 = vor.u32 %v7147_v60, %v5952_v59 }
  0x10   :  { %v5954_v63 = vld [vmem:[%s12936_s1 + $0xa0] sm:$0xf0]  ;;  %v7148_v1 = vld [vmem:[%s12936_s1 + $0xa4] sm:$0xf0]  ;;  %v5962_v3 = vld [vmem:[%s12936_s1 + $0xa8] sm:$0xf0] }
  0x11   :  { %414 = vmatpush.bf16.msra.mxu0 %v6017_v44  ;;  %428 = vmatpush.bf16.msra.mxu1 %v6021_v45  ;;  %v5957_v5 = vor.u32 %v7143_v61, %v5954_v63  ;;  %v5961_v6 = vor.u32 %v7148_v1, %v5960_v0  ;;  %v5920_v7 = vld [vmem:[%s12936_s1 + $0x40] sm:$0xf]  ;;  %v7135_v9 = vld [vmem:[%s12936_s1 + $0x44] sm:$0xf]  ;;  %v5965_v10 = vor.u32 %v7144_v2, %v5962_v3  ;;  %v5928_v12 = vld [vmem:[%s12936_s1 + $0x48] sm:$0xf] }
  0x12   :  { %442 = vmatpush.bf16.msra.mxu2 %v6025_v46  ;;  %v7139_v8 = vld [vmem:[%s12936_s1 + $0x5c] sm:$0xf0]  ;;  %v5922_v11 = vld [vmem:[%s12936_s1 + $0x60] sm:$0xf0]  ;;  %v7140_v13 = vld [vmem:[%s12936_s1 + $0x64] sm:$0xf0] }
  0x13   :  { %456 = vmatpush.bf16.msra.mxu3 %v6029_v50  ;;  %v7136_v14 = vld [vmem:[%s12936_s1 + $0x4c] sm:$0xf]  ;;  %v5888_v16 = vld [vmem:[%s12936_s1] sm:$0xf]  ;;  %v5921_v17 = vor.u32 %v7139_v8, %v5920_v7  ;;  %v7127_v19 = vld [vmem:[%s12936_s1 + $0x4] sm:$0xf]  ;;  %v5925_v21 = vor.u32 %v7135_v9, %v5922_v11  ;;  %v5929_v22 = vor.u32 %v7140_v13, %v5928_v12 }
  0x14   :  { %v5930_v15 = vld [vmem:[%s12936_s1 + $0x68] sm:$0xf0]  ;;  %v7131_v18 = vld [vmem:[%s12936_s1 + $0x1c] sm:$0xf0]  ;;  %v5890_v20 = vld [vmem:[%s12936_s1 + $0x20] sm:$0xf0] }
  0x15   :  { %415 = vmatpush.bf16.msra.mxu0 %v5985_v56  ;;  %429 = vmatpush.bf16.msra.mxu1 %v5989_v57  ;;  %v5896_v23 = vld [vmem:[%s12936_s1 + $0x8] sm:$0xf]  ;;  %v7128_v25 = vld [vmem:[%s12936_s1 + $0xc] sm:$0xf]  ;;  %v5933_v26 = vor.u32 %v7136_v14, %v5930_v15  ;;  %v6128_v28 = vld [vmem:[%s12936_s1 + $0x1d0] sm:$0xf]  ;;  %v5889_v32 = vor.u32 %v7131_v18, %v5888_v16  ;;  %v5893_v37 = vor.u32 %v7127_v19, %v5890_v20 }
  0x16   :  { %443 = vmatpush.bf16.msra.mxu2 %v5993_v58  ;;  %v7132_v24 = vld [vmem:[%s12936_s1 + $0x24] sm:$0xf0]  ;;  %v5898_v27 = vld [vmem:[%s12936_s1 + $0x28] sm:$0xf0]  ;;  %v7189_v29 = vld [vmem:[%s12936_s1 + $0x1ec] sm:$0xf0] }
  0x17   :  { %457 = vmatpush.bf16.msra.mxu3 %v5997_v62  ;;  %v7185_v30 = vld [vmem:[%s12936_s1 + $0x1d4] sm:$0xf]  ;;  %v6136_v33 = vld [vmem:[%s12936_s1 + $0x1d8] sm:$0xf]  ;;  %v7186_v35 = vld [vmem:[%s12936_s1 + $0x1dc] sm:$0xf]  ;;  %v5897_v38 = vor.u32 %v7132_v24, %v5896_v23  ;;  %v5901_v42 = vor.u32 %v7128_v25, %v5898_v27  ;;  %v6129_v43 = vor.u32 %v7189_v29, %v6128_v28 }
  0x18   :  { %v6130_v31 = vld [vmem:[%s12936_s1 + $0x1f0] sm:$0xf0]  ;;  %v7190_v34 = vld [vmem:[%s12936_s1 + $0x1f4] sm:$0xf0]  ;;  %v7577_v36 = vmov 0   ;;  %v24_v40 = vld [vmem:[%s12937_s0] sm:$0xff] }
  0x19   :  { %416 = vmatpush.bf16.msra.mxu0 %v5953_v4  ;;  %430 = vmatpush.bf16.msra.mxu1 %v5957_v5  ;;  %v6138_v39 = vld [vmem:[%s12936_s1 + $0x1f8] sm:$0xf0]  ;;  %v25_v41 = vld [vmem:[%s12937_s0 + $0x8] sm:$0xff]  ;;  %v6133_v44 = vor.u32 %v7185_v30, %v6130_v31  ;;  %v6137_v45 = vor.u32 %v7190_v34, %v6136_v33  ;;  %v6096_v46 = vld [vmem:[%s12936_s1 + $0x190] sm:$0xf]  ;;  %s7581_s24 = smov 125  }
  0x1a   :  { %444 = vmatpush.bf16.msra.mxu2 %v5961_v6  ;;  %7390 = vset.pattern.permute.xlu1 %v7577_v36  ;;  %v7181_v47 = vld [vmem:[%s12936_s1 + $0x1ac] sm:$0xf0]  ;;  %v7177_v48 = vld [vmem:[%s12936_s1 + $0x194] sm:$0xf]  ;;  %v6141_v49 = vor.u32 %v7186_v35, %v6138_v39  ;;  %v6104_v51 = vld [vmem:[%s12936_s1 + $0x198] sm:$0xf]  ;;  %v7895_v53 = vpack.c.bf16 %v25_v41, %v24_v40 }
  0x1b   :  { %458 = vmatpush.bf16.msra.mxu3 %v5965_v10  ;;  %7389 = vset.pattern.permute.xlu0 %v7577_v36  ;;  %v6098_v50 = vld [vmem:[%s12936_s1 + $0x1b0] sm:$0xf0]  ;;  %v7182_v52 = vld [vmem:[%s12936_s1 + $0x1b4] sm:$0xf0]  ;;  %v7178_v54 = vld [vmem:[%s12936_s1 + $0x19c] sm:$0xf]  ;;  %v6097_v56 = vor.u32 %v7181_v47, %v6096_v46 }
  0x1c   :  { %7391 = vset.pattern.permute.xlu2 %v7577_v36  ;;  %v6106_v55 = vld [vmem:[%s12936_s1 + $0x1b8] sm:$0xf0]  ;;  %v6101_v57 = vor.u32 %v7177_v48, %v6098_v50  ;;  %v6105_v58 = vor.u32 %v7182_v52, %v6104_v51  ;;  %v6064_v59 = vld [vmem:[%s12936_s1 + $0x150] sm:$0xf]  ;;  %v7169_v61 = vld [vmem:[%s12936_s1 + $0x154] sm:$0xf] }
  0x1d   :  { %417 = vmatpush.bf16.msra.mxu0 %v5921_v17  ;;  %431 = vmatpush.bf16.msra.mxu1 %v5925_v21  ;;  %v7173_v60 = vld [vmem:[%s12936_s1 + $0x16c] sm:$0xf0]  ;;  %v6109_v62 = vor.u32 %v7178_v54, %v6106_v55  ;;  %v6066_v63 = vld [vmem:[%s12936_s1 + $0x170] sm:$0xf0]  ;;  %v6072_v0 = vld [vmem:[%s12936_s1 + $0x158] sm:$0xf] }
  0x1e   :  { %445 = vmatpush.bf16.msra.mxu2 %v5929_v22  ;;  %v7174_v1 = vld [vmem:[%s12936_s1 + $0x174] sm:$0xf0]  ;;  %v7170_v2 = vld [vmem:[%s12936_s1 + $0x15c] sm:$0xf]  ;;  %v7933_v4 = vld [vmem:[%s12938_s5 + $0x30] sm:$0xff]  ;;  %v6065_v5 = vor.u32 %v7173_v60, %v6064_v59  ;;  %v6069_v7 = vor.u32 %v7169_v61, %v6066_v63  ;;  %s7582_s27 = smov 2  }
  0x1f   :  { %459 = vmatpush.bf16.msra.mxu3 %v5933_v26  ;;  %v6074_v3 = vld [vmem:[%s12936_s1 + $0x178] sm:$0xf0]  ;;  %v7939_v6 = vld [vmem:[%s12938_s5 + $0x20] sm:$0xff]  ;;  %v6073_v8 = vor.u32 %v7174_v1, %v6072_v0  ;;  %v6032_v9 = vld [vmem:[%s12936_s1 + $0x110] sm:$0xf]  ;;  %563 = vperm.xlu0 %7389, %v7933_v4   ;;  %s7583_s16 = smov 1  }
  0x20   :  { %v7165_v10 = vld [vmem:[%s12936_s1 + $0x12c] sm:$0xf0]  ;;  %v7161_v11 = vld [vmem:[%s12936_s1 + $0x114] sm:$0xf]  ;;  %v6077_v12 = vor.u32 %v7170_v2, %v6074_v3  ;;  %v6040_v14 = vld [vmem:[%s12936_s1 + $0x118] sm:$0xf]  ;;  %553 = vperm.xlu1 %7390, %v7939_v6  }
  0x21   :  { %418 = vmatpush.bf16.msra.mxu0 %v5889_v32  ;;  %432 = vmatpush.bf16.msra.mxu1 %v5893_v37  ;;  %v6034_v13 = vld [vmem:[%s12936_s1 + $0x130] sm:$0xf0]  ;;  %v7166_v15 = vld [vmem:[%s12936_s1 + $0x134] sm:$0xf0]  ;;  %v7162_v16 = vld [vmem:[%s12936_s1 + $0x11c] sm:$0xf]  ;;  %v6033_v18 = vor.u32 %v7165_v10, %v6032_v9 }
  0x22   :  { %446 = vmatpush.bf16.msra.mxu2 %v5897_v38  ;;  %v6042_v17 = vld [vmem:[%s12936_s1 + $0x138] sm:$0xf0]  ;;  %v6037_v19 = vor.u32 %v7161_v11, %v6034_v13  ;;  %v6041_v20 = vor.u32 %v7166_v15, %v6040_v14  ;;  %v6000_v21 = vld [vmem:[%s12936_s1 + $0xd0] sm:$0xf]  ;;  %v7153_v23 = vld [vmem:[%s12936_s1 + $0xd4] sm:$0xf] }
  0x23   :  { %460 = vmatpush.bf16.msra.mxu3 %v5901_v42  ;;  %v7157_v22 = vld [vmem:[%s12936_s1 + $0xec] sm:$0xf0]  ;;  %v6045_v24 = vor.u32 %v7162_v16, %v6042_v17  ;;  %v6002_v25 = vld [vmem:[%s12936_s1 + $0xf0] sm:$0xf0]  ;;  %v6008_v26 = vld [vmem:[%s12936_s1 + $0xd8] sm:$0xf] }
  0x24   :  { %419 = vmatmul.bf16.vlgmr.msra.gmra.mxu0 %v7895_v53  ;;  %433 = vmatmul.bf16.vlgmr.msra.gmra.mxu1 %v7895_v53  ;;  %v7158_v27 = vld [vmem:[%s12936_s1 + $0xf4] sm:$0xf0]  ;;  %v7154_v28 = vld [vmem:[%s12936_s1 + $0xdc] sm:$0xf]  ;;  %v6001_v31 = vor.u32 %v7157_v22, %v6000_v21  ;;  %v7999_v32 = vld [vmem:[%s12938_s5 + $0x28] sm:$0xff]  ;;  %v6005_v34 = vor.u32 %v7153_v23, %v6002_v25  ;;  %s7584_s17 = smov 124  }
  0x25   :  { %467 = vmatpush.bf16.msrb.mxu0 %v6129_v43  ;;  %481 = vmatpush.bf16.msrb.mxu1 %v6133_v44  ;;  %v6010_v29 = vld [vmem:[%s12936_s1 + $0xf8] sm:$0xf0]  ;;  %v525_v33 = vld [vmem:[%s12938_s5 + $0x10] sm:$0xff]  ;;  %v6009_v35 = vor.u32 %v7158_v27, %v6008_v26  ;;  %v5976_v41 = vld [vmem:[%s12936_s1 + $0x98] sm:$0xf]  ;;  %s7585_s22 = smov 127  }
  0x26   :  { %495 = vmatpush.bf16.msrb.mxu2 %v6137_v45  ;;  %461 = vmatmul.bf16.vlgmr.msra.gmra.mxu3 %v7895_v53  ;;  %v7994_v30 = vld [vmem:[%s12938_s5 + $0x38] sm:$0xff]  ;;  %v5968_v36 = vld [vmem:[%s12936_s1 + $0x90] sm:$0xf]  ;;  %v7145_v38 = vld [vmem:[%s12936_s1 + $0x94] sm:$0xf]  ;;  %v6013_v39 = vor.u32 %v7154_v28, %v6010_v29  ;;  %s7605_s28 = smov 122  }
  0x27   :  { %509 = vmatpush.bf16.msrb.mxu3 %v6141_v49  ;;  %447 = vmatmul.bf16.vlgmr.msra.gmra.mxu2 %v7895_v53  ;;  %v7149_v37 = vld [vmem:[%s12936_s1 + $0xac] sm:$0xf0]  ;;  %v5970_v40 = vld [vmem:[%s12936_s1 + $0xb0] sm:$0xf0]  ;;  %v7150_v42 = vld [vmem:[%s12936_s1 + $0xb4] sm:$0xf0] }
  0x28   :  { %568 = vperm.xlu0 %7389, %v7994_v30   ;;  %v7146_v43 = vld [vmem:[%s12936_s1 + $0x9c] sm:$0xf]  ;;  %558 = vperm.xlu1 %7390, %v7999_v32   ;;  %v5969_v45 = vor.u32 %v7149_v37, %v5968_v36  ;;  %v5973_v46 = vor.u32 %v7145_v38, %v5970_v40  ;;  %v5977_v47 = vor.u32 %v7150_v42, %v5976_v41  ;;  %v5936_v48 = vld [vmem:[%s12936_s1 + $0x50] sm:$0xf]  ;;  %v7137_v50 = vld [vmem:[%s12936_s1 + $0x54] sm:$0xf] }
  0x29   :  { %468 = vmatpush.bf16.msrb.mxu0 %v6097_v56  ;;  %482 = vmatpush.bf16.msrb.mxu1 %v6101_v57  ;;  %v5978_v44 = vld [vmem:[%s12936_s1 + $0xb8] sm:$0xf0]  ;;  %v7141_v49 = vld [vmem:[%s12936_s1 + $0x6c] sm:$0xf0]  ;;  %v5938_v52 = vld [vmem:[%s12936_s1 + $0x70] sm:$0xf0] }
  0x2a   :  { %496 = vmatpush.bf16.msrb.mxu2 %v6105_v58  ;;  %543 = vperm.xlu2 %7391, %v525_v33   ;;  %v5981_v51 = vor.u32 %v7146_v43, %v5978_v44  ;;  %v5944_v54 = vld [vmem:[%s12936_s1 + $0x58] sm:$0xf]  ;;  %v4782_v56 = vld [vmem:[%s12938_s5] sm:$0xff]  ;;  %v7138_v57 = vld [vmem:[%s12936_s1 + $0x5c] sm:$0xf]  ;;  %v5937_v60 = vor.u32 %v7141_v49, %v5936_v48  ;;  %s7606_s29 = smov 121  }
  0x2b   :  { %510 = vmatpush.bf16.msrb.mxu3 %v6109_v62  ;;  %v7142_v55 = vld [vmem:[%s12936_s1 + $0x74] sm:$0xf0]  ;;  %v5946_v58 = vld [vmem:[%s12936_s1 + $0x78] sm:$0xf0]  ;;  %v4783_v59 = vld [vmem:[%s12938_s5 + $0x8] sm:$0xff]  ;;  %v5941_v62 = vor.u32 %v7137_v50, %v5938_v52  ;;  %s7607_s30 = smov 120  }
  0x2c   :  { %v526_v61 = vld [vmem:[%s12938_s5 + $0x18] sm:$0xff]  ;;  %v5945_v63 = vor.u32 %v7142_v55, %v5944_v54  ;;  %v5904_v0 = vld [vmem:[%s12936_s1 + $0x10] sm:$0xf]  ;;  %v7129_v2 = vld [vmem:[%s12936_s1 + $0x14] sm:$0xf]  ;;  %v5949_v3 = vor.u32 %v7138_v57, %v5946_v58  ;;  %s7608_s0 = smov 119  }
  0x2d   :  { %469 = vmatpush.bf16.msrb.mxu0 %v6065_v5  ;;  %483 = vmatpush.bf16.msrb.mxu1 %v6069_v7  ;;  %v7133_v1 = vld [vmem:[%s12936_s1 + $0x2c] sm:$0xf0]  ;;  %v5906_v5 = vld [vmem:[%s12936_s1 + $0x30] sm:$0xf0]  ;;  %v5912_v7 = vld [vmem:[%s12936_s1 + $0x18] sm:$0xf] }
  0x2e   :  { %497 = vmatpush.bf16.msrb.mxu2 %v6073_v8  ;;  %v7134_v8 = vld [vmem:[%s12936_s1 + $0x34] sm:$0xf0]  ;;  %v7130_v9 = vld [vmem:[%s12936_s1 + $0x1c] sm:$0xf]  ;;  %v5905_v11 = vor.u32 %v7133_v1, %v5904_v0  ;;  %s7610_s7 = smov 117   ;;  %s7611_s8 = smov 116  }
  0x2f   :  { %511 = vmatpush.bf16.msrb.mxu3 %v6077_v12  ;;  %v5914_v10 = vld [vmem:[%s12936_s1 + $0x38] sm:$0xf0]  ;;  %v5909_v12 = vor.u32 %v7129_v2, %v5906_v5  ;;  %v5913_v13 = vor.u32 %v7134_v8, %v5912_v7  ;;  %v7213_v5 = vld [vmem:[%s12939_s2 + $0xb0] sm:$0xff]  ;;  %s7612_s9 = smov 115   ;;  %s7613_s11 = smov 114  }
  0x30   :  { %533 = vperm.xlu0 %7389, %v4782_v56   ;;  %538 = vperm.xlu1 %7390, %v4783_v59   ;;  %v5917_v14 = vor.u32 %v7130_v9, %v5914_v10  ;;  %v7193_v7 = vld [vmem:[%s12939_s2 + $0x10] sm:$0xff]  ;;  %v7214_v8 = vld [vmem:[%s12939_s2 + $0xb8] sm:$0xff]  ;;  %v7215_v10 = vld [vmem:[%s12939_s2 + $0xc0] sm:$0xff]  ;;  %s7614_s12 = smov 113  }
  0x31   :  { %470 = vmatpush.bf16.msrb.mxu0 %v6033_v18  ;;  %484 = vmatpush.bf16.msrb.mxu1 %v6037_v19  ;;  %v7194_v9 = vld [vmem:[%s12939_s2 + $0x18] sm:$0xff] }
  0x32   :  { %498 = vmatpush.bf16.msrb.mxu2 %v6041_v20  ;;  %548 = vperm.xlu2 %7391, %v526_v61   ;;  %v7191_v61 = vld [vmem:[%s12939_s2] sm:$0xff] }
  0x33   :  { %512 = vmatpush.bf16.msrb.mxu3 %v6045_v24 }
  0x35   :  { %471 = vmatpush.bf16.msrb.mxu0 %v6001_v31  ;;  %485 = vmatpush.bf16.msrb.mxu1 %v6005_v34 }
  0x36   :  { %499 = vmatpush.bf16.msrb.mxu2 %v6009_v35 }
  0x37   :  { %513 = vmatpush.bf16.msrb.mxu3 %v6013_v39 }
  0x39   :  { %472 = vmatpush.bf16.msrb.mxu0 %v5969_v45  ;;  %486 = vmatpush.bf16.msrb.mxu1 %v5973_v46 }
  0x3a   :  { %500 = vmatpush.bf16.msrb.mxu2 %v5977_v47 }
  0x3b   :  { %514 = vmatpush.bf16.msrb.mxu3 %v5981_v51 }
  0x3d   :  { %473 = vmatpush.bf16.msrb.mxu0 %v5937_v60  ;;  %487 = vmatpush.bf16.msrb.mxu1 %v5941_v62  ;;  %v7212_v62 = vld [vmem:[%s12939_s2 + $0xa8] sm:$0xff] }
  0x3e   :  { %501 = vmatpush.bf16.msrb.mxu2 %v5945_v63 }
  0x3f   :  { %515 = vmatpush.bf16.msrb.mxu3 %v5949_v3  ;;  %v7192_v3 = vld [vmem:[%s12939_s2 + $0x8] sm:$0xff] }
  0x41   :  { %474 = vmatpush.bf16.msrb.mxu0 %v5905_v11  ;;  %488 = vmatpush.bf16.msrb.mxu1 %v5909_v12  ;;  %v7195_v11 = vld [vmem:[%s12939_s2 + $0x20] sm:$0xff]  ;;  %v7216_v12 = vld [vmem:[%s12939_s2 + $0xc8] sm:$0xff] }
  0x42   :  { %502 = vmatpush.bf16.msrb.mxu2 %v5913_v13  ;;  %v7196_v13 = vld [vmem:[%s12939_s2 + $0x28] sm:$0xff] }
  0x43   :  { %516 = vmatpush.bf16.msrb.mxu3 %v5917_v14  ;;  %v7217_v14 = vld [vmem:[%s12939_s2 + $0xd0] sm:$0xff] }
  0x44   :  { %475 = vmatmul.bf16.vlgmr.msrb.gmra.mxu0 %v7895_v53  ;;  %489 = vmatmul.bf16.vlgmr.msrb.gmra.mxu1 %v7895_v53 }
  0x45   :  { %503 = vmatmul.bf16.vlgmr.msrb.gmra.mxu2 %v7895_v53 }
  0x46   :  { %517 = vmatmul.bf16.vlgmr.msrb.gmra.mxu3 %v7895_v53 }
  0x84   :  { %v544_v25 = vpop.permute.xlu2 %543 }
  0x8c   :  { %v549_v38 = vpop.permute.xlu2 %548 }
  0x91   :  { %v564_v19 = vpop.permute.xlu0 %563 }
  0x92   :  { %v554_v20 = vpop.permute.xlu1 %553 }
  0x9a   :  { %v569_v26 = vpop.permute.xlu0 %568  ;;  %v559_v27 = vpop.permute.xlu1 %558 }
  0xa1   :  { %v420_v15 = vpop.f32.mrf.mxu0  ;;  %v434_v16 = vpop.f32.mrf.mxu1 }
  0xa2   :  { %v534_v41 = vpop.permute.xlu0 %533  ;;  %v539_v44 = vpop.permute.xlu1 %538 }
  0xa3   :  { %v573_v50 = vadd.f32 %v539_v44, %v434_v16  ;;  %v571_v51 = vadd.f32 %v534_v41, %v420_v15  ;;  %v7578_v15 = vmov 1   ;;  %v7197_v16 = vld [vmem:[%s12939_s2 + $0x30] sm:$0xff] }
  0xa4   :  { %7393 = vset.pattern.permute.xlu1 %v7578_v15  ;;  %7394 = vset.pattern.permute.xlu2 %v7578_v15 }
  0xa5   :  { %v716_v57 = vpack.c.bf16 %v573_v50, %v571_v51  ;;  %1915 = vperm.xlu1 %7393, %v7994_v30   ;;  %1907 = vperm.xlu2 %7394, %v7999_v32   ;;  %v7199_v30 = vld [vmem:[%s12939_s2 + $0x40] sm:$0xff] }
  0xa6   :  { %7392 = vset.pattern.permute.xlu0 %v7578_v15 }
  0xa7   :  { %1911 = vperm.xlu0 %7392, %v7933_v4   ;;  %v7198_v4 = vld [vmem:[%s12939_s2 + $0x38] sm:$0xff] }
  0xa9   :  { %v462_v18 = vpop.f32.mrf.mxu3  ;;  %v422_v21 = vpop.f32.mrf.mxu0 }
  0xaa   :  { %v448_v17 = vpop.f32.mrf.mxu2  ;;  %v436_v22 = vpop.f32.mrf.mxu1  ;;  %v577_v40 = vadd.f32 %v549_v38, %v462_v18  ;;  %v572_v1 = vadd.f32 %v534_v41, %v422_v21  ;;  %v7220_v18 = vld [vmem:[%s12939_s2 + $0xe8] sm:$0xff] }
  0xab   :  { %v575_v39 = vadd.f32 %v544_v25, %v448_v17  ;;  %v574_v0 = vadd.f32 %v539_v44, %v436_v22  ;;  %v7218_v17 = vld [vmem:[%s12939_s2 + $0xd8] sm:$0xff] }
  0xad   :  { %v718_v54 = vpack.c.bf16 %v577_v40, %v575_v39  ;;  %v717_v2 = vpack.c.bf16 %v574_v0, %v572_v1  ;;  %1903 = vperm.xlu1 %7393, %v7939_v6   ;;  %v7219_v6 = vld [vmem:[%s12939_s2 + $0xe0] sm:$0xff] }
  0xb1   :  { %v464_v24 = vpop.f32.mrf.mxu3 }
  0xb2   :  { %v450_v23 = vpop.f32.mrf.mxu2  ;;  %v578_v59 = vadd.f32 %v549_v38, %v464_v24  ;;  %v7200_v24 = vld [vmem:[%s12939_s2 + $0x48] sm:$0xff] }
  0xb3   :  { %v576_v58 = vadd.f32 %v544_v25, %v450_v23 }
  0xb5   :  { %v719_v63 = vpack.c.bf16 %v578_v59, %v576_v58 }
  0xc1   :  { %v476_v28 = vpop.f32.mrf.mxu0  ;;  %v490_v29 = vpop.f32.mrf.mxu1 }
  0xc2   :  { %v579_v53 = vadd.f32 %v554_v20, %v476_v28  ;;  %v581_v36 = vadd.f32 %v559_v27, %v490_v29 }
  0xc4   :  { %v720_v42 = vpack.c.bf16 %v581_v36, %v579_v53  ;;  %v7201_v53 = vld [vmem:[%s12939_s2 + $0x50] sm:$0xff] }
  0xc8   :  { %v504_v31 = vpop.f32.mrf.mxu2 }
  0xc9   :  { %v583_v33 = vadd.f32 %v564_v19, %v504_v31  ;;  %v518_v34 = vpop.f32.mrf.mxu3  ;;  %v478_v47 = vpop.f32.mrf.mxu0 }
  0xca   :  { %v585_v35 = vadd.f32 %v569_v26, %v518_v34  ;;  %v492_v48 = vpop.f32.mrf.mxu1  ;;  %v580_v55 = vadd.f32 %v554_v20, %v478_v47 }
  0xcb   :  { %v582_v56 = vadd.f32 %v559_v27, %v492_v48 }
  0xcc   :  { %v722_v37 = vpack.c.bf16 %v585_v35, %v583_v33  ;;  %v7221_v33 = vld [vmem:[%s12939_s2 + $0xf0] sm:$0xff] }
  0xcd   :  { %v721_v60 = vpack.c.bf16 %v582_v56, %v580_v55 }
  0xce   :  { %985 = vmatpush.bf16.msra.mxu0 %v722_v37  ;;  %7338 = vmatpush.bf16.msra.mxu3 %v722_v37 }
  0xd0   :  { %v506_v43 = vpop.f32.mrf.mxu2 }
  0xd1   :  { %v584_v45 = vadd.f32 %v564_v19, %v506_v43  ;;  %v520_v46 = vpop.f32.mrf.mxu3 }
  0xd2   :  { %v586_v49 = vadd.f32 %v569_v26, %v520_v46  ;;  %986 = vmatpush.bf16.msra.mxu0 %v720_v42  ;;  %7339 = vmatpush.bf16.msra.mxu3 %v720_v42  ;;  %v7222_v42 = vld [vmem:[%s12939_s2 + $0xf8] sm:$0xff] }
  0xd4   :  { %v723_v52 = vpack.c.bf16 %v586_v49, %v584_v45  ;;  %v7202_v45 = vld [vmem:[%s12939_s2 + $0x58] sm:$0xff] }
  0xd6   :  { %987 = vmatpush.bf16.msra.mxu0 %v718_v54  ;;  %7340 = vmatpush.bf16.msra.mxu3 %v718_v54 }
  0xd7   :  { %1154 = vmatpush.bf16.msra.mxu1 %v723_v52  ;;  %7342 = vmatpush.bf16.msra.mxu2 %v723_v52  ;;  %v7203_v52 = vld [vmem:[%s12939_s2 + $0x60] sm:$0xff] }
  0xda   :  { %988 = vmatpush.bf16.msra.mxu0 %v716_v57  ;;  %7341 = vmatpush.bf16.msra.mxu3 %v716_v57 }
  0xdb   :  { %1155 = vmatpush.bf16.msra.mxu1 %v721_v60  ;;  %7343 = vmatpush.bf16.msra.mxu2 %v721_v60 }
  0xdd   :  { %6284 = vmatmul.msk.bf16.vlgmr.msra.gmra.mxu0 %vm884_vm0, %v7191_v61  ;;  %6305 = vmatmul.msk.bf16.vlgmr.msra.gmra.mxu3 %vm884_vm0, %v7212_v62 }
  0xdf   :  { %1156 = vmatpush.bf16.msra.mxu1 %v719_v63  ;;  %7344 = vmatpush.bf16.msra.mxu2 %v719_v63 }
  0xe3   :  { %1157 = vmatpush.bf16.msra.mxu1 %v717_v2  ;;  %7345 = vmatpush.bf16.msra.mxu2 %v717_v2 }
  0xe6   :  { %6316 = vmatmul.msk.bf16.vlgmr.msra.gmra.mxu1 %vm884_vm0, %v7191_v61  ;;  %6337 = vmatmul.msk.bf16.vlgmr.msra.gmra.mxu2 %vm884_vm0, %v7212_v62  ;;  %v7204_v61 = vld [vmem:[%s12939_s2 + $0x68] sm:$0xff] }
  0xed   :  { %6285 = vmatmul.msk.bf16.gmra.mxu0 %vm884_vm0, %v7192_v3  ;;  %6306 = vmatmul.msk.bf16.gmra.mxu3 %vm884_vm0, %v7213_v5 }
  0xf6   :  { %6317 = vmatmul.msk.bf16.gmra.mxu1 %vm884_vm0, %v7192_v3  ;;  %6338 = vmatmul.msk.bf16.gmra.mxu2 %vm884_vm0, %v7213_v5 }
  0xfd   :  { %6286 = vmatmul.msk.bf16.gmra.mxu0 %vm884_vm0, %v7193_v7  ;;  %6307 = vmatmul.msk.bf16.gmra.mxu3 %vm884_vm0, %v7214_v8 }
  0xff   :  { %v8249_v1 = vpop.permute.xlu2 %1907 }
 0x100   :  { %13146 = vst [vmem:[#allocation2_spill] sm:$0xff] %v8249_v1 }
 0x106   :  { %6318 = vmatmul.msk.bf16.gmra.mxu1 %vm884_vm0, %v7193_v7  ;;  %6339 = vmatmul.msk.bf16.gmra.mxu2 %vm884_vm0, %v7214_v8  ;;  %v7205_v8 = vld [vmem:[%s12939_s2 + $0x70] sm:$0xff] }
 0x10d   :  { %6287 = vmatmul.msk.bf16.gmra.mxu0 %vm884_vm0, %v7194_v9  ;;  %6308 = vmatmul.msk.bf16.gmra.mxu3 %vm884_vm0, %v7215_v10 }
 0x116   :  { %6319 = vmatmul.msk.bf16.gmra.mxu1 %vm884_vm0, %v7194_v9  ;;  %6340 = vmatmul.msk.bf16.gmra.mxu2 %vm884_vm0, %v7215_v10 }
 0x11d   :  { %6288 = vmatmul.msk.bf16.gmra.mxu0 %vm884_vm0, %v7195_v11  ;;  %6309 = vmatmul.msk.bf16.gmra.mxu3 %vm884_vm0, %v7216_v12 }
 0x126   :  { %6320 = vmatmul.msk.bf16.gmra.mxu1 %vm884_vm0, %v7195_v11  ;;  %6341 = vmatmul.msk.bf16.gmra.mxu2 %vm884_vm0, %v7216_v12 }
 0x12d   :  { %6289 = vmatmul.msk.bf16.gmra.mxu0 %vm884_vm0, %v7196_v13  ;;  %6310 = vmatmul.msk.bf16.gmra.mxu3 %vm884_vm0, %v7217_v14 }
 0x136   :  { %6321 = vmatmul.msk.bf16.gmra.mxu1 %vm884_vm0, %v7196_v13  ;;  %6342 = vmatmul.msk.bf16.gmra.mxu2 %vm884_vm0, %v7217_v14  ;;  %v8264_v14 = vpop.permute.xlu1 %1915 }
 0x137   :  { %13147 = vst [vmem:[#allocation3_spill] sm:$0xff] %v8264_v14 }
 0x13d   :  { %6290 = vmatmul.msk.bf16.gmra.mxu0 %vm884_vm0, %v7197_v16  ;;  %6311 = vmatmul.msk.bf16.gmra.mxu3 %vm884_vm0, %v7218_v17 }
 0x146   :  { %6322 = vmatmul.msk.bf16.gmra.mxu1 %vm884_vm0, %v7197_v16  ;;  %6343 = vmatmul.msk.bf16.gmra.mxu2 %vm884_vm0, %v7218_v17 }
 0x14d   :  { %6291 = vmatmul.msk.bf16.gmra.mxu0 %vm884_vm0, %v7198_v4  ;;  %6312 = vmatmul.msk.bf16.gmra.mxu3 %vm884_vm0, %v7219_v6 }
 0x156   :  { %6323 = vmatmul.msk.bf16.gmra.mxu1 %vm884_vm0, %v7198_v4  ;;  %6344 = vmatmul.msk.bf16.gmra.mxu2 %vm884_vm0, %v7219_v6 }
 0x15a   :  { %v990_v32 = vpop.f32.mrf.mxu0 }
 0x15b   :  { %1319 = vrot.lane.b32.xlu2 %v990_v32, %s7579_s10  ;;  %v7206_v32 = vld [vmem:[%s12939_s2 + $0x78] sm:$0xff] }
 0x15d   :  { %6292 = vmatmul.msk.bf16.gmra.mxu0 %vm884_vm0, %v7199_v30  ;;  %6313 = vmatmul.msk.bf16.gmra.mxu3 %vm884_vm0, %v7220_v18 }
 0x160   :  { %v1095_v19 = vpop.f32.mrf.mxu3 }
 0x161   :  { %1647 = vrot.lane.b32.xlu1 %v1095_v19, %s7580_s13  ;;  %v8279_v19 = vpop.permute.xlu0 %1911 }
 0x162   :  { %v992_v20 = vpop.f32.mrf.mxu0  ;;  %13149 = vst [vmem:[#allocation5_spill] sm:$0xff] %v8279_v19 }
 0x163   :  { %v1159_v21 = vpop.f32.mrf.mxu1  ;;  %1321 = vrot.lane.b32.xlu0 %v992_v20, %s7579_s10 }
 0x166   :  { %6324 = vmatmul.msk.bf16.gmra.mxu1 %vm884_vm0, %v7199_v30  ;;  %6345 = vmatmul.msk.bf16.gmra.mxu2 %vm884_vm0, %v7220_v18  ;;  %v8274_v30 = vpop.permute.xlu1 %1903 }
 0x167   :  { %13148 = vst [vmem:[#allocation4_spill] sm:$0xff] %v8274_v30 }
 0x168   :  { %v1097_v22 = vpop.f32.mrf.mxu3 }
 0x169   :  { %1649 = vrot.lane.b32.xlu2 %v1097_v22, %s7580_s13  ;;  %1335 = vrot.lane.b32.xlu1 %v1159_v21, %s7579_s10  ;;  %v1264_v23 = vpop.f32.mrf.mxu2 }
 0x16a   :  { %v995_v25 = vpop.f32.mrf.mxu0 }
 0x16b   :  { %v1161_v26 = vpop.f32.mrf.mxu1  ;;  %1663 = vrot.lane.b32.xlu0 %v1264_v23, %s7580_s13 }
 0x16d   :  { %6293 = vmatmul.msk.bf16.gmra.mxu0 %vm884_vm0, %v7200_v24  ;;  %6314 = vmatmul.msk.bf16.gmra.mxu3 %vm884_vm0, %v7221_v33 }
 0x170   :  { %v1100_v27 = vpop.f32.mrf.mxu3 }
 0x171   :  { %1323 = vrot.lane.b32.xlu2 %v995_v25, %s7579_s10  ;;  %1651 = vrot.lane.b32.xlu1 %v1100_v27, %s7580_s13  ;;  %v1266_v28 = vpop.f32.mrf.mxu2 }
 0x172   :  { %v997_v29 = vpop.f32.mrf.mxu0 }
 0x173   :  { %v1164_v31 = vpop.f32.mrf.mxu1  ;;  %1325 = vrot.lane.b32.xlu0 %v997_v29, %s7579_s10 }
 0x176   :  { %6325 = vmatmul.msk.bf16.gmra.mxu1 %vm884_vm0, %v7200_v24  ;;  %6346 = vmatmul.msk.bf16.gmra.mxu2 %vm884_vm0, %v7221_v33 }
 0x178   :  { %v1102_v34 = vpop.f32.mrf.mxu3 }
 0x179   :  { %1665 = vrot.lane.b32.xlu1 %v1266_v28, %s7580_s13  ;;  %1337 = vrot.lane.b32.xlu2 %v1161_v26, %s7579_s10  ;;  %v1269_v35 = vpop.f32.mrf.mxu2 }
 0x17a   :  { %v1000_v36 = vpop.f32.mrf.mxu0 }
 0x17b   :  { %v1166_v37 = vpop.f32.mrf.mxu1  ;;  %1667 = vrot.lane.b32.xlu0 %v1269_v35, %s7580_s13 }
 0x17d   :  { %6294 = vmatmul.msk.bf16.gmra.mxu0 %vm884_vm0, %v7201_v53  ;;  %6315 = vmatmul.msk.bf16.gmra.mxu3 %vm884_vm0, %v7222_v42 }
 0x180   :  { %v1105_v38 = vpop.f32.mrf.mxu3 }
 0x181   :  { %1653 = vrot.lane.b32.xlu2 %v1102_v34, %s7580_s13  ;;  %1339 = vrot.lane.b32.xlu1 %v1164_v31, %s7579_s10  ;;  %v1271_v39 = vpop.f32.mrf.mxu2  ;;  %v7207_v31 = vld [vmem:[%s12939_s2 + $0x80] sm:$0xff] }
 0x182   :  { %v1002_v40 = vpop.f32.mrf.mxu0 }
 0x183   :  { %v1169_v41 = vpop.f32.mrf.mxu1 }
 0x184   :  { %1343 = vrot.lane.b32.xlu0 %v1169_v41, %s7579_s10 }
 0x186   :  { %6326 = vmatmul.msk.bf16.gmra.mxu1 %vm884_vm0, %v7201_v53  ;;  %6347 = vmatmul.msk.bf16.gmra.mxu2 %vm884_vm0, %v7222_v42 }
 0x188   :  { %v1107_v43 = vpop.f32.mrf.mxu3 }
 0x189   :  { %1327 = vrot.lane.b32.xlu1 %v1000_v36, %s7579_s10  ;;  %1341 = vrot.lane.b32.xlu2 %v1166_v37, %s7579_s10  ;;  %v1274_v44 = vpop.f32.mrf.mxu2 }
 0x18a   :  { %v1005_v46 = vpop.f32.mrf.mxu0 }
 0x18b   :  { %v1171_v47 = vpop.f32.mrf.mxu1 }
 0x18c   :  { %1671 = vrot.lane.b32.xlu0 %v1274_v44, %s7580_s13 }
 0x18d   :  { %6295 = vmatmul.msk.bf16.gmra.mxu0 %vm884_vm0, %v7202_v45 }
 0x190   :  { %v1110_v48 = vpop.f32.mrf.mxu3 }
 0x191   :  { %1655 = vrot.lane.b32.xlu1 %v1105_v38, %s7580_s13  ;;  %1329 = vrot.lane.b32.xlu2 %v1002_v40, %s7579_s10  ;;  %v1276_v51 = vpop.f32.mrf.mxu2 }
 0x192   :  { %v1007_v49 = vpop.f32.mrf.mxu0 }
 0x193   :  { %v1174_v50 = vpop.f32.mrf.mxu1 }
 0x194   :  { %1724 = vrot.lane.b32.xlu0 %v1110_v48, %s7581_s24 }
 0x196   :  { %6327 = vmatmul.msk.bf16.gmra.mxu1 %vm884_vm0, %v7202_v45 }
 0x198   :  { %v1112_v57 = vpop.f32.mrf.mxu3 }
 0x199   :  { %1669 = vrot.lane.b32.xlu1 %v1271_v39, %s7580_s13  ;;  %1657 = vrot.lane.b32.xlu2 %v1107_v43, %s7580_s13  ;;  %v1279_v56 = vpop.f32.mrf.mxu2  ;;  %v7208_v43 = vld [vmem:[%s12939_s2 + $0x88] sm:$0xff] }
 0x19a   :  { %v1010_v54 = vpop.f32.mrf.mxu0 }
 0x19b   :  { %v1176_v55 = vpop.f32.mrf.mxu1 }
 0x19c   :  { %1333 = vrot.lane.b32.xlu0 %v1007_v49, %s7579_s10 }
 0x19d   :  { %6296 = vmatmul.msk.bf16.gmra.mxu0 %vm884_vm0, %v7203_v52 }
 0x1a0   :  { %v1115_v0 = vpop.f32.mrf.mxu3 }
 0x1a1   :  { %1331 = vrot.lane.b32.xlu2 %v1005_v46, %s7579_s10  ;;  %1345 = vrot.lane.b32.xlu1 %v1171_v47, %s7579_s10  ;;  %v1281_v60 = vpop.f32.mrf.mxu2 }
 0x1a2   :  { %v1012_v58 = vpop.f32.mrf.mxu0 }
 0x1a3   :  { %v1179_v59 = vpop.f32.mrf.mxu1 }
 0x1a4   :  { %1400 = vrot.lane.b32.xlu0 %v1010_v54, %s7582_s27 }
 0x1a6   :  { %6328 = vmatmul.msk.bf16.gmra.mxu1 %vm884_vm0, %v7203_v52 }
 0x1a8   :  { %v1117_v7 = vpop.f32.mrf.mxu3 }
 0x1a9   :  { %1740 = vrot.lane.b32.xlu2 %v1279_v56, %s7581_s24  ;;  %1673 = vrot.lane.b32.xlu1 %v1276_v51, %s7580_s13  ;;  %v1284_v2 = vpop.f32.mrf.mxu2 }
 0x1aa   :  { %v1015_v62 = vpop.f32.mrf.mxu0 }
 0x1ab   :  { %v1181_v63 = vpop.f32.mrf.mxu1 }
 0x1ac   :  { %1742 = vrot.lane.b32.xlu0 %v1281_v60, %s7581_s24 }
 0x1ad   :  { %6297 = vmatmul.msk.bf16.gmra.mxu0 %vm884_vm0, %v7204_v61 }
 0x1b0   :  { %v1120_v13 = vpop.f32.mrf.mxu3 }
 0x1b1   :  { %1347 = vrot.lane.b32.xlu1 %v1174_v50, %s7579_s10  ;;  %1349 = vrot.lane.b32.xlu2 %v1176_v55, %s7579_s10  ;;  %v1286_v10 = vpop.f32.mrf.mxu2 }
 0x1b2   :  { %v1017_v3 = vpop.f32.mrf.mxu0 }
 0x1b3   :  { %v1184_v5 = vpop.f32.mrf.mxu1 }
 0x1b4   :  { %1744 = vrot.lane.b32.xlu0 %v1284_v2, %s7581_s24 }
 0x1b5   :  { %v8260_v11 = vpop.permute.xlu2 %1319 }
 0x1b6   :  { %6329 = vmatmul.msk.bf16.gmra.mxu1 %vm884_vm0, %v7204_v61 }
 0x1b8   :  { %v1122_v6 = vpop.f32.mrf.mxu3 }
 0x1b9   :  { %1726 = vrot.lane.b32.xlu1 %v1112_v57, %s7581_s24  ;;  %1416 = vrot.lane.b32.xlu2 %v1179_v59, %s7582_s27  ;;  %v1289_v4 = vpop.f32.mrf.mxu2 }
 0x1ba   :  { %v1020_v9 = vpop.f32.mrf.mxu0 }
 0x1bb   :  { %v1186_v12 = vpop.f32.mrf.mxu1 }
 0x1bc   :  { %1418 = vrot.lane.b32.xlu0 %v1181_v63, %s7582_s27 }
 0x1bd   :  { %6298 = vmatmul.msk.bf16.gmra.mxu0 %vm884_vm0, %v7205_v8 }
 0x1c0   :  { %v1125_v28 = vpop.f32.mrf.mxu3 }
 0x1c1   :  { %1728 = vrot.lane.b32.xlu1 %v1115_v0, %s7581_s24  ;;  %1730 = vrot.lane.b32.xlu2 %v1117_v7, %s7581_s24  ;;  %v1291_v22 = vpop.f32.mrf.mxu2 }
 0x1c2   :  { %v1022_v15 = vpop.f32.mrf.mxu0 }
 0x1c3   :  { %v1189_v16 = vpop.f32.mrf.mxu1  ;;  %v8268_v17 = vpop.permute.xlu2 %1649 }
 0x1c4   :  { %1406 = vrot.lane.b32.xlu0 %v1017_v3, %s7582_s27 }
 0x1c6   :  { %6330 = vmatmul.msk.bf16.gmra.mxu1 %vm884_vm0, %v7205_v8 }
 0x1c8   :  { %v1127_v38 = vpop.f32.mrf.mxu3 }
 0x1c9   :  { %1402 = vrot.lane.b32.xlu1 %v1012_v58, %s7582_s27  ;;  %1404 = vrot.lane.b32.xlu2 %v1015_v62, %s7582_s27  ;;  %v1294_v29 = vpop.f32.mrf.mxu2  ;;  %v7209_v58 = vld [vmem:[%s12939_s2 + $0x90] sm:$0xff] }
 0x1ca   :  { %v1025_v18 = vpop.f32.mrf.mxu0 }
 0x1cb   :  { %v1191_v20 = vpop.f32.mrf.mxu1  ;;  %v8281_v21 = vpop.permute.xlu2 %1323 }
 0x1cc   :  { %1734 = vrot.lane.b32.xlu0 %v1122_v6, %s7581_s24 }
 0x1cd   :  { %6299 = vmatmul.msk.bf16.gmra.mxu0 %vm884_vm0, %v7206_v32 }
 0x1d0   :  { %v1130_v48 = vpop.f32.mrf.mxu3 }
 0x1d1   :  { %1746 = vrot.lane.b32.xlu1 %v1286_v10, %s7581_s24  ;;  %1732 = vrot.lane.b32.xlu2 %v1120_v13, %s7581_s24  ;;  %v1296_v50 = vpop.f32.mrf.mxu2  ;;  %v7210_v13 = vld [vmem:[%s12939_s2 + $0x98] sm:$0xff] }
 0x1d2   :  { %v8287_v23 = vpop.f32.mrf.mxu0 }
 0x1d3   :  { %v1194_v24 = vpop.f32.mrf.mxu1  ;;  %v8289_v25 = vpop.permute.xlu1 %1647 }
 0x1d4   :  { %v8291_v26 = vpop.permute.xlu2 %1337  ;;  %1408 = vrot.lane.b32.xlu0 %v1020_v9, %s7582_s27 }
 0x1d5   :  { %v8294_v27 = vpop.permute.xlu0 %1321 }
 0x1d6   :  { %6331 = vmatmul.msk.bf16.gmra.mxu1 %vm884_vm0, %v7206_v32 }
 0x1d8   :  { %v1132_v57 = vpop.f32.mrf.mxu3 }
 0x1d9   :  { %1420 = vrot.lane.b32.xlu1 %v1184_v5, %s7582_s27  ;;  %1422 = vrot.lane.b32.xlu2 %v1186_v12, %s7582_s27  ;;  %v8356_v60 = vpop.f32.mrf.mxu2 }
 0x1da   :  { %v1030_v33 = vpop.f32.mrf.mxu0 }
 0x1db   :  { %v1196_v34 = vpop.f32.mrf.mxu1  ;;  %v8302_v35 = vpop.permute.xlu1 %1335 }
 0x1dc   :  { %v8304_v53 = vpop.permute.xlu2 %1653  ;;  %1752 = vrot.lane.b32.xlu0 %v1294_v29, %s7581_s24 }
 0x1dd   :  { %6300 = vmatmul.msk.bf16.gmra.mxu0 %vm884_vm0, %v7207_v31  ;;  %v8308_v36 = vpop.permute.xlu0 %1663 }
 0x1e0   :  { %v1135_v2 = vpop.f32.mrf.mxu3 }
 0x1e1   :  { %1748 = vrot.lane.b32.xlu1 %v1289_v4, %s7581_s24  ;;  %1750 = vrot.lane.b32.xlu2 %v1291_v22, %s7581_s24  ;;  %v8377_v9 = vpop.f32.mrf.mxu2 }
 0x1e2   :  { %v8312_v37 = vpop.f32.mrf.mxu0 }
 0x1e3   :  { %v1199_v39 = vpop.f32.mrf.mxu1  ;;  %v8314_v40 = vpop.permute.xlu1 %1651 }
 0x1e4   :  { %v8316_v41 = vpop.permute.xlu2 %1341  ;;  %1412 = vrot.lane.b32.xlu0 %v1025_v18, %s7582_s27 }
 0x1e5   :  { %v8319_v42 = vpop.permute.xlu0 %1325 }
 0x1e6   :  { %6332 = vmatmul.msk.bf16.gmra.mxu1 %vm884_vm0, %v7207_v31 }
 0x1e8   :  { %v1137_v12 = vpop.f32.mrf.mxu3 }
 0x1e9   :  { %1736 = vrot.lane.b32.xlu1 %v1125_v28, %s7581_s24  ;;  %1424 = vrot.lane.b32.xlu2 %v1189_v16, %s7582_s27  ;;  %v1304_v18 = vpop.f32.mrf.mxu2 }
 0x1ea   :  { %v1035_v44 = vpop.f32.mrf.mxu0 }
 0x1eb   :  { %v1201_v45 = vpop.f32.mrf.mxu1  ;;  %v8327_v46 = vpop.permute.xlu1 %1665 }
 0x1ec   :  { %v8329_v47 = vpop.permute.xlu2 %1329  ;;  %1426 = vrot.lane.b32.xlu0 %v1191_v20, %s7582_s27 }
 0x1ed   :  { %6301 = vmatmul.msk.bf16.gmra.mxu0 %vm884_vm0, %v7208_v43  ;;  %v8333_v49 = vpop.permute.xlu0 %1667 }
 0x1f0   :  { %v1140_v22 = vpop.f32.mrf.mxu3 }
 0x1f1   :  { %1410 = vrot.lane.b32.xlu1 %v1022_v15, %s7582_s27  ;;  %1738 = vrot.lane.b32.xlu2 %v1127_v38, %s7581_s24  ;;  %v1306_v31 = vpop.f32.mrf.mxu2 }
 0x1f2   :  { %v8337_v51 = vpop.f32.mrf.mxu0 }
 0x1f3   :  { %v8339_v52 = vpop.f32.mrf.mxu1  ;;  %v8341_v54 = vpop.permute.xlu1 %1339 }
 0x1f4   :  { %v8343_v55 = vpop.permute.xlu2 %1657  ;;  %1430 = vrot.lane.b32.xlu0 %v1196_v34, %s7582_s27 }
 0x1f6   :  { %v8346_v56 = vpop.permute.xlu0 %1343  ;;  %6333 = vmatmul.msk.bf16.gmra.mxu1 %vm884_vm0, %v7208_v43 }
 0x1f9   :  { %1754 = vrot.lane.b32.xlu1 %v1296_v50, %s7581_s24  ;;  %1428 = vrot.lane.b32.xlu2 %v1194_v24, %s7582_s27 }
 0x1fa   :  { %v8354_v59 = vpop.f32.mrf.mxu0 }
 0x1fb   :  { %v8358_v61 = vpop.f32.mrf.mxu1  ;;  %v8360_v62 = vpop.permute.xlu1 %1327 }
 0x1fc   :  { %v8362_v63 = vpop.permute.xlu2 %1331  ;;  %1481 = vrot.lane.b32.xlu0 %v1030_v33, %s7583_s16  ;;  %v7211_v33 = vld [vmem:[%s12939_s2 + $0xa0] sm:$0xff] }
 0x1fd   :  { %6302 = vmatmul.msk.bf16.gmra.mxu0 %vm884_vm0, %v7209_v58 }
 0x1fe   :  { %v8366_v0 = vpop.permute.xlu0 %1671 }
 0x201   :  { %1805 = vrot.lane.b32.xlu1 %v1130_v48, %s7584_s17  ;;  %1807 = vrot.lane.b32.xlu2 %v1132_v57, %s7584_s17  ;;  %v1309_v48 = vpop.f32.mrf.mxu2 }
 0x202   :  { %v1042_v3 = vpop.f32.mrf.mxu0 }
 0x203   :  { %v8370_v5 = vpop.f32.mrf.mxu1  ;;  %v8372_v7 = vpop.permute.xlu1 %1655 }
 0x204   :  { %v8374_v8 = vpop.permute.xlu2 %1740  ;;  %1809 = vrot.lane.b32.xlu0 %v1135_v2, %s7584_s17 }
 0x206   :  { %v8379_v10 = vpop.permute.xlu0 %1724  ;;  %6334 = vmatmul.msk.bf16.gmra.mxu1 %vm884_vm0, %v7209_v58 }
 0x209   :  { %1414 = vrot.lane.b32.xlu1 %v8287_v23, %s7582_s27  ;;  %1497 = vrot.lane.b32.xlu2 %v1199_v39, %s7583_s16  ;;  %v1142_v39 = vpop.f32.mrf.mxu3 }
 0x20a   :  { %v8388_v15 = vpop.f32.mrf.mxu0 }
 0x20b   :  { %v8390_v16 = vpop.f32.mrf.mxu1  ;;  %v8392_v4 = vpop.permute.xlu1 %1669 }
 0x20c   :  { %v8394_v6 = vpop.permute.xlu2 %1349  ;;  %1485 = vrot.lane.b32.xlu0 %v1035_v44, %s7583_s16 }
 0x20d   :  { %6303 = vmatmul.msk.bf16.gmra.mxu0 %vm884_vm0, %v7210_v13 }
 0x20e   :  { %v8398_v32 = vpop.permute.xlu0 %1333 }
 0x211   :  { %1483 = vrot.lane.b32.xlu1 %v8312_v37, %s7583_s16  ;;  %1825 = vrot.lane.b32.xlu2 %v1304_v18, %s7584_s17  ;;  %v1145_v2 = vpop.f32.mrf.mxu3  ;;  %v1311_v18 = vpop.f32.mrf.mxu2 }
 0x212   :  { %v8403_v20 = vpop.f32.mrf.mxu0 }
 0x213   :  { %v1214_v23 = vpop.f32.mrf.mxu1  ;;  %v8405_v24 = vpop.permute.xlu1 %1345 }
 0x214   :  { %v8407_v28 = vpop.permute.xlu2 %1416  ;;  %1499 = vrot.lane.b32.xlu0 %v1201_v45, %s7583_s16 }
 0x216   :  { %v8410_v29 = vpop.permute.xlu0 %1400  ;;  %6335 = vmatmul.msk.bf16.gmra.mxu1 %vm884_vm0, %v7210_v13 }
 0x219   :  { %1811 = vrot.lane.b32.xlu1 %v1137_v12, %s7584_s17  ;;  %1813 = vrot.lane.b32.xlu2 %v1140_v22, %s7584_s17 }
 0x21a   :  { %v8418_v34 = vpop.f32.mrf.mxu0 }
 0x21b   :  { %v1216_v37 = vpop.f32.mrf.mxu1  ;;  %v8424_v43 = vpop.permute.xlu1 %1673 }
 0x21c   :  { %v8420_v38 = vpop.permute.xlu2 %1730  ;;  %1827 = vrot.lane.b32.xlu0 %v1306_v31, %s7584_s17 }
 0x21d   :  { %13150 = vst [vmem:[#allocation6_spill] sm:$0xff] %v8420_v38  ;;  %6304 = vmatmul.msk.bf16.gmra.mxu0 %vm884_vm0, %v7211_v33 }
 0x21e   :  { %v8426_v44 = vpop.permute.xlu0 %1742 }
 0x221   :  { %1487 = vrot.lane.b32.xlu1 %v8337_v51, %s7583_s16  ;;  %1501 = vrot.lane.b32.xlu2 %v8339_v52, %s7583_s16 }
 0x222   :  { %v8432_v45 = vpop.f32.mrf.mxu0 }
 0x223   :  { %v8434_v50 = vpop.f32.mrf.mxu1  ;;  %v8442_v12 = vpop.permute.xlu1 %1347 }
 0x224   :  { %v8436_v57 = vpop.permute.xlu2 %1404  ;;  %1815 = vrot.lane.b32.xlu0 %v1142_v39, %s7584_s17 }
 0x225   :  { %13151 = vst [vmem:[#allocation7_spill] sm:$0xff] %v8436_v57 }
 0x226   :  { %v8439_v58 = vpop.permute.xlu0 %1744  ;;  %6336 = vmatmul.msk.bf16.gmra.mxu1 %vm884_vm0, %v7211_v33 }
 0x229   :  { %1829 = vrot.lane.b32.xlu1 %v1309_v48, %s7584_s17  ;;  %1817 = vrot.lane.b32.xlu2 %v1145_v2, %s7584_s17 }
 0x22a   :  { %v8446_v51 = vpop.f32.mrf.mxu0 }
 0x22b   :  { %v8448_v52 = vpop.f32.mrf.mxu1  ;;  %v8458_v31 = vpop.permute.xlu1 %1726 }
 0x22c   :  { %v8450_v13 = vpop.permute.xlu2 %1732  ;;  %1489 = vrot.lane.b32.xlu0 %v8354_v59, %s7583_s16  ;;  %v1314_v59 = vpop.f32.mrf.mxu2 }
 0x22d   :  { %13152 = vst [vmem:[#allocation8_spill] sm:$0xff] %v8450_v13 }
 0x22e   :  { %v8454_v22 = vpop.permute.xlu0 %1418 }
 0x231   :  { %1491 = vrot.lane.b32.xlu1 %v1042_v3, %s7583_s16  ;;  %1831 = vrot.lane.b32.xlu2 %v1311_v18, %s7584_s17  ;;  %v1147_v3 = vpop.f32.mrf.mxu3 }
 0x232   :  { %v8460_v33 = vpop.f32.mrf.mxu0 }
 0x233   :  { %v8462_v39 = vpop.f32.mrf.mxu1  ;;  %v8477_v19 = vpop.permute.xlu1 %1728 }
 0x234   :  { %1503 = vrot.lane.b32.xlu0 %v8358_v61, %s7583_s16  ;;  %v8466_v48 = vpop.permute.xlu2 %1422  ;;  %v1316_v30 = vpop.f32.mrf.mxu2 }
 0x236   :  { %v8468_v2 = vpop.permute.xlu0 %1406 }
 0x239   :  { %1833 = vrot.lane.b32.xlu1 %v1314_v59, %s7584_s17  ;;  %1505 = vrot.lane.b32.xlu2 %v8370_v5, %s7583_s16 }
 0x23a   :  { %v8473_v18 = vpop.f32.mrf.mxu0 }
 0x23b   :  { %13153 = vst [vmem:[#allocation9_spill] sm:$0xff] %v8473_v18  ;;  %v8475_v14 = vpop.f32.mrf.mxu1  ;;  %v8493_v13 = vpop.permute.xlu1 %1402 }
 0x23c   :  { %1819 = vrot.lane.b32.xlu0 %v1147_v3, %s7584_s17  ;;  %v8482_v1 = vpop.permute.xlu2 %1750 }
 0x23d   :  { %13155 = vst [vmem:[#allocation11_spill] sm:$0xff] %v8482_v1 }
 0x23e   :  { %v8480_v61 = vpop.permute.xlu0 %1734 }
 0x23f   :  { %13154 = vst [vmem:[#allocation10_spill] sm:$0xff] %v8480_v61 }
 0x241   :  { %1493 = vrot.lane.b32.xlu2 %v8388_v15, %s7583_s16  ;;  %1509 = vrot.lane.b32.xlu1 %v1214_v23, %s7583_s16 }
 0x242   :  { %v8487_v59 = vpop.f32.mrf.mxu0 }
 0x243   :  { %13156 = vst [vmem:[#allocation12_spill] sm:$0xff] %v8487_v59  ;;  %v8489_v5 = vpop.f32.mrf.mxu1 }
 0x244   :  { %13157 = vst [vmem:[#allocation13_spill] sm:$0xff] %v8489_v5  ;;  %1507 = vrot.lane.b32.xlu0 %v8390_v16, %s7583_s16  ;;  %v8497_v57 = vpop.permute.xlu2 %1424  ;;  %v8508_v5 = vpop.permute.xlu1 %1746 }
 0x245   :  { %13161 = vst [vmem:[#allocation17_spill] sm:$0xff] %v8508_v5 }
 0x246   :  { %v8495_v3 = vpop.permute.xlu0 %1408 }
 0x249   :  { %1835 = vrot.lane.b32.xlu2 %v1316_v30, %s7584_s17 }
 0x24a   :  { %v8500_v38 = vpop.f32.mrf.mxu0 }
 0x24b   :  { %13158 = vst [vmem:[#allocation14_spill] sm:$0xff] %v8500_v38  ;;  %v8502_v15 = vpop.f32.mrf.mxu1 }
 0x24c   :  { %13159 = vst [vmem:[#allocation15_spill] sm:$0xff] %v8502_v15  ;;  %1495 = vrot.lane.b32.xlu0 %v8403_v20, %s7583_s16  ;;  %v8513_v59 = vpop.permute.xlu2 %1738  ;;  %v8519_v38 = vpop.permute.xlu1 %1420 }
 0x24d   :  { %13163 = vst [vmem:[#allocation19_spill] sm:$0xff] %v8513_v59 }
 0x24e   :  { %v8506_v23 = vpop.permute.xlu0 %1752  ;;  %13166 = vst [vmem:[#allocation22_spill] sm:$0xff] %v8519_v38 }
 0x24f   :  { %13160 = vst [vmem:[#allocation16_spill] sm:$0xff] %v8506_v23 }
 0x251   :  { %1511 = vrot.lane.b32.xlu2 %v1216_v37, %s7583_s16 }
 0x252   :  { %v8511_v16 = vpop.f32.mrf.mxu0 }
 0x253   :  { %13162 = vst [vmem:[#allocation18_spill] sm:$0xff] %v8511_v16  ;;  %v8515_v18 = vpop.f32.mrf.mxu1 }
 0x254   :  { %13164 = vst [vmem:[#allocation20_spill] sm:$0xff] %v8515_v18  ;;  %v8524_v20 = vpop.permute.xlu2 %1428  ;;  %v8529_v59 = vpop.permute.xlu1 %1748 }
 0x255   :  { %13168 = vst [vmem:[#allocation24_spill] sm:$0xff] %v8524_v20 }
 0x256   :  { %v8517_v30 = vpop.permute.xlu0 %1412  ;;  %13170 = vst [vmem:[#allocation26_spill] sm:$0xff] %v8529_v59 }
 0x257   :  { %13165 = vst [vmem:[#allocation21_spill] sm:$0xff] %v8517_v30 }
 0x25a   :  { %v1070_v15 = vpop.f32.mrf.mxu0 }
 0x25b   :  { %v8521_v61 = vpop.f32.mrf.mxu1  ;;  %1562 = vrot.lane.b32.xlu2 %v1070_v15, %s7585_s22 }
 0x25c   :  { %13167 = vst [vmem:[#allocation23_spill] sm:$0xff] %v8521_v61  ;;  %v8532_v18 = vpop.permute.xlu2 %1807  ;;  %v8538_v15 = vpop.permute.xlu1 %1736 }
 0x25d   :  { %13171 = vst [vmem:[#allocation27_spill] sm:$0xff] %v8532_v18 }
 0x25e   :  { %v8526_v23 = vpop.permute.xlu0 %1426  ;;  %13173 = vst [vmem:[#allocation29_spill] sm:$0xff] %v8538_v15 }
 0x25f   :  { %13169 = vst [vmem:[#allocation25_spill] sm:$0xff] %v8526_v23 }
 0x262   :  { %v1072_v37 = vpop.f32.mrf.mxu0 }
 0x263   :  { %v1239_v16 = vpop.f32.mrf.mxu1  ;;  %1564 = vrot.lane.b32.xlu1 %v1072_v37, %s7585_s22 }
 0x264   :  { %1578 = vrot.lane.b32.xlu2 %v1239_v16, %s7585_s22  ;;  %v8540_v23 = vpop.permute.xlu2 %1497  ;;  %v8546_v16 = vpop.permute.xlu1 %1410 }
 0x265   :  { %13174 = vst [vmem:[#allocation30_spill] sm:$0xff] %v8540_v23 }
 0x266   :  { %v8534_v30 = vpop.permute.xlu0 %1430  ;;  %13176 = vst [vmem:[#allocation32_spill] sm:$0xff] %v8546_v16 }
 0x267   :  { %13172 = vst [vmem:[#allocation28_spill] sm:$0xff] %v8534_v30 }
 0x26a   :  { %v1075_v61 = vpop.f32.mrf.mxu0 }
 0x26b   :  { %v1241_v38 = vpop.f32.mrf.mxu1  ;;  %1566 = vrot.lane.b32.xlu1 %v1075_v61, %s7585_s22 }
 0x26c   :  { %1580 = vrot.lane.b32.xlu0 %v1241_v38, %s7585_s22  ;;  %v8548_v30 = vpop.permute.xlu2 %1825  ;;  %v8554_v38 = vpop.permute.xlu1 %1754 }
 0x26d   :  { %13177 = vst [vmem:[#allocation33_spill] sm:$0xff] %v8548_v30 }
 0x26e   :  { %v8542_v20 = vpop.permute.xlu0 %1481  ;;  %13179 = vst [vmem:[#allocation35_spill] sm:$0xff] %v8554_v38 }
 0x26f   :  { %13175 = vst [vmem:[#allocation31_spill] sm:$0xff] %v8542_v20 }
 0x272   :  { %v1077_v37 = vpop.f32.mrf.mxu0 }
 0x273   :  { %v1244_v59 = vpop.f32.mrf.mxu1  ;;  %1568 = vrot.lane.b32.xlu2 %v1077_v37, %s7585_s22 }
 0x274   :  { %1582 = vrot.lane.b32.xlu0 %v1244_v59, %s7585_s22  ;;  %v8558_v59 = vpop.permute.xlu2 %1813  ;;  %v8562_v16 = vpop.permute.xlu1 %1805 }
 0x275   :  { %13180 = vst [vmem:[#allocation36_spill] sm:$0xff] %v8558_v59 }
 0x276   :  { %v8550_v5 = vpop.permute.xlu0 %1809  ;;  %13182 = vst [vmem:[#allocation38_spill] sm:$0xff] %v8562_v16 }
 0x277   :  { %13178 = vst [vmem:[#allocation34_spill] sm:$0xff] %v8550_v5 }
 0x27a   :  { %v1080_v18 = vpop.f32.mrf.mxu0 }
 0x27b   :  { %v1246_v61 = vpop.f32.mrf.mxu1 }
 0x27c   :  { %1570 = vrot.lane.b32.xlu0 %v1080_v18, %s7585_s22  ;;  %1584 = vrot.lane.b32.xlu1 %v1246_v61, %s7585_s22  ;;  %v8566_v18 = vpop.permute.xlu2 %1501 }
 0x27d   :  { %13183 = vst [vmem:[#allocation39_spill] sm:$0xff] %v8566_v18 }
 0x27e   :  { %v8560_v37 = vpop.permute.xlu0 %1485 }
 0x27f   :  { %13181 = vst [vmem:[#allocation37_spill] sm:$0xff] %v8560_v37 }
 0x282   :  { %v1082_v20 = vpop.f32.mrf.mxu0 }
 0x283   :  { %v1249_v23 = vpop.f32.mrf.mxu1 }
 0x284   :  { %1572 = vrot.lane.b32.xlu1 %v1082_v20, %s7585_s22  ;;  %1586 = vrot.lane.b32.xlu2 %v1249_v23, %s7585_s22  ;;  %v8572_v23 = vpop.permute.xlu1 %1414  ;;  %v8574_v59 = vpop.permute.xlu2 %1817 }
 0x285   :  { %13185 = vst [vmem:[#allocation41_spill] sm:$0xff] %v8572_v23 }
 0x286   :  { %v8568_v61 = vpop.permute.xlu0 %1499  ;;  %13186 = vst [vmem:[#allocation42_spill] sm:$0xff] %v8574_v59 }
 0x287   :  { %13184 = vst [vmem:[#allocation40_spill] sm:$0xff] %v8568_v61 }
 0x28a   :  { %v1085_v30 = vpop.f32.mrf.mxu0 }
 0x28b   :  { %v1251_v15 = vpop.f32.mrf.mxu1 }
 0x28c   :  { %1588 = vrot.lane.b32.xlu0 %v1251_v15, %s7585_s22  ;;  %1574 = vrot.lane.b32.xlu1 %v1085_v30, %s7585_s22  ;;  %v8582_v30 = vpop.permute.xlu1 %1483 }
 0x28d   :  { %13188 = vst [vmem:[#allocation44_spill] sm:$0xff] %v8582_v30 }
 0x28e   :  { %v8576_v37 = vpop.permute.xlu0 %1827 }
 0x28f   :  { %13187 = vst [vmem:[#allocation43_spill] sm:$0xff] %v8576_v37 }
 0x292   :  { %v1087_v5 = vpop.f32.mrf.mxu0 }
 0x293   :  { %v1254_v20 = vpop.f32.mrf.mxu1  ;;  %1576 = vrot.lane.b32.xlu2 %v1087_v5, %s7585_s22 }
 0x294   :  { %1590 = vrot.lane.b32.xlu0 %v1254_v20, %s7585_s22  ;;  %v8584_v20 = vpop.permute.xlu2 %1831  ;;  %v8590_v59 = vpop.permute.xlu1 %1811 }
 0x295   :  { %13189 = vst [vmem:[#allocation45_spill] sm:$0xff] %v8584_v20 }
 0x296   :  { %v8586_v18 = vpop.permute.xlu0 %1815  ;;  %13191 = vst [vmem:[#allocation47_spill] sm:$0xff] %v8590_v59  ;;  %v7556_v59 = vld [vmem:[%s12938_s5] sm:$0xff] }
 0x297   :  { %13190 = vst [vmem:[#allocation46_spill] sm:$0xff] %v8586_v18 }
 0x29a   :  { %v1090_v16 = vpop.f32.mrf.mxu0 }
 0x29b   :  { %v1256_v15 = vpop.f32.mrf.mxu1  ;;  %1643 = vrot.lane.b32.xlu2 %v1090_v16, %s7580_s13  ;;  %v587_v16 = vlaneseq }
 0x29c   :  { %1821 = vrot.lane.b32.xlu0 %v8356_v60, %s7584_s17  ;;  %1592 = vrot.lane.b32.xlu1 %v1256_v15, %s7585_s22  ;;  %v7555_v60 = vld [vmem:[%s12938_s5 + $0x18] sm:$0xff]  ;;  %v8598_v15 = vpop.permute.xlu2 %1505  ;;  %v8605_v20 = vpop.permute.xlu1 %1487 }
 0x29d   :  { %13192 = vst [vmem:[#allocation48_spill] sm:$0xff] %v8598_v15 }
 0x29e   :  { %v8600_v18 = vpop.permute.xlu0 %1489  ;;  %13194 = vst [vmem:[#allocation50_spill] sm:$0xff] %v8605_v20 }
 0x29f   :  { %13193 = vst [vmem:[#allocation49_spill] sm:$0xff] %v8600_v18 }
 0x2a2   :  { %v1092_v5 = vpop.f32.mrf.mxu0 }
 0x2a3   :  { %v1259_v61 = vpop.f32.mrf.mxu1 }
 0x2a4   :  { %1645 = vrot.lane.b32.xlu0 %v1092_v5, %s7580_s13  ;;  %1659 = vrot.lane.b32.xlu1 %v1259_v61, %s7580_s13  ;;  %v8602_v5 = vand.u32 127, %v587_v16  ;;  %v8641_v30 = vpop.permute.xlu1 %1829 }
 0x2a5   :  { %13199 = vst [vmem:[#allocation55_spill] sm:$0xff] %v8641_v30 }
 0x2a6   :  { %v589_v61 = vadd.s32 128, %v8602_v5  ;;  %v8617_v16 = vpop.permute.xlu0 %1503  ;;  %vm1351_vm1 = vcmp.lt.s32.totalorder %v8602_v5, 3  ;;  %vm592_vm2 = vcmp.ge.s32.totalorder %v8602_v5, 3  ;;  %vm628_vm4 = vcmp.lt.s32.totalorder %v8602_v5, 126 }
 0x2a7   :  { %13196 = vst [vmem:[#allocation52_spill] sm:$0xff] %v8617_v16  ;;  %v1352_v18 = vsel %vm1351_vm1, %v8260_v11, %v8302_v35  ;;  %v1686_v23 = vsel %vm628_vm4, %v8308_v36, %v8289_v25  ;;  %v1363_v38 = vsel %vm1351_vm1, %v8316_v41, %v8319_v42  ;;  %vm636_vm6 = vcmp.lt.s32.totalorder %v8602_v5, 125 }
 0x2a8   :  { %vm602_vm8 = vcmp.ge.s32.totalorder %v8602_v5, 2  ;;  %vm1432_vm10 = vcmp.lt.s32.totalorder %v8602_v5, 2  ;;  %vm610_vm11 = vcmp.ge.s32.totalorder %v8602_v5, 1  ;;  %vm1513_vm13 = vcmp.lt.s32.totalorder %v8602_v5, 1 }
 0x2a9   :  { %vm644_vm14 = vcmp.lt.s32.totalorder %v8602_v5, 124 }
 0x2ab   :  { %v1261_v37 = vpop.f32.mrf.mxu1 }
 0x2ac   :  { %1899 = vperm.xlu0 %7392, %v7555_v60   ;;  %1823 = vrot.lane.b32.xlu1 %v8377_v9, %s7584_s17  ;;  %v7557_v9 = vld [vmem:[%s12938_s5 + $0x10] sm:$0xff]  ;;  %v8615_v60 = vpop.permute.xlu2 %1493 }
 0x2ad   :  { %1661 = vrot.lane.b32.xlu2 %v1261_v37, %s7580_s13  ;;  %v8613_v37 = vand.u32 127, %v589_v61  ;;  %13195 = vst [vmem:[#allocation51_spill] sm:$0xff] %v8615_v60  ;;  %v1353_v61 = vsel %vm1351_vm1, %v8294_v27, %v8291_v26  ;;  %v12984_v60 = vmov 0.0  }
 0x2ae   :  { %v8636_v20 = vsel %vm592_vm2, 1.0, %v12984_v60  ;;  %vm620_vm2 = vcmp.lt.s32.totalorder %v8602_v5, 127 }
 0x2af   :  { %vm593_vm3 = vcmp.ge.s32.totalorder %v8613_v37, 3  ;;  %vm629_vm5 = vcmp.lt.s32.totalorder %v8613_v37, 126  ;;  %13197 = vst [vmem:[#allocation53_spill] sm:$0xff] %v8636_v20  ;;  %vm637_vm7 = vcmp.lt.s32.totalorder %v8613_v37, 125  ;;  %vm603_vm9 = vcmp.ge.s32.totalorder %v8613_v37, 2 }
 0x2b0   :  { %v8639_v16 = vsel %vm593_vm3, 1.0, %v12984_v60  ;;  %v8649_v15 = vsel %vm629_vm5, 1.0, %v12984_v60  ;;  %vm611_vm12 = vcmp.ge.s32.totalorder %v8613_v37, 1  ;;  %vm645_vm15 = vcmp.lt.s32.totalorder %v8613_v37, 124 }
 0x2b1   :  { %13198 = vst [vmem:[#allocation54_spill] sm:$0xff] %v8639_v16  ;;  %v8709_v1 = vmul.f32 %v8649_v15, %v1686_v23  ;;  %vm621_vm3 = vcmp.lt.s32.totalorder %v8613_v37, 127 }
 0x2b2   :  { %13201 = vst [vmem:[#allocation57_spill] sm:$0xff] %v8649_v15 }
 0x2b3   :  { %13205 = vst [vmem:[#allocation61_spill] sm:$0xff] %v8709_v1 }
 0x2b4   :  { %1887 = vperm.xlu1 %7393, %v7556_v59   ;;  %v7558_v59 = vld [vmem:[%s12938_s5 + $0x8] sm:$0xff] }
 0x2b5   :  { %1895 = vperm.xlu2 %7394, %v7557_v9   ;;  %v1361_v9 = vsel %vm1351_vm1, %v8291_v26, %v8294_v27  ;;  %v1360_v26 = vsel %vm1351_vm1, %v8302_v35, %v8260_v11  ;;  %v1678_v27 = vsel %vm628_vm4, %v8289_v25, %v8308_v36  ;;  %v8681_v11 = vpop.permute.xlu0 %1819  ;;  %v1355_v35 = vsel %vm1351_vm1, %v8319_v42, %v8316_v41 }
 0x2b6   :  { %v8660_v30 = vmul.f32 %v8636_v20, %v1361_v9  ;;  %v8679_v9 = vpop.permute.xlu2 %1835  ;;  %13203 = vst [vmem:[#allocation59_spill] sm:$0xff] %v8681_v11  ;;  %v1679_v25 = vsel %vm628_vm4, %v8268_v17, %v8327_v46  ;;  %v1687_v36 = vsel %vm628_vm4, %v8327_v46, %v8268_v17  ;;  %v1680_v41 = vsel %vm628_vm4, %v8314_v40, %v8333_v49 }
 0x2b7   :  { %13202 = vst [vmem:[#allocation58_spill] sm:$0xff] %v8679_v9  ;;  %v1688_v42 = vsel %vm628_vm4, %v8333_v49, %v8314_v40  ;;  %v1369_v11 = vmul.f32 %v8639_v16, %v1352_v18  ;;  %v13206_v17 = vmov 0.0   ;;  %v8726_v40 = vmul.f32 %v8649_v15, %v1687_v36 }
 0x2b8   :  { %v8714_v46 = vsel %vm636_vm6, 1.0, %v13206_v17  ;;  %v1362_v49 = vsel %vm1351_vm1, %v8341_v54, %v8281_v21  ;;  %v8733_v18 = vmul.f32 %v8639_v16, %v1355_v35  ;;  %v1682_v36 = vsel %vm628_vm4, %v8372_v7, %v8366_v0 }
 0x2b9   :  { %13207 = vst [vmem:[#allocation62_spill] sm:$0xff] %v8714_v46  ;;  %v1364_v35 = vsel %vm1351_vm1, %v8346_v56, %v8360_v62 }
 0x2ba   :  { %13210 = vst [vmem:[#allocation65_spill] sm:$0xff] %v8726_v40  ;;  %v1372_v40 = vmul.f32 %v8636_v20, %v1362_v49  ;;  %v8787_v49 = vsel %vm603_vm9, 1.0, %v13206_v17  ;;  %v8790_v1 = vmul.f32 %v8636_v20, %v1364_v35 }
 0x2bb   :  { %13214 = vst [vmem:[#allocation69_spill] sm:$0xff] %v8787_v49 }
 0x2bd   :  { %1891 = vperm.xlu2 %7394, %v7558_v59   ;;  %v8646_v59 = vsel %vm628_vm4, 1.0, %v12984_v60  ;;  %v8667_v60 = vmul.f32 %v8639_v16, %v1353_v61  ;;  %v1368_v61 = vmul.f32 %v8636_v20, %v1360_v26  ;;  %v8717_v26 = vsel %vm637_vm7, 1.0, %v13206_v17 }
 0x2be   :  { %13200 = vst [vmem:[#allocation56_spill] sm:$0xff] %v8646_v59  ;;  %v8697_v9 = vmul.f32 %v8646_v59, %v1678_v27  ;;  %v8720_v27 = vmul.f32 %v8636_v20, %v1363_v38  ;;  %v8736_v23 = vmul.f32 %v8646_v59, %v1680_v41  ;;  %v8739_v38 = vmul.f32 %v8649_v15, %v1688_v42  ;;  %v8759_v42 = vpop.permute.xlu1 %1491  ;;  %v8809_v35 = vpop.permute.xlu2 %1511 }
 0x2bf   :  { %13208 = vst [vmem:[#allocation63_spill] sm:$0xff] %v8717_v26  ;;  %v1356_v41 = vsel %vm1351_vm1, %v8360_v62, %v8346_v56  ;;  %v1765_v56 = vsel %vm636_vm6, %v8374_v8, %v8379_v10  ;;  %v1681_v62 = vsel %vm628_vm4, %v8304_v53, %v8392_v4 }
 0x2c0   :  { %13204 = vst [vmem:[#allocation60_spill] sm:$0xff] %v8697_v9  ;;  %v8723_v9 = vmul.f32 %v8646_v59, %v1679_v25  ;;  %v1354_v25 = vsel %vm1351_vm1, %v8281_v21, %v8341_v54  ;;  %v1690_v21 = vsel %vm628_vm4, %v8366_v0, %v8372_v7  ;;  %v1757_v54 = vsel %vm636_vm6, %v8379_v10, %v8374_v8 }
 0x2c1   :  { %13211 = vst [vmem:[#allocation66_spill] sm:$0xff] %v8739_v38  ;;  %v8780_v0 = vsel %vm602_vm8, 1.0, %v13206_v17  ;;  %v1373_v7 = vmul.f32 %v8639_v16, %v1354_v25  ;;  %v8793_v8 = vmul.f32 %v8639_v16, %v1356_v41  ;;  %v8796_v10 = vmul.f32 %v8649_v15, %v1690_v21  ;;  %v8811_v41 = vpop.permute.xlu0 %1507 }
 0x2c2   :  { %13209 = vst [vmem:[#allocation64_spill] sm:$0xff] %v8723_v9  ;;  %v8784_v9 = vmul.f32 %v8646_v59, %v1682_v36  ;;  %v8799_v38 = vmul.f32 %v8714_v46, %v1757_v54  ;;  %v1689_v25 = vsel %vm628_vm4, %v8392_v4, %v8304_v53  ;;  %v1367_v36 = vsel %vm1351_vm1, %v8394_v6, %v8398_v32 }
 0x2c3   :  { %13212 = vst [vmem:[#allocation67_spill] sm:$0xff] %v8780_v0  ;;  %v8814_v21 = vmul.f32 %v8717_v26, %v1765_v56  ;;  %v8817_v54 = vmul.f32 %v8646_v59, %v1681_v62  ;;  %v1359_v53 = vsel %vm1351_vm1, %v8398_v32, %v8394_v6  ;;  %v1441_v4 = vsel %vm1432_vm10, %v8407_v28, %v8410_v29 }
 0x2c4   :  { %13213 = vst [vmem:[#allocation68_spill] sm:$0xff] %v8784_v9  ;;  %v1365_v56 = vsel %vm1351_vm1, %v8405_v24, %v8329_v47  ;;  %v1433_v6 = vsel %vm1432_vm10, %v8410_v29, %v8407_v28  ;;  %v1384_v32 = vadd.f32 %v1368_v61, %v8418_v34  ;;  %v8841_v62 = vmul.f32 %v8649_v15, %v1689_v25 }
 0x2c5   :  { %13215 = vst [vmem:[#allocation70_spill] sm:$0xff] %v8796_v10  ;;  %v1449_v28 = vmul.f32 %v8780_v0, %v1441_v4  ;;  %v1385_v29 = vadd.f32 %v1369_v11, %v8434_v50  ;;  %v1366_v34 = vsel %vm1351_vm1, %v8442_v12, %v8362_v63  ;;  %v1358_v61 = vsel %vm1351_vm1, %v8362_v63, %v8442_v12 }
 0x2c6   :  { %13216 = vst [vmem:[#allocation71_spill] sm:$0xff] %v8799_v38  ;;  %v1357_v38 = vsel %vm1351_vm1, %v8329_v47, %v8405_v24  ;;  %v1691_v47 = vsel %vm628_vm4, %v8424_v43, %v8343_v55  ;;  %v8852_v24 = vmul.f32 %v8636_v20, %v1367_v36  ;;  %v1450_v25 = vmul.f32 %v8787_v49, %v1433_v6  ;;  %v8884_v12 = vpop.permute.xlu1 %1833 }
 0x2c7   :  { %13217 = vst [vmem:[#allocation72_spill] sm:$0xff] %v8814_v21  ;;  %v1683_v21 = vsel %vm628_vm4, %v8343_v55, %v8424_v43  ;;  %v1378_v55 = vmul.f32 %v8636_v20, %v1365_v56  ;;  %v8867_v43 = vmul.f32 %v8639_v16, %v1357_v38  ;;  %v8870_v36 = vmul.f32 %v8639_v16, %v1359_v53 }
 0x2c8   :  { %v8872_v50 = vadd.f32 %v1449_v28, %v1384_v32  ;;  %v8875_v11 = vmul.f32 %v8646_v59, %v1683_v21  ;;  %v8878_v4 = vmul.f32 %v8649_v15, %v1691_v47  ;;  %v1444_v63 = vsel %vm1432_vm10, %v8466_v48, %v8468_v2  ;;  %v13249_v59 = vld [vmem:[#allocation16_spill] sm:$0xff] }
 0x2c9   :  { %v1386_v38 = vadd.f32 %v8660_v30, %v8432_v45  ;;  %v1758_v53 = vsel %vm636_vm6, %v8458_v31, %v8426_v44  ;;  %v1380_v21 = vmul.f32 %v8636_v20, %v1366_v34  ;;  %v8894_v56 = vmul.f32 %v8639_v16, %v1358_v61  ;;  %v8907_v30 = vpop.permute.xlu2 %1562 }
 0x2ca   :  { %13218 = vst [vmem:[#allocation73_spill] sm:$0xff] %v8875_v11  ;;  %v8896_v6 = vadd.f32 %v1450_v25, %v1385_v29  ;;  %v1388_v32 = vadd.f32 %v1372_v40, %v8446_v51  ;;  %v1766_v47 = vsel %vm636_vm6, %v8426_v44, %v8458_v31  ;;  %v1436_v45 = vsel %vm1432_vm10, %v8468_v2, %v8466_v48 }
 0x2cb   :  { %13219 = vst [vmem:[#allocation74_spill] sm:$0xff] %v8878_v4  ;;  %v1387_v28 = vadd.f32 %v8667_v60, %v8448_v52  ;;  %v1455_v29 = vmul.f32 %v8780_v0, %v1444_v63  ;;  %v1434_v51 = vsel %vm1432_vm10, %v8493_v13, %v8454_v22  ;;  %v1442_v44 = vsel %vm1432_vm10, %v8454_v22, %v8493_v13  ;;  %v8933_v60 = vpop.permute.xlu0 %1495  ;;  %v13226_v63 = vld [vmem:[#allocation9_spill] sm:$0xff] }
 0x2cc   :  { %v8921_v31 = vmul.f32 %v8714_v46, %v1758_v53  ;;  %v1759_v52 = vsel %vm636_vm6, %v8477_v19, %v8439_v58  ;;  %v1767_v48 = vsel %vm636_vm6, %v8439_v58, %v8477_v19  ;;  %v1391_v2 = vadd.f32 %v8733_v18, %v8475_v14  ;;  %v13225_v18 = vld [vmem:[#allocation10_spill] sm:$0xff] }
 0x2cd   :  { %v8936_v13 = vmul.f32 %v8717_v26, %v1766_v47  ;;  %v1390_v22 = vadd.f32 %v8720_v27, %v8460_v33  ;;  %v1389_v40 = vadd.f32 %v1373_v7, %v8462_v39  ;;  %v1456_v34 = vmul.f32 %v8787_v49, %v1436_v45  ;;  %v13224_v27 = vld [vmem:[#allocation11_spill] sm:$0xff]  ;;  %v13228_v45 = vld [vmem:[#allocation6_spill] sm:$0xff] }
 0x2ce   :  { %13220 = vst [vmem:[#allocation75_spill] sm:$0xff] %v8921_v31  ;;  %v1451_v61 = vmul.f32 %v8780_v0, %v1442_v44  ;;  %v1452_v25 = vmul.f32 %v8787_v49, %v1434_v51  ;;  %v1437_v14 = vsel %vm1432_vm10, %v8495_v3, %v8497_v57  ;;  %v1445_v19 = vsel %vm1432_vm10, %v8497_v57, %v8495_v3  ;;  %v13227_v3 = vld [vmem:[#allocation17_spill] sm:$0xff] }
 0x2cf   :  { %13221 = vst [vmem:[#allocation76_spill] sm:$0xff] %v8936_v13  ;;  %v8953_v58 = vmul.f32 %v8714_v46, %v1759_v52  ;;  %v8956_v33 = vmul.f32 %v8717_v26, %v1767_v48  ;;  %v8958_v39 = vadd.f32 %v1455_v29, %v1390_v22  ;;  %v1762_v7 = vsel %vm636_vm6, %v13225_v18, %v13224_v27  ;;  %v13229_v52 = vld [vmem:[#allocation22_spill] sm:$0xff]  ;;  %v13230_v48 = vld [vmem:[#allocation7_spill] sm:$0xff] }
 0x2d0   :  { %v1392_v53 = vadd.f32 %v8790_v1, %v13226_v63  ;;  %v8966_v47 = vadd.f32 %v1456_v34, %v1391_v2  ;;  %v1770_v57 = vsel %vm636_vm6, %v13224_v27, %v13225_v18  ;;  %v1760_v29 = vsel %vm636_vm6, %v13228_v45, %v13227_v3  ;;  %v13231_v63 = vld [vmem:[#allocation12_spill] sm:$0xff] }
 0x2d1   :  { %13222 = vst [vmem:[#allocation77_spill] sm:$0xff] %v8953_v58  ;;  %v1457_v51 = vmul.f32 %v8780_v0, %v1445_v19  ;;  %v1458_v44 = vmul.f32 %v8787_v49, %v1437_v14  ;;  %v1435_v1 = vsel %vm1432_vm10, %v13230_v48, %v13229_v52  ;;  %v1443_v2 = vsel %vm1432_vm10, %v13229_v52, %v13230_v48  ;;  %v8997_v19 = vpop.permute.xlu1 %1509  ;;  %v13232_v52 = vld [vmem:[#allocation13_spill] sm:$0xff]  ;;  %v13237_v48 = vld [vmem:[#allocation15_spill] sm:$0xff] }
 0x2d2   :  { %13223 = vst [vmem:[#allocation78_spill] sm:$0xff] %v8956_v33  ;;  %v8986_v22 = vadd.f32 %v1451_v61, %v1386_v38  ;;  %v8988_v34 = vadd.f32 %v1452_v25, %v1387_v28  ;;  %v8991_v27 = vmul.f32 %v8714_v46, %v1762_v7  ;;  %v1768_v14 = vsel %vm636_vm6, %v13227_v3, %v13228_v45  ;;  %v9012_v7 = vpop.permute.xlu2 %1578  ;;  %v13236_v45 = vld [vmem:[#allocation14_spill] sm:$0xff]  ;;  %v13256_v33 = vld [vmem:[#allocation35_spill] sm:$0xff] }
 0x2d3   :  { %v9000_v18 = vmul.f32 %v8717_v26, %v1770_v57  ;;  %v1394_v16 = vadd.f32 %v1378_v55, %v13231_v63  ;;  %v1393_v38 = vadd.f32 %v8793_v8, %v13232_v52  ;;  %v9007_v28 = vmul.f32 %v8714_v46, %v1760_v29  ;;  %v13238_v63 = vld [vmem:[#allocation24_spill] sm:$0xff]  ;;  %v13257_v58 = vld [vmem:[#allocation19_spill] sm:$0xff] }
 0x2d4   :  { %v1453_v61 = vmul.f32 %v8780_v0, %v1443_v2  ;;  %v1454_v25 = vmul.f32 %v8787_v49, %v1435_v1  ;;  %v9017_v55 = vmul.f32 %v8717_v26, %v1768_v14  ;;  %v9019_v3 = vadd.f32 %v1457_v51, %v1392_v53  ;;  %v13239_v1 = vld [vmem:[#allocation21_spill] sm:$0xff]  ;;  %v13241_v51 = vld [vmem:[#allocation26_spill] sm:$0xff] }
 0x2d5   :  { %13233 = vst [vmem:[#allocation11_spill] sm:$0xff] %v9007_v28  ;;  %v9021_v8 = vadd.f32 %v1458_v44, %v1393_v38  ;;  %v1396_v29 = vadd.f32 %v1380_v21, %v13236_v45  ;;  %v1395_v2 = vadd.f32 %v8867_v43, %v13237_v48  ;;  %v1439_v52 = vsel %vm1432_vm10, %v13239_v1, %v13238_v63  ;;  %v13242_v44 = vld [vmem:[#allocation8_spill] sm:$0xff]  ;;  %v13244_v43 = vld [vmem:[#allocation25_spill] sm:$0xff] }
 0x2d6   :  { %13235 = vst [vmem:[#allocation9_spill] sm:$0xff] %v9017_v55  ;;  %v1447_v14 = vsel %vm1432_vm10, %v13238_v63, %v13239_v1  ;;  %v9035_v53 = vsel %vm610_vm11, 1.0, %v13206_v17  ;;  %v1761_v21 = vsel %vm636_vm6, %v13242_v44, %v13241_v51  ;;  %v13243_v38 = vld [vmem:[#allocation32_spill] sm:$0xff]  ;;  %v9046_v48 = vsel %vm611_vm12, 1.0, %v13206_v17  ;;  %v13255_v55 = vld [vmem:[#allocation23_spill] sm:$0xff] }
 0x2d7   :  { %13240 = vst [vmem:[#allocation17_spill] sm:$0xff] %v9035_v53  ;;  %v1446_v45 = vsel %vm1432_vm10, %v13244_v43, %v13243_v38  ;;  %v9049_v20 = vadd.f32 %v1453_v61, %v1388_v32  ;;  %v9051_v63 = vadd.f32 %v1454_v25, %v1389_v40  ;;  %v1769_v1 = vsel %vm636_vm6, %v13241_v51, %v13242_v44  ;;  %v13246_v32 = vld [vmem:[#allocation18_spill] sm:$0xff]  ;;  %v13247_v61 = vld [vmem:[#allocation20_spill] sm:$0xff] }
 0x2d8   :  { %13245 = vst [vmem:[#allocation6_spill] sm:$0xff] %v9046_v48  ;;  %v1461_v13 = vmul.f32 %v8780_v0, %v1447_v14  ;;  %v1462_v31 = vmul.f32 %v8787_v49, %v1439_v52  ;;  %v1438_v15 = vsel %vm1432_vm10, %v13243_v38, %v13244_v43  ;;  %v1398_v40 = vadd.f32 %v8852_v24, %v13246_v32  ;;  %v13250_v38 = vld [vmem:[#allocation29_spill] sm:$0xff] }
 0x2d9   :  { %v1397_v25 = vadd.f32 %v8894_v56, %v13247_v61  ;;  %v9070_v51 = vmul.f32 %v8714_v46, %v1761_v21  ;;  %v1459_v14 = vmul.f32 %v8780_v0, %v1446_v45  ;;  %v9073_v44 = vpop.permute.xlu1 %1564  ;;  %v9076_v52 = vmul.f32 %v8717_v26, %v1769_v1  ;;  %v13252_v45 = vld [vmem:[#allocation30_spill] sm:$0xff]  ;;  %v13253_v1 = vld [vmem:[#allocation31_spill] sm:$0xff] }
 0x2da   :  { %13248 = vst [vmem:[#allocation22_spill] sm:$0xff] %v9073_v44  ;;  %v1763_v43 = vsel %vm636_vm6, %v13250_v38, %v13249_v59  ;;  %v1771_v24 = vsel %vm636_vm6, %v13249_v59, %v13250_v38  ;;  %v9089_v56 = vsel %vm644_vm14, 1.0, %v13206_v17  ;;  %v1460_v21 = vmul.f32 %v8787_v49, %v1438_v15  ;;  %v9103_v59 = vpop.permute.xlu2 %1568  ;;  %v13268_v44 = vld [vmem:[#allocation33_spill] sm:$0xff] }
 0x2db   :  { %13251 = vst [vmem:[#allocation7_spill] sm:$0xff] %v9089_v56  ;;  %v1514_v32 = vsel %vm1513_vm13, %v13253_v1, %v13252_v45  ;;  %v1522_v61 = vsel %vm1513_vm13, %v13252_v45, %v13253_v1  ;;  %v9101_v4 = vsel %vm645_vm15, 1.0, %v13206_v17  ;;  %v9107_v11 = vadd.f32 %v1461_v13, %v1396_v29  ;;  %v13261_v29 = vld [vmem:[#allocation28_spill] sm:$0xff] }
 0x2dc   :  { %13254 = vst [vmem:[#allocation12_spill] sm:$0xff] %v9101_v4  ;;  %v9109_v15 = vadd.f32 %v1462_v31, %v1397_v25  ;;  %v1399_v28 = vadd.f32 %v8870_v36, %v13255_v55  ;;  %v1764_v10 = vsel %vm636_vm6, %v13257_v58, %v13256_v33  ;;  %v9118_v45 = vmul.f32 %v8714_v46, %v1763_v43  ;;  %v13260_v55 = vld [vmem:[#allocation41_spill] sm:$0xff] }
 0x2dd   :  { %v9121_v1 = vmul.f32 %v8717_v26, %v1771_v24  ;;  %v9123_v9 = vadd.f32 %v1459_v14, %v1394_v16  ;;  %v1772_v31 = vsel %vm636_vm6, %v13256_v33, %v13257_v58  ;;  %v1530_v36 = vmul.f32 %v9035_v53, %v1522_v61  ;;  %v13262_v43 = vld [vmem:[#allocation49_spill] sm:$0xff] }
 0x2de   :  { %v9014_v57 = vpop.permute.xlu0 %1580  ;;  %13258 = vst [vmem:[#allocation13_spill] sm:$0xff] %v9118_v45  ;;  %v1531_v13 = vmul.f32 %v9046_v48, %v1514_v32  ;;  %v1448_v25 = vsel %vm1432_vm10, %v13261_v29, %v13260_v55  ;;  %v13263_v45 = vld [vmem:[#allocation48_spill] sm:$0xff]  ;;  %v9139_v14 = vadd.f32 %v1460_v21, %v1395_v2  ;;  %v9142_v24 = vmul.f32 %v8714_v46, %v1764_v10  ;;  %v13265_v33 = vld [vmem:[#allocation37_spill] sm:$0xff]  ;;  %v13266_v32 = vld [vmem:[#allocation39_spill] sm:$0xff] }
 0x2df   :  { %13234 = vst [vmem:[#allocation10_spill] sm:$0xff] %v9014_v57  ;;  %v1526_v16 = vsel %vm1513_vm13, %v13263_v45, %v13262_v43  ;;  %v1440_v58 = vsel %vm1432_vm10, %v13260_v55, %v13261_v29  ;;  %v1524_v61 = vsel %vm1513_vm13, %v13266_v32, %v13265_v33  ;;  %v13269_v57 = vld [vmem:[#allocation34_spill] sm:$0xff]  ;;  %v1516_v21 = vsel %vm1513_vm13, %v13265_v33, %v13266_v32  ;;  %v13270_v29 = vld [vmem:[#allocation44_spill] sm:$0xff] }
 0x2e0   :  { %13259 = vst [vmem:[#allocation14_spill] sm:$0xff] %v9121_v1  ;;  %v9153_v1 = vmul.f32 %v8717_v26, %v1772_v31  ;;  %v1840_v2 = vsel %vm644_vm14, %v13269_v57, %v13268_v44  ;;  %v1848_v10 = vsel %vm644_vm14, %v13268_v44, %v13269_v57  ;;  %v1463_v55 = vmul.f32 %v8780_v0, %v1448_v25  ;;  %v13271_v31 = vld [vmem:[#allocation40_spill] sm:$0xff] }
 0x2e1   :  { %13264 = vst [vmem:[#allocation15_spill] sm:$0xff] %v9142_v24  ;;  %v1523_v26 = vsel %vm1513_vm13, %v13271_v31, %v13270_v29  ;;  %v1538_v46 = vmul.f32 %v9035_v53, %v1526_v16  ;;  %v9177_v57 = vadd.f32 %v1530_v36, %v8872_v50  ;;  %v9180_v44 = vadd.f32 %v1531_v13, %v8896_v6  ;;  %v13274_v24 = vld [vmem:[#allocation47_spill] sm:$0xff] }
 0x2e2   :  { %13267 = vst [vmem:[#allocation24_spill] sm:$0xff] %v9153_v1  ;;  %v9174_v1 = vpop.permute.xlu1 %1566  ;;  %v1464_v33 = vmul.f32 %v8787_v49, %v1440_v58  ;;  %v1534_v25 = vmul.f32 %v9035_v53, %v1524_v61  ;;  %v9185_v32 = vmul.f32 %v9089_v56, %v1840_v2  ;;  %v9188_v0 = vmul.f32 %v9101_v4, %v1848_v10  ;;  %v1587_v36 = vpop.permute.xlu2 %1586  ;;  %v13273_v49 = vld [vmem:[#allocation43_spill] sm:$0xff] }
 0x2e3   :  { %v1535_v16 = vmul.f32 %v9046_v48, %v1516_v21  ;;  %v1515_v50 = vsel %vm1513_vm13, %v13270_v29, %v13271_v31  ;;  %v1532_v13 = vmul.f32 %v9035_v53, %v1523_v26  ;;  %v1518_v58 = vsel %vm1513_vm13, %v13262_v43, %v13263_v45 }
 0x2e4   :  { %v9203_v61 = vsel %vm620_vm2, 1.0, %v13206_v17  ;;  %v9207_v10 = vadd.f32 %v1463_v55, %v1398_v40  ;;  %v1554_v21 = vadd.f32 %v1538_v46, %v9019_v3  ;;  %v9212_v29 = vadd.f32 %v1464_v33, %v1399_v28  ;;  %v13275_v55 = vld [vmem:[#allocation45_spill] sm:$0xff]  ;;  %v13276_v33 = vld [vmem:[#allocation46_spill] sm:$0xff] }
 0x2e5   :  { %13272 = vst [vmem:[#allocation21_spill] sm:$0xff] %v9203_v61  ;;  %v9215_v45 = vadd.f32 %v1534_v25, %v9049_v20  ;;  %v1533_v43 = vmul.f32 %v9046_v48, %v1515_v50  ;;  %v1841_v40 = vsel %vm644_vm14, %v13274_v24, %v13273_v49  ;;  %v1849_v37 = vsel %vm644_vm14, %v13273_v49, %v13274_v24 }
 0x2e6   :  { %v9105_v38 = vpop.permute.xlu0 %1582  ;;  %v1539_v46 = vmul.f32 %v9046_v48, %v1518_v58  ;;  %v9230_v20 = vadd.f32 %v1535_v16, %v9051_v63  ;;  %v9233_v3 = vadd.f32 %v1532_v13, %v8986_v22  ;;  %v1843_v25 = vsel %vm644_vm14, %v13276_v33, %v13275_v55 }
 0x2e7   :  { %v9240_v50 = vsel %vm621_vm3, 1.0, %v13206_v17  ;;  %v9253_v13 = vadd.f32 %v1533_v43, %v8988_v34  ;;  %v9256_v17 = vmul.f32 %v9089_v56, %v1841_v40  ;;  %v9259_v58 = vmul.f32 %v9101_v4, %v1849_v37  ;;  %v13281_v43 = vld [vmem:[#allocation55_spill] sm:$0xff] }
 0x2e8   :  { %13277 = vst [vmem:[#allocation26_spill] sm:$0xff] %v9240_v50  ;;  %v1519_v34 = vsel %vm1513_vm13, %v8759_v42, %v8811_v41 }
 0x2e9   :  { %13280 = vst [vmem:[#allocation8_spill] sm:$0xff] %v9259_v58 }
 0x2ee   :  { %v1571_v6 = vpop.permute.xlu0 %1570  ;;  %v1585_v16 = vpop.permute.xlu1 %1584 }
 0x2ef   :  { %v1599_v2 = vsel %vm620_vm2, %v1571_v6, %v1587_v36  ;;  %v1607_v31 = vsel %vm620_vm2, %v1587_v36, %v1571_v6  ;;  %v13278_v36 = vld [vmem:[#allocation52_spill] sm:$0xff]  ;;  %v13279_v6 = vld [vmem:[#allocation50_spill] sm:$0xff] }
 0x2f0   :  { %v1619_v26 = vmul.f32 %v9203_v61, %v1599_v2  ;;  %v1517_v49 = vsel %vm1513_vm13, %v13279_v6, %v13278_v36  ;;  %v1525_v63 = vsel %vm1513_vm13, %v13278_v36, %v13279_v6  ;;  %v1620_v22 = vmul.f32 %v9240_v50, %v1607_v31  ;;  %v13282_v31 = vld [vmem:[#allocation36_spill] sm:$0xff]  ;;  %v13284_v36 = vld [vmem:[#allocation58_spill] sm:$0xff]  ;;  %v13285_v6 = vld [vmem:[#allocation59_spill] sm:$0xff] }
 0x2f1   :  { %v1851_v2 = vsel %vm644_vm14, %v13275_v55, %v13276_v33  ;;  %v1842_v40 = vsel %vm644_vm14, %v13282_v31, %v13281_v43  ;;  %v1536_v37 = vmul.f32 %v9035_v53, %v1525_v63 }
 0x2f2   :  { %v1635_v28 = vadd.f32 %v1619_v26, %v1554_v21  ;;  %v9266_v21 = vmul.f32 %v9089_v56, %v1843_v25  ;;  %v1527_v26 = vsel %vm1513_vm13, %v8811_v41, %v8759_v42  ;;  %v9297_v25 = vmul.f32 %v9101_v4, %v1851_v2 }
 0x2f3   :  { %v1540_v63 = vmul.f32 %v9035_v53, %v1527_v26  ;;  %v1862_v58 = vmul.f32 %v9089_v56, %v1842_v40  ;;  %v1552_v2 = vadd.f32 %v1536_v37, %v8958_v39  ;;  %v1853_v40 = vsel %vm644_vm14, %v13284_v36, %v13285_v6 }
 0x2f4   :  { %v1716_v24 = vadd.f32 %v8736_v23, %v1635_v28  ;;  %v1555_v23 = vadd.f32 %v1539_v46, %v9021_v8  ;;  %v1850_v8 = vsel %vm644_vm14, %v13281_v43, %v13282_v31  ;;  %v1537_v46 = vmul.f32 %v9046_v48, %v1517_v49  ;;  %v13283_v28 = vld [vmem:[#allocation42_spill] sm:$0xff]  ;;  %v9305_v31 = vpop.permute.xlu2 %1576 }
 0x2f5   :  { %v1844_v55 = vsel %vm644_vm14, %v13283_v28, %v8884_v12  ;;  %v1852_v42 = vsel %vm644_vm14, %v8884_v12, %v13283_v28  ;;  %v1845_v49 = vsel %vm644_vm14, %v13285_v6, %v13284_v36  ;;  %v1541_v43 = vmul.f32 %v9046_v48, %v1519_v34  ;;  %v13287_v28 = vld [vmem:[#allocation66_spill] sm:$0xff] }
 0x2f6   :  { %v1636_v41 = vadd.f32 %v1620_v22, %v1555_v23  ;;  %v1797_v33 = vadd.f32 %v9070_v51, %v1716_v24  ;;  %v1863_v12 = vmul.f32 %v9101_v4, %v1850_v8  ;;  %v13286_v51 = vld [vmem:[#allocation51_spill] sm:$0xff]  ;;  %v1553_v23 = vadd.f32 %v1537_v46, %v8966_v47 }
 0x2f7   :  { %v1520_v22 = vsel %vm1513_vm13, %v13286_v51, %v8997_v19  ;;  %v1528_v24 = vsel %vm1513_vm13, %v8997_v19, %v13286_v51  ;;  %v9320_v34 = vmul.f32 %v9089_v56, %v1844_v55  ;;  %v9323_v26 = vmul.f32 %v9101_v4, %v1852_v42 }
 0x2f8   :  { %v9330_v8 = vmul.f32 %v9089_v56, %v1845_v49  ;;  %v1717_v19 = vadd.f32 %v13287_v28, %v1636_v41  ;;  %v1878_v51 = vadd.f32 %v1862_v58, %v1797_v33  ;;  %v1542_v39 = vmul.f32 %v9035_v53, %v1528_v24  ;;  %v13288_v49 = vld [vmem:[#allocation4_spill] sm:$0xff] }
 0x2f9   :  { %v1543_v47 = vmul.f32 %v9046_v48, %v1520_v22  ;;  %v1556_v37 = vadd.f32 %v1540_v63, %v9123_v9  ;;  %v1557_v46 = vadd.f32 %v1541_v43, %v9139_v14  ;;  %v1521_v55 = vsel %vm1513_vm13, %v8933_v60, %v8809_v35  ;;  %v1573_v14 = vpop.permute.xlu1 %1572 }
 0x2fa   :  { %v1529_v42 = vsel %vm1513_vm13, %v8809_v35, %v8933_v60  ;;  %v1597_v58 = vsel %vm620_vm2, %v9174_v1, %v9105_v38  ;;  %v1605_v9 = vsel %vm620_vm2, %v9105_v38, %v9174_v1  ;;  %v1598_v33 = vsel %vm620_vm2, %v9103_v59, %v1585_v16 }
 0x2fb   :  { %v1606_v35 = vsel %vm620_vm2, %v1585_v16, %v9103_v59  ;;  %v1798_v6 = vadd.f32 %v9076_v52, %v1717_v19  ;;  %v9367_v63 = vadd.f32 %v13288_v49, %v1878_v51  ;;  %v1544_v43 = vmul.f32 %v9035_v53, %v1529_v42 }
 0x2fc   :  { %v1595_v59 = vsel %vm620_vm2, %v8907_v30, %v9012_v7  ;;  %v1603_v16 = vsel %vm620_vm2, %v9012_v7, %v8907_v30  ;;  %v1615_v52 = vmul.f32 %v9203_v61, %v1597_v58  ;;  %v9379_v22 = vpop.permute.xlu2 %1643  ;;  %v1616_v24 = vmul.f32 %v9240_v50, %v1605_v9 }
 0x2fd   :  { %v1617_v28 = vmul.f32 %v9203_v61, %v1598_v33  ;;  %v9384_v42 = vmul.f32 %v9101_v4, %v1853_v40  ;;  %v1958_v58 = vmin.f32 %v9367_v63, 0.0  ;;  %v1879_v9 = vadd.f32 %v1863_v12, %v1798_v6 }
 0x2fe   :  { %v1589_v41 = vpop.permute.xlu0 %1588  ;;  %v1545_v33 = vmul.f32 %v9046_v48, %v1521_v55  ;;  %v1611_v40 = vmul.f32 %v9203_v61, %v1595_v59  ;;  %v13291_v59 = vld [vmem:[#allocation60_spill] sm:$0xff]  ;;  %vm1942_vm15 = vcmp.gt.f32.partialorder %v9367_v63, 0.0 }
 0x2ff   :  { %v1600_v60 = vsel %vm620_vm2, %v1573_v14, %v1589_v41  ;;  %v1608_v36 = vsel %vm620_vm2, %v1589_v41, %v1573_v14  ;;  %v1558_v14 = vadd.f32 %v1542_v39, %v9107_v11  ;;  %v1559_v41 = vadd.f32 %v1543_v47, %v9109_v15 }
 0x300   :  { %v1621_v38 = vmul.f32 %v9203_v61, %v1600_v60  ;;  %v1622_v1 = vmul.f32 %v9240_v50, %v1608_v36  ;;  %v1618_v60 = vmul.f32 %v9240_v50, %v1606_v35  ;;  %v1631_v11 = vadd.f32 %v1615_v52, %v9215_v45 }
 0x301   :  { %v1632_v15 = vadd.f32 %v1616_v24, %v9230_v20  ;;  %v1633_v39 = vadd.f32 %v1617_v28, %v1552_v2  ;;  %v1575_v47 = vpop.permute.xlu1 %1574  ;;  %v1982_v6 = vmul.f32 1.442695, %v1958_v58  ;;  %v9407_v20 = vadd.f32 %v13288_v49, %v1879_v9  ;;  %v13289_v2 = vld [vmem:[#allocation10_spill] sm:$0xff]  ;;  %v13292_v49 = vld [vmem:[#allocation61_spill] sm:$0xff]  ;;  %v13295_v58 = vld [vmem:[#allocation68_spill] sm:$0xff] }
 0x302   :  { %v1637_v19 = vadd.f32 %v1621_v38, %v1556_v37  ;;  %v1638_v51 = vadd.f32 %v1622_v1, %v1557_v46  ;;  %v1560_v37 = vadd.f32 %v1544_v43, %v9207_v10  ;;  %v1612_v46 = vmul.f32 %v9240_v50, %v1603_v16 }
 0x303   :  { %v1634_v35 = vadd.f32 %v1618_v60, %v1553_v23  ;;  %v13290_v23 = vld [vmem:[#allocation22_spill] sm:$0xff]  ;;  %v1712_v16 = vadd.f32 %v13291_v59, %v1631_v11  ;;  %v1713_v52 = vadd.f32 %v13292_v49, %v1632_v15  ;;  %v9424_v28 = vadd.f32 %v1611_v40, %v9177_v57  ;;  %v13294_v60 = vld [vmem:[#allocation65_spill] sm:$0xff] }
 0x304   :  { %v1718_v30 = vadd.f32 %v8817_v54, %v1637_v19  ;;  %v1719_v7 = vadd.f32 %v8841_v62, %v1638_v51  ;;  %v1604_v38 = vsel %vm620_vm2, %v13289_v2, %v13290_v23  ;;  %v13293_v19 = vld [vmem:[#allocation64_spill] sm:$0xff]  ;;  %7439 = vpow2.f32 %v1982_v6  ;;  %v13298_v15 = vld [vmem:[#allocation13_spill] sm:$0xff] }
 0x305   :  { %v1714_v51 = vadd.f32 %v13293_v19, %v1633_v39  ;;  %v9433_v11 = vadd.f32 %v1612_v46, %v9180_v44  ;;  %v1614_v57 = vmul.f32 %v9240_v50, %v1604_v38  ;;  %v13303_v38 = vld [vmem:[#allocation9_spill] sm:$0xff]  ;;  %vm1943_vm3 = vcmp.gt.f32.partialorder %v9407_v20, 0.0 }
 0x306   :  { %v1799_v54 = vadd.f32 %v8991_v27, %v1718_v30  ;;  %v1591_v62 = vpop.permute.xlu0 %1590  ;;  %v1800_v12 = vadd.f32 %v9000_v18, %v1719_v7  ;;  %v1561_v27 = vadd.f32 %v1545_v33, %v9212_v29  ;;  %v1596_v18 = vsel %vm620_vm2, %v13290_v23, %v13289_v2  ;;  %v13296_v33 = vld [vmem:[#allocation70_spill] sm:$0xff] }
 0x307   :  { %v1601_v55 = vsel %vm620_vm2, %v1575_v47, %v1591_v62  ;;  %v1609_v10 = vsel %vm620_vm2, %v1591_v62, %v1575_v47  ;;  %v9418_v1 = vpop.permute.xlu2 %1661  ;;  %v1715_v30 = vadd.f32 %v13294_v60, %v1634_v35 }
 0x308   :  { %v1623_v36 = vmul.f32 %v9203_v61, %v1601_v55  ;;  %v1624_v45 = vmul.f32 %v9240_v50, %v1609_v10  ;;  %v1880_v43 = vadd.f32 %v9266_v21, %v1799_v54  ;;  %v1881_v7 = vadd.f32 %v9297_v25, %v1800_v12  ;;  %v13299_v25 = vld [vmem:[#allocation14_spill] sm:$0xff]  ;;  %v13300_v12 = vld [vmem:[#allocation77_spill] sm:$0xff] }
 0x309   :  { %v1959_v21 = vmin.f32 %v9407_v20, 0.0  ;;  %v1793_v55 = vadd.f32 %v13300_v12, %v1712_v16  ;;  %v13301_v10 = vld [vmem:[#allocation78_spill] sm:$0xff] }
 0x30a   :  { %v1639_v24 = vadd.f32 %v1623_v36, %v1558_v14  ;;  %v1640_v29 = vadd.f32 %v1624_v45, %v1559_v41  ;;  %v1613_v14 = vmul.f32 %v9203_v61, %v1596_v18  ;;  %v13297_v41 = vld [vmem:[#allocation2_spill] sm:$0xff]  ;;  %v1794_v36 = vadd.f32 %v13301_v10, %v1713_v52  ;;  %v13302_v45 = vld [vmem:[#allocation11_spill] sm:$0xff] }
 0x30b   :  { %v9438_v40 = vadd.f32 %v13297_v41, %v1880_v43  ;;  %v1795_v6 = vadd.f32 %v13302_v45, %v1714_v51  ;;  %v9452_v2 = vadd.f32 %v13297_v41, %v1881_v7  ;;  %v1796_v43 = vadd.f32 %v13303_v38, %v1715_v30  ;;  %v13304_v51 = vld [vmem:[#allocation5_spill] sm:$0xff]  ;;  %v13311_v45 = vld [vmem:[#allocation56_spill] sm:$0xff] }
 0x30c   :  { %v1720_v9 = vadd.f32 %v13295_v58, %v1639_v24  ;;  %v1721_v47 = vadd.f32 %v13296_v33, %v1640_v29  ;;  %v1984_v59 = vmul.f32 1.442695, %v1959_v21  ;;  %v1629_v16 = vadd.f32 %v1613_v14, %v9233_v3  ;;  %v7440_v24 = vpop.eup %7439  ;;  %v13305_v33 = vld [vmem:[#allocation8_spill] sm:$0xff]  ;;  %v13307_v14 = vld [vmem:[#allocation74_spill] sm:$0xff] }
 0x30d   :  { %v1630_v29 = vadd.f32 %v1614_v57, %v9253_v13  ;;  %v1874_v19 = vadd.f32 %v9185_v32, %v1793_v55  ;;  %v1875_v3 = vadd.f32 %v9188_v0, %v1794_v36  ;;  %v1961_v58 = vmin.f32 %v9452_v2, 0.0  ;;  %v13306_v32 = vld [vmem:[#allocation73_spill] sm:$0xff]  ;;  %v13310_v55 = vld [vmem:[#allocation24_spill] sm:$0xff] }
 0x30e   :  { %v1801_v39 = vadd.f32 %v13298_v15, %v1720_v9  ;;  %v1802_v54 = vadd.f32 %v13299_v25, %v1721_v47  ;;  %v1822_v62 = vpop.permute.xlu0 %1821  ;;  %v1593_v35 = vpop.permute.xlu1 %1592  ;;  %v1876_v9 = vadd.f32 %v9256_v17, %v1795_v6  ;;  %v1877_v47 = vadd.f32 %v13305_v33, %v1796_v43 }
 0x30f   :  { %v1602_v44 = vsel %vm620_vm2, %v9305_v31, %v1593_v35  ;;  %v1610_v46 = vsel %vm620_vm2, %v1593_v35, %v9305_v31  ;;  %v1960_v31 = vmin.f32 %v9438_v40, 0.0  ;;  %v1896_v7 = vpop.permute.xlu2 %1895  ;;  %7441 = vpow2.f32 %v1984_v59  ;;  %v13309_v35 = vld [vmem:[#allocation15_spill] sm:$0xff]  ;;  %v13312_v59 = vld [vmem:[#allocation57_spill] sm:$0xff] }
 0x310   :  { %v1882_v23 = vadd.f32 %v9320_v34, %v1801_v39  ;;  %v1883_v18 = vadd.f32 %v9323_v26, %v1802_v54  ;;  %v1625_v49 = vmul.f32 %v9203_v61, %v1602_v44  ;;  %v1626_v52 = vmul.f32 %v9240_v50, %v1610_v46 }
 0x311   :  { %v1986_v41 = vmul.f32 1.442695, %v1960_v31  ;;  %v9476_v15 = vadd.f32 -1.0, %v7440_v24  ;;  %v9483_v39 = vadd.f32 %v1896_v7, %v1875_v3  ;;  %v1988_v44 = vmul.f32 1.442695, %v1961_v58 }
 0x312   :  { %v9464_v34 = vadd.f32 %v13304_v51, %v1882_v23  ;;  %v9467_v26 = vadd.f32 %v13304_v51, %v1883_v18  ;;  %v1641_v60 = vadd.f32 %v1625_v49, %v1560_v37  ;;  %v1642_v30 = vadd.f32 %v1626_v52, %v1561_v27  ;;  %v13308_v37 = vld [vmem:[#allocation38_spill] sm:$0xff] }
 0x313   :  { %v1838_v0 = vsel %vm644_vm14, %v13308_v37, %v1822_v62  ;;  %v9481_v27 = vadd.f32 %v1896_v7, %v1874_v19  ;;  %7443 = vpow2.f32 %v1986_v41  ;;  %v13315_v41 = vld [vmem:[#allocation27_spill] sm:$0xff]  ;;  %vm1944_vm5 = vcmp.gt.f32.partialorder %v9438_v40, 0.0 }
 0x314   :  { %v1962_v13 = vmin.f32 %v9464_v34, 0.0  ;;  %v1722_v21 = vadd.f32 %v13306_v32, %v1641_v60  ;;  %v1723_v57 = vadd.f32 %v13307_v14, %v1642_v30  ;;  %v1963_v54 = vmin.f32 %v9467_v26, 0.0 }
 0x315   :  { %v7442_v31 = vpop.eup %7441  ;;  %v1846_v60 = vsel %vm644_vm14, %v1822_v62, %v13308_v37  ;;  %7445 = vpow2.f32 %v1988_v44  ;;  %v1954_v7 = vmin.f32 %v9481_v27, 0.0  ;;  %v1955_v62 = vmin.f32 %v9483_v39, 0.0 }
 0x316   :  { %v1646_v17 = vpop.permute.xlu0 %1645  ;;  %v1660_v25 = vpop.permute.xlu1 %1659  ;;  %v1803_v12 = vadd.f32 %v13309_v35, %v1722_v21  ;;  %v1804_v10 = vadd.f32 %v13310_v55, %v1723_v57  ;;  %v1990_v18 = vmul.f32 1.442695, %v1962_v13  ;;  %v1992_v51 = vmul.f32 1.442695, %v1963_v54  ;;  %v13314_v21 = vld [vmem:[#allocation75_spill] sm:$0xff] }
 0x317   :  { %v1677_v36 = vsel %vm628_vm4, %v1646_v17, %v9418_v1  ;;  %v1685_v46 = vsel %vm628_vm4, %v9418_v1, %v1646_v17  ;;  %v1676_v23 = vsel %vm628_vm4, %v9379_v22, %v1660_v25  ;;  %v1684_v52 = vsel %vm628_vm4, %v1660_v25, %v9379_v22  ;;  %v13317_v35 = vld [vmem:[#allocation71_spill] sm:$0xff] }
 0x318   :  { %v1694_v6 = vmul.f32 %v13311_v45, %v1677_v36  ;;  %v1884_v38 = vadd.f32 %v9330_v8, %v1803_v12  ;;  %v1885_v43 = vadd.f32 %v9384_v42, %v1804_v10  ;;  %v1695_v49 = vmul.f32 %v13312_v59, %v1685_v46  ;;  %v13313_v8 = vld [vmem:[#allocation3_spill] sm:$0xff]  ;;  %v13318_v10 = vld [vmem:[#allocation72_spill] sm:$0xff] }
 0x319   :  { %v1692_v1 = vmul.f32 %v13311_v45, %v1676_v23  ;;  %v1693_v19 = vmul.f32 %v13312_v59, %v1684_v52  ;;  %v1854_v22 = vmul.f32 %v9089_v56, %v1838_v0  ;;  %7447 = vpow2.f32 %v1990_v18  ;;  %v13316_v0 = vld [vmem:[#allocation76_spill] sm:$0xff] }
 0x31a   :  { %v1710_v24 = vadd.f32 %v1694_v6, %v1629_v16  ;;  %v9510_v30 = vadd.f32 %v13313_v8, %v1884_v38  ;;  %v9513_v42 = vadd.f32 %v13313_v8, %v1885_v43  ;;  %v1711_v3 = vadd.f32 %v1695_v49, %v1630_v29  ;;  %v1892_v49 = vpop.permute.xlu2 %1891 }
 0x31b   :  { %v1708_v16 = vadd.f32 %v1692_v1, %v9424_v28  ;;  %v1709_v58 = vadd.f32 %v1693_v19, %v9433_v11  ;;  %7449 = vpow2.f32 %v1992_v51  ;;  %v1855_v6 = vmul.f32 %v9101_v4, %v1846_v60 }
 0x31c   :  { %v1964_v33 = vmin.f32 %v9510_v30, 0.0  ;;  %v1791_v14 = vadd.f32 %v13314_v21, %v1710_v24  ;;  %v1965_v57 = vmin.f32 %v9513_v42, 0.0  ;;  %v1792_v17 = vadd.f32 %v13316_v0, %v1711_v3 }
 0x31d   :  { %v1789_v12 = vadd.f32 %v13317_v35, %v1708_v16  ;;  %v1790_v36 = vadd.f32 %v13318_v10, %v1709_v58  ;;  %v1974_v23 = vmul.f32 1.442695, %v1954_v7  ;;  %v1976_v51 = vmul.f32 1.442695, %v1955_v62 }
 0x31e   :  { %v1900_v13 = vpop.permute.xlu0 %1899  ;;  %v1824_v32 = vpop.permute.xlu1 %1823  ;;  %v1994_v44 = vmul.f32 1.442695, %v1964_v33  ;;  %v1996_v38 = vmul.f32 1.442695, %v1965_v57  ;;  %v6357_v3 = vadd.f32 -1.0, %v7442_v31  ;;  %vm1946_vm7 = vcmp.gt.f32.partialorder %v9464_v34, 0.0 }
 0x31f   :  { %v9523_v29 = vadd.f32 %v1900_v13, %v1876_v9  ;;  %v9525_v28 = vadd.f32 %v1900_v13, %v1877_v47  ;;  %v1839_v11 = vsel %vm644_vm14, %v13315_v41, %v1824_v32  ;;  %v1847_v37 = vsel %vm644_vm14, %v1824_v32, %v13315_v41  ;;  %v7444_v9 = vpop.eup %7443 }
 0x320   :  { %v1856_v25 = vmul.f32 %v9089_v56, %v1839_v11  ;;  %v1857_v54 = vmul.f32 %v9101_v4, %v1847_v37  ;;  %v7446_v46 = vpop.eup %7445  ;;  %7451 = vpow2.f32 %v1994_v44  ;;  %v1870_v16 = vadd.f32 %v1854_v22, %v1789_v12 }
 0x321   :  { %v1956_v47 = vmin.f32 %v9523_v29, 0.0  ;;  %v1957_v55 = vmin.f32 %v9525_v28, 0.0  ;;  %v7448_v43 = vpop.eup %7447  ;;  %7453 = vpow2.f32 %v1996_v38  ;;  %v1871_v58 = vadd.f32 %v1855_v6, %v1790_v36 }
 0x322   :  { %v1872_v18 = vadd.f32 %v1856_v25, %v1791_v14  ;;  %v1873_v1 = vadd.f32 %v1857_v54, %v1792_v17  ;;  %v7450_v19 = vpop.eup %7449  ;;  %vm1947_vm8 = vcmp.gt.f32.partialorder %v9467_v26, 0.0  ;;  %vm1945_vm9 = vcmp.gt.f32.partialorder %v9452_v2, 0.0 }
 0x323   :  { %v1978_v52 = vmul.f32 1.442695, %v1956_v47  ;;  %v1980_v24 = vmul.f32 1.442695, %v1957_v55  ;;  %v6360_v31 = vadd.f32 -1.0, %v7448_v43  ;;  %v6358_v22 = vadd.f32 -1.0, %v7444_v9 }
 0x324   :  { %v9541_v8 = vadd.f32 %v1892_v49, %v1872_v18  ;;  %v9547_v7 = vadd.f32 %v1892_v49, %v1873_v1  ;;  %vm1948_vm11 = vcmp.gt.f32.partialorder %v9510_v30, 0.0  ;;  %v6361_v57 = vadd.f32 -1.0, %v7450_v19 }
 0x325   :  { %7455 = vpow2.f32 %v1978_v52  ;;  %vm1949_vm12 = vcmp.gt.f32.partialorder %v9513_v42, 0.0  ;;  %v6359_v37 = vadd.f32 -1.0, %v7446_v46  ;;  %v2026_v47 = vsel %vm1946_vm7, %v9464_v34, %v6360_v31 }
 0x326   :  { %7457 = vpow2.f32 %v1980_v24  ;;  %v1888_v60 = vpop.permute.xlu1 %1887  ;;  %v1952_v13 = vmin.f32 %v9541_v8, 0.0  ;;  %v7452_v32 = vpop.eup %7451  ;;  %v1953_v12 = vmin.f32 %v9547_v7, 0.0  ;;  %v2024_v10 = vsel %vm1944_vm5, %v9438_v40, %v6358_v22 }
 0x327   :  { %7459 = vpow2.f32 %v1974_v23  ;;  %v9549_v33 = vadd.f32 %v1888_v60, %v1870_v16  ;;  %v9551_v62 = vadd.f32 %v1888_v60, %v1871_v58  ;;  %v7454_v41 = vpop.eup %7453  ;;  %v6362_v11 = vadd.f32 -1.0, %v7452_v32 }
 0x328   :  { %7461 = vpow2.f32 %v1976_v51  ;;  %v1970_v0 = vmul.f32 1.442695, %v1952_v13  ;;  %v6363_v35 = vadd.f32 -1.0, %v7454_v41  ;;  %v2027_v46 = vsel %vm1947_vm8, %v9467_v26, %v6361_v57  ;;  %v7228_v57 = vld [vmem:[%s12939_s2 + $0x128] sm:$0xff] }
 0x329   :  { %v1950_v21 = vmin.f32 %v9549_v33, 0.0  ;;  %v1951_v14 = vmin.f32 %v9551_v62, 0.0  ;;  %v2028_v55 = vsel %vm1948_vm11, %v9510_v30, %v6362_v11  ;;  %v1972_v18 = vmul.f32 1.442695, %v1953_v12  ;;  %v7559_v11 = vld [vmem:[%s12938_s5 + $0x38] sm:$0xff] }
 0x32a   :  { %7463 = vpow2.f32 %v1970_v0  ;;  %v2101_v44 = vpack.c.bf16 %v2028_v55, %v2026_v47  ;;  %v2029_v6 = vsel %vm1949_vm12, %v9513_v42, %v6363_v35  ;;  %v2025_v40 = vsel %vm1945_vm9, %v9452_v2, %v6359_v37  ;;  %v7560_v37 = vld [vmem:[%s12938_s5 + $0x30] sm:$0xff]  ;;  %v7561_v0 = vld [vmem:[%s12938_s5 + $0x28] sm:$0xff]  ;;  %v7231_v35 = vld [vmem:[%s12939_s2 + $0x140] sm:$0xff] }
 0x32b   :  { %v7456_v17 = vpop.eup %7455  ;;  %v1966_v25 = vmul.f32 1.442695, %v1950_v21  ;;  %v1968_v54 = vmul.f32 1.442695, %v1951_v14  ;;  %v2102_v34 = vpack.c.bf16 %v2029_v6, %v2027_v46  ;;  %v2022_v26 = vsel %vm1942_vm15, %v9367_v63, %v9476_v15  ;;  %v7223_v14 = vld [vmem:[%s12939_s2 + $0x100] sm:$0xff] }
 0x32c   :  { %v7458_v9 = vpop.eup %7457  ;;  %v6354_v30 = vadd.f32 -1.0, %v7456_v17  ;;  %2363 = vmatpush.bf16.msrb.mxu2 %v2101_v44  ;;  %v2099_v43 = vpack.c.bf16 %v2024_v10, %v2022_v26  ;;  %v2023_v49 = vsel %vm1943_vm3, %v9407_v20, %v6357_v3  ;;  %vm1940_vm5 = vcmp.gt.f32.partialorder %v9523_v29, 0.0  ;;  %v7562_v17 = vld [vmem:[%s12938_s5 + $0x20] sm:$0xff]  ;;  %v7232_v10 = vld [vmem:[%s12939_s2 + $0x148] sm:$0xff] }
 0x32d   :  { %v7460_v36 = vpop.eup %7459  ;;  %7465 = vpow2.f32 %v1966_v25  ;;  %v6355_v38 = vadd.f32 -1.0, %v7458_v9  ;;  %2532 = vmatpush.bf16.msrb.mxu3 %v2102_v34  ;;  %v2100_v1 = vpack.c.bf16 %v2025_v40, %v2023_v49  ;;  %vm1941_vm7 = vcmp.gt.f32.partialorder %v9525_v28, 0.0  ;;  %v7229_v25 = vld [vmem:[%s12939_s2 + $0x130] sm:$0xff] }
 0x32e   :  { %v7462_v23 = vpop.eup %7461  ;;  %7467 = vpow2.f32 %v1968_v54  ;;  %v6352_v42 = vadd.f32 -1.0, %v7460_v36  ;;  %v2020_v19 = vsel %vm1940_vm5, %v9523_v29, %v6354_v30  ;;  %vm1938_vm8 = vcmp.gt.f32.partialorder %v9481_v27, 0.0  ;;  %v7230_v54 = vld [vmem:[%s12939_s2 + $0x138] sm:$0xff] }
 0x32f   :  { %7469 = vpow2.f32 %v1972_v18  ;;  %v6353_v52 = vadd.f32 -1.0, %v7462_v23  ;;  %v2021_v63 = vsel %vm1941_vm7, %v9525_v28, %v6355_v38  ;;  %vm1939_vm9 = vcmp.gt.f32.partialorder %v9483_v39, 0.0  ;;  %v7233_v23 = vld [vmem:[%s12939_s2 + $0x150] sm:$0xff]  ;;  %v7234_v38 = vld [vmem:[%s12939_s2 + $0x158] sm:$0xff] }
 0x330   :  { %v7464_v24 = vpop.eup %7463  ;;  %2364 = vmatpush.bf16.msrb.mxu2 %v2099_v43  ;;  %v2018_v20 = vsel %vm1938_vm8, %v9481_v27, %v6352_v42  ;;  %vm1936_vm11 = vcmp.gt.f32.partialorder %v9541_v8, 0.0  ;;  %vm1934_vm12 = vcmp.gt.f32.partialorder %v9549_v33, 0.0  ;;  %vm1935_vm15 = vcmp.gt.f32.partialorder %v9551_v62, 0.0 }
 0x331   :  { %v6350_v15 = vadd.f32 -1.0, %v7464_v24  ;;  %2533 = vmatpush.bf16.msrb.mxu3 %v2100_v1  ;;  %v2097_v16 = vpack.c.bf16 %v2020_v19, %v2018_v20  ;;  %v2019_v29 = vsel %vm1939_vm9, %v9483_v39, %v6353_v52  ;;  %vm1937_vm3 = vcmp.gt.f32.partialorder %v9547_v7, 0.0  ;;  %v7235_v52 = vld [vmem:[%s12939_s2 + $0x160] sm:$0xff] }
 0x332   :  { %v2098_v31 = vpack.c.bf16 %v2021_v63, %v2019_v29  ;;  %v7587_v41 = vmov 2   ;;  %v7236_v63 = vld [vmem:[%s12939_s2 + $0x168] sm:$0xff] }
 0x333   :  { %v7466_v2 = vpop.eup %7465  ;;  %v2016_v22 = vsel %vm1936_vm11, %v9541_v8, %v6350_v15  ;;  %v7224_v8 = vld [vmem:[%s12939_s2 + $0x108] sm:$0xff]  ;;  %7396 = vset.pattern.permute.xlu2 %v7587_v41  ;;  %7395 = vset.pattern.permute.xlu1 %v7587_v41 }
 0x334   :  { %v7468_v51 = vpop.eup %7467  ;;  %v6348_v3 = vadd.f32 -1.0, %v7466_v2  ;;  %2365 = vmatpush.bf16.msrb.mxu2 %v2097_v16  ;;  %3286 = vperm.xlu2 %7396, %v7559_v11   ;;  %v7237_v16 = vld [vmem:[%s12939_s2 + $0x170] sm:$0xff] }
 0x335   :  { %v6349_v58 = vadd.f32 -1.0, %v7468_v51  ;;  %v7470_v60 = vpop.eup %7469  ;;  %2534 = vmatpush.bf16.msrb.mxu3 %v2098_v31  ;;  %3282 = vperm.xlu1 %7395, %v7560_v37   ;;  %v7241_v37 = vld [vmem:[%s12939_s2 + $0x190] sm:$0xff] }
 0x336   :  { %v2014_v28 = vsel %vm1934_vm12, %v9549_v33, %v6348_v3  ;;  %v6351_v13 = vadd.f32 -1.0, %v7470_v60  ;;  %v7226_v33 = vld [vmem:[%s12939_s2 + $0x118] sm:$0xff]  ;;  %7397 = vset.pattern.permute.xlu0 %v7587_v41 }
 0x337   :  { %v2095_v27 = vpack.c.bf16 %v2016_v22, %v2014_v28  ;;  %v2015_v32 = vsel %vm1935_vm15, %v9551_v62, %v6349_v58  ;;  %v7227_v62 = vld [vmem:[%s12939_s2 + $0x120] sm:$0xff]  ;;  %v7238_v28 = vld [vmem:[%s12939_s2 + $0x178] sm:$0xff] }
 0x338   :  { %v2017_v39 = vsel %vm1937_vm3, %v9547_v7, %v6351_v13  ;;  %v7225_v7 = vld [vmem:[%s12939_s2 + $0x110] sm:$0xff] }
 0x339   :  { %v2096_v21 = vpack.c.bf16 %v2017_v39, %v2015_v32  ;;  %2366 = vmatpush.bf16.msrb.mxu2 %v2095_v27  ;;  %v7239_v39 = vld [vmem:[%s12939_s2 + $0x180] sm:$0xff] }
 0x33b   :  { %2535 = vmatpush.bf16.msrb.mxu3 %v2096_v21 }
 0x33c   :  { %6556 = vmatmul.msk.bf16.vlgmr.msrb.gmra.mxu2 %vm884_vm0, %v7223_v14  ;;  %3278 = vperm.xlu2 %7396, %v7561_v0  }
 0x33d   :  { %3274 = vperm.xlu1 %7395, %v7562_v17  }
 0x33e   :  { %6588 = vmatmul.msk.bf16.vlgmr.msrb.gmra.mxu3 %vm884_vm0, %v7223_v14 }
 0x34c   :  { %6557 = vmatmul.msk.bf16.gmra.mxu2 %vm884_vm0, %v7224_v8 }
 0x34e   :  { %6589 = vmatmul.msk.bf16.gmra.mxu3 %vm884_vm0, %v7224_v8 }
 0x35c   :  { %6558 = vmatmul.msk.bf16.gmra.mxu2 %vm884_vm0, %v7225_v7 }
 0x35e   :  { %6590 = vmatmul.msk.bf16.gmra.mxu3 %vm884_vm0, %v7225_v7 }
 0x36c   :  { %6559 = vmatmul.msk.bf16.gmra.mxu2 %vm884_vm0, %v7226_v33 }
 0x36e   :  { %6591 = vmatmul.msk.bf16.gmra.mxu3 %vm884_vm0, %v7226_v33  ;;  %v7240_v33 = vld [vmem:[%s12939_s2 + $0x188] sm:$0xff] }
 0x37c   :  { %6560 = vmatmul.msk.bf16.gmra.mxu2 %vm884_vm0, %v7227_v62 }
 0x37e   :  { %6592 = vmatmul.msk.bf16.gmra.mxu3 %vm884_vm0, %v7227_v62 }
 0x38c   :  { %6561 = vmatmul.msk.bf16.gmra.mxu2 %vm884_vm0, %v7228_v57 }
 0x38e   :  { %6593 = vmatmul.msk.bf16.gmra.mxu3 %vm884_vm0, %v7228_v57 }
 0x39c   :  { %6562 = vmatmul.msk.bf16.gmra.mxu2 %vm884_vm0, %v7229_v25 }
 0x39e   :  { %6594 = vmatmul.msk.bf16.gmra.mxu3 %vm884_vm0, %v7229_v25 }
 0x3ac   :  { %6563 = vmatmul.msk.bf16.gmra.mxu2 %vm884_vm0, %v7230_v54 }
 0x3ae   :  { %6595 = vmatmul.msk.bf16.gmra.mxu3 %vm884_vm0, %v7230_v54 }
 0x3bc   :  { %6564 = vmatmul.msk.bf16.gmra.mxu2 %vm884_vm0, %v7231_v35 }
 0x3be   :  { %6596 = vmatmul.msk.bf16.gmra.mxu3 %vm884_vm0, %v7231_v35  ;;  %v7242_v35 = vld [vmem:[%s12939_s2 + $0x198] sm:$0xff] }
 0x3bf   :  { %v2368_v12 = vpop.f32.mrf.mxu2 }
 0x3c0   :  { %2697 = vrot.lane.b32.xlu0 %v2368_v12, %s7579_s10 }
 0x3c1   :  { %v2537_v9 = vpop.f32.mrf.mxu3 }
 0x3c2   :  { %2713 = vrot.lane.b32.xlu2 %v2537_v9, %s7579_s10 }
 0x3c7   :  { %v2370_v47 = vpop.f32.mrf.mxu2 }
 0x3c8   :  { %2699 = vrot.lane.b32.xlu1 %v2370_v47, %s7579_s10 }
 0x3c9   :  { %v2539_v55 = vpop.f32.mrf.mxu3 }
 0x3ca   :  { %2715 = vrot.lane.b32.xlu0 %v2539_v55, %s7579_s10 }
 0x3cc   :  { %6565 = vmatmul.msk.bf16.gmra.mxu2 %vm884_vm0, %v7232_v10 }
 0x3ce   :  { %6597 = vmatmul.msk.bf16.gmra.mxu3 %vm884_vm0, %v7232_v10  ;;  %v7243_v10 = vld [vmem:[%s12939_s2 + $0x1a0] sm:$0xff] }
 0x3cf   :  { %v2373_v36 = vpop.f32.mrf.mxu2 }
 0x3d1   :  { %v2542_v44 = vpop.f32.mrf.mxu3 }
 0x3d2   :  { %2701 = vrot.lane.b32.xlu0 %v2373_v36, %s7579_s10  ;;  %2717 = vrot.lane.b32.xlu2 %v2542_v44, %s7579_s10 }
 0x3d7   :  { %v2375_v46 = vpop.f32.mrf.mxu2 }
 0x3d8   :  { %2703 = vrot.lane.b32.xlu1 %v2375_v46, %s7579_s10 }
 0x3d9   :  { %v2544_v6 = vpop.f32.mrf.mxu3 }
 0x3da   :  { %2719 = vrot.lane.b32.xlu0 %v2544_v6, %s7579_s10 }
 0x3dc   :  { %6566 = vmatmul.msk.bf16.gmra.mxu2 %vm884_vm0, %v7233_v23 }
 0x3de   :  { %6598 = vmatmul.msk.bf16.gmra.mxu3 %vm884_vm0, %v7233_v23  ;;  %v7244_v23 = vld [vmem:[%s12939_s2 + $0x1a8] sm:$0xff] }
 0x3df   :  { %v2378_v34 = vpop.f32.mrf.mxu2 }
 0x3e0   :  { %2705 = vrot.lane.b32.xlu2 %v2378_v34, %s7579_s10 }
 0x3e1   :  { %v2547_v30 = vpop.f32.mrf.mxu3 }
 0x3e2   :  { %2721 = vrot.lane.b32.xlu1 %v2547_v30, %s7579_s10 }
 0x3e7   :  { %v2380_v18 = vpop.f32.mrf.mxu2 }
 0x3e8   :  { %2707 = vrot.lane.b32.xlu0 %v2380_v18, %s7579_s10 }
 0x3e9   :  { %v2549_v40 = vpop.f32.mrf.mxu3 }
 0x3ea   :  { %2723 = vrot.lane.b32.xlu2 %v2549_v40, %s7579_s10 }
 0x3ec   :  { %6567 = vmatmul.msk.bf16.gmra.mxu2 %vm884_vm0, %v7234_v38 }
 0x3ee   :  { %6599 = vmatmul.msk.bf16.gmra.mxu3 %vm884_vm0, %v7234_v38  ;;  %v7245_v38 = vld [vmem:[%s12939_s2 + $0x1b0] sm:$0xff] }
 0x3ef   :  { %v2383_v26 = vpop.f32.mrf.mxu2 }
 0x3f0   :  { %2709 = vrot.lane.b32.xlu0 %v2383_v26, %s7579_s10 }
 0x3f1   :  { %v2552_v42 = vpop.f32.mrf.mxu3 }
 0x3f2   :  { %2725 = vrot.lane.b32.xlu2 %v2552_v42, %s7579_s10 }
 0x3f7   :  { %v2385_v43 = vpop.f32.mrf.mxu2 }
 0x3f8   :  { %2711 = vrot.lane.b32.xlu1 %v2385_v43, %s7579_s10 }
 0x3f9   :  { %v2554_v49 = vpop.f32.mrf.mxu3 }
 0x3fa   :  { %2727 = vrot.lane.b32.xlu0 %v2554_v49, %s7579_s10 }
 0x3fc   :  { %6568 = vmatmul.msk.bf16.gmra.mxu2 %vm884_vm0, %v7235_v52 }
 0x3fe   :  { %6600 = vmatmul.msk.bf16.gmra.mxu3 %vm884_vm0, %v7235_v52  ;;  %v7246_v52 = vld [vmem:[%s12939_s2 + $0x1b8] sm:$0xff] }
 0x3ff   :  { %v2388_v24 = vpop.f32.mrf.mxu2 }
 0x400   :  { %2777 = vrot.lane.b32.xlu1 %v2388_v24, %s7582_s27 }
 0x401   :  { %v2557_v1 = vpop.f32.mrf.mxu3 }
 0x402   :  { %2793 = vrot.lane.b32.xlu0 %v2557_v1, %s7582_s27 }
 0x407   :  { %v2390_v19 = vpop.f32.mrf.mxu2 }
 0x408   :  { %2779 = vrot.lane.b32.xlu2 %v2390_v19, %s7582_s27 }
 0x409   :  { %v2559_v2 = vpop.f32.mrf.mxu3 }
 0x40a   :  { %2795 = vrot.lane.b32.xlu1 %v2559_v2, %s7582_s27 }
 0x40c   :  { %6569 = vmatmul.msk.bf16.gmra.mxu2 %vm884_vm0, %v7236_v63 }
 0x40e   :  { %6601 = vmatmul.msk.bf16.gmra.mxu3 %vm884_vm0, %v7236_v63  ;;  %v7247_v63 = vld [vmem:[%s12939_s2 + $0x1c0] sm:$0xff] }
 0x40f   :  { %v2393_v15 = vpop.f32.mrf.mxu2 }
 0x410   :  { %2781 = vrot.lane.b32.xlu0 %v2393_v15, %s7582_s27 }
 0x411   :  { %v2562_v51 = vpop.f32.mrf.mxu3 }
 0x412   :  { %2797 = vrot.lane.b32.xlu2 %v2562_v51, %s7582_s27 }
 0x417   :  { %v2395_v20 = vpop.f32.mrf.mxu2 }
 0x418   :  { %2783 = vrot.lane.b32.xlu1 %v2395_v20, %s7582_s27 }
 0x419   :  { %v2564_v3 = vpop.f32.mrf.mxu3 }
 0x41a   :  { %2799 = vrot.lane.b32.xlu0 %v2564_v3, %s7582_s27 }
 0x41c   :  { %6570 = vmatmul.msk.bf16.gmra.mxu2 %vm884_vm0, %v7237_v16 }
 0x41e   :  { %6602 = vmatmul.msk.bf16.gmra.mxu3 %vm884_vm0, %v7237_v16  ;;  %v7248_v16 = vld [vmem:[%s12939_s2 + $0x1c8] sm:$0xff] }
 0x41f   :  { %v2398_v29 = vpop.f32.mrf.mxu2 }
 0x420   :  { %2785 = vrot.lane.b32.xlu1 %v2398_v29, %s7582_s27 }
 0x421   :  { %v2567_v58 = vpop.f32.mrf.mxu3 }
 0x422   :  { %2801 = vrot.lane.b32.xlu0 %v2567_v58, %s7582_s27 }
 0x427   :  { %v2400_v60 = vpop.f32.mrf.mxu2 }
 0x428   :  { %2787 = vrot.lane.b32.xlu2 %v2400_v60, %s7582_s27  ;;  %v9824_v60 = vpop.permute.xlu2 %3286 }
 0x429   :  { %v2569_v31 = vpop.f32.mrf.mxu3  ;;  %13321 = vst [vmem:[#allocation18_spill] sm:$0xff] %v9824_v60 }
 0x42a   :  { %2803 = vrot.lane.b32.xlu1 %v2569_v31, %s7582_s27 }
 0x42c   :  { %6571 = vmatmul.msk.bf16.gmra.mxu2 %vm884_vm0, %v7238_v28 }
 0x42e   :  { %6603 = vmatmul.msk.bf16.gmra.mxu3 %vm884_vm0, %v7238_v28  ;;  %v9826_v28 = vpop.permute.xlu1 %3282 }
 0x42f   :  { %v2403_v22 = vpop.f32.mrf.mxu2  ;;  %13322 = vst [vmem:[#allocation20_spill] sm:$0xff] %v9826_v28 }
 0x431   :  { %v2572_v27 = vpop.f32.mrf.mxu3 }
 0x432   :  { %2805 = vrot.lane.b32.xlu0 %v2572_v27, %s7582_s27  ;;  %2789 = vrot.lane.b32.xlu1 %v2403_v22, %s7582_s27  ;;  %v7249_v27 = vld [vmem:[%s12939_s2 + $0x1d0] sm:$0xff] }
 0x437   :  { %v2405_v13 = vpop.f32.mrf.mxu2 }
 0x438   :  { %2791 = vrot.lane.b32.xlu2 %v2405_v13, %s7582_s27  ;;  %v9835_v13 = vpop.permute.xlu2 %3278 }
 0x439   :  { %v2574_v32 = vpop.f32.mrf.mxu3  ;;  %13323 = vst [vmem:[#allocation16_spill] sm:$0xff] %v9835_v13 }
 0x43a   :  { %2807 = vrot.lane.b32.xlu1 %v2574_v32, %s7582_s27 }
 0x43c   :  { %6572 = vmatmul.msk.bf16.gmra.mxu2 %vm884_vm0, %v7239_v39 }
 0x43e   :  { %6604 = vmatmul.msk.bf16.gmra.mxu3 %vm884_vm0, %v7239_v39 }
 0x43f   :  { %v2408_v21 = vpop.f32.mrf.mxu2 }
 0x441   :  { %v2577_v14 = vpop.f32.mrf.mxu3 }
 0x442   :  { %2873 = vrot.lane.b32.xlu0 %v2577_v14, %s7583_s16  ;;  %2857 = vrot.lane.b32.xlu1 %v2408_v21, %s7583_s16  ;;  %v9839_v21 = vpop.permute.xlu1 %3274  ;;  %v9841_v14 = vpop.permute.xlu0 %2697 }
 0x443   :  { %13324 = vst [vmem:[#allocation29_spill] sm:$0xff] %v9839_v21 }
 0x447   :  { %v2410_v8 = vpop.f32.mrf.mxu2 }
 0x448   :  { %2859 = vrot.lane.b32.xlu2 %v2410_v8, %s7583_s16 }
 0x449   :  { %v2579_v7 = vpop.f32.mrf.mxu3 }
 0x44a   :  { %2875 = vrot.lane.b32.xlu1 %v2579_v7, %s7583_s16 }
 0x44c   :  { %6573 = vmatmul.msk.bf16.gmra.mxu2 %vm884_vm0, %v7240_v33 }
 0x44e   :  { %6605 = vmatmul.msk.bf16.gmra.mxu3 %vm884_vm0, %v7240_v33  ;;  %v7250_v33 = vld [vmem:[%s12939_s2 + $0x1d8] sm:$0xff] }
 0x44f   :  { %v2413_v62 = vpop.f32.mrf.mxu2 }
 0x451   :  { %v2582_v57 = vpop.f32.mrf.mxu3 }
 0x452   :  { %2877 = vrot.lane.b32.xlu0 %v2582_v57, %s7583_s16  ;;  %2861 = vrot.lane.b32.xlu1 %v2413_v62, %s7583_s16  ;;  %v9847_v62 = vpop.permute.xlu2 %2713  ;;  %v9850_v57 = vpop.permute.xlu1 %2699 }
 0x457   :  { %v2415_v41 = vpop.f32.mrf.mxu2 }
 0x458   :  { %2863 = vrot.lane.b32.xlu2 %v2415_v41, %s7583_s16  ;;  %v9854_v41 = vpop.permute.xlu0 %2715 }
 0x459   :  { %v2584_v11 = vpop.f32.mrf.mxu3 }
 0x45a   :  { %2879 = vrot.lane.b32.xlu1 %v2584_v11, %s7583_s16 }
 0x45c   :  { %6574 = vmatmul.msk.bf16.gmra.mxu2 %vm884_vm0, %v7241_v37 }
 0x45e   :  { %6606 = vmatmul.msk.bf16.gmra.mxu3 %vm884_vm0, %v7241_v37 }
 0x45f   :  { %v2418_v0 = vpop.f32.mrf.mxu2 }
 0x461   :  { %v2587_v17 = vpop.f32.mrf.mxu3 }
 0x462   :  { %2881 = vrot.lane.b32.xlu0 %v2587_v17, %s7583_s16  ;;  %2865 = vrot.lane.b32.xlu1 %v2418_v0, %s7583_s16  ;;  %v9857_v0 = vpop.permute.xlu2 %2717  ;;  %v9860_v17 = vpop.permute.xlu1 %2703 }
 0x467   :  { %v2420_v25 = vpop.f32.mrf.mxu2 }
 0x468   :  { %2867 = vrot.lane.b32.xlu2 %v2420_v25, %s7583_s16 }
 0x469   :  { %v2589_v54 = vpop.f32.mrf.mxu3 }
 0x46a   :  { %2883 = vrot.lane.b32.xlu1 %v2589_v54, %s7583_s16  ;;  %v9862_v54 = vpop.permute.xlu0 %2701 }
 0x46c   :  { %6575 = vmatmul.msk.bf16.gmra.mxu2 %vm884_vm0, %v7242_v35 }
 0x46e   :  { %6607 = vmatmul.msk.bf16.gmra.mxu3 %vm884_vm0, %v7242_v35 }
 0x46f   :  { %v2423_v12 = vpop.f32.mrf.mxu2 }
 0x470   :  { %2869 = vrot.lane.b32.xlu0 %v2423_v12, %s7583_s16  ;;  %v7251_v12 = vld [vmem:[%s12939_s2 + $0x1e0] sm:$0xff] }
 0x471   :  { %v2592_v9 = vpop.f32.mrf.mxu3 }
 0x472   :  { %2885 = vrot.lane.b32.xlu2 %v2592_v9, %s7583_s16  ;;  %v9868_v9 = vpop.permute.xlu2 %2705 }
 0x477   :  { %v2425_v47 = vpop.f32.mrf.mxu2 }
 0x478   :  { %2871 = vrot.lane.b32.xlu1 %v2425_v47, %s7583_s16  ;;  %v9873_v47 = vpop.permute.xlu1 %2721 }
 0x479   :  { %v2594_v55 = vpop.f32.mrf.mxu3 }
 0x47a   :  { %2887 = vrot.lane.b32.xlu0 %v2594_v55, %s7583_s16 }
 0x47c   :  { %6576 = vmatmul.msk.bf16.gmra.mxu2 %vm884_vm0, %v7243_v10 }
 0x47e   :  { %6608 = vmatmul.msk.bf16.gmra.mxu3 %vm884_vm0, %v7243_v10 }
 0x47f   :  { %v9761_v36 = vpop.f32.mrf.mxu2 }
 0x481   :  { %v9763_v44 = vpop.f32.mrf.mxu3 }
 0x487   :  { %v9765_v46 = vpop.f32.mrf.mxu2 }
 0x489   :  { %v9767_v6 = vpop.f32.mrf.mxu3 }
 0x48c   :  { %6577 = vmatmul.msk.bf16.gmra.mxu2 %vm884_vm0, %v7244_v23 }
 0x48e   :  { %6609 = vmatmul.msk.bf16.gmra.mxu3 %vm884_vm0, %v7244_v23  ;;  %v9877_v23 = vpop.permute.xlu0 %2719 }
 0x48f   :  { %v9774_v34 = vpop.f32.mrf.mxu2 }
 0x491   :  { %v9776_v30 = vpop.f32.mrf.mxu3 }
 0x497   :  { %v9778_v18 = vpop.f32.mrf.mxu2 }
 0x499   :  { %v9780_v40 = vpop.f32.mrf.mxu3 }
 0x49c   :  { %6578 = vmatmul.msk.bf16.gmra.mxu2 %vm884_vm0, %v7245_v38 }
 0x49e   :  { %6610 = vmatmul.msk.bf16.gmra.mxu3 %vm884_vm0, %v7245_v38  ;;  %v9879_v38 = vpop.permute.xlu2 %2723 }
 0x49f   :  { %v9787_v26 = vpop.f32.mrf.mxu2 }
 0x4a1   :  { %v9789_v42 = vpop.f32.mrf.mxu3 }
 0x4a7   :  { %v9791_v43 = vpop.f32.mrf.mxu2 }
 0x4a9   :  { %v9793_v49 = vpop.f32.mrf.mxu3 }
 0x4ac   :  { %6579 = vmatmul.msk.bf16.gmra.mxu2 %vm884_vm0, %v7246_v52 }
 0x4ae   :  { %6611 = vmatmul.msk.bf16.gmra.mxu3 %vm884_vm0, %v7246_v52  ;;  %v9881_v52 = vpop.permute.xlu1 %2711 }
 0x4af   :  { %v9800_v24 = vpop.f32.mrf.mxu2 }
 0x4b1   :  { %v9802_v1 = vpop.f32.mrf.mxu3 }
 0x4b7   :  { %v9804_v19 = vpop.f32.mrf.mxu2 }
 0x4b8   :  { %13319 = vst [vmem:[#allocation32_spill] sm:$0xff] %v9804_v19 }
 0x4b9   :  { %v9806_v2 = vpop.f32.mrf.mxu3 }
 0x4ba   :  { %13320 = vst [vmem:[#allocation25_spill] sm:$0xff] %v9806_v2 }
 0x4bc   :  { %6580 = vmatmul.msk.bf16.gmra.mxu2 %vm884_vm0, %v7247_v63 }
 0x4be   :  { %6612 = vmatmul.msk.bf16.gmra.mxu3 %vm884_vm0, %v7247_v63 }
 0x4bf   :  { %v2448_v15 = vpop.f32.mrf.mxu2 }
 0x4c0   :  { %2937 = vrot.lane.b32.xlu0 %v2448_v15, %s7585_s22 }
 0x4c1   :  { %v2617_v51 = vpop.f32.mrf.mxu3 }
 0x4c2   :  { %2953 = vrot.lane.b32.xlu2 %v2617_v51, %s7585_s22  ;;  %v7252_v51 = vld [vmem:[%s12939_s2 + $0x1e8] sm:$0xff] }
 0x4c7   :  { %v2450_v20 = vpop.f32.mrf.mxu2 }
 0x4c8   :  { %2939 = vrot.lane.b32.xlu1 %v2450_v20, %s7585_s22  ;;  %v9888_v20 = vpop.permute.xlu0 %2707 }
 0x4c9   :  { %v2619_v3 = vpop.f32.mrf.mxu3 }
 0x4ca   :  { %2955 = vrot.lane.b32.xlu0 %v2619_v3, %s7585_s22  ;;  %v9890_v3 = vpop.permute.xlu2 %2725 }
 0x4cc   :  { %6581 = vmatmul.msk.bf16.gmra.mxu2 %vm884_vm0, %v7248_v16 }
 0x4ce   :  { %6613 = vmatmul.msk.bf16.gmra.mxu3 %vm884_vm0, %v7248_v16 }
 0x4cf   :  { %v2453_v29 = vpop.f32.mrf.mxu2 }
 0x4d0   :  { %2941 = vrot.lane.b32.xlu2 %v2453_v29, %s7585_s22  ;;  %v9894_v29 = vpop.permute.xlu1 %2777 }
 0x4d1   :  { %v2622_v58 = vpop.f32.mrf.mxu3 }
 0x4d2   :  { %2957 = vrot.lane.b32.xlu1 %v2622_v58, %s7585_s22 }
 0x4d7   :  { %v2455_v31 = vpop.f32.mrf.mxu2 }
 0x4d8   :  { %2943 = vrot.lane.b32.xlu0 %v2455_v31, %s7585_s22  ;;  %v9898_v31 = vpop.permute.xlu2 %2779 }
 0x4d9   :  { %v2624_v22 = vpop.f32.mrf.mxu3 }
 0x4da   :  { %2959 = vrot.lane.b32.xlu2 %v2624_v22, %s7585_s22  ;;  %v9900_v22 = vpop.permute.xlu0 %2709 }
 0x4dc   :  { %6582 = vmatmul.msk.bf16.gmra.mxu2 %vm884_vm0, %v7249_v27 }
 0x4de   :  { %6614 = vmatmul.msk.bf16.gmra.mxu3 %vm884_vm0, %v7249_v27 }
 0x4df   :  { %v2458_v32 = vpop.f32.mrf.mxu2 }
 0x4e0   :  { %2945 = vrot.lane.b32.xlu1 %v2458_v32, %s7585_s22 }
 0x4e1   :  { %v2627_v39 = vpop.f32.mrf.mxu3 }
 0x4e2   :  { %2961 = vrot.lane.b32.xlu0 %v2627_v39, %s7585_s22  ;;  %v7253_v39 = vld [vmem:[%s12939_s2 + $0x1f0] sm:$0xff] }
 0x4e7   :  { %v2460_v8 = vpop.f32.mrf.mxu2 }
 0x4e8   :  { %2947 = vrot.lane.b32.xlu2 %v2460_v8, %s7585_s22  ;;  %v9907_v8 = vpop.permute.xlu1 %2795 }
 0x4e9   :  { %v2629_v7 = vpop.f32.mrf.mxu3 }
 0x4ea   :  { %2963 = vrot.lane.b32.xlu1 %v2629_v7, %s7585_s22  ;;  %v9909_v7 = vpop.permute.xlu2 %2797 }
 0x4ec   :  { %6583 = vmatmul.msk.bf16.gmra.mxu2 %vm884_vm0, %v7250_v33 }
 0x4ee   :  { %6615 = vmatmul.msk.bf16.gmra.mxu3 %vm884_vm0, %v7250_v33  ;;  %v9913_v33 = vpop.permute.xlu0 %2727 }
 0x4ef   :  { %v2463_v11 = vpop.f32.mrf.mxu2 }
 0x4f0   :  { %2949 = vrot.lane.b32.xlu2 %v2463_v11, %s7585_s22 }
 0x4f1   :  { %v2632_v37 = vpop.f32.mrf.mxu3 }
 0x4f2   :  { %2965 = vrot.lane.b32.xlu1 %v2632_v37, %s7585_s22 }
 0x4f7   :  { %v2465_v25 = vpop.f32.mrf.mxu2 }
 0x4f8   :  { %2951 = vrot.lane.b32.xlu0 %v2465_v25, %s7585_s22  ;;  %v9917_v25 = vpop.permute.xlu1 %2783 }
 0x4f9   :  { %v2634_v35 = vpop.f32.mrf.mxu3 }
 0x4fa   :  { %2967 = vrot.lane.b32.xlu2 %v2634_v35, %s7585_s22  ;;  %v9919_v35 = vpop.permute.xlu2 %2787 }
 0x4fc   :  { %6584 = vmatmul.msk.bf16.gmra.mxu2 %vm884_vm0, %v7251_v12 }
 0x4fe   :  { %6616 = vmatmul.msk.bf16.gmra.mxu3 %vm884_vm0, %v7251_v12 }
 0x4ff   :  { %v2468_v55 = vpop.f32.mrf.mxu2 }
 0x501   :  { %v2637_v10 = vpop.f32.mrf.mxu3 }
 0x502   :  { %3033 = vrot.lane.b32.xlu1 %v2637_v10, %s7580_s13  ;;  %3017 = vrot.lane.b32.xlu2 %v2468_v55, %s7580_s13  ;;  %v9921_v55 = vpop.permute.xlu0 %2793 }
 0x507   :  { %v2470_v63 = vpop.f32.mrf.mxu2 }
 0x508   :  { %3019 = vrot.lane.b32.xlu0 %v2470_v63, %s7580_s13  ;;  %v7254_v63 = vld [vmem:[%s12939_s2 + $0x1f8] sm:$0xff] }
 0x509   :  { %v2639_v15 = vpop.f32.mrf.mxu3 }
 0x50a   :  { %3035 = vrot.lane.b32.xlu2 %v2639_v15, %s7580_s13  ;;  %v9928_v15 = vpop.permute.xlu2 %2791 }
 0x50c   :  { %6585 = vmatmul.msk.bf16.gmra.mxu2 %vm884_vm0, %v7252_v51 }
 0x50e   :  { %6617 = vmatmul.msk.bf16.gmra.mxu3 %vm884_vm0, %v7252_v51  ;;  %v9930_v51 = vpop.permute.xlu1 %2785 }
 0x50f   :  { %v2473_v16 = vpop.f32.mrf.mxu2 }
 0x511   :  { %v2642_v58 = vpop.f32.mrf.mxu3 }
 0x512   :  { %3037 = vrot.lane.b32.xlu1 %v2642_v58, %s7580_s13  ;;  %3021 = vrot.lane.b32.xlu2 %v2473_v16, %s7580_s13  ;;  %v9934_v58 = vpop.permute.xlu0 %2781 }
 0x517   :  { %v2475_v27 = vpop.f32.mrf.mxu2 }
 0x518   :  { %3023 = vrot.lane.b32.xlu0 %v2475_v27, %s7580_s13 }
 0x519   :  { %v2644_v32 = vpop.f32.mrf.mxu3 }
 0x51a   :  { %3039 = vrot.lane.b32.xlu2 %v2644_v32, %s7580_s13  ;;  %v9938_v32 = vpop.permute.xlu2 %2859 }
 0x51b   :  { %13325 = vst [vmem:[#allocation30_spill] sm:$0xff] %v9938_v32 }
 0x51c   :  { %6586 = vmatmul.msk.bf16.gmra.mxu2 %vm884_vm0, %v7253_v39 }
 0x51e   :  { %6618 = vmatmul.msk.bf16.gmra.mxu3 %vm884_vm0, %v7253_v39  ;;  %v9940_v39 = vpop.permute.xlu1 %2803 }
 0x51f   :  { %v2478_v11 = vpop.f32.mrf.mxu2 }
 0x521   :  { %v2647_v37 = vpop.f32.mrf.mxu3 }
 0x522   :  { %3041 = vrot.lane.b32.xlu1 %v2647_v37, %s7580_s13  ;;  %3025 = vrot.lane.b32.xlu2 %v2478_v11, %s7580_s13 }
 0x526   :  { %v9948_v60 = vpop.permute.xlu1 %2789 }
 0x527   :  { %v2480_v12 = vpop.f32.mrf.mxu2 }
 0x528   :  { %3027 = vrot.lane.b32.xlu0 %v2480_v12, %s7580_s13  ;;  %v9944_v12 = vpop.permute.xlu0 %2799 }
 0x529   :  { %v2649_v10 = vpop.f32.mrf.mxu3 }
 0x52a   :  { %3043 = vrot.lane.b32.xlu2 %v2649_v10, %s7580_s13  ;;  %v9946_v10 = vpop.permute.xlu2 %2863 }
 0x52b   :  { %13326 = vst [vmem:[#allocation31_spill] sm:$0xff] %v9946_v10 }
 0x52c   :  { %6587 = vmatmul.msk.bf16.gmra.mxu2 %vm884_vm0, %v7254_v63 }
 0x52e   :  { %6619 = vmatmul.msk.bf16.gmra.mxu3 %vm884_vm0, %v7254_v63 }
 0x52f   :  { %v2483_v16 = vpop.f32.mrf.mxu2 }
 0x530   :  { %v9954_v28 = vpop.permute.xlu0 %2801 }
 0x531   :  { %v2652_v27 = vpop.f32.mrf.mxu3 }
 0x532   :  { %3045 = vrot.lane.b32.xlu1 %v2652_v27, %s7580_s13  ;;  %3029 = vrot.lane.b32.xlu2 %v2483_v16, %s7580_s13  ;;  %v9952_v16 = vpop.permute.xlu2 %2867 }
 0x533   :  { %13327 = vst [vmem:[#allocation23_spill] sm:$0xff] %v9952_v16 }
 0x537   :  { %v2485_v11 = vpop.f32.mrf.mxu2 }
 0x538   :  { %3031 = vrot.lane.b32.xlu0 %v2485_v11, %s7580_s13  ;;  %v9962_v4 = vpop.permute.xlu0 %2805 }
 0x539   :  { %v2654_v37 = vpop.f32.mrf.mxu3 }
 0x53a   :  { %3047 = vrot.lane.b32.xlu2 %v2654_v37, %s7580_s13  ;;  %v9958_v37 = vpop.permute.xlu1 %2807  ;;  %v9960_v21 = vpop.permute.xlu2 %2885 }
 0x53b   :  { %13328 = vst [vmem:[#allocation35_spill] sm:$0xff] %v9960_v21 }
 0x53f   :  { %v2488_v63 = vpop.f32.mrf.mxu2 }
 0x540   :  { %3097 = vrot.lane.b32.xlu0 %v2488_v63, %s7581_s24  ;;  %v9968_v59 = vpop.permute.xlu0 %2873 }
 0x541   :  { %v2657_v27 = vpop.f32.mrf.mxu3 }
 0x542   :  { %3113 = vrot.lane.b32.xlu2 %v2657_v27, %s7581_s24  ;;  %v9966_v27 = vpop.permute.xlu2 %2953  ;;  %v9970_v45 = vpop.permute.xlu1 %2857 }
 0x543   :  { %13329 = vst [vmem:[#allocation19_spill] sm:$0xff] %v9966_v27 }
 0x547   :  { %v2490_v13 = vpop.f32.mrf.mxu2 }
 0x548   :  { %3099 = vrot.lane.b32.xlu1 %v2490_v13, %s7581_s24  ;;  %v9976_v61 = vpop.permute.xlu0 %2877 }
 0x549   :  { %v2659_v11 = vpop.f32.mrf.mxu3  ;;  %13331 = vst [vmem:[#allocation28_spill] sm:$0xff] %v9976_v61 }
 0x54a   :  { %3115 = vrot.lane.b32.xlu0 %v2659_v11, %s7581_s24  ;;  %v9974_v50 = vpop.permute.xlu2 %2941  ;;  %v9978_v21 = vpop.permute.xlu1 %2875 }
 0x54b   :  { %13330 = vst [vmem:[#allocation41_spill] sm:$0xff] %v9974_v50 }
 0x54c   :  { %13332 = vst [vmem:[#allocation49_spill] sm:$0xff] %v9978_v21 }
 0x54f   :  { %v2493_v56 = vpop.f32.mrf.mxu2 }
 0x550   :  { %3101 = vrot.lane.b32.xlu1 %v2493_v56, %s7581_s24  ;;  %v9982_v27 = vpop.permute.xlu0 %2881 }
 0x551   :  { %v2662_v63 = vpop.f32.mrf.mxu3  ;;  %13333 = vst [vmem:[#allocation48_spill] sm:$0xff] %v9982_v27 }
 0x552   :  { %3117 = vrot.lane.b32.xlu0 %v2662_v63, %s7581_s24  ;;  %v9984_v16 = vpop.permute.xlu2 %2959 }
 0x553   :  { %13334 = vst [vmem:[#allocation37_spill] sm:$0xff] %v9984_v16 }
 0x557   :  { %v2495_v13 = vpop.f32.mrf.mxu2 }
 0x558   :  { %3103 = vrot.lane.b32.xlu2 %v2495_v13, %s7581_s24  ;;  %v9986_v13 = vpop.permute.xlu1 %2861  ;;  %v9990_v50 = vpop.permute.xlu0 %2869 }
 0x559   :  { %v2664_v11 = vpop.f32.mrf.mxu3  ;;  %13335 = vst [vmem:[#allocation39_spill] sm:$0xff] %v9986_v13 }
 0x55a   :  { %3119 = vrot.lane.b32.xlu1 %v2664_v11, %s7581_s24  ;;  %13336 = vst [vmem:[#allocation33_spill] sm:$0xff] %v9990_v50  ;;  %v9992_v61 = vpop.permute.xlu2 %2947 }
 0x55b   :  { %13337 = vst [vmem:[#allocation34_spill] sm:$0xff] %v9992_v61 }
 0x55f   :  { %v2498_v56 = vpop.f32.mrf.mxu2 }
 0x560   :  { %3105 = vrot.lane.b32.xlu0 %v2498_v56, %s7581_s24  ;;  %v9998_v16 = vpop.permute.xlu0 %2887 }
 0x561   :  { %v2667_v63 = vpop.f32.mrf.mxu3  ;;  %13339 = vst [vmem:[#allocation40_spill] sm:$0xff] %v9998_v16 }
 0x562   :  { %3121 = vrot.lane.b32.xlu2 %v2667_v63, %s7581_s24  ;;  %v9996_v63 = vpop.permute.xlu1 %2879  ;;  %v10000_v27 = vpop.permute.xlu2 %2949 }
 0x563   :  { %13338 = vst [vmem:[#allocation44_spill] sm:$0xff] %v9996_v63 }
 0x564   :  { %13340 = vst [vmem:[#allocation43_spill] sm:$0xff] %v10000_v27 }
 0x567   :  { %v2500_v10 = vpop.f32.mrf.mxu2 }
 0x568   :  { %3107 = vrot.lane.b32.xlu1 %v2500_v10, %s7581_s24  ;;  %v10006_v61 = vpop.permute.xlu0 %2937 }
 0x569   :  { %v2669_v11 = vpop.f32.mrf.mxu3  ;;  %13342 = vst [vmem:[#allocation45_spill] sm:$0xff] %v10006_v61 }
 0x56a   :  { %3123 = vrot.lane.b32.xlu0 %v2669_v11, %s7581_s24  ;;  %v10004_v11 = vpop.permute.xlu1 %2865  ;;  %v10008_v19 = vpop.permute.xlu2 %2967 }
 0x56b   :  { %13341 = vst [vmem:[#allocation47_spill] sm:$0xff] %v10004_v11 }
 0x56c   :  { %13343 = vst [vmem:[#allocation46_spill] sm:$0xff] %v10008_v19 }
 0x56f   :  { %v2503_v2 = vpop.f32.mrf.mxu2 }
 0x570   :  { %3109 = vrot.lane.b32.xlu2 %v2503_v2, %s7581_s24  ;;  %v10012_v16 = vpop.permute.xlu0 %2955 }
 0x571   :  { %v2672_v56 = vpop.f32.mrf.mxu3  ;;  %13345 = vst [vmem:[#allocation50_spill] sm:$0xff] %v10012_v16 }
 0x572   :  { %3125 = vrot.lane.b32.xlu1 %v2672_v56, %s7581_s24  ;;  %v10010_v56 = vpop.permute.xlu1 %2883  ;;  %v10014_v21 = vpop.permute.xlu2 %3017 }
 0x573   :  { %13344 = vst [vmem:[#allocation52_spill] sm:$0xff] %v10010_v56 }
 0x574   :  { %13346 = vst [vmem:[#allocation55_spill] sm:$0xff] %v10014_v21 }
 0x577   :  { %v2505_v13 = vpop.f32.mrf.mxu2 }
 0x578   :  { %3111 = vrot.lane.b32.xlu0 %v2505_v13, %s7581_s24 }
 0x579   :  { %v2674_v10 = vpop.f32.mrf.mxu3 }
 0x57a   :  { %3127 = vrot.lane.b32.xlu2 %v2674_v10, %s7581_s24  ;;  %v10016_v32 = vpop.permute.xlu1 %2871  ;;  %v10018_v10 = vpop.permute.xlu0 %2943 }
 0x57b   :  { %13347 = vst [vmem:[#allocation36_spill] sm:$0xff] %v10016_v32  ;;  %v10022_v61 = vpop.permute.xlu2 %3035 }
 0x57c   :  { %13348 = vst [vmem:[#allocation42_spill] sm:$0xff] %v10018_v10 }
 0x57d   :  { %13349 = vst [vmem:[#allocation58_spill] sm:$0xff] %v10022_v61 }
 0x57f   :  { %v2508_v50 = vpop.f32.mrf.mxu2 }
 0x581   :  { %v2677_v2 = vpop.f32.mrf.mxu3 }
 0x582   :  { %v10024_v19 = vpop.permute.xlu1 %2939  ;;  %v10028_v21 = vpop.permute.xlu0 %2961 }
 0x583   :  { %13350 = vst [vmem:[#allocation59_spill] sm:$0xff] %v10024_v19  ;;  %v10030_v16 = vpop.permute.xlu2 %3021 }
 0x584   :  { %13351 = vst [vmem:[#allocation51_spill] sm:$0xff] %v10028_v21 }
 0x585   :  { %13352 = vst [vmem:[#allocation66_spill] sm:$0xff] %v10030_v16 }
 0x587   :  { %v2510_v63 = vpop.f32.mrf.mxu2 }
 0x589   :  { %v2679_v27 = vpop.f32.mrf.mxu3 }
 0x58a   :  { %v10032_v32 = vpop.permute.xlu1 %2957 }
 0x58b   :  { %13353 = vst [vmem:[#allocation4_spill] sm:$0xff] %v10032_v32 }
 0x58f   :  { %v2513_v13 = vpop.f32.mrf.mxu2 }
 0x590   :  { %3181 = vrot.lane.b32.xlu0 %v2513_v13, %s7584_s17 }
 0x591   :  { %v2682_v11 = vpop.f32.mrf.mxu3 }
 0x592   :  { %3197 = vrot.lane.b32.xlu2 %v2682_v11, %s7584_s17  ;;  %v10036_v11 = vpop.permute.xlu0 %2951  ;;  %v10038_v19 = vpop.permute.xlu1 %2945 }
 0x593   :  { %13354 = vst [vmem:[#allocation10_spill] sm:$0xff] %v10036_v11 }
 0x594   :  { %13355 = vst [vmem:[#allocation22_spill] sm:$0xff] %v10038_v19 }
 0x597   :  { %v2515_v56 = vpop.f32.mrf.mxu2 }
 0x598   :  { %3183 = vrot.lane.b32.xlu1 %v2515_v56, %s7584_s17 }
 0x599   :  { %v2684_v48 = vpop.f32.mrf.mxu3 }
 0x59a   :  { %3199 = vrot.lane.b32.xlu0 %v2684_v48, %s7584_s17  ;;  %v10041_v48 = vpop.permute.xlu2 %3039  ;;  %v10044_v16 = vpop.permute.xlu0 %3019 }
 0x59b   :  { %13356 = vst [vmem:[#allocation60_spill] sm:$0xff] %v10041_v48 }
 0x59c   :  { %13357 = vst [vmem:[#allocation61_spill] sm:$0xff] %v10044_v16 }
 0x59f   :  { %v2518_v10 = vpop.f32.mrf.mxu2 }
 0x5a1   :  { %v2687_v13 = vpop.f32.mrf.mxu3 }
 0x5a2   :  { %3185 = vrot.lane.b32.xlu0 %v2518_v10, %s7584_s17  ;;  %3201 = vrot.lane.b32.xlu2 %v2687_v13, %s7584_s17  ;;  %v10048_v10 = vpop.permute.xlu1 %2963  ;;  %v10050_v13 = vpop.permute.xlu0 %3023 }
 0x5a3   :  { %13358 = vst [vmem:[#allocation64_spill] sm:$0xff] %v10048_v10  ;;  %v10052_v11 = vpop.permute.xlu2 %3025  ;;  %v13379_v10 = vld [vmem:[#allocation69_spill] sm:$0xff] }
 0x5a4   :  { %13359 = vst [vmem:[#allocation65_spill] sm:$0xff] %v10050_v13 }
 0x5a5   :  { %13360 = vst [vmem:[#allocation68_spill] sm:$0xff] %v10052_v11  ;;  %v13375_v11 = vld [vmem:[#allocation54_spill] sm:$0xff] }
 0x5a7   :  { %v2520_v61 = vpop.f32.mrf.mxu2 }
 0x5a8   :  { %3187 = vrot.lane.b32.xlu1 %v2520_v61, %s7584_s17 }
 0x5a9   :  { %v2689_v56 = vpop.f32.mrf.mxu3 }
 0x5aa   :  { %3203 = vrot.lane.b32.xlu0 %v2689_v56, %s7584_s17  ;;  %v10057_v56 = vpop.permute.xlu0 %3027  ;;  %v10059_v48 = vpop.permute.xlu1 %2965 }
 0x5ab   :  { %13361 = vst [vmem:[#allocation70_spill] sm:$0xff] %v10057_v56  ;;  %v7564_v56 = vld [vmem:[%s12938_s5 + $0x8] sm:$0xff] }
 0x5ac   :  { %13362 = vst [vmem:[#allocation2_spill] sm:$0xff] %v10059_v48 }
 0x5af   :  { %v2523_v21 = vpop.f32.mrf.mxu2 }
 0x5b1   :  { %v2692_v32 = vpop.f32.mrf.mxu3 }
 0x5b2   :  { %3205 = vrot.lane.b32.xlu2 %v2692_v32, %s7584_s17  ;;  %3189 = vrot.lane.b32.xlu0 %v2523_v21, %s7584_s17  ;;  %v10061_v32 = vpop.permute.xlu2 %3043  ;;  %v7563_v21 = vld [vmem:[%s12938_s5 + $0x10] sm:$0xff] }
 0x5b3   :  { %13363 = vst [vmem:[#allocation13_spill] sm:$0xff] %v10061_v32 }
 0x5b7   :  { %v2525_v19 = vpop.f32.mrf.mxu2 }
 0x5b8   :  { %3191 = vrot.lane.b32.xlu1 %v2525_v19, %s7584_s17  ;;  %v10068_v19 = vpop.permute.xlu0 %3031 }
 0x5b9   :  { %v2694_v61 = vpop.f32.mrf.mxu3  ;;  %13364 = vst [vmem:[#allocation14_spill] sm:$0xff] %v10068_v19  ;;  %v7566_v19 = vld [vmem:[%s12938_s5] sm:$0xff] }
 0x5ba   :  { %3179 = vrot.lane.b32.xlu2 %v2510_v63, %s7584_s17  ;;  %3207 = vrot.lane.b32.xlu0 %v2694_v61, %s7584_s17  ;;  %v10070_v63 = vpop.permute.xlu1 %3033  ;;  %v10072_v61 = vpop.permute.xlu2 %3029 }
 0x5bb   :  { %13365 = vst [vmem:[#allocation77_spill] sm:$0xff] %v10070_v63  ;;  %v13378_v63 = vld [vmem:[#allocation67_spill] sm:$0xff] }
 0x5bc   :  { %13366 = vst [vmem:[#allocation78_spill] sm:$0xff] %v10072_v61 }
 0x5c0   :  { %3177 = vrot.lane.b32.xlu1 %v2508_v50, %s7584_s17  ;;  %v7565_v50 = vld [vmem:[%s12938_s5 + $0x18] sm:$0xff] }
 0x5c2   :  { %3266 = vperm.xlu2 %7396, %v7563_v21   ;;  %3193 = vrot.lane.b32.xlu0 %v2677_v2, %s7584_s17  ;;  %v10081_v21 = vpop.permute.xlu1 %3037  ;;  %v10083_v2 = vpop.permute.xlu0 %3097 }
 0x5c3   :  { %13367 = vst [vmem:[#allocation11_spill] sm:$0xff] %v10081_v21 }
 0x5c4   :  { %13368 = vst [vmem:[#allocation9_spill] sm:$0xff] %v10083_v2  ;;  %v2729_v2 = vsel %vm1351_vm1, %v9841_v14, %v9847_v62 }
 0x5c8   :  { %3195 = vrot.lane.b32.xlu1 %v2679_v27, %s7584_s17  ;;  %v10088_v27 = vpop.permute.xlu2 %3047 }
 0x5c9   :  { %13369 = vst [vmem:[#allocation5_spill] sm:$0xff] %v10088_v27  ;;  %v2732_v27 = vsel %vm1351_vm1, %v9860_v17, %v9877_v23 }
 0x5ca   :  { %3262 = vperm.xlu2 %7396, %v7564_v56   ;;  %3270 = vperm.xlu0 %7397, %v7565_v50   ;;  %v10090_v61 = vpop.permute.xlu1 %3041  ;;  %v10092_v32 = vpop.permute.xlu0 %3115  ;;  %v2737_v50 = vsel %vm1351_vm1, %v9847_v62, %v9841_v14  ;;  %v2731_v14 = vsel %vm1351_vm1, %v9862_v54, %v9857_v0 }
 0x5cb   :  { %13370 = vst [vmem:[#allocation8_spill] sm:$0xff] %v10090_v61  ;;  %v2746_v61 = vmul.f32 %v13375_v11, %v2729_v2  ;;  %v2750_v2 = vmul.f32 %v13375_v11, %v2731_v14 }
 0x5cc   :  { %13371 = vst [vmem:[#allocation73_spill] sm:$0xff] %v10092_v32  ;;  %v2738_v32 = vsel %vm1351_vm1, %v9854_v41, %v9850_v57 }
 0x5d0   :  { %3258 = vperm.xlu1 %7395, %v7566_v19   ;;  %v10094_v56 = vpop.permute.xlu2 %3113  ;;  %v2730_v19 = vsel %vm1351_vm1, %v9850_v57, %v9854_v41  ;;  %v2740_v57 = vsel %vm1351_vm1, %v9877_v23, %v9860_v17  ;;  %v13374_v41 = vld [vmem:[#allocation53_spill] sm:$0xff]  ;;  %v2734_v17 = vsel %vm1351_vm1, %v9888_v20, %v9879_v38  ;;  %v2742_v23 = vsel %vm1351_vm1, %v9879_v38, %v9888_v20 }
 0x5d1   :  { %13372 = vst [vmem:[#allocation74_spill] sm:$0xff] %v10094_v56  ;;  %v2739_v56 = vsel %vm1351_vm1, %v9857_v0, %v9862_v54  ;;  %v2745_v13 = vmul.f32 %v13374_v41, %v2737_v50  ;;  %v2747_v21 = vmul.f32 %v13374_v41, %v2738_v32  ;;  %v2748_v0 = vmul.f32 %v13375_v11, %v2730_v19 }
 0x5d2   :  { %v10120_v62 = vpop.permute.xlu1 %3045  ;;  %v2741_v54 = vsel %vm1351_vm1, %v9873_v47, %v9868_v9  ;;  %v2749_v32 = vmul.f32 %v13374_v41, %v2739_v56  ;;  %v2751_v50 = vmul.f32 %v13374_v41, %v2740_v57  ;;  %v2752_v19 = vmul.f32 %v13375_v11, %v2732_v27  ;;  %v10162_v16 = vpop.permute.xlu0 %3117 }
 0x5d3   :  { %13373 = vst [vmem:[#allocation38_spill] sm:$0xff] %v10120_v62  ;;  %v2733_v62 = vsel %vm1351_vm1, %v9868_v9, %v9873_v47  ;;  %v2743_v9 = vsel %vm1351_vm1, %v9890_v3, %v9900_v22  ;;  %v2735_v47 = vsel %vm1351_vm1, %v9900_v22, %v9890_v3  ;;  %v2736_v38 = vsel %vm1351_vm1, %v9881_v52, %v9913_v33 }
 0x5d4   :  { %13376 = vst [vmem:[#allocation15_spill] sm:$0xff] %v10162_v16  ;;  %v2744_v20 = vsel %vm1351_vm1, %v9913_v33, %v9881_v52  ;;  %v2753_v27 = vmul.f32 %v13374_v41, %v2741_v54  ;;  %v2754_v56 = vmul.f32 %v13375_v11, %v2733_v62  ;;  %v2809_v3 = vsel %vm1432_vm10, %v9894_v29, %v9921_v55 }
 0x5d5   :  { %v2817_v22 = vsel %vm1432_vm10, %v9921_v55, %v9894_v29  ;;  %v2755_v57 = vmul.f32 %v13374_v41, %v2742_v23  ;;  %v2756_v52 = vmul.f32 %v13375_v11, %v2734_v17  ;;  %v2810_v33 = vsel %vm1432_vm10, %v9898_v31, %v9907_v8 }
 0x5d6   :  { %v2818_v62 = vsel %vm1432_vm10, %v9907_v8, %v9898_v31  ;;  %v2757_v54 = vmul.f32 %v13374_v41, %v2743_v9  ;;  %v2761_v29 = vadd.f32 %v2745_v13, %v9761_v36  ;;  %v2762_v55 = vadd.f32 %v2746_v61, %v9763_v44 }
 0x5d7   :  { %v10199_v17 = vmul.f32 %v13374_v41, %v2744_v20  ;;  %v10202_v23 = vmul.f32 %v13375_v11, %v2736_v38  ;;  %v2825_v48 = vmul.f32 %v13378_v63, %v2817_v22  ;;  %v2826_v31 = vmul.f32 %v13379_v10, %v2809_v3 }
 0x5d8   :  { %v10174_v14 = vpop.permute.xlu2 %3103  ;;  %v2819_v8 = vsel %vm1432_vm10, %v9909_v7, %v9934_v58  ;;  %v2763_v36 = vadd.f32 %v2747_v21, %v9765_v46  ;;  %v2827_v44 = vmul.f32 %v13378_v63, %v2818_v62  ;;  %v2828_v13 = vmul.f32 %v13379_v10, %v2810_v33 }
 0x5d9   :  { %13377 = vst [vmem:[#allocation24_spill] sm:$0xff] %v10174_v14  ;;  %v2758_v14 = vmul.f32 %v13375_v11, %v2735_v47  ;;  %v2811_v61 = vsel %vm1432_vm10, %v9934_v58, %v9909_v7  ;;  %v2764_v9 = vadd.f32 %v2748_v0, %v9767_v6  ;;  %v2812_v47 = vsel %vm1432_vm10, %v9917_v25, %v9944_v12 }
 0x5da   :  { %v10204_v16 = vpop.permute.xlu1 %3099  ;;  %v2820_v46 = vsel %vm1432_vm10, %v9944_v12, %v9917_v25  ;;  %v2765_v21 = vadd.f32 %v2749_v32, %v9774_v34  ;;  %v2766_v38 = vadd.f32 %v2750_v2, %v9776_v30  ;;  %v2841_v20 = vadd.f32 %v2825_v48, %v2761_v29  ;;  %v10235_v58 = vpop.permute.xlu0 %3105 }
 0x5db   :  { %v2842_v3 = vadd.f32 %v2826_v31, %v2762_v55  ;;  %v2829_v7 = vmul.f32 %v13378_v63, %v2819_v8  ;;  %v2821_v6 = vsel %vm1432_vm10, %v9954_v28, %v9930_v51  ;;  %v10237_v0 = vadd.f32 %v2827_v44, %v2763_v36 }
 0x5dc   :  { %v2830_v22 = vmul.f32 %v13379_v10, %v2811_v61  ;;  %v2813_v34 = vsel %vm1432_vm10, %v9930_v51, %v9954_v28  ;;  %v2767_v30 = vadd.f32 %v2751_v50, %v9778_v18  ;;  %v10247_v12 = vadd.f32 %v2828_v13, %v2764_v9  ;;  %v13381_v9 = vld [vmem:[#allocation30_spill] sm:$0xff] }
 0x5dd   :  { %v2831_v48 = vmul.f32 %v13378_v63, %v2820_v46  ;;  %v2832_v32 = vmul.f32 %v13379_v10, %v2812_v47  ;;  %v2822_v2 = vsel %vm1432_vm10, %v9940_v39, %v9919_v35  ;;  %v10255_v33 = vadd.f32 %v2829_v7, %v2765_v21  ;;  %v13382_v47 = vld [vmem:[#allocation49_spill] sm:$0xff] }
 0x5de   :  { %v10257_v62 = vadd.f32 %v2830_v22, %v2766_v38  ;;  %v2814_v18 = vsel %vm1432_vm10, %v9919_v35, %v9940_v39  ;;  %v2833_v28 = vmul.f32 %v13378_v63, %v2821_v6  ;;  %v2768_v51 = vadd.f32 %v2752_v19, %v9780_v40  ;;  %v13383_v6 = vld [vmem:[#allocation32_spill] sm:$0xff] }
 0x5df   :  { %v2769_v50 = vadd.f32 %v2753_v27, %v9787_v26  ;;  %v2770_v29 = vadd.f32 %v2754_v56, %v9789_v42  ;;  %v2834_v55 = vmul.f32 %v13379_v10, %v2813_v34  ;;  %v10268_v31 = vadd.f32 %v2831_v48, %v2767_v30  ;;  %v13384_v34 = vld [vmem:[#allocation25_spill] sm:$0xff]  ;;  %v13385_v48 = vld [vmem:[#allocation28_spill] sm:$0xff] }
 0x5e0   :  { %v10245_v25 = vpop.permute.xlu2 %3121  ;;  %v2835_v8 = vmul.f32 %v13378_v63, %v2822_v2  ;;  %v2771_v36 = vadd.f32 %v2755_v57, %v9791_v43  ;;  %v2772_v44 = vadd.f32 %v2756_v52, %v9793_v49  ;;  %v2836_v35 = vmul.f32 %v13379_v10, %v2814_v18 }
 0x5e1   :  { %v2815_v40 = vsel %vm1432_vm10, %v9948_v60, %v9962_v4  ;;  %v2823_v26 = vsel %vm1432_vm10, %v9962_v4, %v9948_v60  ;;  %v2824_v42 = vsel %vm1432_vm10, %v9958_v37, %v9928_v15  ;;  %v2773_v49 = vadd.f32 %v2757_v54, %v9800_v24 }
 0x5e2   :  { %v10286_v43 = vpop.permute.xlu1 %3101  ;;  %v2774_v39 = vadd.f32 %v2758_v14, %v9802_v1  ;;  %v2889_v19 = vsel %vm1513_vm13, %v9970_v45, %v9968_v59  ;;  %v2897_v4 = vsel %vm1513_vm13, %v9968_v59, %v9970_v45  ;;  %v2848_v60 = vadd.f32 %v2832_v32, %v2768_v51  ;;  %v13380_v59 = vld [vmem:[#allocation6_spill] sm:$0xff]  ;;  %v13386_v32 = vld [vmem:[#allocation39_spill] sm:$0xff]  ;;  %v13387_v51 = vld [vmem:[#allocation44_spill] sm:$0xff] }
 0x5e3   :  { %v2849_v27 = vadd.f32 %v2833_v28, %v2769_v50  ;;  %v2850_v56 = vadd.f32 %v2834_v55, %v2770_v29  ;;  %v2816_v24 = vsel %vm1432_vm10, %v9928_v15, %v9958_v37  ;;  %v2851_v57 = vadd.f32 %v2835_v8, %v2771_v36  ;;  %v10313_v15 = vpop.permute.xlu0 %3123  ;;  %v13388_v50 = vld [vmem:[#allocation31_spill] sm:$0xff]  ;;  %v13390_v55 = vld [vmem:[#allocation48_spill] sm:$0xff] }
 0x5e4   :  { %v2852_v1 = vadd.f32 %v2836_v35, %v2772_v44  ;;  %v2837_v14 = vmul.f32 %v13378_v63, %v2823_v26  ;;  %v2838_v52 = vmul.f32 %v13379_v10, %v2815_v40  ;;  %v2839_v13 = vmul.f32 %v13378_v63, %v2824_v42  ;;  %v13389_v29 = vld [vmem:[#allocation47_spill] sm:$0xff] }
 0x5e5   :  { %v2905_v45 = vmul.f32 %v9035_v53, %v2897_v4  ;;  %v2906_v61 = vmul.f32 %v13380_v59, %v2889_v19  ;;  %v2898_v46 = vsel %vm1513_vm13, %v13382_v47, %v13381_v9  ;;  %v2840_v37 = vmul.f32 %v13379_v10, %v2816_v24 }
 0x5e6   :  { %v2853_v21 = vadd.f32 %v2837_v14, %v2773_v49  ;;  %v2854_v38 = vadd.f32 %v2838_v52, %v2774_v39  ;;  %v2890_v7 = vsel %vm1513_vm13, %v13381_v9, %v13382_v47  ;;  %v2775_v22 = vadd.f32 %v10199_v17, %v13383_v6  ;;  %v13391_v49 = vld [vmem:[#allocation52_spill] sm:$0xff]  ;;  %v13392_v39 = vld [vmem:[#allocation23_spill] sm:$0xff]  ;;  %v13393_v14 = vld [vmem:[#allocation33_spill] sm:$0xff] }
 0x5e7   :  { %v2776_v30 = vadd.f32 %v10202_v23, %v13384_v34  ;;  %v2891_v2 = vsel %vm1513_vm13, %v13386_v32, %v13385_v48  ;;  %v2899_v18 = vsel %vm1513_vm13, %v13385_v48, %v13386_v32  ;;  %v2907_v28 = vmul.f32 %v9035_v53, %v2898_v46  ;;  %v13394_v52 = vld [vmem:[#allocation35_spill] sm:$0xff]  ;;  %v13395_v32 = vld [vmem:[#allocation36_spill] sm:$0xff] }
 0x5e8   :  { %v10304_v54 = vpop.permute.xlu2 %3109  ;;  %v2892_v17 = vsel %vm1513_vm13, %v13388_v50, %v13387_v51  ;;  %v2900_v23 = vsel %vm1513_vm13, %v13387_v51, %v13388_v50  ;;  %v2901_v8 = vsel %vm1513_vm13, %v13390_v55, %v13389_v29  ;;  %v10345_v36 = vadd.f32 %v2905_v45, %v2841_v20 }
 0x5e9   :  { %v10347_v44 = vadd.f32 %v2906_v61, %v2842_v3  ;;  %v2908_v35 = vmul.f32 %v13380_v59, %v2890_v7  ;;  %v2893_v40 = vsel %vm1513_vm13, %v13389_v29, %v13390_v55  ;;  %v2909_v26 = vmul.f32 %v9035_v53, %v2899_v18  ;;  %v13398_v55 = vld [vmem:[#allocation45_spill] sm:$0xff] }
 0x5ea   :  { %v2910_v42 = vmul.f32 %v13380_v59, %v2891_v2  ;;  %v2894_v19 = vsel %vm1513_vm13, %v13392_v39, %v13391_v49  ;;  %v2902_v20 = vsel %vm1513_vm13, %v13391_v49, %v13392_v39  ;;  %v2911_v3 = vmul.f32 %v9035_v53, %v2900_v23  ;;  %v10371_v61 = vpop.permute.xlu1 %3119  ;;  %v13396_v2 = vld [vmem:[#allocation40_spill] sm:$0xff] }
 0x5eb   :  { %v2912_v4 = vmul.f32 %v13380_v59, %v2892_v17  ;;  %v2913_v24 = vmul.f32 %v9035_v53, %v2901_v8  ;;  %v2903_v45 = vsel %vm1513_vm13, %v13394_v52, %v13393_v14  ;;  %v2855_v9 = vadd.f32 %v2839_v13, %v2775_v22  ;;  %v10385_v13 = vpop.permute.xlu0 %3111 }
 0x5ec   :  { %v2856_v47 = vadd.f32 %v2840_v37, %v2776_v30  ;;  %v2923_v46 = vadd.f32 %v2907_v28, %v10237_v0  ;;  %v2914_v7 = vmul.f32 %v13380_v59, %v2893_v40  ;;  %v2915_v6 = vmul.f32 %v9035_v53, %v2902_v20  ;;  %v13400_v40 = vld [vmem:[#allocation59_spill] sm:$0xff]  ;;  %v13402_v20 = vld [vmem:[#allocation41_spill] sm:$0xff] }
 0x5ed   :  { %v2916_v34 = vmul.f32 %v13380_v59, %v2894_v19  ;;  %v2895_v48 = vsel %vm1513_vm13, %v13393_v14, %v13394_v52  ;;  %v2904_v18 = vsel %vm1513_vm13, %v13396_v2, %v13395_v32  ;;  %v2924_v0 = vadd.f32 %v2908_v35, %v10247_v12  ;;  %v13399_v35 = vld [vmem:[#allocation50_spill] sm:$0xff]  ;;  %v13401_v19 = vld [vmem:[#allocation4_spill] sm:$0xff] }
 0x5ee   :  { %v2925_v37 = vadd.f32 %v2909_v26, %v10255_v33  ;;  %v2926_v22 = vadd.f32 %v2910_v42, %v10257_v62  ;;  %v2917_v30 = vmul.f32 %v9035_v53, %v2903_v45  ;;  %v2927_v51 = vadd.f32 %v2911_v3, %v10268_v31  ;;  %v13397_v33 = vld [vmem:[#allocation19_spill] sm:$0xff]  ;;  %v13404_v3 = vld [vmem:[#allocation26_spill] sm:$0xff] }
 0x5ef   :  { %v2928_v50 = vadd.f32 %v2912_v4, %v2848_v60  ;;  %v2929_v17 = vadd.f32 %v2913_v24, %v2849_v27  ;;  %v2896_v23 = vsel %vm1513_vm13, %v13395_v32, %v13396_v2  ;;  %v2918_v29 = vmul.f32 %v13380_v59, %v2895_v48  ;;  %v13405_v24 = vld [vmem:[#allocation37_spill] sm:$0xff]  ;;  %v13406_v14 = vld [vmem:[#allocation42_spill] sm:$0xff] }
 0x5f0   :  { %v10391_v28 = vpop.permute.xlu2 %3127  ;;  %v2919_v12 = vmul.f32 %v9035_v53, %v2904_v18  ;;  %v2969_v62 = vsel %vm620_vm2, %v13398_v55, %v13397_v33  ;;  %v2977_v31 = vsel %vm620_vm2, %v13397_v33, %v13398_v55  ;;  %v2930_v60 = vadd.f32 %v2914_v7, %v2850_v56  ;;  %v13407_v18 = vld [vmem:[#allocation51_spill] sm:$0xff]  ;;  %v13409_v33 = vld [vmem:[#allocation64_spill] sm:$0xff]  ;;  %v13410_v55 = vld [vmem:[#allocation34_spill] sm:$0xff] }
 0x5f1   :  { %v2931_v27 = vadd.f32 %v2915_v6, %v2851_v57  ;;  %v2932_v8 = vadd.f32 %v2916_v34, %v2852_v1  ;;  %v2970_v26 = vsel %vm620_vm2, %v13400_v40, %v13399_v35  ;;  %v10412_v42 = vadd.f32 %v2917_v30, %v2853_v21  ;;  %v13403_v57 = vld [vmem:[#allocation21_spill] sm:$0xff]  ;;  %v13408_v30 = vld [vmem:[#allocation22_spill] sm:$0xff] }
 0x5f2   :  { %v2920_v49 = vmul.f32 %v13380_v59, %v2896_v23  ;;  %v2978_v39 = vsel %vm620_vm2, %v13399_v35, %v13400_v40  ;;  %v2971_v56 = vsel %vm620_vm2, %v13402_v20, %v13401_v19  ;;  %v2985_v1 = vmul.f32 %v13403_v57, %v2969_v62  ;;  %v10433_v45 = vpop.permute.xlu1 %3107  ;;  %v13437_v59 = vld [vmem:[#allocation29_spill] sm:$0xff] }
 0x5f3   :  { %v2986_v4 = vmul.f32 %v13404_v3, %v2977_v31  ;;  %v2979_v21 = vsel %vm620_vm2, %v13401_v19, %v13402_v20  ;;  %v2972_v52 = vsel %vm620_vm2, %v13406_v14, %v13405_v24  ;;  %v2934_v7 = vadd.f32 %v2918_v29, %v2854_v38 }
 0x5f4   :  { %v2935_v6 = vadd.f32 %v2919_v12, %v2855_v9  ;;  %v2987_v34 = vmul.f32 %v13403_v57, %v2970_v26  ;;  %v2980_v48 = vsel %vm620_vm2, %v13405_v24, %v13406_v14  ;;  %v2988_v32 = vmul.f32 %v13404_v3, %v2978_v39  ;;  %v13411_v24 = vld [vmem:[#allocation2_spill] sm:$0xff]  ;;  %v13412_v14 = vld [vmem:[#allocation43_spill] sm:$0xff] }
 0x5f5   :  { %v2989_v2 = vmul.f32 %v13403_v57, %v2971_v56  ;;  %v2973_v23 = vsel %vm620_vm2, %v13408_v30, %v13407_v18  ;;  %v2981_v38 = vsel %vm620_vm2, %v13407_v18, %v13408_v30  ;;  %v2990_v29 = vmul.f32 %v13404_v3, %v2979_v21 }
 0x5f6   :  { %v2991_v12 = vmul.f32 %v13403_v57, %v2972_v52  ;;  %v2974_v62 = vsel %vm620_vm2, %v13410_v55, %v13409_v33  ;;  %v2982_v31 = vsel %vm620_vm2, %v13409_v33, %v13410_v55  ;;  %v2936_v40 = vadd.f32 %v2920_v49, %v2856_v47  ;;  %v13415_v33 = vld [vmem:[#allocation77_spill] sm:$0xff]  ;;  %v13416_v55 = vld [vmem:[#allocation55_spill] sm:$0xff] }
 0x5f7   :  { %v3001_v26 = vadd.f32 %v2985_v1, %v10345_v36  ;;  %v3002_v39 = vadd.f32 %v2986_v4, %v10347_v44  ;;  %v2992_v19 = vmul.f32 %v13404_v3, %v2980_v48  ;;  %v3003_v20 = vadd.f32 %v2987_v34, %v2923_v46  ;;  %v13413_v44 = vld [vmem:[#allocation46_spill] sm:$0xff] }
 0x5f8   :  { %v10462_v35 = vpop.permute.xlu2 %3197  ;;  %v2993_v56 = vmul.f32 %v13403_v57, %v2973_v23  ;;  %v2994_v21 = vmul.f32 %v13404_v3, %v2981_v38  ;;  %v2975_v52 = vsel %vm620_vm2, %v13412_v14, %v13411_v24  ;;  %v2995_v18 = vmul.f32 %v13403_v57, %v2974_v62  ;;  %v13414_v46 = vld [vmem:[#allocation10_spill] sm:$0xff] }
 0x5f9   :  { %v2996_v47 = vmul.f32 %v13404_v3, %v2982_v31  ;;  %v2983_v36 = vsel %vm620_vm2, %v13411_v24, %v13412_v14  ;;  %v2976_v49 = vsel %vm620_vm2, %v13414_v46, %v13413_v44  ;;  %v10483_v1 = vadd.f32 %v2988_v32, %v2924_v0  ;;  %v13419_v14 = vld [vmem:[#allocation56_spill] sm:$0xff] }
 0x5fa   :  { %v3005_v4 = vadd.f32 %v2989_v2, %v2925_v37  ;;  %v3006_v34 = vadd.f32 %v2990_v29, %v2926_v22  ;;  %v10485_v48 = vadd.f32 %v2991_v12, %v2927_v51  ;;  %v10487_v30 = vadd.f32 %v2992_v19, %v2928_v50  ;;  %v13417_v51 = vld [vmem:[#allocation58_spill] sm:$0xff]  ;;  %v13418_v50 = vld [vmem:[#allocation61_spill] sm:$0xff]  ;;  %v10508_v19 = vpop.permute.xlu1 %3125 }
 0x5fb   :  { %v2997_v23 = vmul.f32 %v13403_v57, %v2975_v52  ;;  %v2984_v38 = vsel %vm620_vm2, %v13413_v44, %v13414_v46  ;;  %v3049_v62 = vsel %vm628_vm4, %v13416_v55, %v13415_v33  ;;  %v2998_v0 = vmul.f32 %v13404_v3, %v2983_v36  ;;  %v13420_v36 = vld [vmem:[#allocation11_spill] sm:$0xff]  ;;  %v13421_v44 = vld [vmem:[#allocation66_spill] sm:$0xff] }
 0x5fc   :  { %v2999_v37 = vmul.f32 %v13403_v57, %v2976_v49  ;;  %v3057_v22 = vsel %vm628_vm4, %v13415_v33, %v13416_v55  ;;  %v3050_v32 = vsel %vm628_vm4, %v13418_v50, %v13417_v51  ;;  %v3009_v2 = vadd.f32 %v2993_v56, %v2929_v17 }
 0x5fd   :  { %v3010_v29 = vadd.f32 %v2994_v21, %v2930_v60  ;;  %v3011_v12 = vadd.f32 %v2995_v18, %v2931_v27  ;;  %v3012_v31 = vadd.f32 %v2996_v47, %v2932_v8  ;;  %v3000_v24 = vmul.f32 %v13404_v3, %v2984_v38  ;;  %v13422_v27 = vld [vmem:[#allocation57_spill] sm:$0xff]  ;;  %v13423_v21 = vld [vmem:[#allocation8_spill] sm:$0xff] }
 0x5fe   :  { %v3065_v52 = vmul.f32 %v13419_v14, %v3049_v62  ;;  %v3051_v46 = vsel %vm628_vm4, %v13421_v44, %v13420_v36  ;;  %v3059_v49 = vsel %vm628_vm4, %v13420_v36, %v13421_v44  ;;  %v3066_v8 = vmul.f32 %v13422_v27, %v3057_v22  ;;  %v13424_v18 = vld [vmem:[#allocation68_spill] sm:$0xff] }
 0x5ff   :  { %v3067_v56 = vmul.f32 %v13419_v14, %v3050_v32  ;;  %v3053_v47 = vsel %vm628_vm4, %v13424_v18, %v13423_v21  ;;  %v3061_v38 = vsel %vm628_vm4, %v13423_v21, %v13424_v18  ;;  %v3013_v33 = vadd.f32 %v2997_v23, %v10412_v42  ;;  %v13426_v23 = vld [vmem:[#allocation65_spill] sm:$0xff]  ;;  %v13429_v18 = vld [vmem:[#allocation62_spill] sm:$0xff] }
 0x600   :  { %v3202_v17 = vpop.permute.xlu2 %3201  ;;  %v3014_v55 = vadd.f32 %v2998_v0, %v2934_v7  ;;  %v10533_v62 = vadd.f32 %v2999_v37, %v2935_v6  ;;  %v3058_v22 = vsel %vm628_vm4, %v13417_v51, %v13418_v50  ;;  %v3069_v32 = vmul.f32 %v13419_v14, %v3051_v46  ;;  %v13425_v6 = vld [vmem:[#allocation60_spill] sm:$0xff] }
 0x601   :  { %v3070_v36 = vmul.f32 %v13422_v27, %v3059_v49  ;;  %v3133_v44 = vsel %vm636_vm6, %v10235_v58, %v10245_v25  ;;  %v3141_v42 = vsel %vm636_vm6, %v10245_v25, %v10235_v58  ;;  %v10549_v7 = vadd.f32 %v3000_v24, %v2936_v40  ;;  %v13427_v58 = vld [vmem:[#allocation13_spill] sm:$0xff]  ;;  %v13428_v25 = vld [vmem:[#allocation70_spill] sm:$0xff] }
 0x602   :  { %v10450_v9 = vpop.permute.xlu0 %3181  ;;  %v3052_v0 = vsel %vm628_vm4, %v13426_v23, %v13425_v6  ;;  %v3073_v37 = vmul.f32 %v13419_v14, %v3053_v47  ;;  %v3074_v51 = vmul.f32 %v13422_v27, %v3061_v38  ;;  %v10557_v50 = vadd.f32 %v3065_v52, %v3001_v26  ;;  %v13430_v52 = vld [vmem:[#allocation63_spill] sm:$0xff] }
 0x603   :  { %v10559_v46 = vadd.f32 %v3066_v8, %v3002_v39  ;;  %v10562_v49 = vmul.f32 %v13422_v27, %v3058_v22  ;;  %v10564_v21 = vadd.f32 %v3067_v56, %v3003_v20  ;;  %v3054_v40 = vsel %vm628_vm4, %v13428_v25, %v13427_v58 }
 0x604   :  { %v3062_v24 = vsel %vm628_vm4, %v13427_v58, %v13428_v25  ;;  %v3153_v26 = vmul.f32 %v13429_v18, %v3133_v44  ;;  %v3154_v39 = vmul.f32 %v13430_v52, %v3141_v42  ;;  %v10576_v8 = vadd.f32 %v3069_v32, %v3005_v4  ;;  %v13431_v58 = vld [vmem:[#allocation38_spill] sm:$0xff] }
 0x605   :  { %v10578_v47 = vadd.f32 %v3070_v36, %v3006_v34  ;;  %v3060_v20 = vsel %vm628_vm4, %v13425_v6, %v13426_v23  ;;  %v3071_v56 = vmul.f32 %v13419_v14, %v3052_v0  ;;  %v3089_v22 = vadd.f32 %v3073_v37, %v3009_v2  ;;  %v13432_v25 = vld [vmem:[#allocation78_spill] sm:$0xff]  ;;  %v13433_v0 = vld [vmem:[#allocation7_spill] sm:$0xff] }
 0x606   :  { %v3090_v3 = vadd.f32 %v3074_v51, %v3010_v29  ;;  %v3055_v44 = vsel %vm628_vm4, %v13432_v25, %v13431_v58  ;;  %v3063_v4 = vsel %vm628_vm4, %v13431_v58, %v13432_v25  ;;  %v3075_v36 = vmul.f32 %v13419_v14, %v3054_v40  ;;  %v13434_v51 = vld [vmem:[#allocation12_spill] sm:$0xff] }
 0x607   :  { %v3076_v42 = vmul.f32 %v13422_v27, %v3062_v24  ;;  %v3169_v6 = vadd.f32 %v3153_v26, %v3089_v22  ;;  %v3077_v58 = vmul.f32 %v13419_v14, %v3055_v44  ;;  %v3078_v25 = vmul.f32 %v13422_v27, %v3063_v4  ;;  %v13435_v24 = vld [vmem:[#allocation5_spill] sm:$0xff] }
 0x608   :  { %v3170_v23 = vadd.f32 %v3154_v39, %v3090_v3  ;;  %v3134_v40 = vsel %vm636_vm6, %v10433_v45, %v10313_v15  ;;  %v13436_v3 = vld [vmem:[#allocation14_spill] sm:$0xff]  ;;  %v10624_v4 = vmul.f32 %v13422_v27, %v3060_v20 }
 0x609   :  { %v3056_v26 = vsel %vm628_vm4, %v13436_v3, %v13435_v24  ;;  %v3064_v39 = vsel %vm628_vm4, %v13435_v24, %v13436_v3 }
 0x60a   :  { %v10585_v38 = vpop.permute.xlu1 %3183  ;;  %v3079_v20 = vmul.f32 %v13419_v14, %v3056_v26 }
 0x60c   :  { %v10520_v60 = vpop.permute.xlu0 %3199  ;;  %v10595_v34 = vpop.permute.xlu2 %3205 }
 0x614   :  { %v3186_v32 = vpop.permute.xlu0 %3185  ;;  %v10661_v3 = vpop.permute.xlu2 %3179 }
 0x615   :  { %v3213_v2 = vsel %vm644_vm14, %v3186_v32, %v3202_v17  ;;  %v3221_v29 = vsel %vm644_vm14, %v3202_v17, %v3186_v32  ;;  %v3142_v17 = vsel %vm636_vm6, %v10313_v15, %v10433_v45  ;;  %v10627_v32 = vadd.f32 %v3071_v56, %v10485_v48  ;;  %v13438_v56 = vld [vmem:[#allocation74_spill] sm:$0xff] }
 0x616   :  { %v3233_v37 = vmul.f32 %v13433_v0, %v3213_v2  ;;  %v3234_v57 = vmul.f32 %v13434_v51, %v3221_v29  ;;  %v3091_v2 = vadd.f32 %v3075_v36, %v3011_v12  ;;  %v3092_v15 = vadd.f32 %v3076_v42, %v3012_v31  ;;  %v13439_v12 = vld [vmem:[#allocation9_spill] sm:$0xff] }
 0x617   :  { %v3155_v45 = vmul.f32 %v13429_v18, %v3134_v40  ;;  %v3156_v29 = vmul.f32 %v13430_v52, %v3142_v17  ;;  %v3129_v31 = vsel %vm636_vm6, %v13439_v12, %v13438_v56  ;;  %v3135_v36 = vsel %vm636_vm6, %v10304_v54, %v10508_v19 }
 0x618   :  { %v3249_v22 = vadd.f32 %v3233_v37, %v3169_v6  ;;  %v3250_v44 = vadd.f32 %v3234_v57, %v3170_v23  ;;  %v3093_v6 = vadd.f32 %v3077_v58, %v3013_v33  ;;  %v3094_v57 = vadd.f32 %v3078_v25, %v3014_v55  ;;  %v13440_v37 = vld [vmem:[#allocation15_spill] sm:$0xff] }
 0x619   :  { %v3080_v23 = vmul.f32 %v13422_v27, %v3064_v39  ;;  %v3137_v55 = vsel %vm636_vm6, %v13438_v56, %v13439_v12  ;;  %v3131_v58 = vsel %vm636_vm6, %v10286_v43, %v13440_v37  ;;  %v3171_v17 = vadd.f32 %v3155_v45, %v3091_v2 }
 0x61a   :  { %v10632_v53 = vadd.f32 %v13437_v59, %v3249_v22  ;;  %v10635_v10 = vadd.f32 %v13437_v59, %v3250_v44  ;;  %v3188_v48 = vpop.permute.xlu1 %3187  ;;  %v3172_v24 = vadd.f32 %v3156_v29, %v3092_v15  ;;  %v3095_v22 = vadd.f32 %v3079_v20, %v10533_v62 }
 0x61b   :  { %v3143_v44 = vsel %vm636_vm6, %v10508_v19, %v10304_v54  ;;  %v3157_v56 = vmul.f32 %v13429_v18, %v3135_v36  ;;  %v3139_v2 = vsel %vm636_vm6, %v13440_v37, %v10286_v43  ;;  %v10677_v62 = vmul.f32 %v13429_v18, %v3129_v31  ;;  %v13441_v36 = vld [vmem:[#allocation16_spill] sm:$0xff] }
 0x61c   :  { %v3204_v42 = vpop.permute.xlu0 %3203  ;;  %v3329_v59 = vmin.f32 %v10632_v53, 0.0  ;;  %v3330_v33 = vmin.f32 %v10635_v10, 0.0  ;;  %v10680_v20 = vmul.f32 %v13430_v52, %v3137_v55  ;;  %v3149_v54 = vmul.f32 %v13429_v18, %v3131_v58 }
 0x61d   :  { %v3214_v25 = vsel %vm644_vm14, %v3188_v48, %v3204_v42  ;;  %v3222_v40 = vsel %vm644_vm14, %v3204_v42, %v3188_v48  ;;  %v3096_v48 = vadd.f32 %v3080_v23, %v10549_v7  ;;  %v3158_v19 = vmul.f32 %v13430_v52, %v3143_v44 }
 0x61e   :  { %v3235_v26 = vmul.f32 %v13433_v0, %v3214_v25  ;;  %v3236_v39 = vmul.f32 %v13434_v51, %v3222_v40  ;;  %v3353_v12 = vmul.f32 1.442695, %v3329_v59  ;;  %v3355_v29 = vmul.f32 1.442695, %v3330_v33 }
 0x61f   :  { %v3211_v43 = vsel %vm644_vm14, %v10450_v9, %v10462_v35  ;;  %v3150_v23 = vmul.f32 %v13430_v52, %v3139_v2  ;;  %v3173_v31 = vadd.f32 %v3157_v56, %v3093_v6  ;;  %v3136_v59 = vsel %vm636_vm6, %v10385_v13, %v10391_v28 }
 0x620   :  { %v3251_v15 = vadd.f32 %v3235_v26, %v3171_v17  ;;  %v3252_v45 = vadd.f32 %v3236_v39, %v3172_v24  ;;  %7471 = vpow2.f32 %v3353_v12  ;;  %v3144_v33 = vsel %vm636_vm6, %v10391_v28, %v10385_v13  ;;  %v3267_v12 = vpop.permute.xlu2 %3266 }
 0x621   :  { %v3219_v55 = vsel %vm644_vm14, %v10462_v35, %v10450_v9  ;;  %7473 = vpow2.f32 %v3355_v29  ;;  %v3229_v6 = vmul.f32 %v13433_v0, %v3211_v43  ;;  %v3174_v28 = vadd.f32 %v3158_v19, %v3094_v57  ;;  %v13442_v57 = vld [vmem:[#allocation73_spill] sm:$0xff]  ;;  %v13443_v43 = vld [vmem:[#allocation24_spill] sm:$0xff] }
 0x622   :  { %v10689_v42 = vadd.f32 %v13441_v36, %v3251_v15  ;;  %v10692_v7 = vadd.f32 %v13441_v36, %v3252_v45  ;;  %v3165_v24 = vadd.f32 %v3149_v54, %v10576_v8  ;;  %v3159_v26 = vmul.f32 %v13429_v18, %v3136_v59 }
 0x623   :  { %v3160_v39 = vmul.f32 %v13430_v52, %v3144_v33  ;;  %v3230_v56 = vmul.f32 %v13434_v51, %v3219_v55  ;;  %v3130_v45 = vsel %vm636_vm6, %v10204_v16, %v13442_v57  ;;  %v3138_v8 = vsel %vm636_vm6, %v13442_v57, %v10204_v16 }
 0x624   :  { %v3190_v37 = vpop.permute.xlu0 %3189  ;;  %v3331_v58 = vmin.f32 %v10689_v42, 0.0  ;;  %v3332_v13 = vmin.f32 %v10692_v7, 0.0  ;;  %v3245_v29 = vadd.f32 %v3229_v6, %v3165_v24  ;;  %v3166_v19 = vadd.f32 %v3150_v23, %v10578_v47 }
 0x625   :  { %v3215_v25 = vsel %vm644_vm14, %v3190_v37, %v10595_v34  ;;  %v3223_v40 = vsel %vm644_vm14, %v10595_v34, %v3190_v37  ;;  %v3132_v36 = vsel %vm636_vm6, %v13443_v43, %v10371_v61  ;;  %v3140_v16 = vsel %vm636_vm6, %v10371_v61, %v13443_v43 }
 0x626   :  { %v3237_v17 = vmul.f32 %v13433_v0, %v3215_v25  ;;  %v3238_v9 = vmul.f32 %v13434_v51, %v3223_v40  ;;  %v3357_v35 = vmul.f32 1.442695, %v3331_v58  ;;  %v3359_v44 = vmul.f32 1.442695, %v3332_v13  ;;  %v7472_v15 = vpop.eup %7471 }
 0x627   :  { %v7474_v54 = vpop.eup %7473  ;;  %v3175_v55 = vadd.f32 %v3159_v26, %v3095_v22  ;;  %v3176_v37 = vadd.f32 %v3160_v39, %v3096_v48  ;;  %v10745_v58 = vadd.f32 %v3267_v12, %v3245_v29  ;;  %v3246_v23 = vadd.f32 %v3230_v56, %v3166_v19 }
 0x628   :  { %v3253_v2 = vadd.f32 %v3237_v17, %v3173_v31  ;;  %v3254_v34 = vadd.f32 %v3238_v9, %v3174_v28  ;;  %7475 = vpow2.f32 %v3357_v35  ;;  %v13444_v31 = vld [vmem:[#allocation20_spill] sm:$0xff]  ;;  %vm3313_vm5 = vcmp.gt.f32.partialorder %v10632_v53, 0.0 }
 0x629   :  { %7477 = vpow2.f32 %v3359_v44  ;;  %v6628_v40 = vadd.f32 -1.0, %v7472_v15  ;;  %v6629_v22 = vadd.f32 -1.0, %v7474_v54  ;;  %v10754_v17 = vadd.f32 %v3267_v12, %v3246_v23  ;;  %v13445_v54 = vld [vmem:[#allocation18_spill] sm:$0xff] }
 0x62a   :  { %v10736_v59 = vadd.f32 %v13444_v31, %v3253_v2  ;;  %v10739_v33 = vadd.f32 %v13444_v31, %v3254_v34  ;;  %v3192_v47 = vpop.permute.xlu1 %3191  ;;  %vm3314_vm7 = vcmp.gt.f32.partialorder %v10635_v10, 0.0  ;;  %v3325_v26 = vmin.f32 %v10745_v58, 0.0 }
 0x62b   :  { %vm3315_vm8 = vcmp.gt.f32.partialorder %v10689_v42, 0.0  ;;  %vm3316_vm9 = vcmp.gt.f32.partialorder %v10692_v7, 0.0  ;;  %v10765_v15 = vsel %vm3313_vm5, %v10632_v53, %v6628_v40  ;;  %v10771_v29 = vsel %vm3314_vm7, %v10635_v10, %v6629_v22 }
 0x62c   :  { %v3333_v6 = vmin.f32 %v10736_v59, 0.0  ;;  %v3208_v25 = vpop.permute.xlu0 %3207  ;;  %v3334_v13 = vmin.f32 %v10739_v33, 0.0  ;;  %v3151_v53 = vmul.f32 %v13429_v18, %v3132_v36  ;;  %v3212_v10 = vsel %vm644_vm14, %v10585_v38, %v10520_v60 }
 0x62d   :  { %v3216_v28 = vsel %vm644_vm14, %v3192_v47, %v3208_v25  ;;  %v3224_v61 = vsel %vm644_vm14, %v3208_v25, %v3192_v47  ;;  %v3220_v23 = vsel %vm644_vm14, %v10520_v60, %v10585_v38  ;;  %v3147_v25 = vmul.f32 %v13429_v18, %v3130_v45 }
 0x62e   :  { %v7476_v48 = vpop.eup %7475  ;;  %v3239_v9 = vmul.f32 %v13433_v0, %v3216_v28  ;;  %v3240_v35 = vmul.f32 %v13434_v51, %v3224_v61  ;;  %v3361_v44 = vmul.f32 1.442695, %v3333_v6  ;;  %v3363_v12 = vmul.f32 1.442695, %v3334_v13 }
 0x62f   :  { %v7478_v24 = vpop.eup %7477  ;;  %v6630_v39 = vadd.f32 -1.0, %v7476_v48  ;;  %v3148_v40 = vmul.f32 %v13430_v52, %v3138_v8  ;;  %v3152_v13 = vmul.f32 %v13430_v52, %v3140_v16  ;;  %v3231_v28 = vmul.f32 %v13433_v0, %v3212_v10 }
 0x630   :  { %v3255_v56 = vadd.f32 %v3239_v9, %v3175_v55  ;;  %v3256_v2 = vadd.f32 %v3240_v35, %v3176_v37  ;;  %v6631_v34 = vadd.f32 -1.0, %v7478_v24  ;;  %7479 = vpow2.f32 %v3361_v44 }
 0x631   :  { %v10768_v57 = vsel %vm3315_vm8, %v10689_v42, %v6630_v39  ;;  %v3326_v42 = vmin.f32 %v10754_v17, 0.0  ;;  %7481 = vpow2.f32 %v3363_v12  ;;  %v3345_v61 = vmul.f32 1.442695, %v3325_v26 }
 0x632   :  { %v10774_v19 = vadd.f32 %v13445_v54, %v3255_v56  ;;  %v10777_v43 = vadd.f32 %v13445_v54, %v3256_v2  ;;  %v3470_v31 = vpack.c.bf16 %v10768_v57, %v10765_v15  ;;  %v10782_v55 = vsel %vm3316_vm9, %v10692_v7, %v6631_v34  ;;  %v3178_v37 = vpop.permute.xlu1 %3177 }
 0x633   :  { %v3471_v47 = vpack.c.bf16 %v10782_v55, %v10771_v29  ;;  %v3084_v60 = vadd.f32 %v10562_v49, %v10483_v1  ;;  %v3088_v38 = vadd.f32 %v10624_v4, %v10487_v30  ;;  %v3232_v9 = vmul.f32 %v13434_v51, %v3220_v23 }
 0x634   :  { %v3335_v7 = vmin.f32 %v10774_v19, 0.0  ;;  %v3336_v36 = vmin.f32 %v10777_v43, 0.0  ;;  %v3194_v6 = vpop.permute.xlu0 %3193  ;;  %v3347_v35 = vmul.f32 1.442695, %v3326_v42  ;;  %v3161_v45 = vadd.f32 %v10677_v62, %v10557_v50 }
 0x635   :  { %v3162_v8 = vadd.f32 %v10680_v20, %v10559_v46  ;;  %v3167_v16 = vadd.f32 %v3151_v53, %v10627_v32  ;;  %v3168_v24 = vadd.f32 %v3152_v13, %v3088_v38  ;;  %v3209_v1 = vsel %vm644_vm14, %v3178_v37, %v3194_v6 }
 0x636   :  { %v3365_v22 = vmul.f32 1.442695, %v3335_v7  ;;  %v3367_v48 = vmul.f32 1.442695, %v3336_v36  ;;  %v3217_v30 = vsel %vm644_vm14, %v3194_v6, %v3178_v37  ;;  %v7480_v49 = vpop.eup %7479  ;;  %v3163_v4 = vadd.f32 %v3147_v25, %v10564_v21  ;;  %v3263_v25 = vpop.permute.xlu2 %3262 }
 0x637   :  { %v3164_v26 = vadd.f32 %v3148_v40, %v3084_v60  ;;  %v3247_v50 = vadd.f32 %v3231_v28, %v3167_v16  ;;  %v7482_v62 = vpop.eup %7481  ;;  %v3248_v46 = vadd.f32 %v3232_v9, %v3168_v24  ;;  %vm3317_vm11 = vcmp.gt.f32.partialorder %v10736_v59, 0.0 }
 0x638   :  { %7483 = vpow2.f32 %v3365_v22  ;;  %vm3318_vm12 = vcmp.gt.f32.partialorder %v10739_v33, 0.0  ;;  %v3225_v32 = vmul.f32 %v13433_v0, %v3209_v1  ;;  %v3226_v39 = vmul.f32 %v13434_v51, %v3217_v30 }
 0x639   :  { %7485 = vpow2.f32 %v3367_v48  ;;  %vm3319_vm15 = vcmp.gt.f32.partialorder %v10774_v19, 0.0  ;;  %v6632_v10 = vadd.f32 -1.0, %v7480_v49  ;;  %vm3320_vm3 = vcmp.gt.f32.partialorder %v10777_v43, 0.0 }
 0x63a   :  { %7487 = vpow2.f32 %v3345_v61  ;;  %v3196_v20 = vpop.permute.xlu1 %3195  ;;  %v6633_v42 = vadd.f32 -1.0, %v7482_v62  ;;  %v3241_v40 = vadd.f32 %v3225_v32, %v3161_v45  ;;  %v3242_v13 = vadd.f32 %v3226_v39, %v3162_v8 }
 0x63b   :  { %7489 = vpow2.f32 %v3347_v35  ;;  %v3210_v21 = vsel %vm644_vm14, %v10661_v3, %v3196_v20  ;;  %v3218_v56 = vsel %vm644_vm14, %v3196_v20, %v10661_v3  ;;  %v3397_v35 = vsel %vm3317_vm11, %v10736_v59, %v6632_v10 }
 0x63c   :  { %v3271_v44 = vpop.permute.xlu0 %3270  ;;  %v3227_v12 = vmul.f32 %v13433_v0, %v3210_v21  ;;  %v3228_v54 = vmul.f32 %v13434_v51, %v3218_v56  ;;  %v3398_v45 = vsel %vm3318_vm12, %v10739_v33, %v6633_v42  ;;  %vm3309_vm5 = vcmp.gt.f32.partialorder %v10745_v58, 0.0 }
 0x63d   :  { %v3295_v2 = vadd.f32 %v3271_v44, %v3247_v50  ;;  %v10827_v34 = vadd.f32 %v3271_v44, %v3248_v46  ;;  %vm3310_vm8 = vcmp.gt.f32.partialorder %v10754_v17, 0.0 }
 0x63e   :  { %v7484_v53 = vpop.eup %7483  ;;  %v3243_v36 = vadd.f32 %v3227_v12, %v3163_v4  ;;  %v3244_v3 = vadd.f32 %v3228_v54, %v3164_v26 }
 0x63f   :  { %v7486_v37 = vpop.eup %7485  ;;  %v3327_v23 = vmin.f32 %v3295_v2, 0.0  ;;  %v3328_v7 = vmin.f32 %v10827_v34, 0.0  ;;  %v6634_v28 = vadd.f32 -1.0, %v7484_v53  ;;  %vm3311_vm7 = vcmp.gt.f32.partialorder %v3295_v2, 0.0 }
 0x640   :  { %v7488_v6 = vpop.eup %7487  ;;  %v6635_v61 = vadd.f32 -1.0, %v7486_v37  ;;  %v3291_v38 = vadd.f32 %v3263_v25, %v3243_v36  ;;  %v10834_v9 = vadd.f32 %v3263_v25, %v3244_v3  ;;  %vm3312_vm9 = vcmp.gt.f32.partialorder %v10827_v34, 0.0  ;;  %v7256_v25 = vld [vmem:[%s12939_s2 + $0x208] sm:$0xff] }
 0x641   :  { %v7490_v22 = vpop.eup %7489  ;;  %v3349_v48 = vmul.f32 1.442695, %v3327_v23  ;;  %v3351_v60 = vmul.f32 1.442695, %v3328_v7  ;;  %v3399_v16 = vsel %vm3319_vm15, %v10774_v19, %v6634_v28  ;;  %v6624_v32 = vadd.f32 -1.0, %v7488_v6  ;;  %v7255_v6 = vld [vmem:[%s12939_s2 + $0x200] sm:$0xff] }
 0x642   :  { %v3400_v8 = vsel %vm3320_vm3, %v10777_v43, %v6635_v61  ;;  %v3259_v24 = vpop.permute.xlu1 %3258  ;;  %v3472_v1 = vpack.c.bf16 %v3399_v16, %v3397_v35  ;;  %v3323_v59 = vmin.f32 %v3291_v38, 0.0  ;;  %v3324_v19 = vmin.f32 %v10834_v9, 0.0  ;;  %v7259_v28 = vld [vmem:[%s12939_s2 + $0x220] sm:$0xff]  ;;  %v7261_v35 = vld [vmem:[%s12939_s2 + $0x230] sm:$0xff]  ;;  %v7262_v16 = vld [vmem:[%s12939_s2 + $0x238] sm:$0xff] }
 0x643   :  { %7491 = vpow2.f32 %v3349_v48  ;;  %v3473_v30 = vpack.c.bf16 %v3400_v8, %v3398_v45  ;;  %v3289_v49 = vadd.f32 %v3259_v24, %v3241_v40  ;;  %v3290_v4 = vadd.f32 %v3259_v24, %v3242_v13  ;;  %v7257_v40 = vld [vmem:[%s12939_s2 + $0x210] sm:$0xff]  ;;  %v7258_v13 = vld [vmem:[%s12939_s2 + $0x218] sm:$0xff]  ;;  %v7568_v48 = vld [vmem:[%s12938_s5 + $0x28] sm:$0xff] }
 0x644   :  { %7493 = vpow2.f32 %v3351_v60  ;;  %3734 = vmatpush.bf16.msrb.mxu0 %v3472_v1  ;;  %v3341_v62 = vmul.f32 1.442695, %v3323_v59  ;;  %v3343_v33 = vmul.f32 1.442695, %v3324_v19  ;;  %v6625_v39 = vadd.f32 -1.0, %v7490_v22  ;;  %v7567_v22 = vld [vmem:[%s12938_s5 + $0x38] sm:$0xff] }
 0x645   :  { %3903 = vmatpush.bf16.msrb.mxu1 %v3473_v30  ;;  %v3321_v26 = vmin.f32 %v3289_v49, 0.0  ;;  %v3322_v50 = vmin.f32 %v3290_v4, 0.0  ;;  %v3389_v12 = vsel %vm3309_vm5, %v10745_v58, %v6624_v32  ;;  %vm3305_vm11 = vcmp.gt.f32.partialorder %v3289_v49, 0.0  ;;  %v7569_v60 = vld [vmem:[%s12938_s5 + $0x30] sm:$0xff]  ;;  %v7263_v45 = vld [vmem:[%s12939_s2 + $0x240] sm:$0xff]  ;;  %v7266_v32 = vld [vmem:[%s12939_s2 + $0x258] sm:$0xff] }
 0x646   :  { %7495 = vpow2.f32 %v3341_v62  ;;  %v3390_v57 = vsel %vm3310_vm8, %v10754_v17, %v6625_v39  ;;  %vm3307_vm12 = vcmp.gt.f32.partialorder %v3291_v38, 0.0  ;;  %vm3306_vm15 = vcmp.gt.f32.partialorder %v3290_v4, 0.0 }
 0x647   :  { %v3337_v46 = vmul.f32 1.442695, %v3321_v26  ;;  %v3339_v20 = vmul.f32 1.442695, %v3322_v50  ;;  %7497 = vpow2.f32 %v3343_v33  ;;  %vm3308_vm3 = vcmp.gt.f32.partialorder %v10834_v9, 0.0  ;;  %v7265_v50 = vld [vmem:[%s12939_s2 + $0x250] sm:$0xff] }
 0x648   :  { %3735 = vmatpush.bf16.msrb.mxu0 %v3470_v31  ;;  %v7588_v61 = vmov 3  }
 0x649   :  { %v7492_v43 = vpop.eup %7491  ;;  %3904 = vmatpush.bf16.msrb.mxu1 %v3471_v47  ;;  %7499 = vpow2.f32 %v3337_v46  ;;  %7399 = vset.pattern.permute.xlu0 %v7588_v61 }
 0x64a   :  { %v7494_v44 = vpop.eup %7493  ;;  %v6626_v21 = vadd.f32 -1.0, %v7492_v43  ;;  %7501 = vpow2.f32 %v3339_v20  ;;  %7400 = vset.pattern.permute.xlu1 %v7588_v61  ;;  %4657 = vperm.xlu0 %7399, %v7567_v22  }
 0x64b   :  { %v6627_v56 = vadd.f32 -1.0, %v7494_v44  ;;  %4649 = vperm.xlu1 %7400, %v7568_v48   ;;  %7398 = vset.pattern.permute.xlu2 %v7588_v61 }
 0x64c   :  { %v3391_v54 = vsel %vm3311_vm7, %v3295_v2, %v6626_v21  ;;  %v7496_v31 = vpop.eup %7495  ;;  %4653 = vperm.xlu2 %7398, %v7569_v60  }
 0x64d   :  { %v3468_v15 = vpack.c.bf16 %v3391_v54, %v3389_v12  ;;  %v3392_v29 = vsel %vm3312_vm9, %v10827_v34, %v6627_v56  ;;  %v7498_v47 = vpop.eup %7497  ;;  %v6622_v53 = vadd.f32 -1.0, %v7496_v31  ;;  %v7267_v56 = vld [vmem:[%s12939_s2 + $0x260] sm:$0xff] }
 0x64e   :  { %v3469_v55 = vpack.c.bf16 %v3392_v29, %v3390_v57  ;;  %v6623_v42 = vadd.f32 -1.0, %v7498_v47  ;;  %v7268_v29 = vld [vmem:[%s12939_s2 + $0x268] sm:$0xff] }
 0x64f   :  { %3736 = vmatpush.bf16.msrb.mxu0 %v3468_v15  ;;  %v7500_v10 = vpop.eup %7499  ;;  %v3387_v7 = vsel %vm3307_vm12, %v3291_v38, %v6622_v53  ;;  %v7570_v38 = vld [vmem:[%s12938_s5 + $0x20] sm:$0xff] }
 0x650   :  { %3905 = vmatpush.bf16.msrb.mxu1 %v3469_v55  ;;  %v7502_v37 = vpop.eup %7501  ;;  %v6620_v58 = vadd.f32 -1.0, %v7500_v10  ;;  %v3388_v36 = vsel %vm3308_vm3, %v10834_v9, %v6623_v42  ;;  %v7260_v9 = vld [vmem:[%s12939_s2 + $0x228] sm:$0xff]  ;;  %v7269_v10 = vld [vmem:[%s12939_s2 + $0x270] sm:$0xff] }
 0x651   :  { %v6621_v2 = vadd.f32 -1.0, %v7502_v37 }
 0x652   :  { %v3385_v23 = vsel %vm3305_vm11, %v3289_v49, %v6620_v58  ;;  %4645 = vperm.xlu0 %7399, %v7570_v38   ;;  %v7264_v49 = vld [vmem:[%s12939_s2 + $0x248] sm:$0xff]  ;;  %v7273_v38 = vld [vmem:[%s12939_s2 + $0x290] sm:$0xff] }
 0x653   :  { %v3466_v17 = vpack.c.bf16 %v3387_v7, %v3385_v23  ;;  %v3386_v34 = vsel %vm3306_vm15, %v3290_v4, %v6621_v2  ;;  %v7270_v23 = vld [vmem:[%s12939_s2 + $0x278] sm:$0xff] }
 0x654   :  { %v3467_v3 = vpack.c.bf16 %v3388_v36, %v3386_v34 }
 0x655   :  { %3737 = vmatpush.bf16.msrb.mxu0 %v3466_v17 }
 0x656   :  { %3906 = vmatpush.bf16.msrb.mxu1 %v3467_v3  ;;  %v7271_v3 = vld [vmem:[%s12939_s2 + $0x280] sm:$0xff] }
 0x658   :  { %6828 = vmatmul.msk.bf16.vlgmr.msrb.gmra.mxu0 %vm884_vm0, %v7255_v6 }
 0x659   :  { %6860 = vmatmul.msk.bf16.vlgmr.msrb.gmra.mxu1 %vm884_vm0, %v7255_v6 }
 0x668   :  { %6829 = vmatmul.msk.bf16.gmra.mxu0 %vm884_vm0, %v7256_v25 }
 0x669   :  { %6861 = vmatmul.msk.bf16.gmra.mxu1 %vm884_vm0, %v7256_v25 }
 0x678   :  { %6830 = vmatmul.msk.bf16.gmra.mxu0 %vm884_vm0, %v7257_v40 }
 0x679   :  { %6862 = vmatmul.msk.bf16.gmra.mxu1 %vm884_vm0, %v7257_v40 }
 0x688   :  { %6831 = vmatmul.msk.bf16.gmra.mxu0 %vm884_vm0, %v7258_v13 }
 0x689   :  { %6863 = vmatmul.msk.bf16.gmra.mxu1 %vm884_vm0, %v7258_v13 }
 0x698   :  { %6832 = vmatmul.msk.bf16.gmra.mxu0 %vm884_vm0, %v7259_v28 }
 0x699   :  { %6864 = vmatmul.msk.bf16.gmra.mxu1 %vm884_vm0, %v7259_v28  ;;  %v7272_v28 = vld [vmem:[%s12939_s2 + $0x288] sm:$0xff] }
 0x6a8   :  { %6833 = vmatmul.msk.bf16.gmra.mxu0 %vm884_vm0, %v7260_v9 }
 0x6a9   :  { %6865 = vmatmul.msk.bf16.gmra.mxu1 %vm884_vm0, %v7260_v9 }
 0x6b8   :  { %6834 = vmatmul.msk.bf16.gmra.mxu0 %vm884_vm0, %v7261_v35 }
 0x6b9   :  { %6866 = vmatmul.msk.bf16.gmra.mxu1 %vm884_vm0, %v7261_v35 }
 0x6c8   :  { %6835 = vmatmul.msk.bf16.gmra.mxu0 %vm884_vm0, %v7262_v16 }
 0x6c9   :  { %6867 = vmatmul.msk.bf16.gmra.mxu1 %vm884_vm0, %v7262_v16 }
 0x6d5   :  { %v3739_v8 = vpop.f32.mrf.mxu0 }
 0x6d6   :  { %v3908_v24 = vpop.f32.mrf.mxu1  ;;  %4068 = vrot.lane.b32.xlu1 %v3739_v8, %s7579_s10  ;;  %v7274_v8 = vld [vmem:[%s12939_s2 + $0x298] sm:$0xff] }
 0x6d7   :  { %4084 = vrot.lane.b32.xlu0 %v3908_v24, %s7579_s10 }
 0x6d8   :  { %6836 = vmatmul.msk.bf16.gmra.mxu0 %vm884_vm0, %v7263_v45 }
 0x6d9   :  { %6868 = vmatmul.msk.bf16.gmra.mxu1 %vm884_vm0, %v7263_v45 }
 0x6dd   :  { %v3741_v1 = vpop.f32.mrf.mxu0 }
 0x6de   :  { %v3910_v30 = vpop.f32.mrf.mxu1  ;;  %4070 = vrot.lane.b32.xlu2 %v3741_v1, %s7579_s10 }
 0x6df   :  { %4086 = vrot.lane.b32.xlu1 %v3910_v30, %s7579_s10 }
 0x6e5   :  { %v3744_v4 = vpop.f32.mrf.mxu0 }
 0x6e6   :  { %v3913_v59 = vpop.f32.mrf.mxu1 }
 0x6e7   :  { %4088 = vrot.lane.b32.xlu0 %v3913_v59, %s7579_s10  ;;  %4072 = vrot.lane.b32.xlu1 %v3744_v4, %s7579_s10  ;;  %v7275_v4 = vld [vmem:[%s12939_s2 + $0x2a0] sm:$0xff] }
 0x6e8   :  { %6837 = vmatmul.msk.bf16.gmra.mxu0 %vm884_vm0, %v7264_v49 }
 0x6e9   :  { %6869 = vmatmul.msk.bf16.gmra.mxu1 %vm884_vm0, %v7264_v49 }
 0x6ed   :  { %v3746_v19 = vpop.f32.mrf.mxu0 }
 0x6ee   :  { %v3915_v26 = vpop.f32.mrf.mxu1  ;;  %4074 = vrot.lane.b32.xlu2 %v3746_v19, %s7579_s10 }
 0x6ef   :  { %4090 = vrot.lane.b32.xlu1 %v3915_v26, %s7579_s10 }
 0x6f5   :  { %v3749_v62 = vpop.f32.mrf.mxu0 }
 0x6f6   :  { %v3918_v33 = vpop.f32.mrf.mxu1  ;;  %4076 = vrot.lane.b32.xlu0 %v3749_v62, %s7579_s10  ;;  %v11036_v62 = vpop.permute.xlu2 %4653 }
 0x6f7   :  { %4092 = vrot.lane.b32.xlu2 %v3918_v33, %s7579_s10  ;;  %13448 = vst [vmem:[#allocation27_spill] sm:$0xff] %v11036_v62  ;;  %v7276_v33 = vld [vmem:[%s12939_s2 + $0x2a8] sm:$0xff] }
 0x6f8   :  { %6838 = vmatmul.msk.bf16.gmra.mxu0 %vm884_vm0, %v7265_v50 }
 0x6f9   :  { %6870 = vmatmul.msk.bf16.gmra.mxu1 %vm884_vm0, %v7265_v50 }
 0x6fd   :  { %v3751_v46 = vpop.f32.mrf.mxu0 }
 0x6fe   :  { %v3920_v20 = vpop.f32.mrf.mxu1  ;;  %4078 = vrot.lane.b32.xlu1 %v3751_v46, %s7579_s10 }
 0x6ff   :  { %4094 = vrot.lane.b32.xlu0 %v3920_v20, %s7579_s10 }
 0x705   :  { %v3754_v43 = vpop.f32.mrf.mxu0 }
 0x706   :  { %v3923_v39 = vpop.f32.mrf.mxu1  ;;  %4080 = vrot.lane.b32.xlu1 %v3754_v43, %s7579_s10 }
 0x707   :  { %4096 = vrot.lane.b32.xlu0 %v3923_v39, %s7579_s10 }
 0x708   :  { %6839 = vmatmul.msk.bf16.gmra.mxu0 %vm884_vm0, %v7266_v32 }
 0x709   :  { %6871 = vmatmul.msk.bf16.gmra.mxu1 %vm884_vm0, %v7266_v32 }
 0x70d   :  { %v3756_v44 = vpop.f32.mrf.mxu0 }
 0x70e   :  { %v3925_v21 = vpop.f32.mrf.mxu1  ;;  %4082 = vrot.lane.b32.xlu2 %v3756_v44, %s7579_s10 }
 0x70f   :  { %4098 = vrot.lane.b32.xlu1 %v3925_v21, %s7579_s10  ;;  %v7277_v21 = vld [vmem:[%s12939_s2 + $0x2b0] sm:$0xff]  ;;  %s7609_s10 = smov 118  }
 0x715   :  { %v3759_v12 = vpop.f32.mrf.mxu0 }
 0x716   :  { %v3928_v54 = vpop.f32.mrf.mxu1  ;;  %4148 = vrot.lane.b32.xlu2 %v3759_v12, %s7582_s27 }
 0x717   :  { %4164 = vrot.lane.b32.xlu1 %v3928_v54, %s7582_s27  ;;  %v11062_v54 = vpop.permute.xlu1 %4649 }
 0x718   :  { %6840 = vmatmul.msk.bf16.gmra.mxu0 %vm884_vm0, %v7267_v56  ;;  %13450 = vst [vmem:[#allocation71_spill] sm:$0xff] %v11062_v54 }
 0x719   :  { %6872 = vmatmul.msk.bf16.gmra.mxu1 %vm884_vm0, %v7267_v56 }
 0x71d   :  { %v3761_v15 = vpop.f32.mrf.mxu0 }
 0x71e   :  { %v3930_v57 = vpop.f32.mrf.mxu1  ;;  %4150 = vrot.lane.b32.xlu0 %v3761_v15, %s7582_s27 }
 0x71f   :  { %4166 = vrot.lane.b32.xlu2 %v3930_v57, %s7582_s27 }
 0x725   :  { %v3764_v31 = vpop.f32.mrf.mxu0 }
 0x726   :  { %v3933_v55 = vpop.f32.mrf.mxu1  ;;  %4152 = vrot.lane.b32.xlu1 %v3764_v31, %s7582_s27 }
 0x727   :  { %4168 = vrot.lane.b32.xlu0 %v3933_v55, %s7582_s27 }
 0x728   :  { %6841 = vmatmul.msk.bf16.gmra.mxu0 %vm884_vm0, %v7268_v29 }
 0x729   :  { %6873 = vmatmul.msk.bf16.gmra.mxu1 %vm884_vm0, %v7268_v29 }
 0x72d   :  { %v3766_v47 = vpop.f32.mrf.mxu0 }
 0x72e   :  { %v3935_v53 = vpop.f32.mrf.mxu1  ;;  %4154 = vrot.lane.b32.xlu2 %v3766_v47, %s7582_s27  ;;  %v7278_v47 = vld [vmem:[%s12939_s2 + $0x2b8] sm:$0xff] }
 0x72f   :  { %4170 = vrot.lane.b32.xlu1 %v3935_v53, %s7582_s27 }
 0x735   :  { %v3769_v42 = vpop.f32.mrf.mxu0 }
 0x736   :  { %v3938_v37 = vpop.f32.mrf.mxu1  ;;  %4156 = vrot.lane.b32.xlu2 %v3769_v42, %s7582_s27 }
 0x737   :  { %4172 = vrot.lane.b32.xlu1 %v3938_v37, %s7582_s27 }
 0x738   :  { %6842 = vmatmul.msk.bf16.gmra.mxu0 %vm884_vm0, %v7269_v10  ;;  %v11046_v32 = vpop.permute.xlu2 %4070 }
 0x739   :  { %6874 = vmatmul.msk.bf16.gmra.mxu1 %vm884_vm0, %v7269_v10  ;;  %13449 = vst [vmem:[#allocation76_spill] sm:$0xff] %v11046_v32 }
 0x73d   :  { %v3771_v58 = vpop.f32.mrf.mxu0 }
 0x73e   :  { %v3940_v2 = vpop.f32.mrf.mxu1  ;;  %4158 = vrot.lane.b32.xlu0 %v3771_v58, %s7582_s27 }
 0x73f   :  { %4174 = vrot.lane.b32.xlu2 %v3940_v2, %s7582_s27 }
 0x745   :  { %v3774_v7 = vpop.f32.mrf.mxu0 }
 0x746   :  { %v3943_v17 = vpop.f32.mrf.mxu1 }
 0x747   :  { %4176 = vrot.lane.b32.xlu1 %v3943_v17, %s7582_s27  ;;  %4160 = vrot.lane.b32.xlu2 %v3774_v7, %s7582_s27 }
 0x748   :  { %6843 = vmatmul.msk.bf16.gmra.mxu0 %vm884_vm0, %v7270_v23  ;;  %v11053_v44 = vpop.permute.xlu2 %4074  ;;  %v11072_v31 = vpop.permute.xlu1 %4068 }
 0x749   :  { %6875 = vmatmul.msk.bf16.gmra.mxu1 %vm884_vm0, %v7270_v23  ;;  %v7279_v23 = vld [vmem:[%s12939_s2 + $0x2c0] sm:$0xff] }
 0x74d   :  { %v3776_v34 = vpop.f32.mrf.mxu0 }
 0x74e   :  { %v3945_v36 = vpop.f32.mrf.mxu1  ;;  %4162 = vrot.lane.b32.xlu0 %v3776_v34, %s7582_s27 }
 0x74f   :  { %4178 = vrot.lane.b32.xlu2 %v3945_v36, %s7582_s27 }
 0x751   :  { %v11066_v15 = vpop.permute.xlu2 %4092  ;;  %v11085_v42 = vpop.permute.xlu1 %4086 }
 0x752   :  { %13456 = vst [vmem:[#allocation49_spill] sm:$0xff] %v11085_v42 }
 0x755   :  { %v3779_v6 = vpop.f32.mrf.mxu0 }
 0x756   :  { %v3948_v25 = vpop.f32.mrf.mxu1 }
 0x757   :  { %4244 = vrot.lane.b32.xlu1 %v3948_v25, %s7583_s16  ;;  %4228 = vrot.lane.b32.xlu2 %v3779_v6, %s7583_s16 }
 0x758   :  { %6844 = vmatmul.msk.bf16.gmra.mxu0 %vm884_vm0, %v7271_v3 }
 0x759   :  { %6876 = vmatmul.msk.bf16.gmra.mxu1 %vm884_vm0, %v7271_v3  ;;  %v11096_v17 = vpop.permute.xlu1 %4072  ;;  %v11103_v3 = vpop.permute.xlu0 %4657 }
 0x75a   :  { %13460 = vst [vmem:[#allocation39_spill] sm:$0xff] %v11103_v3 }
 0x75d   :  { %v3781_v40 = vpop.f32.mrf.mxu0 }
 0x75e   :  { %v3950_v13 = vpop.f32.mrf.mxu1  ;;  %4230 = vrot.lane.b32.xlu0 %v3781_v40, %s7583_s16 }
 0x75f   :  { %4246 = vrot.lane.b32.xlu2 %v3950_v13, %s7583_s16 }
 0x761   :  { %v11109_v13 = vpop.permute.xlu1 %4090 }
 0x765   :  { %v3784_v61 = vpop.f32.mrf.mxu0 }
 0x766   :  { %v3953_v22 = vpop.f32.mrf.mxu1 }
 0x767   :  { %4248 = vrot.lane.b32.xlu1 %v3953_v22, %s7583_s16  ;;  %4232 = vrot.lane.b32.xlu2 %v3784_v61, %s7583_s16  ;;  %v7280_v61 = vld [vmem:[%s12939_s2 + $0x2c8] sm:$0xff] }
 0x768   :  { %6845 = vmatmul.msk.bf16.gmra.mxu0 %vm884_vm0, %v7272_v28  ;;  %v11074_v55 = vpop.permute.xlu2 %4082 }
 0x769   :  { %6877 = vmatmul.msk.bf16.gmra.mxu1 %vm884_vm0, %v7272_v28  ;;  %13453 = vst [vmem:[#allocation54_spill] sm:$0xff] %v11074_v55  ;;  %v11111_v28 = vpop.permute.xlu0 %4645 }
 0x76a   :  { %13461 = vst [vmem:[#allocation44_spill] sm:$0xff] %v11111_v28 }
 0x76d   :  { %v3786_v48 = vpop.f32.mrf.mxu0 }
 0x76e   :  { %v3955_v60 = vpop.f32.mrf.mxu1  ;;  %4234 = vrot.lane.b32.xlu0 %v3786_v48, %s7583_s16 }
 0x76f   :  { %4250 = vrot.lane.b32.xlu2 %v3955_v60, %s7583_s16 }
 0x770   :  { %v11087_v37 = vpop.permute.xlu2 %4148  ;;  %v11118_v60 = vpop.permute.xlu1 %4078 }
 0x775   :  { %v3789_v9 = vpop.f32.mrf.mxu0 }
 0x776   :  { %v3958_v35 = vpop.f32.mrf.mxu1 }
 0x777   :  { %4252 = vrot.lane.b32.xlu1 %v3958_v35, %s7583_s16  ;;  %4236 = vrot.lane.b32.xlu2 %v3789_v9, %s7583_s16  ;;  %v11124_v35 = vpop.permute.xlu0 %4084 }
 0x778   :  { %6846 = vmatmul.msk.bf16.gmra.mxu0 %vm884_vm0, %v7273_v38 }
 0x779   :  { %6878 = vmatmul.msk.bf16.gmra.mxu1 %vm884_vm0, %v7273_v38  ;;  %v11099_v36 = vpop.permute.xlu2 %4166 }
 0x77a   :  { %13459 = vst [vmem:[#allocation28_spill] sm:$0xff] %v11099_v36 }
 0x77d   :  { %v3791_v16 = vpop.f32.mrf.mxu0 }
 0x77e   :  { %v3960_v45 = vpop.f32.mrf.mxu1  ;;  %4238 = vrot.lane.b32.xlu0 %v3791_v16, %s7583_s16 }
 0x77f   :  { %4254 = vrot.lane.b32.xlu2 %v3960_v45, %s7583_s16  ;;  %v11129_v45 = vpop.permute.xlu1 %4080 }
 0x780   :  { %13462 = vst [vmem:[#allocation31_spill] sm:$0xff] %v11129_v45 }
 0x785   :  { %v3794_v24 = vpop.f32.mrf.mxu0 }
 0x786   :  { %v3963_v1 = vpop.f32.mrf.mxu1  ;;  %4240 = vrot.lane.b32.xlu1 %v3794_v24, %s7583_s16  ;;  %v7281_v24 = vld [vmem:[%s12939_s2 + $0x2d0] sm:$0xff] }
 0x787   :  { %4256 = vrot.lane.b32.xlu0 %v3963_v1, %s7583_s16 }
 0x788   :  { %6847 = vmatmul.msk.bf16.gmra.mxu0 %vm884_vm0, %v7274_v8  ;;  %v11107_v40 = vpop.permute.xlu2 %4154 }
 0x789   :  { %6879 = vmatmul.msk.bf16.gmra.mxu1 %vm884_vm0, %v7274_v8 }
 0x78d   :  { %v3796_v30 = vpop.f32.mrf.mxu0 }
 0x78e   :  { %v3965_v49 = vpop.f32.mrf.mxu1  ;;  %4242 = vrot.lane.b32.xlu2 %v3796_v30, %s7583_s16  ;;  %v11136_v30 = vpop.permute.xlu0 %4088 }
 0x78f   :  { %4258 = vrot.lane.b32.xlu1 %v3965_v49, %s7583_s16  ;;  %s7604_s16 = smov 123  }
 0x790   :  { %v11121_v38 = vpop.permute.xlu2 %4156 }
 0x795   :  { %v11026_v59 = vpop.f32.mrf.mxu0 }
 0x796   :  { %v11028_v19 = vpop.f32.mrf.mxu1 }
 0x798   :  { %6848 = vmatmul.msk.bf16.gmra.mxu0 %vm884_vm0, %v7275_v4 }
 0x799   :  { %6880 = vmatmul.msk.bf16.gmra.mxu1 %vm884_vm0, %v7275_v4  ;;  %v11131_v8 = vpop.permute.xlu2 %4174  ;;  %v11142_v4 = vpop.permute.xlu1 %4098 }
 0x79a   :  { %13463 = vst [vmem:[#allocation47_spill] sm:$0xff] %v11131_v8 }
 0x79b   :  { %13464 = vst [vmem:[#allocation48_spill] sm:$0xff] %v11142_v4 }
 0x79d   :  { %v11032_v26 = vpop.f32.mrf.mxu0 }
 0x79e   :  { %13446 = vst [vmem:[#allocation3_spill] sm:$0xff] %v11032_v26  ;;  %v11034_v50 = vpop.f32.mrf.mxu1 }
 0x79f   :  { %13447 = vst [vmem:[#allocation75_spill] sm:$0xff] %v11034_v50 }
 0x7a5   :  { %v11041_v46 = vpop.f32.mrf.mxu0 }
 0x7a6   :  { %v11043_v20 = vpop.f32.mrf.mxu1 }
 0x7a8   :  { %6849 = vmatmul.msk.bf16.gmra.mxu0 %vm884_vm0, %v7276_v33 }
 0x7a9   :  { %6881 = vmatmul.msk.bf16.gmra.mxu1 %vm884_vm0, %v7276_v33  ;;  %v11144_v33 = vpop.permute.xlu2 %4160 }
 0x7aa   :  { %13465 = vst [vmem:[#allocation52_spill] sm:$0xff] %v11144_v33 }
 0x7ad   :  { %v11049_v43 = vpop.f32.mrf.mxu0 }
 0x7ae   :  { %v11051_v39 = vpop.f32.mrf.mxu1 }
 0x7b5   :  { %v11058_v56 = vpop.f32.mrf.mxu0 }
 0x7b6   :  { %v11060_v12 = vpop.f32.mrf.mxu1 }
 0x7b8   :  { %6850 = vmatmul.msk.bf16.gmra.mxu0 %vm884_vm0, %v7277_v21 }
 0x7b9   :  { %6882 = vmatmul.msk.bf16.gmra.mxu1 %vm884_vm0, %v7277_v21 }
 0x7bd   :  { %v11068_v57 = vpop.f32.mrf.mxu0 }
 0x7be   :  { %13451 = vst [vmem:[#allocation72_spill] sm:$0xff] %v11068_v57  ;;  %v11070_v29 = vpop.f32.mrf.mxu1  ;;  %v13489_v57 = vld [vmem:[#allocation6_spill] sm:$0xff] }
 0x7bf   :  { %13452 = vst [vmem:[#allocation53_spill] sm:$0xff] %v11070_v29 }
 0x7c5   :  { %v11079_v53 = vpop.f32.mrf.mxu0 }
 0x7c6   :  { %13454 = vst [vmem:[#allocation67_spill] sm:$0xff] %v11079_v53  ;;  %v11081_v10 = vpop.f32.mrf.mxu1 }
 0x7c7   :  { %13455 = vst [vmem:[#allocation30_spill] sm:$0xff] %v11081_v10 }
 0x7c8   :  { %6851 = vmatmul.msk.bf16.gmra.mxu0 %vm884_vm0, %v7278_v47 }
 0x7c9   :  { %6883 = vmatmul.msk.bf16.gmra.mxu1 %vm884_vm0, %v7278_v47  ;;  %v11146_v47 = vpop.permute.xlu0 %4076 }
 0x7cd   :  { %v11089_v58 = vpop.f32.mrf.mxu0 }
 0x7ce   :  { %13457 = vst [vmem:[#allocation32_spill] sm:$0xff] %v11089_v58  ;;  %v11091_v2 = vpop.f32.mrf.mxu1 }
 0x7cf   :  { %13458 = vst [vmem:[#allocation25_spill] sm:$0xff] %v11091_v2 }
 0x7d5   :  { %v3819_v7 = vpop.f32.mrf.mxu0 }
 0x7d6   :  { %v3988_v34 = vpop.f32.mrf.mxu1  ;;  %4308 = vrot.lane.b32.xlu1 %v3819_v7, %s7585_s22  ;;  %v7282_v7 = vld [vmem:[%s12939_s2 + $0x2d8] sm:$0xff] }
 0x7d8   :  { %6852 = vmatmul.msk.bf16.gmra.mxu0 %vm884_vm0, %v7279_v23 }
 0x7d9   :  { %6884 = vmatmul.msk.bf16.gmra.mxu1 %vm884_vm0, %v7279_v23 }
 0x7dd   :  { %v3821_v6 = vpop.f32.mrf.mxu0 }
 0x7de   :  { %v3990_v25 = vpop.f32.mrf.mxu1  ;;  %4324 = vrot.lane.b32.xlu1 %v3988_v34, %s7585_s22  ;;  %4310 = vrot.lane.b32.xlu2 %v3821_v6, %s7585_s22  ;;  %v11153_v6 = vpop.permute.xlu1 %4164 }
 0x7e5   :  { %v3824_v22 = vpop.f32.mrf.mxu0 }
 0x7e6   :  { %v3993_v48 = vpop.f32.mrf.mxu1  ;;  %4326 = vrot.lane.b32.xlu2 %v3990_v25, %s7585_s22  ;;  %4312 = vrot.lane.b32.xlu0 %v3824_v22, %s7585_s22  ;;  %v11159_v22 = vpop.permute.xlu0 %4094 }
 0x7e8   :  { %6853 = vmatmul.msk.bf16.gmra.mxu0 %vm884_vm0, %v7280_v61 }
 0x7e9   :  { %6885 = vmatmul.msk.bf16.gmra.mxu1 %vm884_vm0, %v7280_v61  ;;  %v11156_v61 = vpop.permute.xlu2 %4178 }
 0x7ea   :  { %13466 = vst [vmem:[#allocation23_spill] sm:$0xff] %v11156_v61 }
 0x7ed   :  { %v3826_v9 = vpop.f32.mrf.mxu0 }
 0x7ee   :  { %v3995_v16 = vpop.f32.mrf.mxu1  ;;  %4328 = vrot.lane.b32.xlu2 %v3993_v48, %s7585_s22  ;;  %4314 = vrot.lane.b32.xlu1 %v3826_v9, %s7585_s22  ;;  %v11163_v9 = vpop.permute.xlu1 %4152 }
 0x7ef   :  { %4330 = vrot.lane.b32.xlu0 %v3995_v16, %s7585_s22 }
 0x7f5   :  { %v3829_v1 = vpop.f32.mrf.mxu0 }
 0x7f6   :  { %v3998_v49 = vpop.f32.mrf.mxu1  ;;  %4316 = vrot.lane.b32.xlu2 %v3829_v1, %s7585_s22  ;;  %v11169_v1 = vpop.permute.xlu0 %4096 }
 0x7f7   :  { %4332 = vrot.lane.b32.xlu1 %v3998_v49, %s7585_s22  ;;  %13467 = vst [vmem:[#allocation33_spill] sm:$0xff] %v11169_v1  ;;  %v7283_v49 = vld [vmem:[%s12939_s2 + $0x2e0] sm:$0xff] }
 0x7f8   :  { %6854 = vmatmul.msk.bf16.gmra.mxu0 %vm884_vm0, %v7281_v24 }
 0x7f9   :  { %6886 = vmatmul.msk.bf16.gmra.mxu1 %vm884_vm0, %v7281_v24  ;;  %v11167_v24 = vpop.permute.xlu2 %4228 }
 0x7fd   :  { %v3831_v21 = vpop.f32.mrf.mxu0 }
 0x7fe   :  { %v4000_v23 = vpop.f32.mrf.mxu1  ;;  %4318 = vrot.lane.b32.xlu0 %v3831_v21, %s7585_s22 }
 0x7ff   :  { %4334 = vrot.lane.b32.xlu2 %v4000_v23, %s7585_s22 }
 0x805   :  { %v3834_v34 = vpop.f32.mrf.mxu0 }
 0x806   :  { %v4003_v25 = vpop.f32.mrf.mxu1  ;;  %4320 = vrot.lane.b32.xlu0 %v3834_v34, %s7585_s22  ;;  %v11180_v34 = vpop.permute.xlu0 %4150 }
 0x807   :  { %4336 = vrot.lane.b32.xlu2 %v4003_v25, %s7585_s22  ;;  %13468 = vst [vmem:[#allocation35_spill] sm:$0xff] %v11180_v34  ;;  %v11182_v25 = vpop.permute.xlu2 %4246 }
 0x808   :  { %6855 = vmatmul.msk.bf16.gmra.mxu0 %vm884_vm0, %v7282_v7  ;;  %13469 = vst [vmem:[#allocation36_spill] sm:$0xff] %v11182_v25 }
 0x809   :  { %6887 = vmatmul.msk.bf16.gmra.mxu1 %vm884_vm0, %v7282_v7  ;;  %v11176_v7 = vpop.permute.xlu1 %4170 }
 0x80d   :  { %v3836_v48 = vpop.f32.mrf.mxu0 }
 0x80e   :  { %v4005_v16 = vpop.f32.mrf.mxu1  ;;  %4322 = vrot.lane.b32.xlu1 %v3836_v48, %s7585_s22 }
 0x80f   :  { %4338 = vrot.lane.b32.xlu0 %v4005_v16, %s7585_s22  ;;  %v11193_v62 = vpop.permute.xlu2 %4232 }
 0x811   :  { %v11186_v3 = vpop.permute.xlu1 %4172 }
 0x815   :  { %v3839_v21 = vpop.f32.mrf.mxu0 }
 0x816   :  { %v4008_v23 = vpop.f32.mrf.mxu1  ;;  %4388 = vrot.lane.b32.xlu1 %v3839_v21, %s7580_s13  ;;  %v11188_v21 = vpop.permute.xlu0 %4168 }
 0x817   :  { %4404 = vrot.lane.b32.xlu0 %v4008_v23, %s7580_s13  ;;  %v7284_v23 = vld [vmem:[%s12939_s2 + $0x2e8] sm:$0xff]  ;;  %v11204_v0 = vpop.permute.xlu2 %4250 }
 0x818   :  { %6856 = vmatmul.msk.bf16.gmra.mxu0 %vm884_vm0, %v7283_v49 }
 0x819   :  { %6888 = vmatmul.msk.bf16.gmra.mxu1 %vm884_vm0, %v7283_v49 }
 0x81d   :  { %v3841_v48 = vpop.f32.mrf.mxu0 }
 0x81e   :  { %v4010_v16 = vpop.f32.mrf.mxu1  ;;  %4390 = vrot.lane.b32.xlu2 %v3841_v48, %s7580_s13  ;;  %v11199_v48 = vpop.permute.xlu1 %4176 }
 0x81f   :  { %4406 = vrot.lane.b32.xlu1 %v4010_v16, %s7580_s13  ;;  %13470 = vst [vmem:[#allocation40_spill] sm:$0xff] %v11199_v48  ;;  %v11201_v16 = vpop.permute.xlu0 %4158 }
 0x820   :  { %13471 = vst [vmem:[#allocation19_spill] sm:$0xff] %v11201_v16  ;;  %v13492_v16 = vld [vmem:[#allocation26_spill] sm:$0xff] }
 0x825   :  { %v3844_v49 = vpop.f32.mrf.mxu0 }
 0x826   :  { %v4013_v54 = vpop.f32.mrf.mxu1  ;;  %4392 = vrot.lane.b32.xlu0 %v3844_v49, %s7580_s13  ;;  %v11207_v52 = vpop.permute.xlu1 %4244 }
 0x827   :  { %4408 = vrot.lane.b32.xlu2 %v4013_v54, %s7580_s13  ;;  %v11209_v49 = vpop.permute.xlu0 %4162  ;;  %v7285_v54 = vld [vmem:[%s12939_s2 + $0x2f0] sm:$0xff] }
 0x828   :  { %6857 = vmatmul.msk.bf16.gmra.mxu0 %vm884_vm0, %v7284_v23  ;;  %13472 = vst [vmem:[#allocation45_spill] sm:$0xff] %v11209_v49 }
 0x829   :  { %6889 = vmatmul.msk.bf16.gmra.mxu1 %vm884_vm0, %v7284_v23 }
 0x82d   :  { %v3846_v28 = vpop.f32.mrf.mxu0 }
 0x82e   :  { %v4015_v51 = vpop.f32.mrf.mxu1  ;;  %4394 = vrot.lane.b32.xlu1 %v3846_v28, %s7580_s13  ;;  %v11217_v28 = vpop.permute.xlu2 %4236 }
 0x82f   :  { %4410 = vrot.lane.b32.xlu0 %v4015_v51, %s7580_s13  ;;  %v11220_v51 = vpop.permute.xlu1 %4248  ;;  %v11222_v50 = vpop.permute.xlu0 %4230 }
 0x830   :  { %13473 = vst [vmem:[#allocation50_spill] sm:$0xff] %v11222_v50 }
 0x835   :  { %v3849_v23 = vpop.f32.mrf.mxu0 }
 0x836   :  { %v4018_v18 = vpop.f32.mrf.mxu1 }
 0x837   :  { %4412 = vrot.lane.b32.xlu2 %v4018_v18, %s7580_s13  ;;  %4396 = vrot.lane.b32.xlu0 %v3849_v23, %s7580_s13  ;;  %v11226_v34 = vpop.permute.xlu1 %4252  ;;  %v11228_v18 = vpop.permute.xlu2 %4254 }
 0x838   :  { %6858 = vmatmul.msk.bf16.gmra.mxu0 %vm884_vm0, %v7285_v54  ;;  %13474 = vst [vmem:[#allocation59_spill] sm:$0xff] %v11228_v18  ;;  %v11230_v23 = vpop.permute.xlu0 %4234  ;;  %v13488_v18 = vld [vmem:[#allocation17_spill] sm:$0xff] }
 0x839   :  { %6890 = vmatmul.msk.bf16.gmra.mxu1 %vm884_vm0, %v7285_v54  ;;  %v7286_v54 = vld [vmem:[%s12939_s2 + $0x2f8] sm:$0xff] }
 0x83d   :  { %v3851_v26 = vpop.f32.mrf.mxu0 }
 0x83e   :  { %v4020_v25 = vpop.f32.mrf.mxu1  ;;  %4398 = vrot.lane.b32.xlu1 %v3851_v26, %s7580_s13 }
 0x83f   :  { %4414 = vrot.lane.b32.xlu0 %v4020_v25, %s7580_s13  ;;  %v11239_v26 = vpop.permute.xlu1 %4240  ;;  %v11241_v25 = vpop.permute.xlu2 %4242 }
 0x840   :  { %13475 = vst [vmem:[#allocation4_spill] sm:$0xff] %v11239_v26  ;;  %v11243_v50 = vpop.permute.xlu0 %4238 }
 0x841   :  { %13476 = vst [vmem:[#allocation41_spill] sm:$0xff] %v11241_v25 }
 0x842   :  { %13477 = vst [vmem:[#allocation37_spill] sm:$0xff] %v11243_v50  ;;  %v4180_v50 = vsel %vm1432_vm10, %v11087_v37, %v11153_v6 }
 0x845   :  { %v3854_v36 = vpop.f32.mrf.mxu0 }
 0x846   :  { %v4023_v32 = vpop.f32.mrf.mxu1 }
 0x847   :  { %4416 = vrot.lane.b32.xlu2 %v4023_v32, %s7580_s13  ;;  %4400 = vrot.lane.b32.xlu0 %v3854_v36, %s7580_s13  ;;  %v11247_v58 = vpop.permute.xlu2 %4310  ;;  %v11249_v32 = vpop.permute.xlu1 %4258 }
 0x848   :  { %6859 = vmatmul.msk.bf16.gmra.mxu0 %vm884_vm0, %v7286_v54  ;;  %13478 = vst [vmem:[#allocation42_spill] sm:$0xff] %v11247_v58  ;;  %v11251_v49 = vpop.permute.xlu0 %4256 }
 0x849   :  { %6891 = vmatmul.msk.bf16.gmra.mxu1 %vm884_vm0, %v7286_v54  ;;  %13479 = vst [vmem:[#allocation51_spill] sm:$0xff] %v11249_v32 }
 0x84a   :  { %13480 = vst [vmem:[#allocation22_spill] sm:$0xff] %v11251_v49 }
 0x84d   :  { %v3856_v42 = vpop.f32.mrf.mxu0 }
 0x84e   :  { %v4025_v2 = vpop.f32.mrf.mxu1  ;;  %4402 = vrot.lane.b32.xlu1 %v3856_v42, %s7580_s13 }
 0x84f   :  { %4418 = vrot.lane.b32.xlu0 %v4025_v2, %s7580_s13  ;;  %v4309_v25 = vpop.permute.xlu1 %4308  ;;  %v11255_v61 = vpop.permute.xlu2 %4326 }
 0x850   :  { %13481 = vst [vmem:[#allocation64_spill] sm:$0xff] %v11255_v61 }
 0x855   :  { %v3859_v36 = vpop.f32.mrf.mxu0 }
 0x856   :  { %v4028_v54 = vpop.f32.mrf.mxu1  ;;  %4468 = vrot.lane.b32.xlu2 %v3859_v36, %s7581_s24 }
 0x857   :  { %4484 = vrot.lane.b32.xlu1 %v4028_v54, %s7581_s24  ;;  %v4325_v58 = vpop.permute.xlu1 %4324  ;;  %v11262_v49 = vpop.permute.xlu2 %4328 }
 0x858   :  { %v11257_v10 = vpop.permute.xlu0 %4312 }
 0x85d   :  { %v3861_v26 = vpop.f32.mrf.mxu0 }
 0x85e   :  { %v4030_v42 = vpop.f32.mrf.mxu1  ;;  %4470 = vrot.lane.b32.xlu0 %v3861_v26, %s7581_s24 }
 0x85f   :  { %4486 = vrot.lane.b32.xlu2 %v4030_v42, %s7581_s24  ;;  %v11273_v42 = vpop.permute.xlu2 %4316 }
 0x860   :  { %v11267_v61 = vpop.permute.xlu1 %4314 }
 0x861   :  { %v11265_v36 = vpop.permute.xlu0 %4330 }
 0x865   :  { %v3864_v2 = vpop.f32.mrf.mxu0 }
 0x866   :  { %v4033_v32 = vpop.f32.mrf.mxu1  ;;  %4472 = vrot.lane.b32.xlu0 %v3864_v2, %s7581_s24 }
 0x867   :  { %4488 = vrot.lane.b32.xlu2 %v4033_v32, %s7581_s24  ;;  %v11281_v55 = vpop.permute.xlu2 %4334 }
 0x868   :  { %13484 = vst [vmem:[#allocation43_spill] sm:$0xff] %v11281_v55 }
 0x869   :  { %v11277_v32 = vpop.permute.xlu1 %4332 }
 0x86d   :  { %v3866_v54 = vpop.f32.mrf.mxu0 }
 0x86e   :  { %v4035_v53 = vpop.f32.mrf.mxu1  ;;  %4474 = vrot.lane.b32.xlu1 %v3866_v54, %s7581_s24  ;;  %v4100_v54 = vsel %vm1351_vm1, %v11072_v31, %v11124_v35 }
 0x86f   :  { %4490 = vrot.lane.b32.xlu0 %v4035_v53, %s7581_s24  ;;  %v4108_v53 = vsel %vm1351_vm1, %v11124_v35, %v11072_v31  ;;  %v4188_v31 = vsel %vm1432_vm10, %v11153_v6, %v11087_v37  ;;  %v4260_v35 = vsel %vm1513_vm13, %v11167_v24, %v11207_v52  ;;  %v4348_v37 = vsel %vm620_vm2, %v4325_v58, %v4309_v25  ;;  %v11325_v45 = vpop.permute.xlu2 %4336 }
 0x870   :  { %v11271_v26 = vpop.permute.xlu0 %4318  ;;  %v4196_v6 = vmul.f32 %v13378_v63, %v4188_v31  ;;  %v4277_v1 = vmul.f32 %v13489_v57, %v4260_v35  ;;  %13490 = vst [vmem:[#allocation77_spill] sm:$0xff] %v11325_v45 }
 0x871   :  { %13482 = vst [vmem:[#allocation34_spill] sm:$0xff] %v11271_v26  ;;  %v4117_v26 = vmul.f32 %v13375_v11, %v4100_v54 }
 0x873   :  { %v4133_v54 = vadd.f32 %v4117_v26, %v11028_v19 }
 0x875   :  { %v3869_v33 = vpop.f32.mrf.mxu0 }
 0x876   :  { %v4038_v2 = vpop.f32.mrf.mxu1  ;;  %4476 = vrot.lane.b32.xlu1 %v3869_v33, %s7581_s24 }
 0x877   :  { %4492 = vrot.lane.b32.xlu0 %v4038_v2, %s7581_s24 }
 0x878   :  { %v11279_v48 = vpop.permute.xlu0 %4320 }
 0x879   :  { %13483 = vst [vmem:[#allocation2_spill] sm:$0xff] %v11279_v48  ;;  %v4116_v48 = vmul.f32 %v13374_v41, %v4108_v53 }
 0x87b   :  { %v4132_v53 = vadd.f32 %v4116_v48, %v11026_v59  ;;  %v13491_v48 = vld [vmem:[#allocation21_spill] sm:$0xff] }
 0x87d   :  { %v3871_v4 = vpop.f32.mrf.mxu0  ;;  %v4212_v19 = vadd.f32 %v4196_v6, %v4132_v53 }
 0x87e   :  { %v4040_v33 = vpop.f32.mrf.mxu1  ;;  %4478 = vrot.lane.b32.xlu2 %v3871_v4, %s7581_s24  ;;  %v4268_v4 = vsel %vm1513_vm13, %v11207_v52, %v11167_v24 }
 0x87f   :  { %4494 = vrot.lane.b32.xlu1 %v4040_v33, %s7581_s24  ;;  %v4340_v33 = vsel %vm620_vm2, %v4309_v25, %v4325_v58  ;;  %v4276_v29 = vmul.f32 %v13488_v18, %v4268_v4  ;;  %v4357_v58 = vmul.f32 %v13492_v16, %v4348_v37 }
 0x880   :  { %v11293_v2 = vpop.permute.xlu1 %4322  ;;  %v4356_v26 = vmul.f32 %v13491_v48, %v4340_v33 }
 0x881   :  { %13485 = vst [vmem:[#allocation46_spill] sm:$0xff] %v11293_v2  ;;  %v11297_v55 = vpop.permute.xlu0 %4338  ;;  %v13487_v2 = vld [vmem:[#allocation69_spill] sm:$0xff] }
 0x882   :  { %13486 = vst [vmem:[#allocation10_spill] sm:$0xff] %v11297_v55  ;;  %v4197_v55 = vmul.f32 %v13487_v2, %v4180_v50  ;;  %v4292_v50 = vadd.f32 %v4276_v29, %v4212_v19  ;;  %v4102_v29 = vsel %vm1351_vm1, %v11096_v17, %v11136_v30 }
 0x883   :  { %v4121_v19 = vmul.f32 %v13375_v11, %v4102_v29 }
 0x884   :  { %v4213_v24 = vadd.f32 %v4197_v55, %v4133_v54  ;;  %v4372_v8 = vadd.f32 %v4356_v26, %v4292_v50  ;;  %v4110_v54 = vsel %vm1351_vm1, %v11136_v30, %v11096_v17  ;;  %v4182_v17 = vsel %vm1432_vm10, %v11163_v9, %v11188_v21 }
 0x885   :  { %v3874_v52 = vpop.f32.mrf.mxu0  ;;  %v4262_v30 = vsel %vm1513_vm13, %v11193_v62, %v11220_v51 }
 0x886   :  { %v4043_v59 = vpop.f32.mrf.mxu1  ;;  %4480 = vrot.lane.b32.xlu0 %v3874_v52, %s7581_s24  ;;  %v4293_v31 = vadd.f32 %v4277_v1, %v4213_v24  ;;  %v11345_v1 = vpop.permute.xlu2 %4390  ;;  %v4270_v24 = vsel %vm1513_vm13, %v11220_v51, %v11193_v62  ;;  %v4350_v62 = vsel %vm620_vm2, %v11262_v49, %v11257_v10  ;;  %v4281_v50 = vmul.f32 %v13489_v57, %v4262_v30 }
 0x887   :  { %4496 = vrot.lane.b32.xlu2 %v4043_v59, %s7581_s24  ;;  %v4280_v51 = vmul.f32 %v13488_v18, %v4270_v24 }
 0x888   :  { %v4389_v25 = vpop.permute.xlu1 %4388  ;;  %v4373_v52 = vadd.f32 %v4357_v58, %v4293_v31  ;;  %v4137_v58 = vadd.f32 %v4121_v19, %v11043_v20  ;;  %v4201_v20 = vmul.f32 %v13487_v2, %v4182_v17  ;;  %v4263_v19 = vsel %vm1513_vm13, %v11230_v23, %v11204_v0 }
 0x889   :  { %v4405_v4 = vpop.permute.xlu0 %4404  ;;  %v4271_v17 = vsel %vm1513_vm13, %v11204_v0, %v11230_v23  ;;  %v4112_v0 = vsel %vm1351_vm1, %v11066_v15, %v11146_v47  ;;  %v4104_v23 = vsel %vm1351_vm1, %v11146_v47, %v11066_v15  ;;  %v4283_v47 = vmul.f32 %v13489_v57, %v4263_v19 }
 0x88a   :  { %v4420_v35 = vsel %vm628_vm4, %v4389_v25, %v4405_v4  ;;  %v4428_v45 = vsel %vm628_vm4, %v4405_v4, %v4389_v25  ;;  %v4103_v25 = vsel %vm1351_vm1, %v11053_v44, %v11109_v13  ;;  %v4282_v15 = vmul.f32 %v13488_v18, %v4271_v17 }
 0x88b   :  { %v4436_v55 = vmul.f32 %v13419_v14, %v4420_v35  ;;  %v4437_v53 = vmul.f32 %v13422_v27, %v4428_v45  ;;  %v4120_v45 = vmul.f32 %v13374_v41, %v4110_v54  ;;  %v4361_v35 = vmul.f32 %v13492_v16, %v4350_v62 }
 0x88c   :  { %v4191_v54 = vsel %vm1432_vm10, %v11176_v7, %v11107_v40 }
 0x88d   :  { %v11347_v33 = vadd.f32 %v4436_v55, %v4372_v8  ;;  %v11349_v37 = vadd.f32 %v4437_v53, %v4373_v52  ;;  %v3876_v6 = vpop.f32.mrf.mxu0  ;;  %v4190_v8 = vsel %vm1432_vm10, %v11188_v21, %v11163_v9  ;;  %v4136_v26 = vadd.f32 %v4120_v45, %v11041_v46 }
 0x88e   :  { %v4045_v59 = vpop.f32.mrf.mxu1  ;;  %4482 = vrot.lane.b32.xlu1 %v3876_v6, %s7581_s24  ;;  %v4111_v9 = vsel %vm1351_vm1, %v11109_v13, %v11053_v44  ;;  %v4342_v21 = vsel %vm620_vm2, %v11257_v10, %v11262_v49  ;;  %v4200_v46 = vmul.f32 %v13378_v63, %v4190_v8  ;;  %v4217_v13 = vadd.f32 %v4201_v20, %v4137_v58  ;;  %v4409_v55 = vpop.permute.xlu2 %4408 }
 0x88f   :  { %4498 = vrot.lane.b32.xlu0 %v4045_v59, %s7581_s24  ;;  %v4360_v4 = vmul.f32 %v13491_v48, %v4342_v21  ;;  %v4122_v10 = vmul.f32 %v13374_v41, %v4111_v9  ;;  %v4123_v49 = vmul.f32 %v13375_v11, %v4103_v25  ;;  %v4183_v53 = vsel %vm1432_vm10, %v11107_v40, %v11176_v7 }
 0x890   :  { %v4216_v44 = vadd.f32 %v4200_v46, %v4136_v26  ;;  %v4297_v6 = vadd.f32 %v4281_v50, %v4217_v13  ;;  %v4343_v9 = vsel %vm620_vm2, %v11267_v61, %v11265_v36  ;;  %v4202_v62 = vmul.f32 %v13378_v63, %v4191_v54 }
 0x891   :  { %v11409_v59 = vpop.permute.xlu1 %4406  ;;  %v4138_v58 = vadd.f32 %v4122_v10, %v11049_v43  ;;  %v4139_v25 = vadd.f32 %v4123_v49, %v11051_v39  ;;  %v4351_v43 = vsel %vm620_vm2, %v11265_v36, %v11267_v61  ;;  %v4203_v46 = vmul.f32 %v13487_v2, %v4183_v53 }
 0x892   :  { %v4296_v29 = vadd.f32 %v4280_v51, %v4216_v44  ;;  %v4377_v30 = vadd.f32 %v4361_v35, %v4297_v6  ;;  %v4124_v51 = vmul.f32 %v13374_v41, %v4112_v0  ;;  %v4125_v50 = vmul.f32 %v13375_v11, %v4104_v23 }
 0x893   :  { %v4218_v61 = vadd.f32 %v4202_v62, %v4138_v58  ;;  %v4219_v36 = vadd.f32 %v4203_v46, %v4139_v25  ;;  %v4362_v13 = vmul.f32 %v13491_v48, %v4343_v9  ;;  %v4105_v35 = vsel %vm1351_vm1, %v11118_v60, %v11159_v22  ;;  %v13493_v46 = vld [vmem:[#allocation47_spill] sm:$0xff] }
 0x894   :  { %v4376_v7 = vadd.f32 %v4360_v4, %v4296_v29  ;;  %v4363_v4 = vmul.f32 %v13492_v16, %v4351_v43  ;;  %v4113_v10 = vsel %vm1351_vm1, %v11159_v22, %v11118_v60  ;;  %v4184_v49 = vsel %vm1432_vm10, %v11121_v38, %v11186_v3 }
 0x895   :  { %v11393_v31 = vpop.f32.mrf.mxu0  ;;  %v4140_v54 = vadd.f32 %v4124_v51, %v11058_v56  ;;  %v4141_v29 = vadd.f32 %v4125_v50, %v11060_v12  ;;  %v4298_v6 = vadd.f32 %v4282_v15, %v4218_v61  ;;  %v4264_v60 = vsel %vm1513_vm13, %v11217_v28, %v11226_v34  ;;  %v13494_v15 = vld [vmem:[#allocation19_spill] sm:$0xff]  ;;  %v13496_v61 = vld [vmem:[#allocation33_spill] sm:$0xff] }
 0x896   :  { %v11397_v52 = vpop.f32.mrf.mxu1  ;;  %v4272_v22 = vsel %vm1513_vm13, %v11226_v34, %v11217_v28  ;;  %v4344_v34 = vsel %vm620_vm2, %v11273_v42, %v11277_v32  ;;  %v4352_v28 = vsel %vm620_vm2, %v11277_v32, %v11273_v42  ;;  %v4126_v0 = vmul.f32 %v13374_v41, %v4113_v10  ;;  %v13495_v50 = vld [vmem:[#allocation31_spill] sm:$0xff]  ;;  %v13498_v10 = vld [vmem:[#allocation53_spill] sm:$0xff] }
 0x897   :  { %v4378_v12 = vadd.f32 %v4362_v13, %v4298_v6  ;;  %v4127_v23 = vmul.f32 %v13375_v11, %v4105_v35  ;;  %v4364_v42 = vmul.f32 %v13491_v48, %v4344_v34  ;;  %v4365_v32 = vmul.f32 %v13492_v16, %v4352_v28  ;;  %v13499_v6 = vld [vmem:[#allocation59_spill] sm:$0xff]  ;;  %v13502_v34 = vld [vmem:[#allocation34_spill] sm:$0xff] }
 0x898   :  { %v4393_v45 = vpop.permute.xlu0 %4392  ;;  %v4193_v51 = vsel %vm1432_vm10, %v13493_v46, %v13494_v15  ;;  %v4106_v13 = vsel %vm1351_vm1, %v13495_v50, %v13496_v61 }
 0x899   :  { %v4422_v8 = vsel %vm628_vm4, %v4393_v45, %v4409_v55  ;;  %v4430_v40 = vsel %vm628_vm4, %v4409_v55, %v4393_v45  ;;  %v4192_v55 = vsel %vm1432_vm10, %v11186_v3, %v11121_v38  ;;  %v4299_v45 = vadd.f32 %v4283_v47, %v4219_v36 }
 0x89a   :  { %v4440_v24 = vmul.f32 %v13419_v14, %v4422_v8  ;;  %v4441_v26 = vmul.f32 %v13422_v27, %v4430_v40  ;;  %v4204_v40 = vmul.f32 %v13378_v63, %v4192_v55  ;;  %v4185_v47 = vsel %vm1432_vm10, %v13494_v15, %v13493_v46 }
 0x89b   :  { %v4379_v38 = vadd.f32 %v4363_v4, %v4299_v45  ;;  %v4114_v36 = vsel %vm1351_vm1, %v13496_v61, %v13495_v50  ;;  %v13497_v4 = vld [vmem:[#allocation72_spill] sm:$0xff]  ;;  %v13500_v45 = vld [vmem:[#allocation37_spill] sm:$0xff]  ;;  %v13504_v50 = vld [vmem:[#allocation54_spill] sm:$0xff] }
 0x89c   :  { %v11443_v39 = vadd.f32 %v4440_v24, %v4376_v7  ;;  %v11445_v21 = vadd.f32 %v4441_v26, %v4377_v30  ;;  %v4205_v7 = vmul.f32 %v13487_v2, %v4184_v49  ;;  %v4284_v30 = vmul.f32 %v13488_v18, %v4272_v22 }
 0x89d   :  { %v11451_v20 = vpop.f32.mrf.mxu0  ;;  %v4285_v24 = vmul.f32 %v13489_v57, %v4264_v60  ;;  %v4220_v43 = vadd.f32 %v4204_v40, %v4140_v54  ;;  %v4142_v35 = vadd.f32 %v4126_v0, %v13497_v4  ;;  %v4143_v49 = vadd.f32 %v4127_v23, %v13498_v10  ;;  %v4413_v54 = vpop.permute.xlu2 %4412  ;;  %v13506_v4 = vld [vmem:[#allocation52_spill] sm:$0xff] }
 0x89e   :  { %v11455_v44 = vpop.f32.mrf.mxu1  ;;  %v4221_v62 = vadd.f32 %v4205_v7, %v4141_v29  ;;  %v4273_v60 = vsel %vm1513_vm13, %v13499_v6, %v13500_v45  ;;  %v4207_v40 = vmul.f32 %v13487_v2, %v4185_v47  ;;  %v13501_v7 = vld [vmem:[#allocation43_spill] sm:$0xff] }
 0x89f   :  { %v4300_v55 = vadd.f32 %v4284_v30, %v4220_v43  ;;  %v4345_v28 = vsel %vm620_vm2, %v13502_v34, %v13501_v7  ;;  %v4353_v30 = vsel %vm620_vm2, %v13501_v7, %v13502_v34  ;;  %v4128_v43 = vmul.f32 %v13374_v41, %v4114_v36 }
 0x8a0   :  { %v4395_v53 = vpop.permute.xlu1 %4394  ;;  %v4223_v46 = vadd.f32 %v4207_v40, %v4143_v49  ;;  %v4366_v15 = vmul.f32 %v13491_v48, %v4345_v28  ;;  %v4367_v47 = vmul.f32 %v13492_v16, %v4353_v30  ;;  %v13511_v30 = vld [vmem:[#allocation77_spill] sm:$0xff] }
 0x8a1   :  { %v4411_v19 = vpop.permute.xlu0 %4410 }
 0x8a2   :  { %v4423_v3 = vsel %vm628_vm4, %v4395_v53, %v4411_v19  ;;  %v4431_v56 = vsel %vm628_vm4, %v4411_v19, %v4395_v53  ;;  %v4301_v53 = vadd.f32 %v4285_v24, %v4221_v62  ;;  %v4265_v19 = vsel %vm1513_vm13, %v13500_v45, %v13499_v6 }
 0x8a3   :  { %v4442_v17 = vmul.f32 %v13419_v14, %v4423_v3  ;;  %v4443_v8 = vmul.f32 %v13422_v27, %v4431_v56  ;;  %v4380_v56 = vadd.f32 %v4364_v42, %v4300_v55  ;;  %v4286_v24 = vmul.f32 %v13488_v18, %v4273_v60  ;;  %v13507_v55 = vld [vmem:[#allocation67_spill] sm:$0xff]  ;;  %v13509_v60 = vld [vmem:[#allocation22_spill] sm:$0xff] }
 0x8a4   :  { %v4129_v62 = vmul.f32 %v13375_v11, %v4106_v13  ;;  %v13505_v13 = vld [vmem:[#allocation40_spill] sm:$0xff] }
 0x8a5   :  { %v11503_v26 = vadd.f32 %v4442_v17, %v4378_v12  ;;  %v11505_v58 = vadd.f32 %v4443_v8, %v4379_v38  ;;  %v3884_v25 = vpop.f32.mrf.mxu0  ;;  %v4381_v12 = vadd.f32 %v4365_v32, %v4301_v53  ;;  %v4206_v8 = vmul.f32 %v13378_v63, %v4193_v51  ;;  %v13503_v51 = vld [vmem:[#allocation48_spill] sm:$0xff] }
 0x8a6   :  { %v4053_v9 = vpop.f32.mrf.mxu1  ;;  %4552 = vrot.lane.b32.xlu2 %v3884_v25, %s7584_s17  ;;  %v4287_v25 = vmul.f32 %v13489_v57, %v4265_v19  ;;  %v4107_v61 = vsel %vm1351_vm1, %v13504_v50, %v13503_v51  ;;  %v4115_v36 = vsel %vm1351_vm1, %v13503_v51, %v13504_v50  ;;  %v4194_v10 = vsel %vm1432_vm10, %v13505_v13, %v13506_v4 }
 0x8a7   :  { %4568 = vrot.lane.b32.xlu1 %v4053_v9, %s7584_s17  ;;  %v4222_v32 = vadd.f32 %v4206_v8, %v4142_v35  ;;  %v4186_v35 = vsel %vm1432_vm10, %v13506_v4, %v13505_v13  ;;  %v4144_v53 = vadd.f32 %v4128_v43, %v13507_v55  ;;  %v4208_v34 = vmul.f32 %v13378_v63, %v4194_v10  ;;  %v13513_v10 = vld [vmem:[#allocation23_spill] sm:$0xff] }
 0x8a8   :  { %v4303_v45 = vadd.f32 %v4287_v25, %v4223_v46  ;;  %v4209_v28 = vmul.f32 %v13487_v2, %v4186_v35 }
 0x8a9   :  { %v4397_v29 = vpop.permute.xlu0 %4396  ;;  %v4302_v6 = vadd.f32 %v4286_v24, %v4222_v32  ;;  %v13512_v24 = vld [vmem:[#allocation2_spill] sm:$0xff]  ;;  %v4224_v50 = vadd.f32 %v4208_v34, %v4144_v53  ;;  %v13516_v53 = vld [vmem:[#allocation25_spill] sm:$0xff] }
 0x8aa   :  { %v4424_v22 = vsel %vm628_vm4, %v4397_v29, %v4413_v54  ;;  %v4432_v3 = vsel %vm628_vm4, %v4413_v54, %v4397_v29  ;;  %v13508_v54 = vld [vmem:[#allocation30_spill] sm:$0xff]  ;;  %v4383_v8 = vadd.f32 %v4367_v47, %v4303_v45  ;;  %v4346_v25 = vsel %vm620_vm2, %v13512_v24, %v13511_v30 }
 0x8ab   :  { %v4444_v38 = vmul.f32 %v13419_v14, %v4424_v22  ;;  %v4445_v17 = vmul.f32 %v13422_v27, %v4432_v3  ;;  %v4145_v29 = vadd.f32 %v4129_v62, %v13508_v54  ;;  %v13510_v22 = vld [vmem:[#allocation4_spill] sm:$0xff]  ;;  %v4131_v47 = vmul.f32 %v13375_v11, %v4107_v61 }
 0x8ac   :  { %v4266_v3 = vsel %vm1513_vm13, %v13510_v22, %v13509_v60  ;;  %v4368_v4 = vmul.f32 %v13491_v48, %v4346_v25  ;;  %v13520_v25 = vld [vmem:[#allocation46_spill] sm:$0xff] }
 0x8ad   :  { %v11557_v0 = vadd.f32 %v4444_v38, %v4380_v56  ;;  %v11559_v23 = vadd.f32 %v4445_v17, %v4381_v12  ;;  %v3886_v9 = vpop.f32.mrf.mxu0  ;;  %v4274_v56 = vsel %vm1513_vm13, %v13509_v60, %v13510_v22  ;;  %v4382_v17 = vadd.f32 %v4366_v15, %v4302_v6  ;;  %v13517_v22 = vld [vmem:[#allocation51_spill] sm:$0xff] }
 0x8ae   :  { %v4055_v42 = vpop.f32.mrf.mxu1  ;;  %4554 = vrot.lane.b32.xlu0 %v3886_v9, %s7584_s17  ;;  %v4354_v9 = vsel %vm620_vm2, %v13511_v30, %v13512_v24  ;;  %v4288_v43 = vmul.f32 %v13488_v18, %v4274_v56  ;;  %v4289_v62 = vmul.f32 %v13489_v57, %v4266_v3  ;;  %v4130_v15 = vmul.f32 %v13374_v41, %v4115_v36  ;;  %v13515_v36 = vld [vmem:[#allocation32_spill] sm:$0xff]  ;;  %v13518_v3 = vld [vmem:[#allocation41_spill] sm:$0xff]  ;;  %v13519_v24 = vld [vmem:[#allocation10_spill] sm:$0xff] }
 0x8af   :  { %4570 = vrot.lane.b32.xlu2 %v4055_v42, %s7584_s17  ;;  %v4225_v13 = vadd.f32 %v4209_v28, %v4145_v29  ;;  %v4369_v35 = vmul.f32 %v13492_v16, %v4354_v9  ;;  %v4147_v29 = vadd.f32 %v4131_v47, %v13516_v53  ;;  %v4267_v56 = vsel %vm1513_vm13, %v13518_v3, %v13517_v22  ;;  %v13521_v53 = vld [vmem:[#allocation49_spill] sm:$0xff] }
 0x8b0   :  { %v4399_v49 = vpop.permute.xlu1 %4398  ;;  %v4146_v54 = vadd.f32 %v4130_v15, %v13515_v36  ;;  %v4304_v6 = vadd.f32 %v4288_v43, %v4224_v50  ;;  %v4347_v9 = vsel %vm620_vm2, %v13520_v25, %v13519_v24  ;;  %v4355_v43 = vsel %vm620_vm2, %v13519_v24, %v13520_v25 }
 0x8b1   :  { %v4415_v19 = vpop.permute.xlu0 %4414  ;;  %v4305_v45 = vadd.f32 %v4289_v62, %v4225_v13 }
 0x8b2   :  { %v4425_v12 = vsel %vm628_vm4, %v4399_v49, %v4415_v19  ;;  %v4433_v38 = vsel %vm628_vm4, %v4415_v19, %v4399_v49  ;;  %v13514_v49 = vld [vmem:[#allocation45_spill] sm:$0xff]  ;;  %v4417_v19 = vpop.permute.xlu2 %4416 }
 0x8b3   :  { %v4446_v40 = vmul.f32 %v13419_v14, %v4425_v12  ;;  %v4447_v7 = vmul.f32 %v13422_v27, %v4433_v38  ;;  %v4187_v55 = vsel %vm1432_vm10, %v13514_v49, %v13513_v10  ;;  %v4195_v61 = vsel %vm1432_vm10, %v13513_v10, %v13514_v49 }
 0x8b4   :  { %v4275_v12 = vsel %vm1513_vm13, %v13517_v22, %v13518_v3  ;;  %v4210_v28 = vmul.f32 %v13378_v63, %v4195_v61  ;;  %v4211_v30 = vmul.f32 %v13487_v2, %v4187_v55  ;;  %v4371_v10 = vmul.f32 %v13492_v16, %v4355_v43  ;;  %v13526_v43 = vld [vmem:[#allocation50_spill] sm:$0xff] }
 0x8b5   :  { %v11611_v42 = vadd.f32 %v4446_v40, %v4382_v17  ;;  %v11613_v32 = vadd.f32 %v4447_v7, %v4383_v8  ;;  %v3889_v46 = vpop.f32.mrf.mxu0  ;;  %v4384_v8 = vadd.f32 %v4368_v4, %v4304_v6  ;;  %v4385_v40 = vadd.f32 %v4369_v35, %v4305_v45  ;;  %v13522_v6 = vld [vmem:[#allocation76_spill] sm:$0xff] }
 0x8b6   :  { %v4058_v51 = vpop.f32.mrf.mxu1  ;;  %4556 = vrot.lane.b32.xlu1 %v3889_v46, %s7584_s17  ;;  %v4290_v62 = vmul.f32 %v13488_v18, %v4275_v12  ;;  %v4291_v46 = vmul.f32 %v13489_v57, %v4267_v56  ;;  %v4226_v13 = vadd.f32 %v4210_v28, %v4146_v54  ;;  %v4227_v4 = vadd.f32 %v4211_v30, %v4147_v29 }
 0x8b7   :  { %4572 = vrot.lane.b32.xlu0 %v4058_v51, %s7584_s17  ;;  %v4370_v35 = vmul.f32 %v13491_v48, %v4347_v9  ;;  %v4101_v45 = vsel %vm1351_vm1, %v13522_v6, %v13521_v53  ;;  %v4109_v54 = vsel %vm1351_vm1, %v13521_v53, %v13522_v6  ;;  %v13525_v9 = vld [vmem:[#allocation36_spill] sm:$0xff]  ;;  %v4421_v6 = vsel %vm628_vm4, %v11345_v1, %v11409_v59 }
 0x8b8   :  { %v4306_v55 = vadd.f32 %v4290_v62, %v4226_v13  ;;  %v4307_v61 = vadd.f32 %v4291_v46, %v4227_v4  ;;  %v4118_v30 = vmul.f32 %v13374_v41, %v4109_v54  ;;  %v4119_v24 = vmul.f32 %v13375_v11, %v4101_v45  ;;  %v13528_v41 = vld [vmem:[#allocation75_spill] sm:$0xff]  ;;  %v13531_v54 = vld [vmem:[#allocation62_spill] sm:$0xff] }
 0x8b9   :  { %v4401_v60 = vpop.permute.xlu0 %4400  ;;  %v4261_v62 = vsel %vm1513_vm13, %v13526_v43, %v13525_v9  ;;  %v4269_v46 = vsel %vm1513_vm13, %v13525_v9, %v13526_v43  ;;  %v4429_v45 = vsel %vm628_vm4, %v11409_v59, %v11345_v1  ;;  %v4438_v1 = vmul.f32 %v13419_v14, %v4421_v6 }
 0x8ba   :  { %v4426_v38 = vsel %vm628_vm4, %v4401_v60, %v4417_v19  ;;  %v4434_v17 = vsel %vm628_vm4, %v4417_v19, %v4401_v60  ;;  %v4386_v60 = vadd.f32 %v4370_v35, %v4306_v55  ;;  %v4387_v22 = vadd.f32 %v4371_v10, %v4307_v61  ;;  %v4469_v12 = vpop.permute.xlu2 %4468  ;;  %v13529_v35 = vld [vmem:[#allocation64_spill] sm:$0xff]  ;;  %v13530_v10 = vld [vmem:[#allocation42_spill] sm:$0xff] }
 0x8bb   :  { %v4448_v7 = vmul.f32 %v13419_v14, %v4426_v38  ;;  %v4449_v34 = vmul.f32 %v13422_v27, %v4434_v17  ;;  %v4135_v13 = vadd.f32 %v4119_v24, %v13528_v41  ;;  %v4349_v55 = vsel %vm620_vm2, %v13529_v35, %v13530_v10 }
 0x8bc   :  { %v4279_v53 = vmul.f32 %v13489_v57, %v4261_v62  ;;  %v4439_v59 = vmul.f32 %v13422_v27, %v4429_v45 }
 0x8bd   :  { %v11657_v15 = vadd.f32 %v4448_v7, %v4384_v8  ;;  %v11659_v47 = vadd.f32 %v4449_v34, %v4385_v40  ;;  %v3891_v51 = vpop.f32.mrf.mxu0  ;;  %v13523_v40 = vld [vmem:[#allocation28_spill] sm:$0xff]  ;;  %v13524_v7 = vld [vmem:[#allocation35_spill] sm:$0xff] }
 0x8be   :  { %v4060_v50 = vpop.f32.mrf.mxu1  ;;  %4558 = vrot.lane.b32.xlu2 %v3891_v51, %s7584_s17  ;;  %v4181_v34 = vsel %vm1432_vm10, %v13524_v7, %v13523_v40  ;;  %v4189_v28 = vsel %vm1432_vm10, %v13523_v40, %v13524_v7  ;;  %v13527_v51 = vld [vmem:[#allocation3_spill] sm:$0xff] }
 0x8bf   :  { %4574 = vrot.lane.b32.xlu1 %v4060_v50, %s7584_s17  ;;  %v4134_v50 = vadd.f32 %v4118_v30, %v13527_v51  ;;  %v4198_v11 = vmul.f32 %v13378_v63, %v4189_v28  ;;  %v4199_v4 = vmul.f32 %v13487_v2, %v4181_v34 }
 0x8c0   :  { %v4403_v49 = vpop.permute.xlu1 %4402 }
 0x8c1   :  { %v4419_v36 = vpop.permute.xlu0 %4418 }
 0x8c2   :  { %v4427_v29 = vsel %vm628_vm4, %v4403_v49, %v4419_v36  ;;  %v4435_v19 = vsel %vm628_vm4, %v4419_v36, %v4403_v49  ;;  %v4341_v49 = vsel %vm620_vm2, %v13530_v10, %v13529_v35  ;;  %v4278_v36 = vmul.f32 %v13488_v18, %v4269_v46  ;;  %v4487_v34 = vpop.permute.xlu2 %4486 }
 0x8c3   :  { %v4450_v3 = vmul.f32 %v13419_v14, %v4427_v29  ;;  %v4451_v56 = vmul.f32 %v13422_v27, %v4435_v19  ;;  %v13532_v29 = vld [vmem:[#allocation63_spill] sm:$0xff]  ;;  %v4214_v19 = vadd.f32 %v4198_v11, %v4134_v50 }
 0x8c5   :  { %v11679_v38 = vadd.f32 %v4450_v3, %v4386_v60  ;;  %v11681_v17 = vadd.f32 %v4451_v56, %v4387_v22  ;;  %v3894_v8 = vpop.f32.mrf.mxu0  ;;  %v4215_v60 = vadd.f32 %v4199_v4, %v4135_v13  ;;  %v4358_v22 = vmul.f32 %v13491_v48, %v4341_v49  ;;  %v11779_v13 = vld [vmem:[%s12938_s5] sm:$0xff] }
 0x8c6   :  { %v4063_v25 = vpop.f32.mrf.mxu1  ;;  %v4359_v3 = vmul.f32 %v13492_v16, %v4349_v55  ;;  %v4294_v40 = vadd.f32 %v4278_v36, %v4214_v19  ;;  %v11800_v36 = vld [vmem:[%s12938_s5 + $0x8] sm:$0xff] }
 0x8c7   :  { %4576 = vrot.lane.b32.xlu0 %v4063_v25, %s7584_s17  ;;  %4560 = vrot.lane.b32.xlu1 %v3894_v8, %s7584_s17  ;;  %v4295_v7 = vadd.f32 %v4279_v53, %v4215_v60 }
 0x8c8   :  { %v4374_v16 = vadd.f32 %v4358_v22, %v4294_v40 }
 0x8c9   :  { %v4485_v61 = vpop.permute.xlu1 %4484  ;;  %v4375_v48 = vadd.f32 %v4359_v3, %v4295_v7 }
 0x8ca   :  { %v4500_v63 = vsel %vm636_vm6, %v4469_v12, %v4485_v61  ;;  %v4508_v2 = vsel %vm636_vm6, %v4485_v61, %v4469_v12  ;;  %v4454_v30 = vadd.f32 %v4438_v1, %v4374_v16  ;;  %v4489_v43 = vpop.permute.xlu2 %4488 }
 0x8cb   :  { %v4516_v18 = vmul.f32 %v13531_v54, %v4500_v63  ;;  %v4517_v57 = vmul.f32 %v13532_v29, %v4508_v2  ;;  %v4455_v27 = vadd.f32 %v4439_v59, %v4375_v48 }
 0x8cd   :  { %v11734_v56 = vadd.f32 %v4516_v18, %v11347_v33  ;;  %v11737_v12 = vadd.f32 %v4517_v57, %v11349_v37  ;;  %v3896_v8 = vpop.f32.mrf.mxu0 }
 0x8ce   :  { %v4065_v28 = vpop.f32.mrf.mxu1  ;;  %4562 = vrot.lane.b32.xlu2 %v3896_v8, %s7584_s17 }
 0x8cf   :  { %4548 = vrot.lane.b32.xlu0 %v11393_v31, %s7584_s17  ;;  %4578 = vrot.lane.b32.xlu1 %v4065_v28, %s7584_s17 }
 0x8d0   :  { %v4471_v33 = vpop.permute.xlu0 %4470 }
 0x8d1   :  { %v4501_v37 = vsel %vm636_vm6, %v4471_v33, %v4487_v34  ;;  %v4509_v14 = vsel %vm636_vm6, %v4487_v34, %v4471_v33 }
 0x8d2   :  { %v4518_v24 = vmul.f32 %v13531_v54, %v4501_v37  ;;  %v4519_v25 = vmul.f32 %v13532_v29, %v4509_v14  ;;  %v13533_v14 = vld [vmem:[#allocation7_spill] sm:$0xff] }
 0x8d4   :  { %v11751_v9 = vadd.f32 %v4518_v24, %v4454_v30  ;;  %v11753_v31 = vadd.f32 %v4519_v25, %v4455_v27  ;;  %v13534_v27 = vld [vmem:[#allocation12_spill] sm:$0xff] }
 0x8d6   :  { %4564 = vrot.lane.b32.xlu2 %v11397_v52, %s7584_s17 }
 0x8d7   :  { %4566 = vrot.lane.b32.xlu0 %v11455_v44, %s7584_s17  ;;  %4550 = vrot.lane.b32.xlu1 %v11451_v20, %s7584_s17  ;;  %v7571_v20 = vld [vmem:[%s12938_s5 + $0x18] sm:$0xff] }
 0x8d8   :  { %v4473_v62 = vpop.permute.xlu0 %4472  ;;  %v4479_v53 = vpop.permute.xlu2 %4478 }
 0x8d9   :  { %v4502_v46 = vsel %vm636_vm6, %v4473_v62, %v4489_v43  ;;  %v4510_v51 = vsel %vm636_vm6, %v4489_v43, %v4473_v62 }
 0x8da   :  { %v4520_v50 = vmul.f32 %v13531_v54, %v4502_v46  ;;  %v4521_v41 = vmul.f32 %v13532_v29, %v4510_v51 }
 0x8dc   :  { %v11768_v52 = vadd.f32 %v4520_v50, %v11443_v39  ;;  %v11771_v44 = vadd.f32 %v4521_v41, %v11445_v21  ;;  %v7573_v39 = vld [vmem:[%s12938_s5 + $0x10] sm:$0xff] }
 0x8dd   :  { %v13535_v50 = vld [vmem:[#allocation44_spill] sm:$0xff] }
 0x8de   :  { %4641 = vperm.xlu2 %7398, %v7571_v20  }
 0x8df   :  { %4629 = vperm.xlu0 %7399, %v11779_v13   ;;  %4637 = vperm.xlu1 %7400, %v7573_v39  }
 0x8e0   :  { %v4475_v11 = vpop.permute.xlu1 %4474 }
 0x8e1   :  { %v4491_v21 = vpop.permute.xlu0 %4490  ;;  %v4497_v6 = vpop.permute.xlu2 %4496 }
 0x8e2   :  { %v4503_v4 = vsel %vm636_vm6, %v4475_v11, %v4491_v21  ;;  %v4511_v35 = vsel %vm636_vm6, %v4491_v21, %v4475_v11 }
 0x8e3   :  { %v4522_v10 = vmul.f32 %v13531_v54, %v4503_v4  ;;  %v4523_v49 = vmul.f32 %v13532_v29, %v4511_v35 }
 0x8e5   :  { %v11792_v55 = vadd.f32 %v4522_v10, %v11503_v26  ;;  %v11795_v61 = vadd.f32 %v4523_v49, %v11505_v58 }
 0x8e7   :  { %4633 = vperm.xlu1 %7400, %v11800_v36  }
 0x8e8   :  { %v4477_v2 = vpop.permute.xlu1 %4476 }
 0x8e9   :  { %v4493_v63 = vpop.permute.xlu0 %4492 }
 0x8ea   :  { %v4504_v3 = vsel %vm636_vm6, %v4477_v2, %v4493_v63  ;;  %v4512_v8 = vsel %vm636_vm6, %v4493_v63, %v4477_v2 }
 0x8eb   :  { %v4524_v7 = vmul.f32 %v13531_v54, %v4504_v3  ;;  %v4525_v1 = vmul.f32 %v13532_v29, %v4512_v8 }
 0x8ed   :  { %v4540_v28 = vadd.f32 %v4524_v7, %v11557_v0  ;;  %v4541_v33 = vadd.f32 %v4525_v1, %v11559_v23  ;;  %v13536_v7 = vld [vmem:[#allocation71_spill] sm:$0xff] }
 0x8f1   :  { %v4495_v18 = vpop.permute.xlu1 %4494 }
 0x8f2   :  { %v4505_v37 = vsel %vm636_vm6, %v4479_v53, %v4495_v18  ;;  %v4513_v25 = vsel %vm636_vm6, %v4495_v18, %v4479_v53 }
 0x8f3   :  { %v4526_v46 = vmul.f32 %v13531_v54, %v4505_v37  ;;  %v4527_v51 = vmul.f32 %v13532_v29, %v4513_v25 }
 0x8f5   :  { %v4542_v39 = vadd.f32 %v4526_v46, %v11611_v42  ;;  %v4543_v35 = vadd.f32 %v4527_v51, %v11613_v32 }
 0x8f8   :  { %v4481_v45 = vpop.permute.xlu0 %4480 }
 0x8f9   :  { %v4506_v10 = vsel %vm636_vm6, %v4481_v45, %v4497_v6  ;;  %v4514_v42 = vsel %vm636_vm6, %v4497_v6, %v4481_v45 }
 0x8fa   :  { %v4528_v3 = vmul.f32 %v13531_v54, %v4506_v10  ;;  %v4529_v32 = vmul.f32 %v13532_v29, %v4514_v42 }
 0x8fc   :  { %v4544_v37 = vadd.f32 %v4528_v3, %v11657_v15  ;;  %v4545_v25 = vadd.f32 %v4529_v32, %v11659_v47 }
 0x900   :  { %v11803_v57 = vpop.permute.xlu2 %4552  ;;  %v4483_v19 = vpop.permute.xlu1 %4482 }
 0x901   :  { %v4499_v26 = vpop.permute.xlu0 %4498 }
 0x902   :  { %v4507_v6 = vsel %vm636_vm6, %v4483_v19, %v4499_v26  ;;  %v4515_v45 = vsel %vm636_vm6, %v4499_v26, %v4483_v19 }
 0x903   :  { %v4531_v15 = vmul.f32 %v13532_v29, %v4515_v45 }
 0x905   :  { %v4547_v10 = vadd.f32 %v4531_v15, %v11681_v17 }
 0x909   :  { %v4571_v60 = vpop.permute.xlu2 %4570 }
 0x918   :  { %v4559_v40 = vpop.permute.xlu2 %4558 }
 0x919   :  { %v11805_v58 = vpop.permute.xlu1 %4568 }
 0x920   :  { %v4555_v22 = vpop.permute.xlu0 %4554 }
 0x921   :  { %v4583_v26 = vsel %vm644_vm14, %v4555_v22, %v4571_v60  ;;  %v4591_v46 = vsel %vm644_vm14, %v4571_v60, %v4555_v22  ;;  %v4582_v60 = vsel %vm644_vm14, %v11803_v57, %v11805_v58 }
 0x922   :  { %v4602_v47 = vmul.f32 %v13533_v14, %v4583_v26  ;;  %v4600_v3 = vmul.f32 %v13533_v14, %v4582_v60  ;;  %v13538_v26 = vld [vmem:[#allocation39_spill] sm:$0xff] }
 0x928   :  { %v4557_v59 = vpop.permute.xlu1 %4556  ;;  %v11825_v43 = vpop.permute.xlu2 %4562 }
 0x929   :  { %v4573_v34 = vpop.permute.xlu0 %4572 }
 0x92a   :  { %v4584_v16 = vsel %vm644_vm14, %v4557_v59, %v4573_v34  ;;  %v4592_v48 = vsel %vm644_vm14, %v4573_v34, %v4557_v59 }
 0x92b   :  { %v4604_v30 = vmul.f32 %v13533_v14, %v4584_v16  ;;  %v4605_v24 = vmul.f32 %v13534_v27, %v4592_v48 }
 0x92d   :  { %v4620_v0 = vadd.f32 %v4604_v30, %v4540_v28  ;;  %v4621_v62 = vadd.f32 %v4605_v24, %v4541_v33 }
 0x92f   :  { %v11830_v23 = vadd.f32 %v13535_v50, %v4620_v0  ;;  %v11833_v41 = vadd.f32 %v13535_v50, %v4621_v62  ;;  %v4530_v62 = vmul.f32 %v13531_v54, %v4507_v6 }
 0x930   :  { %v11850_v8 = vpop.permute.xlu2 %4564 }
 0x931   :  { %v4575_v20 = vpop.permute.xlu1 %4574  ;;  %v4700_v11 = vmin.f32 %v11830_v23, 0.0  ;;  %v4701_v63 = vmin.f32 %v11833_v41, 0.0  ;;  %vm4684_vm1 = vcmp.gt.f32.partialorder %v11830_v23, 0.0  ;;  %vm4685_vm5 = vcmp.gt.f32.partialorder %v11833_v41, 0.0 }
 0x932   :  { %v4585_v21 = vsel %vm644_vm14, %v4559_v40, %v4575_v20  ;;  %v4593_v4 = vsel %vm644_vm14, %v4575_v20, %v4559_v40 }
 0x933   :  { %v4606_v49 = vmul.f32 %v13533_v14, %v4585_v21  ;;  %v4607_v53 = vmul.f32 %v13534_v27, %v4593_v4  ;;  %v4724_v40 = vmul.f32 1.442695, %v4700_v11  ;;  %v4726_v33 = vmul.f32 1.442695, %v4701_v63  ;;  %v13537_v21 = vld [vmem:[#allocation27_spill] sm:$0xff] }
 0x934   :  { %v4603_v11 = vmul.f32 %v13534_v27, %v4591_v46 }
 0x935   :  { %v4622_v2 = vadd.f32 %v4606_v49, %v4542_v39  ;;  %v4623_v18 = vadd.f32 %v4607_v53, %v4543_v35  ;;  %7503 = vpow2.f32 %v4724_v40  ;;  %v4546_v35 = vadd.f32 %v4530_v62, %v11679_v38 }
 0x936   :  { %7505 = vpow2.f32 %v4726_v33  ;;  %v4590_v49 = vsel %vm644_vm14, %v11805_v58, %v11803_v57  ;;  %v4619_v57 = vadd.f32 %v4603_v11, %v11795_v61 }
 0x937   :  { %v11854_v1 = vadd.f32 %v13536_v7, %v4622_v2  ;;  %v11857_v59 = vadd.f32 %v13536_v7, %v4623_v18  ;;  %v4618_v2 = vadd.f32 %v4602_v47, %v11792_v55 }
 0x938   :  { %v4642_v22 = vpop.permute.xlu2 %4641 }
 0x939   :  { %v4702_v34 = vmin.f32 %v11854_v1, 0.0  ;;  %v4703_v28 = vmin.f32 %v11857_v59, 0.0  ;;  %v4577_v16 = vpop.permute.xlu0 %4576  ;;  %v4561_v48 = vpop.permute.xlu1 %4560  ;;  %v11908_v7 = vadd.f32 %v4642_v22, %v4618_v2  ;;  %vm4686_vm10 = vcmp.gt.f32.partialorder %v11854_v1, 0.0 }
 0x93a   :  { %v4586_v30 = vsel %vm644_vm14, %v4561_v48, %v4577_v16  ;;  %v4594_v24 = vsel %vm644_vm14, %v4577_v16, %v4561_v48  ;;  %vm4687_vm13 = vcmp.gt.f32.partialorder %v11857_v59, 0.0 }
 0x93b   :  { %v4608_v19 = vmul.f32 %v13533_v14, %v4586_v30  ;;  %v4609_v0 = vmul.f32 %v13534_v27, %v4594_v24  ;;  %v4728_v51 = vmul.f32 1.442695, %v4702_v34  ;;  %v4730_v39 = vmul.f32 1.442695, %v4703_v28  ;;  %v7504_v29 = vpop.eup %7503 }
 0x93c   :  { %v7506_v17 = vpop.eup %7505  ;;  %v6900_v58 = vadd.f32 -1.0, %v7504_v29  ;;  %v11913_v34 = vadd.f32 %v4642_v22, %v4619_v57  ;;  %v4698_v15 = vmin.f32 %v11908_v7, 0.0  ;;  %v7589_v57 = vmov 4  }
 0x93d   :  { %v4624_v50 = vadd.f32 %v4608_v19, %v4544_v37  ;;  %v4625_v20 = vadd.f32 %v4609_v0, %v4545_v25  ;;  %7507 = vpow2.f32 %v4728_v51  ;;  %v6901_v24 = vadd.f32 -1.0, %v7506_v17  ;;  %7402 = vset.pattern.permute.xlu0 %v7589_v57  ;;  %7401 = vset.pattern.permute.xlu2 %v7589_v57 }
 0x93e   :  { %7509 = vpow2.f32 %v4730_v39  ;;  %v11918_v37 = vsel %vm4684_vm1, %v11830_v23, %v6900_v58  ;;  %v4601_v23 = vmul.f32 %v13534_v27, %v4590_v49  ;;  %v4699_v47 = vmin.f32 %v11913_v34, 0.0  ;;  %4791 = vperm.xlu0 %7402, %v11800_v36   ;;  %4786 = vperm.xlu2 %7401, %v11779_v13  }
 0x93f   :  { %v11882_v4 = vadd.f32 %v13537_v21, %v4624_v50  ;;  %v11885_v54 = vadd.f32 %v13537_v21, %v4625_v20  ;;  %v4720_v22 = vmul.f32 1.442695, %v4698_v15  ;;  %v4616_v49 = vadd.f32 %v4600_v3, %v11768_v52 }
 0x940   :  { %vm4682_vm12 = vcmp.gt.f32.partialorder %v11908_v7, 0.0  ;;  %vm4683_vm3 = vcmp.gt.f32.partialorder %v11913_v34, 0.0 }
 0x941   :  { %v4549_v53 = vpop.permute.xlu0 %4548  ;;  %v4579_v42 = vpop.permute.xlu1 %4578  ;;  %v4704_v63 = vmin.f32 %v11882_v4, 0.0  ;;  %v4705_v40 = vmin.f32 %v11885_v54, 0.0  ;;  %vm4688_vm7 = vcmp.gt.f32.partialorder %v11882_v4, 0.0  ;;  %vm4689_vm8 = vcmp.gt.f32.partialorder %v11885_v54, 0.0 }
 0x942   :  { %v4587_v18 = vsel %vm644_vm14, %v11825_v43, %v4579_v42  ;;  %v4595_v38 = vsel %vm644_vm14, %v4579_v42, %v11825_v43  ;;  %v4580_v25 = vsel %vm644_vm14, %v4549_v53, %v11850_v8 }
 0x943   :  { %v7508_v32 = vpop.eup %7507  ;;  %v4610_v55 = vmul.f32 %v13533_v14, %v4587_v18  ;;  %v4611_v6 = vmul.f32 %v13534_v27, %v4595_v38  ;;  %v4732_v28 = vmul.f32 1.442695, %v4704_v63  ;;  %v4734_v33 = vmul.f32 1.442695, %v4705_v40 }
 0x944   :  { %v7510_v45 = vpop.eup %7509  ;;  %v6902_v43 = vadd.f32 -1.0, %v7508_v32  ;;  %v4596_v11 = vmul.f32 %v13533_v14, %v4580_v25 }
 0x945   :  { %v4626_v61 = vadd.f32 %v4610_v55, %v4546_v35  ;;  %v4627_v16 = vadd.f32 %v4611_v6, %v4547_v10  ;;  %v6903_v48 = vadd.f32 -1.0, %v7510_v45  ;;  %7511 = vpow2.f32 %v4732_v28 }
 0x946   :  { %v11921_v30 = vsel %vm4686_vm10, %v11854_v1, %v6902_v43  ;;  %v4588_v1 = vsel %vm644_vm14, %v11850_v8, %v4549_v53  ;;  %7513 = vpow2.f32 %v4734_v33  ;;  %v11950_v8 = vsel %vm4685_vm5, %v11833_v41, %v6901_v24 }
 0x947   :  { %v11927_v19 = vadd.f32 %v13538_v26, %v4626_v61  ;;  %v11930_v0 = vadd.f32 %v13538_v26, %v4627_v16  ;;  %v4778_v62 = vpack.c.bf16 %v11921_v30, %v11918_v37  ;;  %v11942_v50 = vsel %vm4687_vm13, %v11857_v59, %v6903_v48 }
 0x948   :  { %v4597_v21 = vmul.f32 %v13534_v27, %v4588_v1  ;;  %v4779_v60 = vpack.c.bf16 %v11942_v50, %v11950_v8  ;;  %v4722_v10 = vmul.f32 1.442695, %v4699_v47  ;;  %v4617_v53 = vadd.f32 %v4601_v23, %v11771_v44 }
 0x949   :  { %v4567_v46 = vpop.permute.xlu0 %4566  ;;  %v4551_v51 = vpop.permute.xlu1 %4550  ;;  %v4706_v20 = vmin.f32 %v11927_v19, 0.0  ;;  %v4707_v39 = vmin.f32 %v11930_v0, 0.0  ;;  %v4612_v63 = vadd.f32 %v4596_v11, %v11734_v56  ;;  %vm4690_vm9 = vcmp.gt.f32.partialorder %v11927_v19, 0.0 }
 0x94a   :  { %v4581_v35 = vsel %vm644_vm14, %v4551_v51, %v4567_v46  ;;  %v4589_v42 = vsel %vm644_vm14, %v4567_v46, %v4551_v51  ;;  %v4613_v2 = vadd.f32 %v4597_v21, %v11737_v12  ;;  %vm4691_vm11 = vcmp.gt.f32.partialorder %v11930_v0, 0.0 }
 0x94b   :  { %v4736_v29 = vmul.f32 1.442695, %v4706_v20  ;;  %v4738_v59 = vmul.f32 1.442695, %v4707_v39  ;;  %v7512_v41 = vpop.eup %7511  ;;  %v4598_v38 = vmul.f32 %v13533_v14, %v4581_v35  ;;  %v4599_v56 = vmul.f32 %v13534_v27, %v4589_v42  ;;  %v6976_v42 = vld [vmem:[%s12940_s3 + $0xa8] sm:$0xf] }
 0x94c   :  { %v7514_v18 = vpop.eup %7513  ;;  %v6904_v12 = vadd.f32 -1.0, %v7512_v41 }
 0x94d   :  { %7515 = vpow2.f32 %v4736_v29  ;;  %v6905_v55 = vadd.f32 -1.0, %v7514_v18  ;;  %v4614_v27 = vadd.f32 %v4598_v38, %v11751_v9  ;;  %v4615_v25 = vadd.f32 %v4599_v56, %v11753_v31 }
 0x94e   :  { %7517 = vpow2.f32 %v4738_v59  ;;  %v4768_v26 = vsel %vm4688_vm7, %v11882_v4, %v6904_v12 }
 0x94f   :  { %7519 = vpow2.f32 %v4720_v22  ;;  %v4769_v9 = vsel %vm4689_vm8, %v11885_v54, %v6905_v55 }
 0x950   :  { %7521 = vpow2.f32 %v4722_v10 }
 0x951   :  { %v4630_v17 = vpop.permute.xlu0 %4629  ;;  %v4638_v40 = vpop.permute.xlu1 %4637 }
 0x952   :  { %v11964_v52 = vadd.f32 %v4630_v17, %v4612_v63  ;;  %v11966_v44 = vadd.f32 %v4630_v17, %v4613_v2  ;;  %v11968_v3 = vadd.f32 %v4638_v40, %v4616_v49  ;;  %v11970_v58 = vadd.f32 %v4638_v40, %v4617_v53  ;;  %v7303_v63 = vld [vmem:[%s12940_s3 + $0xb0] sm:$0xf0] }
 0x953   :  { %v7516_v14 = vpop.eup %7515  ;;  %v7319_v40 = vld [vmem:[%s12940_s3 + $0x170] sm:$0xf0] }
 0x954   :  { %v4692_v32 = vmin.f32 %v11964_v52, 0.0  ;;  %v7518_v6 = vpop.eup %7517  ;;  %v4693_v45 = vmin.f32 %v11966_v44, 0.0  ;;  %v4696_v43 = vmin.f32 %v11968_v3, 0.0  ;;  %v4697_v28 = vmin.f32 %v11970_v58, 0.0 }
 0x955   :  { %v6906_v61 = vadd.f32 -1.0, %v7516_v14  ;;  %v6907_v16 = vadd.f32 -1.0, %v7518_v6  ;;  %v7520_v48 = vpop.eup %7519  ;;  %vm4680_vm15 = vcmp.gt.f32.partialorder %v11968_v3, 0.0  ;;  %vm4681_vm1 = vcmp.gt.f32.partialorder %v11970_v58, 0.0 }
 0x956   :  { %v4716_v33 = vmul.f32 1.442695, %v4696_v43  ;;  %v4718_v24 = vmul.f32 1.442695, %v4697_v28  ;;  %v4708_v23 = vmul.f32 1.442695, %v4692_v32  ;;  %v7522_v46 = vpop.eup %7521 }
 0x957   :  { %v4770_v15 = vsel %vm4690_vm9, %v11927_v19, %v6906_v61  ;;  %v4771_v1 = vsel %vm4691_vm11, %v11930_v0, %v6907_v16  ;;  %v4710_v51 = vmul.f32 1.442695, %v4693_v45  ;;  %v6898_v54 = vadd.f32 -1.0, %v7520_v48  ;;  %v7032_v28 = vld [vmem:[%s12940_s3 + $0x150] sm:$0xf] }
 0x958   :  { %v4780_v39 = vpack.c.bf16 %v4770_v15, %v4768_v26  ;;  %v4781_v47 = vpack.c.bf16 %v4771_v1, %v4769_v9  ;;  %7523 = vpow2.f32 %v4716_v33  ;;  %v6899_v59 = vadd.f32 -1.0, %v7522_v46  ;;  %v7317_v61 = vld [vmem:[%s12940_s3 + $0x158] sm:$0xf0]  ;;  %v6960_v16 = vld [vmem:[%s12940_s3 + $0x78] sm:$0xf] }
 0x959   :  { %v4634_v20 = vpop.permute.xlu1 %4633  ;;  %7525 = vpow2.f32 %v4718_v24  ;;  %v4762_v30 = vsel %vm4682_vm12, %v11908_v7, %v6898_v54  ;;  %v6910_v7 = vld [vmem:[%s12941_s4] sm:$0xf]  ;;  %vm4676_vm10 = vcmp.gt.f32.partialorder %v11964_v52, 0.0  ;;  %vm4677_vm5 = vcmp.gt.f32.partialorder %v11966_v44, 0.0  ;;  %v7299_v48 = vld [vmem:[%s12940_s3 + $0x80] sm:$0xf0] }
 0x95a   :  { %v4662_v31 = vadd.f32 %v4634_v20, %v4614_v27  ;;  %v4663_v11 = vadd.f32 %v4634_v20, %v4615_v25  ;;  %4806 = vmatpush.bf16.msra.mxu2 %v4780_v39  ;;  %4820 = vmatpush.bf16.msra.mxu3 %v4781_v47  ;;  %7527 = vpow2.f32 %v4708_v23  ;;  %v4763_v8 = vsel %vm4683_vm3, %v11913_v34, %v6899_v59  ;;  %v7040_v34 = vld [vmem:[%s12940_s3 + $0x168] sm:$0xf]  ;;  %v7024_v24 = vld [vmem:[%s12940_s3 + $0x138] sm:$0xf]  ;;  %v7315_v25 = vld [vmem:[%s12940_s3 + $0x140] sm:$0xf0] }
 0x95b   :  { %7529 = vpow2.f32 %v4710_v51  ;;  %v7041_v6 = vor.u32 %v7319_v40, %v7040_v34  ;;  %v7033_v33 = vor.u32 %v7317_v61, %v7032_v28  ;;  %v6961_v26 = vor.u32 %v7299_v48, %v6960_v16  ;;  %v6952_v15 = vld [vmem:[%s12940_s3 + $0x60] sm:$0xf]  ;;  %v7297_v9 = vld [vmem:[%s12940_s3 + $0x68] sm:$0xf0]  ;;  %v6944_v39 = vld [vmem:[%s12940_s3 + $0x48] sm:$0xf] }
 0x95c   :  { %v4694_v4 = vmin.f32 %v4662_v31, 0.0  ;;  %v4695_v19 = vmin.f32 %v4663_v11, 0.0  ;;  %vm4678_vm13 = vcmp.gt.f32.partialorder %v4662_v31, 0.0  ;;  %vm4679_vm7 = vcmp.gt.f32.partialorder %v4663_v11, 0.0  ;;  %v7016_v1 = vld [vmem:[%s12940_s3 + $0x120] sm:$0xf] }
 0x95d   :  { %v7025_v23 = vor.u32 %v7315_v25, %v7024_v24  ;;  %v6953_v46 = vor.u32 %v7297_v9, %v6952_v15  ;;  %v7313_v51 = vld [vmem:[%s12940_s3 + $0x128] sm:$0xf0]  ;;  %v7295_v47 = vld [vmem:[%s12940_s3 + $0x50] sm:$0xf0]  ;;  %v7000_v54 = vld [vmem:[%s12940_s3 + $0xf0] sm:$0xf] }
 0x95e   :  { %v4712_v21 = vmul.f32 1.442695, %v4694_v4  ;;  %v4714_v29 = vmul.f32 1.442695, %v4695_v19  ;;  %4807 = vmatpush.bf16.msra.mxu2 %v4778_v62  ;;  %4821 = vmatpush.bf16.msra.mxu3 %v4779_v60  ;;  %v7524_v0 = vpop.eup %7523  ;;  %v7017_v20 = vor.u32 %v7313_v51, %v7016_v1  ;;  %v7311_v4 = vld [vmem:[%s12940_s3 + $0x110] sm:$0xf0] }
 0x95f   :  { %v7526_v22 = vpop.eup %7525  ;;  %v6896_v35 = vadd.f32 -1.0, %v7524_v0  ;;  %v7309_v59 = vld [vmem:[%s12940_s3 + $0xf8] sm:$0xf0]  ;;  %v6970_v40 = vld [vmem:[%s12940_s3 + $0x9c] sm:$0xf0]  ;;  %vm5236_vm12 = vcmp.lt.s32.totalorder %v8602_v5, 123 }
 0x960   :  { %7531 = vpow2.f32 %v4712_v21  ;;  %v7528_v10 = vpop.eup %7527  ;;  %v6897_v49 = vadd.f32 -1.0, %v7526_v22  ;;  %v6936_v21 = vld [vmem:[%s12940_s3 + $0x30] sm:$0xf]  ;;  %v7001_v22 = vor.u32 %v7309_v59, %v7000_v54  ;;  %v7294_v51 = vld [vmem:[%s12940_s3 + $0x4c] sm:$0xf]  ;;  %v7592_v54 = vmov 10  }
 0x961   :  { %7533 = vpow2.f32 %v4714_v29  ;;  %v7530_v53 = vpop.eup %7529  ;;  %v4760_v37 = vsel %vm4680_vm15, %v11968_v3, %v6896_v35  ;;  %v6892_v60 = vadd.f32 -1.0, %v7528_v10  ;;  %v7287_v3 = vld [vmem:[%s12941_s4 + $0x10] sm:$0xf0]  ;;  %v7293_v29 = vld [vmem:[%s12940_s3 + $0x38] sm:$0xf0]  ;;  %vm5265_vm15 = vcmp.lt.s32.totalorder %v8602_v5, 122 }
 0x962   :  { %v4776_v62 = vpack.c.bf16 %v4762_v30, %v4760_v37  ;;  %v4761_v50 = vsel %vm4681_vm1, %v11970_v58, %v6897_v49  ;;  %v6893_v18 = vadd.f32 -1.0, %v7530_v53  ;;  %v6977_v58 = vor.u32 %v7303_v63, %v6976_v42  ;;  %v6928_v35 = vld [vmem:[%s12940_s3 + $0x18] sm:$0xf]  ;;  %v7291_v10 = vld [vmem:[%s12940_s3 + $0x20] sm:$0xf0] }
 0x963   :  { %v4777_v41 = vpack.c.bf16 %v4763_v8, %v4761_v50  ;;  %v4756_v56 = vsel %vm4676_vm10, %v11964_v52, %v6892_v60  ;;  %v6911_v43 = vor.u32 %v7287_v3, %v6910_v7  ;;  %v6968_v52 = vld [vmem:[%s12940_s3 + $0x90] sm:$0xf]  ;;  %v6937_v0 = vor.u32 %v7293_v29, %v6936_v21  ;;  %v6992_v49 = vld [vmem:[%s12940_s3 + $0xd8] sm:$0xf]  ;;  %v7307_v37 = vld [vmem:[%s12940_s3 + $0xe0] sm:$0xf0] }
 0x964   :  { %4808 = vmatpush.bf16.msra.mxu2 %v4776_v62  ;;  %v4757_v32 = vsel %vm4677_vm5, %v11966_v44, %v6893_v18  ;;  %v7301_v44 = vld [vmem:[%s12940_s3 + $0x98] sm:$0xf0]  ;;  %v6929_v53 = vor.u32 %v7291_v10, %v6928_v35  ;;  %v6993_v30 = vor.u32 %v7307_v37, %v6992_v49  ;;  %v6920_v62 = vld [vmem:[%s12940_s3] sm:$0xf]  ;;  %v7289_v50 = vld [vmem:[%s12940_s3 + $0x8] sm:$0xf0] }
 0x965   :  { %4822 = vmatpush.bf16.msra.mxu3 %v4777_v41  ;;  %v6969_v27 = vor.u32 %v7301_v44, %v6968_v52  ;;  %v6984_v8 = vld [vmem:[%s12940_s3 + $0xc0] sm:$0xf]  ;;  %v6921_v60 = vor.u32 %v7289_v50, %v6920_v62  ;;  %v7305_v41 = vld [vmem:[%s12940_s3 + $0xc8] sm:$0xf0]  ;;  %v6978_v63 = vld [vmem:[%s12940_s3 + $0xb4] sm:$0xf0] }
 0x966   :  { %v7532_v2 = vpop.eup %7531  ;;  %v7302_v42 = vld [vmem:[%s12940_s3 + $0xac] sm:$0xf]  ;;  %v7034_v3 = vld [vmem:[%s12940_s3 + $0x15c] sm:$0xf0]  ;;  %v7591_v52 = vmov 9   ;;  %vm5294_vm3 = vcmp.lt.s32.totalorder %v8602_v5, 121 }
 0x967   :  { %v7534_v38 = vpop.eup %7533  ;;  %v6894_v17 = vadd.f32 -1.0, %v7532_v2  ;;  %v6985_v2 = vor.u32 %v7305_v41, %v6984_v8  ;;  %v6981_v18 = vor.u32 %v7302_v42, %v6978_v63  ;;  %v7318_v7 = vld [vmem:[%s12940_s3 + $0x16c] sm:$0xf]  ;;  %7405 = vset.pattern.permute.xlu2 %v7591_v52  ;;  %v6954_v24 = vld [vmem:[%s12940_s3 + $0x6c] sm:$0xf0]  ;;  %vm5323_vm1 = vcmp.lt.s32.totalorder %v8602_v5, 120 }
 0x968   :  { %v6895_v57 = vadd.f32 -1.0, %v7534_v38  ;;  %v7042_v38 = vld [vmem:[%s12940_s3 + $0x174] sm:$0xf0]  ;;  %5129 = vperm.xlu2 %7405, %v11779_v13   ;;  %v6938_v35 = vld [vmem:[%s12940_s3 + $0x3c] sm:$0xf0]  ;;  %vm5352_vm10 = vcmp.lt.s32.totalorder %v8602_v5, 119 }
 0x969   :  { %v4758_v12 = vsel %vm4678_vm13, %v4662_v31, %v6894_v17  ;;  %v7008_v31 = vld [vmem:[%s12940_s3 + $0x108] sm:$0xf]  ;;  %v7300_v17 = vld [vmem:[%s12940_s3 + $0x94] sm:$0xf]  ;;  %v7045_v34 = vor.u32 %v7318_v7, %v7042_v38  ;;  %v7306_v42 = vld [vmem:[%s12940_s3 + $0xdc] sm:$0xf] }
 0x96a   :  { %v4774_v14 = vpack.c.bf16 %v4758_v12, %v4756_v56  ;;  %v4759_v55 = vsel %vm4679_vm7, %v4663_v11, %v6895_v57  ;;  %v6945_v11 = vor.u32 %v7295_v47, %v6944_v39  ;;  %v7009_v19 = vor.u32 %v7311_v4, %v7008_v31  ;;  %v7316_v57 = vld [vmem:[%s12940_s3 + $0x154] sm:$0xf]  ;;  %v7310_v31 = vld [vmem:[%s12940_s3 + $0x10c] sm:$0xf]  ;;  %v6930_v41 = vld [vmem:[%s12940_s3 + $0x24] sm:$0xf0] }
 0x96b   :  { %v4775_v45 = vpack.c.bf16 %v4759_v55, %v4757_v32  ;;  %v6973_v56 = vor.u32 %v7300_v17, %v6970_v40  ;;  %v7037_v12 = vor.u32 %v7316_v57, %v7034_v3  ;;  %v7298_v32 = vld [vmem:[%s12940_s3 + $0x7c] sm:$0xf]  ;;  %v6962_v55 = vld [vmem:[%s12940_s3 + $0x84] sm:$0xf0]  ;;  %v7308_v49 = vld [vmem:[%s12940_s3 + $0xf4] sm:$0xf] }
 0x96c   :  { %4809 = vmatpush.bf16.msra.mxu2 %v4774_v14  ;;  %v7590_v14 = vmov 8   ;;  %v6965_v61 = vor.u32 %v7298_v32, %v6962_v55  ;;  %v6994_v63 = vld [vmem:[%s12940_s3 + $0xe4] sm:$0xf0]  ;;  %v7288_v17 = vld [vmem:[%s12940_s3 + $0x4] sm:$0xf]  ;;  %v7594_v55 = vmov 12  }
 0x96d   :  { %4823 = vmatpush.bf16.msra.mxu3 %v4775_v45  ;;  %7404 = vset.pattern.permute.xlu1 %v7590_v14  ;;  %v7314_v45 = vld [vmem:[%s12940_s3 + $0x13c] sm:$0xf]  ;;  %v6997_v38 = vor.u32 %v7306_v42, %v6994_v63  ;;  %v7304_v57 = vld [vmem:[%s12940_s3 + $0xc4] sm:$0xf]  ;;  %v6986_v3 = vld [vmem:[%s12940_s3 + $0xcc] sm:$0xf0] }
 0x96e   :  { %5109 = vperm.xlu1 %7404, %v11800_v36   ;;  %7403 = vset.pattern.permute.xlu0 %v7590_v14  ;;  %vm5497_vm13 = vcmp.lt.s32.totalorder %v8602_v5, 114  ;;  %vm5526_vm5 = vcmp.lt.s32.totalorder %v8602_v5, 113  ;;  %vm5564_vm7 = vcmask 130048  }
 0x96f   :  { %6912 = vmatmul.msk.bf16.vlgmr.msra.gmra.mxu2 %vm884_vm0, %v6911_v43  ;;  %5105 = vperm.xlu0 %7403, %v11779_v13  }
 0x970   :  { %5048 = vmatpush.bf16.msrb.mxu2 %v6977_v58  ;;  %6913 = vmatmul.msk.bf16.vlgmr.msra.gmra.mxu3 %vm884_vm0, %v6911_v43  ;;  %v7026_v43 = vld [vmem:[%s12940_s3 + $0x144] sm:$0xf0] }
 0x971   :  { %5062 = vmatpush.bf16.msrb.mxu3 %v7041_v6  ;;  %v7029_v48 = vor.u32 %v7314_v45, %v7026_v43  ;;  %v6989_v45 = vor.u32 %v7304_v57, %v6986_v3 }
 0x974   :  { %5049 = vmatpush.bf16.msrb.mxu2 %v6969_v27 }
 0x975   :  { %5063 = vmatpush.bf16.msrb.mxu3 %v7033_v33  ;;  %v7296_v33 = vld [vmem:[%s12940_s3 + $0x64] sm:$0xf] }
 0x976   :  { %v6957_v9 = vor.u32 %v7296_v33, %v6954_v24  ;;  %7406 = vset.pattern.permute.xlu1 %v7591_v52  ;;  %v7595_v33 = vmov 13   ;;  %v7598_v24 = vmov 16  }
 0x977   :  { %5133 = vperm.xlu1 %7406, %v11800_v36   ;;  %7407 = vset.pattern.permute.xlu0 %v7592_v54 }
 0x978   :  { %5050 = vmatpush.bf16.msrb.mxu2 %v6961_v26  ;;  %v7312_v26 = vld [vmem:[%s12940_s3 + $0x124] sm:$0xf]  ;;  %5157 = vperm.xlu0 %7407, %v11779_v13  }
 0x979   :  { %5064 = vmatpush.bf16.msrb.mxu3 %v7025_v23  ;;  %v7018_v23 = vld [vmem:[%s12940_s3 + $0x12c] sm:$0xf0] }
 0x97c   :  { %5051 = vmatpush.bf16.msrb.mxu2 %v6953_v46  ;;  %v7021_v46 = vor.u32 %v7312_v26, %v7018_v23  ;;  %v7600_v26 = vmov 18   ;;  %v7601_v23 = vmov 19  }
 0x97d   :  { %5065 = vmatpush.bf16.msrb.mxu3 %v7017_v20  ;;  %v6946_v20 = vld [vmem:[%s12940_s3 + $0x54] sm:$0xf0] }
 0x97e   :  { %v6949_v29 = vor.u32 %v7294_v51, %v6946_v20 }
 0x97f   :  { %7408 = vset.pattern.permute.xlu1 %v7592_v54 }
 0x980   :  { %5052 = vmatpush.bf16.msrb.mxu2 %v6945_v11  ;;  %v7010_v11 = vld [vmem:[%s12940_s3 + $0x114] sm:$0xf0]  ;;  %5161 = vperm.xlu1 %7408, %v11800_v36  }
 0x981   :  { %5066 = vmatpush.bf16.msrb.mxu3 %v7009_v19  ;;  %v7013_v59 = vor.u32 %v7310_v31, %v7010_v11 }
 0x984   :  { %5053 = vmatpush.bf16.msrb.mxu2 %v6937_v0 }
 0x985   :  { %5067 = vmatpush.bf16.msrb.mxu3 %v7001_v22  ;;  %v7292_v22 = vld [vmem:[%s12940_s3 + $0x34] sm:$0xf] }
 0x986   :  { %v6941_v50 = vor.u32 %v7292_v22, %v6938_v35 }
 0x988   :  { %5054 = vmatpush.bf16.msrb.mxu2 %v6929_v53  ;;  %v7002_v53 = vld [vmem:[%s12940_s3 + $0xfc] sm:$0xf0] }
 0x989   :  { %5068 = vmatpush.bf16.msrb.mxu3 %v6993_v30  ;;  %v7593_v30 = vmov 11   ;;  %v7005_v8 = vor.u32 %v7308_v49, %v7002_v53 }
 0x98a   :  { %7410 = vset.pattern.permute.xlu2 %v7593_v30  ;;  %7409 = vset.pattern.permute.xlu1 %v7593_v30 }
 0x98b   :  { %5189 = vperm.xlu2 %7410, %v11800_v36   ;;  %5185 = vperm.xlu1 %7409, %v11779_v13  }
 0x98c   :  { %5055 = vmatpush.bf16.msrb.mxu2 %v6921_v60  ;;  %v7290_v60 = vld [vmem:[%s12940_s3 + $0x1c] sm:$0xf] }
 0x98d   :  { %5069 = vmatpush.bf16.msrb.mxu3 %v6985_v2  ;;  %v6933_v7 = vor.u32 %v7290_v60, %v6930_v41 }
 0x990   :  { %5076 = vmatpush.bf16.msra.mxu2 %v6981_v18 }
 0x991   :  { %5090 = vmatpush.bf16.msra.mxu3 %v7045_v34  ;;  %v6922_v34 = vld [vmem:[%s12940_s3 + $0xc] sm:$0xf0] }
 0x992   :  { %v6925_v32 = vor.u32 %v7288_v17, %v6922_v34 }
 0x993   :  { %7412 = vset.pattern.permute.xlu2 %v7594_v55  ;;  %7411 = vset.pattern.permute.xlu1 %v7594_v55 }
 0x994   :  { %5077 = vmatpush.bf16.msra.mxu2 %v6973_v56  ;;  %5217 = vperm.xlu2 %7412, %v11800_v36  }
 0x995   :  { %5091 = vmatpush.bf16.msra.mxu3 %v7037_v12  ;;  %5213 = vperm.xlu1 %7411, %v11779_v13  }
 0x998   :  { %v4787_v58 = vpop.permute.xlu2 %4786  ;;  %5078 = vmatpush.bf16.msra.mxu2 %v6965_v61 }
 0x999   :  { %5092 = vmatpush.bf16.msra.mxu3 %v7029_v48 }
 0x99c   :  { %5079 = vmatpush.bf16.msra.mxu2 %v6957_v9  ;;  %7414 = vset.pattern.permute.xlu2 %v7595_v33  ;;  %v7603_v9 = vmov 21  }
 0x99d   :  { %5093 = vmatpush.bf16.msra.mxu3 %v7021_v46  ;;  %5246 = vperm.xlu2 %7414, %v11800_v36  }
 0x99e   :  { %7413 = vset.pattern.permute.xlu1 %v7595_v33 }
 0x99f   :  { %5242 = vperm.xlu1 %7413, %v11779_v13  }
 0x9a0   :  { %5080 = vmatpush.bf16.msra.mxu2 %v6949_v29 }
 0x9a1   :  { %5094 = vmatpush.bf16.msra.mxu3 %v7013_v59 }
 0x9a4   :  { %5081 = vmatpush.bf16.msra.mxu2 %v6941_v50 }
 0x9a5   :  { %5095 = vmatpush.bf16.msra.mxu3 %v7005_v8 }
 0x9a8   :  { %5082 = vmatpush.bf16.msra.mxu2 %v6933_v7 }
 0x9a9   :  { %5096 = vmatpush.bf16.msra.mxu3 %v6997_v38 }
 0x9ac   :  { %5083 = vmatpush.bf16.msra.mxu2 %v6925_v32 }
 0x9ad   :  { %5097 = vmatpush.bf16.msra.mxu3 %v6989_v45 }
 0x9b0   :  { %v4792_v15 = vpop.permute.xlu0 %4791 }
 0x9e0   :  { %v12256_v46 = vpop.permute.xlu1 %5109 }
 0x9e1   :  { %v12386_v17 = vpop.permute.xlu0 %5105 }
 0x9e9   :  { %v12260_v20 = vpop.permute.xlu1 %5133 }
 0x9f2   :  { %v4811_v6 = vpop.f32.mrf.mxu2 }
 0x9f3   :  { %v4825_v44 = vpop.f32.mrf.mxu3  ;;  %v12152_v28 = vadd.f32 %v4811_v6, %v4787_v58 }
 0x9f4   :  { %v12155_v27 = vadd.f32 %v4825_v44, %v4787_v58 }
 0x9f5   :  { %v4834_v16 = vmin.f32 %v12152_v28, 0.0  ;;  %vm4830_vm8 = vcmp.gt.f32.partialorder %v12152_v28, 0.0 }
 0x9f6   :  { %v4835_v25 = vmin.f32 %v12155_v27, 0.0  ;;  %vm4831_vm11 = vcmp.gt.f32.partialorder %v12155_v27, 0.0 }
 0x9f7   :  { %v4838_v1 = vmul.f32 1.442695, %v4834_v16 }
 0x9f8   :  { %v4840_v47 = vmul.f32 1.442695, %v4835_v25  ;;  %v7599_v25 = vmov 17  }
 0x9f9   :  { %7535 = vpow2.f32 %v4838_v1  ;;  %v12254_v1 = vpop.permute.xlu2 %5129 }
 0x9fa   :  { %v4813_v39 = vpop.f32.mrf.mxu2  ;;  %7537 = vpow2.f32 %v4840_v47 }
 0x9fb   :  { %v4814_v4 = vadd.f32 %v4813_v39, %v4792_v15  ;;  %v4827_v19 = vpop.f32.mrf.mxu3 }
 0x9fc   :  { %v12185_v21 = vadd.f32 %v4827_v19, %v4792_v15  ;;  %v7602_v15 = vmov 20  }
 0x9fd   :  { %v4836_v0 = vmin.f32 %v4814_v4, 0.0  ;;  %vm4832_vm0 = vcmp.gt.f32.partialorder %v4814_v4, 0.0 }
 0x9fe   :  { %v4837_v10 = vmin.f32 %v12185_v21, 0.0  ;;  %vm4833_vm9 = vcmp.gt.f32.partialorder %v12185_v21, 0.0 }
 0x9ff   :  { %v4842_v37 = vmul.f32 1.442695, %v4836_v0  ;;  %v7536_v2 = vpop.eup %7535 }
 0xa00   :  { %v4844_v62 = vmul.f32 1.442695, %v4837_v10  ;;  %v7538_v18 = vpop.eup %7537  ;;  %v6914_v40 = vadd.f32 -1.0, %v7536_v2 }
 0xa01   :  { %7539 = vpow2.f32 %v4842_v37  ;;  %v6915_v56 = vadd.f32 -1.0, %v7538_v18  ;;  %v12258_v51 = vpop.permute.xlu2 %5189 }
 0xa02   :  { %7541 = vpow2.f32 %v4844_v62  ;;  %v4850_v52 = vsel %vm4830_vm8, %v12152_v28, %v6914_v40  ;;  %v7596_v28 = vmov 14  }
 0xa03   :  { %v4851_v61 = vsel %vm4831_vm11, %v12155_v27, %v6915_v56  ;;  %7416 = vset.pattern.permute.xlu2 %v7596_v28  ;;  %7415 = vset.pattern.permute.xlu1 %v7596_v28  ;;  %v7597_v27 = vmov 15   ;;  %v7616_v28 = vmov 23  }
 0xa04   :  { %5275 = vperm.xlu2 %7416, %v11800_v36   ;;  %5271 = vperm.xlu1 %7415, %v11779_v13  }
 0xa07   :  { %v7540_v58 = vpop.eup %7539 }
 0xa08   :  { %v7542_v12 = vpop.eup %7541  ;;  %v6916_v14 = vadd.f32 -1.0, %v7540_v58  ;;  %v12396_v58 = vpop.permute.xlu0 %5157 }
 0xa09   :  { %v6917_v6 = vadd.f32 -1.0, %v7542_v12  ;;  %v12262_v39 = vpop.permute.xlu2 %5217  ;;  %v7615_v12 = vmov 22  }
 0xa0a   :  { %v4852_v43 = vsel %vm4832_vm0, %v4814_v4, %v6916_v14 }
 0xa0b   :  { %v4853_v44 = vsel %vm4833_vm9, %v12185_v21, %v6917_v6  ;;  %v4854_v16 = vpack.c.bf16 %v4852_v43, %v4850_v52  ;;  %v12427_v52 = vld [vmem:[%s12938_s5] sm:$0xff] }
 0xa0c   :  { %v4855_v48 = vpack.c.bf16 %v4853_v44, %v4851_v61  ;;  %7417 = vset.pattern.permute.xlu1 %v7597_v27  ;;  %7418 = vset.pattern.permute.xlu2 %v7597_v27  ;;  %13549 = vst [vmem:[#allocation65_spill] sm:$0xff] %v12427_v52 }
 0xa0d   :  { %5056 = vmatmul.bf16.vlgmr.msrb.gmra.mxu2 %v4854_v16  ;;  %5300 = vperm.xlu1 %7417, %v11779_v13  }
 0xa0e   :  { %5070 = vmatmul.bf16.vlgmr.msrb.gmra.mxu3 %v4855_v48  ;;  %5304 = vperm.xlu2 %7418, %v11800_v36  }
 0xa15   :  { %7419 = vset.pattern.permute.xlu1 %v7598_v24 }
 0xa16   :  { %7420 = vset.pattern.permute.xlu2 %v7598_v24  ;;  %5329 = vperm.xlu1 %7419, %v11779_v13  }
 0xa17   :  { %5333 = vperm.xlu2 %7420, %v11800_v36  }
 0xa1d   :  { %5084 = vmatmul.bf16.vlgmr.msra.gmra.mxu2 %v4854_v16 }
 0xa1e   :  { %5098 = vmatmul.bf16.vlgmr.msra.gmra.mxu3 %v4855_v48  ;;  %7421 = vset.pattern.permute.xlu1 %v7599_v25 }
 0xa1f   :  { %7422 = vset.pattern.permute.xlu2 %v7599_v25  ;;  %5358 = vperm.xlu1 %7421, %v11779_v13  }
 0xa20   :  { %5362 = vperm.xlu2 %7422, %v11800_v36  }
 0xa27   :  { %7423 = vset.pattern.permute.xlu1 %v7600_v26 }
 0xa28   :  { %7424 = vset.pattern.permute.xlu2 %v7600_v26  ;;  %5387 = vperm.xlu1 %7423, %v11779_v13  }
 0xa29   :  { %5391 = vperm.xlu2 %7424, %v11800_v36  }
 0xa30   :  { %7425 = vset.pattern.permute.xlu1 %v7601_v23 }
 0xa31   :  { %7426 = vset.pattern.permute.xlu2 %v7601_v23  ;;  %5416 = vperm.xlu1 %7425, %v11779_v13  }
 0xa32   :  { %5420 = vperm.xlu2 %7426, %v11800_v36  }
 0xa39   :  { %7427 = vset.pattern.permute.xlu1 %v7602_v15 }
 0xa3a   :  { %7428 = vset.pattern.permute.xlu2 %v7602_v15  ;;  %5445 = vperm.xlu1 %7427, %v11779_v13   ;;  %v12465_v15 = vld [vmem:[%s12938_s5 + $0x8] sm:$0xff] }
 0xa3b   :  { %5449 = vperm.xlu2 %7428, %v11800_v36   ;;  %13550 = vst [vmem:[#allocation13_spill] sm:$0xff] %v12465_v15 }
 0xa42   :  { %7429 = vset.pattern.permute.xlu1 %v7603_v9 }
 0xa43   :  { %7430 = vset.pattern.permute.xlu2 %v7603_v9  ;;  %5474 = vperm.xlu1 %7429, %v11779_v13   ;;  %v12272_v13 = vpop.permute.xlu1 %5161 }
 0xa44   :  { %5478 = vperm.xlu2 %7430, %v11800_v36   ;;  %v12274_v36 = vpop.permute.xlu2 %5246 }
 0xa45   :  { %13539 = vst [vmem:[#allocation55_spill] sm:$0xff] %v12274_v36 }
 0xa4b   :  { %v12284_v29 = vpop.permute.xlu1 %5185  ;;  %7431 = vset.pattern.permute.xlu1 %v7615_v12 }
 0xa4c   :  { %7432 = vset.pattern.permute.xlu2 %v7615_v12 }
 0xa53   :  { %v12294_v0 = vpop.permute.xlu1 %5213 }
 0xa5b   :  { %v12306_v49 = vpop.permute.xlu1 %5242 }
 0xa5e   :  { %v12286_v54 = vpop.permute.xlu2 %5275 }
 0xa5f   :  { %13540 = vst [vmem:[#allocation58_spill] sm:$0xff] %v12286_v54 }
 0xa68   :  { %v12296_v35 = vpop.permute.xlu2 %5304 }
 0xa69   :  { %13541 = vst [vmem:[#allocation61_spill] sm:$0xff] %v12296_v35 }
 0xa71   :  { %v12308_v53 = vpop.permute.xlu2 %5333 }
 0xa72   :  { %13542 = vst [vmem:[#allocation56_spill] sm:$0xff] %v12308_v53 }
 0xa76   :  { %v12316_v37 = vpop.permute.xlu1 %5271 }
 0xa7a   :  { %v12324_v30 = vpop.permute.xlu2 %5362 }
 0xa7b   :  { %13543 = vst [vmem:[#allocation11_spill] sm:$0xff] %v12324_v30 }
 0xa7f   :  { %v12326_v62 = vpop.permute.xlu1 %5300 }
 0xa83   :  { %v12334_v50 = vpop.permute.xlu2 %5391 }
 0xa84   :  { %13544 = vst [vmem:[#allocation66_spill] sm:$0xff] %v12334_v50 }
 0xa88   :  { %v12336_v8 = vpop.permute.xlu1 %5329 }
 0xa8c   :  { %v12344_v60 = vpop.permute.xlu2 %5420 }
 0xa8d   :  { %13545 = vst [vmem:[#allocation57_spill] sm:$0xff] %v12344_v60 }
 0xa90   :  { %v5057_v47 = vpop.f32.mrf.mxu2 }
 0xa91   :  { %v5071_v31 = vpop.f32.mrf.mxu3  ;;  %v12350_v41 = vpop.permute.xlu1 %5358 }
 0xa92   :  { %v12264_v11 = vadd.f32 %v5071_v31, %v5057_v47 }
 0xa94   :  { %5200 = vrot.lane.b32.xlu0 %v12264_v11, %s7584_s17  ;;  %5116 = vrot.lane.b32.xlu1 %v12264_v11, %s7585_s22 }
 0xa95   :  { %5144 = vrot.lane.b32.xlu2 %v12264_v11, %s7580_s13  ;;  %v12354_v42 = vpop.permute.xlu2 %5449 }
 0xa96   :  { %13546 = vst [vmem:[#allocation8_spill] sm:$0xff] %v12354_v42 }
 0xa98   :  { %v5059_v4 = vpop.f32.mrf.mxu2 }
 0xa99   :  { %v5073_v19 = vpop.f32.mrf.mxu3 }
 0xa9a   :  { %v12276_v21 = vadd.f32 %v5073_v19, %v5059_v4  ;;  %v12362_v63 = vpop.permute.xlu1 %5387 }
 0xa9c   :  { %5228 = vrot.lane.b32.xlu0 %v12264_v11, %s7604_s16  ;;  %5174 = vrot.lane.b32.xlu1 %v12276_v21, %s7581_s24 }
 0xa9d   :  { %5172 = vrot.lane.b32.xlu2 %v12264_v11, %s7581_s24 }
 0xa9e   :  { %v12370_v2 = vpop.permute.xlu2 %5478 }
 0xa9f   :  { %13547 = vst [vmem:[#allocation68_spill] sm:$0xff] %v12370_v2 }
 0xaa0   :  { %v5085_v59 = vpop.f32.mrf.mxu2 }
 0xaa1   :  { %v5099_v22 = vpop.f32.mrf.mxu3 }
 0xaa2   :  { %v12298_v10 = vadd.f32 %v5099_v22, %v5085_v59 }
 0xaa3   :  { %v12372_v18 = vpop.permute.xlu1 %5416 }
 0xaa4   :  { %5257 = vrot.lane.b32.xlu0 %v12264_v11, %s7605_s28  ;;  %5202 = vrot.lane.b32.xlu1 %v12276_v21, %s7584_s17 }
 0xaa5   :  { %5118 = vrot.lane.b32.xlu2 %v12276_v21, %s7585_s22 }
 0xaa8   :  { %v5087_v34 = vpop.f32.mrf.mxu2 }
 0xaa9   :  { %v5101_v40 = vpop.f32.mrf.mxu3 }
 0xaaa   :  { %v12392_v3 = vadd.f32 %v5101_v40, %v5087_v34 }
 0xaac   :  { %5286 = vrot.lane.b32.xlu0 %v12264_v11, %s7606_s29  ;;  %5230 = vrot.lane.b32.xlu1 %v12276_v21, %s7604_s16  ;;  %v12382_v38 = vpop.permute.xlu1 %5445 }
 0xaad   :  { %5176 = vrot.lane.b32.xlu2 %v12298_v10, %s7581_s24 }
 0xab4   :  { %5315 = vrot.lane.b32.xlu0 %v12264_v11, %s7607_s30  ;;  %5259 = vrot.lane.b32.xlu1 %v12276_v21, %s7605_s28 }
 0xab5   :  { %5204 = vrot.lane.b32.xlu2 %v12298_v10, %s7584_s17  ;;  %v12400_v56 = vpop.permute.xlu1 %5474 }
 0xab6   :  { %13548 = vst [vmem:[#allocation60_spill] sm:$0xff] %v12400_v56 }
 0xabc   :  { %5344 = vrot.lane.b32.xlu0 %v12264_v11, %s7608_s0  ;;  %5288 = vrot.lane.b32.xlu1 %v12276_v21, %s7606_s29 }
 0xabd   :  { %5232 = vrot.lane.b32.xlu2 %v12298_v10, %s7604_s16 }
 0xac4   :  { %5373 = vrot.lane.b32.xlu0 %v12264_v11, %s7609_s10  ;;  %5317 = vrot.lane.b32.xlu1 %v12276_v21, %s7607_s30 }
 0xac5   :  { %5261 = vrot.lane.b32.xlu2 %v12298_v10, %s7605_s28 }
 0xacc   :  { %5402 = vrot.lane.b32.xlu0 %v12264_v11, %s7610_s7  ;;  %5346 = vrot.lane.b32.xlu1 %v12276_v21, %s7608_s0 }
 0xacd   :  { %5290 = vrot.lane.b32.xlu2 %v12298_v10, %s7606_s29 }
 0xad4   :  { %5431 = vrot.lane.b32.xlu0 %v12264_v11, %s7611_s8  ;;  %5375 = vrot.lane.b32.xlu1 %v12276_v21, %s7609_s10 }
 0xad5   :  { %5319 = vrot.lane.b32.xlu2 %v12298_v10, %s7607_s30 }
 0xadc   :  { %5460 = vrot.lane.b32.xlu0 %v12264_v11, %s7612_s9  ;;  %5404 = vrot.lane.b32.xlu1 %v12276_v21, %s7610_s7 }
 0xadd   :  { %5348 = vrot.lane.b32.xlu2 %v12298_v10, %s7608_s0 }
 0xae4   :  { %5489 = vrot.lane.b32.xlu0 %v12264_v11, %s7613_s11  ;;  %5433 = vrot.lane.b32.xlu1 %v12276_v21, %s7611_s8 }
 0xae5   :  { %5377 = vrot.lane.b32.xlu2 %v12298_v10, %s7609_s10 }
 0xaec   :  { %5146 = vrot.lane.b32.xlu0 %v12276_v21, %s7580_s13  ;;  %5462 = vrot.lane.b32.xlu1 %v12276_v21, %s7612_s9 }
 0xaed   :  { %5406 = vrot.lane.b32.xlu2 %v12298_v10, %s7610_s7 }
 0xaef   :  { %v12380_v7 = vpop.permute.xlu2 %5144 }
 0xaf4   :  { %5518 = vrot.lane.b32.xlu0 %v12264_v11, %s7614_s12  ;;  %5120 = vrot.lane.b32.xlu1 %v12298_v10, %s7585_s22 }
 0xaf5   :  { %5435 = vrot.lane.b32.xlu2 %v12298_v10, %s7611_s8 }
 0xaf7   :  { %v5173_v57 = vpop.permute.xlu2 %5172 }
 0xafc   :  { %5178 = vrot.lane.b32.xlu0 %v12392_v3, %s7581_s24  ;;  %5148 = vrot.lane.b32.xlu1 %v12298_v10, %s7580_s13 }
 0xafd   :  { %5464 = vrot.lane.b32.xlu2 %v12298_v10, %s7612_s9 }
 0xaff   :  { %v12404_v14 = vpop.permute.xlu2 %5118 }
 0xb04   :  { %5206 = vrot.lane.b32.xlu0 %v12392_v3, %s7584_s17  ;;  %5491 = vrot.lane.b32.xlu1 %v12276_v21, %s7613_s11 }
 0xb05   :  { %5122 = vrot.lane.b32.xlu2 %v12392_v3, %s7585_s22 }
 0xb06   :  { %v5201_v32 = vpop.permute.xlu0 %5200  ;;  %v12412_v55 = vpop.permute.xlu1 %5116 }
 0xb07   :  { %v5177_v6 = vpop.permute.xlu2 %5176 }
 0xb08   :  { %v12416_v45 = vsel %vm636_vm6, %v5173_v57, %v5177_v6  ;;  %v12420_v43 = vsel %vm636_vm6, %v5177_v6, %v5173_v57 }
 0xb0c   :  { %5234 = vrot.lane.b32.xlu0 %v12392_v3, %s7604_s16  ;;  %5503 = vperm.xlu1 %7431, %v12427_v52  }
 0xb0d   :  { %5150 = vrot.lane.b32.xlu2 %v12392_v3, %s7580_s13 }
 0xb0e   :  { %v5229_v44 = vpop.permute.xlu0 %5228  ;;  %v12432_v61 = vpop.permute.xlu1 %5174 }
 0xb0f   :  { %v5205_v16 = vpop.permute.xlu2 %5204 }
 0xb10   :  { %v12436_v48 = vsel %vm644_vm14, %v5201_v32, %v5205_v16  ;;  %v12440_v33 = vsel %vm644_vm14, %v5205_v16, %v5201_v32 }
 0xb14   :  { %5263 = vrot.lane.b32.xlu0 %v12392_v3, %s7605_s28  ;;  %5520 = vrot.lane.b32.xlu1 %v12276_v21, %s7614_s12 }
 0xb15   :  { %7433 = vset.pattern.permute.xlu1 %v7616_v28  ;;  %5493 = vrot.lane.b32.xlu2 %v12298_v10, %s7613_s11 }
 0xb16   :  { %v5258_v27 = vpop.permute.xlu0 %5257  ;;  %v12449_v24 = vpop.permute.xlu1 %5202 }
 0xb17   :  { %v5233_v25 = vpop.permute.xlu2 %5232 }
 0xb18   :  { %v12453_v26 = vsel %vm5236_vm12, %v5229_v44, %v5233_v25  ;;  %v12457_v23 = vsel %vm5236_vm12, %v5233_v25, %v5229_v44 }
 0xb1c   :  { %5292 = vrot.lane.b32.xlu0 %v12392_v3, %s7606_s29  ;;  %5532 = vperm.xlu1 %7433, %v12427_v52  }
 0xb1d   :  { %5507 = vperm.xlu2 %7432, %v12465_v15  }
 0xb1e   :  { %v5287_v9 = vpop.permute.xlu0 %5286  ;;  %v12469_v47 = vpop.permute.xlu1 %5230 }
 0xb1f   :  { %13551 = vst [vmem:[#allocation70_spill] sm:$0xff] %v12469_v47  ;;  %v5262_v31 = vpop.permute.xlu2 %5261 }
 0xb20   :  { %v12473_v4 = vsel %vm5265_vm15, %v5258_v27, %v5262_v31  ;;  %v12477_v19 = vsel %vm5265_vm15, %v5262_v31, %v5258_v27 }
 0xb24   :  { %5321 = vrot.lane.b32.xlu0 %v12392_v3, %s7607_s30 }
 0xb25   :  { %5522 = vrot.lane.b32.xlu2 %v12298_v10, %s7614_s12 }
 0xb26   :  { %v5316_v59 = vpop.permute.xlu0 %5315  ;;  %v12484_v22 = vpop.permute.xlu1 %5259  ;;  %7434 = vset.pattern.permute.xlu2 %v7616_v28 }
 0xb27   :  { %13552 = vst [vmem:[#allocation38_spill] sm:$0xff] %v12484_v22  ;;  %v5291_v34 = vpop.permute.xlu2 %5290  ;;  %v5114_v22 = vmul.f32 %v12256_v46, %v12276_v21 }
 0xb28   :  { %v12488_v40 = vsel %vm5294_vm3, %v5287_v9, %v5291_v34  ;;  %v12492_v57 = vsel %vm5294_vm3, %v5291_v34, %v5287_v9 }
 0xb2c   :  { %5350 = vrot.lane.b32.xlu0 %v12392_v3, %s7608_s0 }
 0xb2d   :  { %5536 = vperm.xlu2 %7434, %v12465_v15  }
 0xb2e   :  { %v5345_v12 = vpop.permute.xlu0 %5344  ;;  %v12498_v32 = vpop.permute.xlu1 %5288 }
 0xb2f   :  { %13553 = vst [vmem:[#allocation78_spill] sm:$0xff] %v12498_v32  ;;  %v5320_v6 = vpop.permute.xlu2 %5319 }
 0xb30   :  { %v12502_v44 = vsel %vm5323_vm1, %v5316_v59, %v5320_v6  ;;  %v12506_v16 = vsel %vm5323_vm1, %v5320_v6, %v5316_v59 }
 0xb34   :  { %5379 = vrot.lane.b32.xlu0 %v12392_v3, %s7609_s10 }
 0xb36   :  { %v12511_v28 = vpop.permute.xlu0 %5373  ;;  %v12513_v27 = vpop.permute.xlu1 %5317 }
 0xb37   :  { %13554 = vst [vmem:[#allocation5_spill] sm:$0xff] %v12513_v27  ;;  %v5349_v25 = vpop.permute.xlu2 %5348 }
 0xb38   :  { %v12517_v9 = vsel %vm5352_vm10, %v5345_v12, %v5349_v25  ;;  %v12521_v31 = vsel %vm5352_vm10, %v5349_v25, %v5345_v12 }
 0xb3c   :  { %5408 = vrot.lane.b32.xlu0 %v12392_v3, %s7610_s7 }
 0xb3e   :  { %v12525_v59 = vpop.permute.xlu0 %5402  ;;  %v12527_v34 = vpop.permute.xlu1 %5346 }
 0xb3f   :  { %13555 = vst [vmem:[#allocation14_spill] sm:$0xff] %v12527_v34  ;;  %v12529_v6 = vpop.permute.xlu2 %5377 }
 0xb44   :  { %5437 = vrot.lane.b32.xlu0 %v12392_v3, %s7611_s8 }
 0xb46   :  { %v12533_v2 = vpop.permute.xlu0 %5431  ;;  %v12535_v42 = vpop.permute.xlu1 %5375 }
 0xb47   :  { %13556 = vst [vmem:[#allocation29_spill] sm:$0xff] %v12535_v42  ;;  %v12537_v60 = vpop.permute.xlu2 %5406 }
 0xb4c   :  { %5466 = vrot.lane.b32.xlu0 %v12392_v3, %s7612_s9 }
 0xb4e   :  { %v12541_v12 = vpop.permute.xlu0 %5460  ;;  %v12543_v25 = vpop.permute.xlu1 %5404 }
 0xb4f   :  { %13557 = vst [vmem:[#allocation74_spill] sm:$0xff] %v12541_v12  ;;  %v12545_v50 = vpop.permute.xlu2 %5435 }
 0xb50   :  { %13558 = vst [vmem:[#allocation9_spill] sm:$0xff] %v12543_v25 }
 0xb54   :  { %5495 = vrot.lane.b32.xlu0 %v12392_v3, %s7613_s11 }
 0xb56   :  { %v12549_v52 = vpop.permute.xlu0 %5489  ;;  %v12551_v15 = vpop.permute.xlu1 %5433 }
 0xb57   :  { %13559 = vst [vmem:[#allocation15_spill] sm:$0xff] %v12549_v52  ;;  %v12553_v30 = vpop.permute.xlu2 %5464 }
 0xb58   :  { %13560 = vst [vmem:[#allocation16_spill] sm:$0xff] %v12551_v15 }
 0xb5c   :  { %5524 = vrot.lane.b32.xlu0 %v12392_v3, %s7614_s12 }
 0xb5e   :  { %v5147_v42 = vpop.permute.xlu0 %5146  ;;  %v12557_v34 = vpop.permute.xlu1 %5462 }
 0xb5f   :  { %13561 = vst [vmem:[#allocation73_spill] sm:$0xff] %v12557_v34  ;;  %v5123_v53 = vpop.permute.xlu2 %5122 }
 0xb60   :  { %v5125_v25 = vsel %vm620_vm2, %v12404_v14, %v5123_v53  ;;  %v5127_v35 = vsel %vm620_vm2, %v5123_v53, %v12404_v14  ;;  %v5115_v53 = vmul.f32 %v12256_v46, %v12392_v3  ;;  %v5112_v46 = vmul.f32 %v12386_v17, %v12264_v11 }
 0xb61   :  { %v5138_v27 = vmul.f32 %v12260_v20, %v5125_v25  ;;  %v5139_v15 = vmul.f32 %v12260_v20, %v5127_v35  ;;  %v5113_v3 = vmul.f32 %v12386_v17, %v12298_v10 }
 0xb63   :  { %v5142_v25 = vadd.f32 %v5138_v27, %v5114_v22  ;;  %v5143_v47 = vadd.f32 %v5139_v15, %v5115_v53 }
 0xb66   :  { %v12567_v54 = vpop.permute.xlu0 %5518  ;;  %v5121_v32 = vpop.permute.xlu1 %5120 }
 0xb67   :  { %13562 = vst [vmem:[#allocation24_spill] sm:$0xff] %v12567_v54  ;;  %v5124_v34 = vsel %vm620_vm2, %v12412_v55, %v5121_v32  ;;  %v5126_v36 = vsel %vm620_vm2, %v5121_v32, %v12412_v55  ;;  %v5151_v14 = vpop.permute.xlu2 %5150  ;;  %vm5468_vm2 = vcmp.lt.s32.totalorder %v8602_v5, 115 }
 0xb68   :  { %v5153_v20 = vsel %vm628_vm4, %v5147_v42, %v5151_v14  ;;  %v5155_v35 = vsel %vm628_vm4, %v5151_v14, %v5147_v42  ;;  %v5136_v55 = vmul.f32 %v12254_v1, %v5124_v34  ;;  %v5137_v21 = vmul.f32 %v12254_v1, %v5126_v36 }
 0xb69   :  { %v5166_v54 = vmul.f32 %v12272_v13, %v5153_v20  ;;  %v5167_v52 = vmul.f32 %v12272_v13, %v5155_v35 }
 0xb6a   :  { %v5140_v42 = vadd.f32 %v5136_v55, %v5112_v46  ;;  %v5141_v22 = vadd.f32 %v5137_v21, %v5113_v3  ;;  %v5336_v3 = vmul.f32 %v12336_v8, %v12502_v44 }
 0xb6b   :  { %v5170_v32 = vadd.f32 %v5166_v54, %v5142_v25  ;;  %v5171_v56 = vadd.f32 %v5167_v52, %v5143_v47  ;;  %v5192_v47 = vmul.f32 %v12284_v29, %v12416_v45  ;;  %v5250_v45 = vmul.f32 %v12306_v49, %v12457_v23 }
 0xb6e   :  { %v5179_v12 = vpop.permute.xlu0 %5178  ;;  %v5149_v15 = vpop.permute.xlu1 %5148 }
 0xb6f   :  { %v5181_v13 = vsel %vm636_vm6, %v12432_v61, %v5179_v12  ;;  %v5183_v1 = vsel %vm636_vm6, %v5179_v12, %v12432_v61  ;;  %v5152_v36 = vsel %vm628_vm4, %v12380_v7, %v5149_v15  ;;  %v5154_v11 = vsel %vm628_vm4, %v5149_v15, %v12380_v7 }
 0xb70   :  { %v5194_v54 = vmul.f32 %v12258_v51, %v5181_v13  ;;  %v5195_v10 = vmul.f32 %v12258_v51, %v5183_v1  ;;  %v5164_v17 = vmul.f32 %v12396_v58, %v5152_v36  ;;  %v5165_v52 = vmul.f32 %v12396_v58, %v5154_v11 }
 0xb71   :  { %v5193_v61 = vmul.f32 %v12284_v29, %v12420_v43  ;;  %v5220_v7 = vmul.f32 %v12294_v0, %v12436_v48  ;;  %v5221_v51 = vmul.f32 %v12294_v0, %v12440_v33  ;;  %v5249_v58 = vmul.f32 %v12306_v49, %v12453_v26  ;;  %v5494_v49 = vpop.permute.xlu2 %5493 }
 0xb72   :  { %v5168_v27 = vadd.f32 %v5164_v17, %v5140_v42  ;;  %v5169_v34 = vadd.f32 %v5165_v52, %v5141_v22  ;;  %v5198_v12 = vadd.f32 %v5194_v54, %v5170_v32  ;;  %v5199_v53 = vadd.f32 %v5195_v10, %v5171_v56  ;;  %v13563_v52 = vld [vmem:[#allocation74_spill] sm:$0xff] }
 0xb73   :  { %v5278_v56 = vmul.f32 %v12316_v37, %v12473_v4  ;;  %v5279_v48 = vmul.f32 %v12316_v37, %v12477_v19  ;;  %v5307_v4 = vmul.f32 %v12326_v62, %v12488_v40  ;;  %v5308_v37 = vmul.f32 %v12326_v62, %v12492_v57 }
 0xb74   :  { %v5196_v14 = vadd.f32 %v5192_v47, %v5168_v27  ;;  %v5197_v20 = vadd.f32 %v5193_v61, %v5169_v34  ;;  %vm5381_vm4 = vcmp.lt.s32.totalorder %v8602_v5, 118  ;;  %vm5410_vm6 = vcmp.lt.s32.totalorder %v8602_v5, 117  ;;  %v13564_v34 = vld [vmem:[#allocation60_spill] sm:$0xff] }
 0xb75   :  { %v5382_v62 = vsel %vm5381_vm4, %v12511_v28, %v12529_v6  ;;  %v5384_v40 = vsel %vm5381_vm4, %v12529_v6, %v12511_v28  ;;  %v5411_v28 = vsel %vm5410_vm6, %v12525_v59, %v12537_v60  ;;  %v5469_v47 = vsel %vm5468_vm2, %v13563_v52, %v12553_v30 }
 0xb76   :  { %v5207_v35 = vpop.permute.xlu0 %5206  ;;  %v5224_v29 = vadd.f32 %v5220_v7, %v5196_v14  ;;  %v5225_v43 = vadd.f32 %v5221_v51, %v5197_v20  ;;  %v12619_v25 = vpop.permute.xlu1 %5491  ;;  %v5394_v1 = vmul.f32 %v12362_v63, %v5382_v62  ;;  %v5395_v36 = vmul.f32 %v12362_v63, %v5384_v40  ;;  %v13565_v20 = vld [vmem:[#allocation15_spill] sm:$0xff] }
 0xb77   :  { %v5209_v0 = vsel %vm644_vm14, %v12449_v24, %v5207_v35  ;;  %v5211_v33 = vsel %vm644_vm14, %v5207_v35, %v12449_v24  ;;  %vm5439_vm14 = vcmp.lt.s32.totalorder %v8602_v5, 116  ;;  %v5423_v54 = vmul.f32 %v12372_v18, %v5411_v28  ;;  %v13572_v28 = vld [vmem:[#allocation5_spill] sm:$0xff] }
 0xb78   :  { %v5222_v26 = vmul.f32 %v12262_v39, %v5209_v0  ;;  %v5223_v23 = vmul.f32 %v12262_v39, %v5211_v33  ;;  %v5253_v55 = vadd.f32 %v5249_v58, %v5224_v29  ;;  %v5254_v21 = vadd.f32 %v5250_v45, %v5225_v43  ;;  %v13566_v33 = vld [vmem:[#allocation24_spill] sm:$0xff]  ;;  %v7336_v5 = vld [vmem:[%s12940_s3 + $0x178] sm:$0xf0] }
 0xb79   :  { %v5337_v39 = vmul.f32 %v12336_v8, %v12506_v16  ;;  %v5365_v8 = vmul.f32 %v12350_v41, %v12517_v9  ;;  %v5366_v16 = vmul.f32 %v12350_v41, %v12521_v31  ;;  %v5413_v9 = vsel %vm5410_vm6, %v12537_v60, %v12525_v59  ;;  %v12679_v11 = vpop.permute.xlu2 %5507 }
 0xb7a   :  { %v5282_v19 = vadd.f32 %v5278_v56, %v5253_v55  ;;  %v5283_v32 = vadd.f32 %v5279_v48, %v5254_v21  ;;  %v12638_v46 = vadd.f32 %v5222_v26, %v5198_v12  ;;  %v12640_v24 = vadd.f32 %v5223_v23, %v5199_v53 }
 0xb7b   :  { %v5440_v41 = vsel %vm5439_vm14, %v12533_v2, %v12545_v50  ;;  %v5442_v63 = vsel %vm5439_vm14, %v12545_v50, %v12533_v2  ;;  %v5424_v60 = vmul.f32 %v12372_v18, %v5413_v9  ;;  %v5471_v50 = vsel %vm5468_vm2, %v12553_v30, %v13563_v52 }
 0xb7c   :  { %v5311_v57 = vadd.f32 %v5307_v4, %v5282_v19  ;;  %v5312_v42 = vadd.f32 %v5308_v37, %v5283_v32  ;;  %v5452_v17 = vmul.f32 %v12382_v38, %v5440_v41  ;;  %v5453_v2 = vmul.f32 %v12382_v38, %v5442_v63  ;;  %v13567_v19 = vld [vmem:[#allocation70_spill] sm:$0xff] }
 0xb7d   :  { %v5481_v12 = vmul.f32 %v13564_v34, %v5469_v47  ;;  %v5482_v53 = vmul.f32 %v13564_v34, %v5471_v50  ;;  %v5498_v58 = vsel %vm5497_vm13, %v13565_v20, %v5494_v49  ;;  %v5500_v30 = vsel %vm5497_vm13, %v5494_v49, %v13565_v20 }
 0xb7e   :  { %v5235_v44 = vpop.permute.xlu0 %5234  ;;  %v5504_v22 = vpop.permute.xlu1 %5503  ;;  %v5340_v15 = vadd.f32 %v5336_v3, %v5311_v57  ;;  %v5341_v13 = vadd.f32 %v5337_v39, %v5312_v42  ;;  %v13568_v39 = vld [vmem:[#allocation38_spill] sm:$0xff]  ;;  %v13569_v57 = vld [vmem:[#allocation55_spill] sm:$0xff] }
 0xb7f   :  { %v5510_v35 = vmul.f32 %v5504_v22, %v5498_v58  ;;  %v5511_v29 = vmul.f32 %v5504_v22, %v5500_v30  ;;  %v5238_v32 = vsel %vm5236_vm12, %v13567_v19, %v5235_v44  ;;  %v5240_v3 = vsel %vm5236_vm12, %v5235_v44, %v13567_v19  ;;  %v13570_v22 = vld [vmem:[#allocation78_spill] sm:$0xff]  ;;  %v13582_v19 = vld [vmem:[#allocation16_spill] sm:$0xff] }
 0xb80   :  { %v5369_v31 = vadd.f32 %v5365_v8, %v5340_v15  ;;  %v5370_v6 = vadd.f32 %v5366_v16, %v5341_v13  ;;  %v5251_v42 = vmul.f32 %v13569_v57, %v5238_v32  ;;  %v5252_v8 = vmul.f32 %v13569_v57, %v5240_v3  ;;  %v13571_v13 = vld [vmem:[#allocation58_spill] sm:$0xff] }
 0xb81   :  { %v5523_v48 = vpop.permute.xlu2 %5522  ;;  %vm5817_vm12 = vcmask 1043456  }
 0xb82   :  { %v5398_v59 = vadd.f32 %v5394_v1, %v5369_v31  ;;  %v5399_v10 = vadd.f32 %v5395_v36, %v5370_v6  ;;  %v5527_v26 = vsel %vm5526_vm5, %v13566_v33, %v5523_v48  ;;  %v5529_v23 = vsel %vm5526_vm5, %v5523_v48, %v13566_v33  ;;  %v13573_v31 = vld [vmem:[#allocation61_spill] sm:$0xff] }
 0xb83   :  { %v13580_v33 = vld [vmem:[#allocation9_spill] sm:$0xff] }
 0xb84   :  { %v5427_v61 = vadd.f32 %v5423_v54, %v5398_v59  ;;  %v5428_v18 = vadd.f32 %v5424_v60, %v5399_v10  ;;  %v5255_v54 = vadd.f32 %v5251_v42, %v12638_v46  ;;  %v5256_v60 = vadd.f32 %v5252_v8, %v12640_v24  ;;  %v13574_v59 = vld [vmem:[#allocation56_spill] sm:$0xff]  ;;  %v13576_v46 = vld [vmem:[#allocation11_spill] sm:$0xff]  ;;  %v13584_v42 = vld [vmem:[#allocation73_spill] sm:$0xff] }
 0xb86   :  { %v5264_v27 = vpop.permute.xlu0 %5263  ;;  %v5456_v7 = vadd.f32 %v5452_v17, %v5427_v61  ;;  %v5457_v51 = vadd.f32 %v5453_v2, %v5428_v18  ;;  %v12696_v14 = vpop.permute.xlu1 %5520  ;;  %v13575_v18 = vld [vmem:[#allocation14_spill] sm:$0xff] }
 0xb87   :  { %v5267_v62 = vsel %vm5265_vm15, %v13568_v39, %v5264_v27  ;;  %v5269_v40 = vsel %vm5265_vm15, %v5264_v27, %v13568_v39  ;;  %v13583_v39 = vld [vmem:[#allocation57_spill] sm:$0xff]  ;;  %vm5813_vm15 = vcmask 64512  }
 0xb88   :  { %v5485_v38 = vadd.f32 %v5481_v12, %v5456_v7  ;;  %v5486_v45 = vadd.f32 %v5482_v53, %v5457_v51  ;;  %v5280_v1 = vmul.f32 %v13571_v13, %v5267_v62  ;;  %v5281_v36 = vmul.f32 %v13571_v13, %v5269_v40 }
 0xb8a   :  { %v5514_v43 = vadd.f32 %v5510_v35, %v5485_v38  ;;  %v5515_v56 = vadd.f32 %v5511_v29, %v5486_v45  ;;  %v5284_v52 = vadd.f32 %v5280_v1, %v5255_v54  ;;  %v5285_v47 = vadd.f32 %v5281_v36, %v5256_v60  ;;  %v13577_v35 = vld [vmem:[#allocation13_spill] sm:$0xff] }
 0xb8b   :  { %v7617_v45 = vmov 5   ;;  %v13578_v29 = vld [vmem:[#allocation65_spill] sm:$0xff] }
 0xb8c   :  { %7435 = vset.pattern.permute.xlu0 %v7617_v45  ;;  %7436 = vset.pattern.permute.xlu1 %v7617_v45  ;;  %v7082_v45 = vld [vmem:[%s12940_s3 + $0x98] sm:$0xf] }
 0xb8d   :  { %5556 = vperm.xlu1 %7436, %v13577_v35   ;;  %5552 = vperm.xlu0 %7435, %v13578_v29  }
 0xb8e   :  { %v5293_v0 = vpop.permute.xlu0 %5292  ;;  %v5533_v55 = vpop.permute.xlu1 %5532 }
 0xb8f   :  { %v5539_v49 = vmul.f32 %v5533_v55, %v5527_v26  ;;  %v5540_v21 = vmul.f32 %v5533_v55, %v5529_v23  ;;  %v5296_v15 = vsel %vm5294_vm3, %v13570_v22, %v5293_v0  ;;  %v5298_v44 = vsel %vm5294_vm3, %v5293_v0, %v13570_v22  ;;  %v13581_v55 = vld [vmem:[#allocation66_spill] sm:$0xff] }
 0xb90   :  { %v5309_v6 = vmul.f32 %v13573_v31, %v5296_v15  ;;  %v5310_v63 = vmul.f32 %v13573_v31, %v5298_v44  ;;  %v13585_v44 = vld [vmem:[#allocation8_spill] sm:$0xff]  ;;  %vm5859_vm3 = vcmask 11264  }
 0xb91   :  { %v12711_v4 = vadd.f32 %v5539_v49, %v5514_v43  ;;  %v12713_v37 = vadd.f32 %v5540_v21, %v5515_v56  ;;  %v13579_v56 = vld [vmem:[#allocation29_spill] sm:$0xff]  ;;  %v13586_v31 = vld [vmem:[#allocation68_spill] sm:$0xff] }
 0xb92   :  { %v5313_v2 = vadd.f32 %v5309_v6, %v5284_v52  ;;  %v5314_v61 = vadd.f32 %v5310_v63, %v5285_v47 }
 0xb96   :  { %v5322_v16 = vpop.permute.xlu0 %5321 }
 0xb97   :  { %v5325_v9 = vsel %vm5323_vm1, %v13572_v28, %v5322_v16  ;;  %v5327_v41 = vsel %vm5323_vm1, %v5322_v16, %v13572_v28 }
 0xb98   :  { %v5338_v10 = vmul.f32 %v13574_v59, %v5325_v9  ;;  %v5339_v17 = vmul.f32 %v13574_v59, %v5327_v41 }
 0xb9a   :  { %v5342_v53 = vadd.f32 %v5338_v10, %v5313_v2  ;;  %v5343_v7 = vadd.f32 %v5339_v17, %v5314_v61  ;;  %v5537_v17 = vpop.permute.xlu2 %5536  ;;  %v7086_v61 = vld [vmem:[%s12940_s3 + $0xb0] sm:$0xf] }
 0xb9e   :  { %v5351_v50 = vpop.permute.xlu0 %5350 }
 0xb9f   :  { %v5354_v27 = vsel %vm5352_vm10, %v13575_v18, %v5351_v50  ;;  %v5356_v34 = vsel %vm5352_vm10, %v5351_v50, %v13575_v18 }
 0xba0   :  { %v5367_v12 = vmul.f32 %v13576_v46, %v5354_v27  ;;  %v5368_v24 = vmul.f32 %v13576_v46, %v5356_v34  ;;  %v7328_v46 = vld [vmem:[%s12940_s3 + $0xb8] sm:$0xf0] }
 0xba2   :  { %v5371_v51 = vadd.f32 %v5367_v12, %v5342_v53  ;;  %v5372_v20 = vadd.f32 %v5368_v24, %v5343_v7  ;;  %v7118_v12 = vld [vmem:[%s12940_s3 + $0x170] sm:$0xf]  ;;  %v7048_v53 = vld [vmem:[%s12941_s4 + $0x4] sm:$0xf]  ;;  %v7320_v7 = vld [vmem:[%s12941_s4 + $0x14] sm:$0xf0] }
 0xba6   :  { %v5380_v58 = vpop.permute.xlu0 %5379 }
 0xba7   :  { %v5383_v48 = vsel %vm5381_vm4, %v13579_v56, %v5380_v58  ;;  %v5385_v0 = vsel %vm5381_vm4, %v5380_v58, %v13579_v56  ;;  %v7335_v56 = vld [vmem:[%s12940_s3 + $0x160] sm:$0xf0] }
 0xba8   :  { %v5396_v49 = vmul.f32 %v13581_v55, %v5383_v48  ;;  %v5397_v21 = vmul.f32 %v13581_v55, %v5385_v0  ;;  %v7078_v48 = vld [vmem:[%s12940_s3 + $0x80] sm:$0xf]  ;;  %v7326_v0 = vld [vmem:[%s12940_s3 + $0x88] sm:$0xf0] }
 0xba9   :  { %v7079_v55 = vor.u32 %v7326_v0, %v7078_v48 }
 0xbaa   :  { %v5400_v22 = vadd.f32 %v5396_v49, %v5371_v51  ;;  %v5401_v15 = vadd.f32 %v5397_v21, %v5372_v20  ;;  %v7087_v51 = vor.u32 %v7328_v46, %v7086_v61  ;;  %v7119_v20 = vor.u32 %v7336_v5, %v7118_v12  ;;  %v7074_v21 = vld [vmem:[%s12940_s3 + $0x68] sm:$0xf]  ;;  %v7329_v61 = vld [vmem:[%s12940_s3 + $0xd0] sm:$0xf0] }
 0xbae   :  { %v5409_v30 = vpop.permute.xlu0 %5408 }
 0xbaf   :  { %v5412_v26 = vsel %vm5410_vm6, %v13580_v33, %v5409_v30  ;;  %v5414_v23 = vsel %vm5410_vm6, %v5409_v30, %v13580_v33 }
 0xbb0   :  { %v5425_v62 = vmul.f32 %v13583_v39, %v5412_v26  ;;  %v5426_v40 = vmul.f32 %v13583_v39, %v5414_v23  ;;  %v7110_v26 = vld [vmem:[%s12940_s3 + $0x140] sm:$0xf]  ;;  %v7334_v23 = vld [vmem:[%s12940_s3 + $0x148] sm:$0xf0]  ;;  %v7333_v39 = vld [vmem:[%s12940_s3 + $0x130] sm:$0xf0] }
 0xbb1   :  { %v7111_v49 = vor.u32 %v7334_v23, %v7110_v26 }
 0xbb2   :  { %v5429_v9 = vadd.f32 %v5425_v62, %v5400_v22  ;;  %v5430_v41 = vadd.f32 %v5426_v40, %v5401_v15  ;;  %v7070_v40 = vld [vmem:[%s12940_s3 + $0x50] sm:$0xf]  ;;  %v7066_v22 = vld [vmem:[%s12940_s3 + $0x38] sm:$0xf]  ;;  %v7323_v15 = vld [vmem:[%s12940_s3 + $0x40] sm:$0xf0] }
 0xbb6   :  { %v5438_v38 = vpop.permute.xlu0 %5437 }
 0xbb7   :  { %v5441_v32 = vsel %vm5439_vm14, %v13582_v19, %v5438_v38  ;;  %v5443_v3 = vsel %vm5439_vm14, %v5438_v38, %v13582_v19  ;;  %v7049_v38 = vor.u32 %v7320_v7, %v7048_v53  ;;  %v7325_v19 = vld [vmem:[%s12940_s3 + $0x70] sm:$0xf0] }
 0xbb8   :  { %v5454_v13 = vmul.f32 %v13585_v44, %v5441_v32  ;;  %v5455_v1 = vmul.f32 %v13585_v44, %v5443_v3  ;;  %v7106_v32 = vld [vmem:[%s12940_s3 + $0x128] sm:$0xf]  ;;  %v7075_v3 = vor.u32 %v7325_v19, %v7074_v21 }
 0xbb9   :  { %v7107_v62 = vor.u32 %v7333_v39, %v7106_v32 }
 0xbba   :  { %v5458_v54 = vadd.f32 %v5454_v13, %v5429_v9  ;;  %v5459_v60 = vadd.f32 %v5455_v1, %v5430_v41  ;;  %v7098_v13 = vld [vmem:[%s12940_s3 + $0xf8] sm:$0xf]  ;;  %v7331_v1 = vld [vmem:[%s12940_s3 + $0x100] sm:$0xf0]  ;;  %v7062_v41 = vld [vmem:[%s12940_s3 + $0x20] sm:$0xf] }
 0xbbb   :  { %v7099_v9 = vor.u32 %v7331_v1, %v7098_v13 }
 0xbbe   :  { %v5467_v43 = vpop.permute.xlu0 %5466 }
 0xbbf   :  { %v5470_v8 = vsel %vm5468_vm2, %v13584_v42, %v5467_v43  ;;  %v5472_v16 = vsel %vm5468_vm2, %v5467_v43, %v13584_v42  ;;  %v7102_v42 = vld [vmem:[%s12940_s3 + $0x110] sm:$0xf] }
 0xbc0   :  { %v5483_v6 = vmul.f32 %v13586_v31, %v5470_v8  ;;  %v5484_v63 = vmul.f32 %v13586_v31, %v5472_v16  ;;  %v7332_v16 = vld [vmem:[%s12940_s3 + $0x118] sm:$0xf0]  ;;  %v7322_v31 = vld [vmem:[%s12940_s3 + $0x28] sm:$0xf0] }
 0xbc1   :  { %v7103_v44 = vor.u32 %v7332_v16, %v7102_v42 }
 0xbc2   :  { %v5487_v52 = vadd.f32 %v5483_v6, %v5458_v54  ;;  %v5488_v47 = vadd.f32 %v5484_v63, %v5459_v60  ;;  %v7094_v6 = vld [vmem:[%s12940_s3 + $0xe0] sm:$0xf]  ;;  %v7330_v63 = vld [vmem:[%s12940_s3 + $0xe8] sm:$0xf0] }
 0xbc6   :  { %v5496_v57 = vpop.permute.xlu0 %5495 }
 0xbc7   :  { %v5499_v36 = vsel %vm5497_vm13, %v12619_v25, %v5496_v57  ;;  %v5501_v28 = vsel %vm5497_vm13, %v5496_v57, %v12619_v25  ;;  %v7324_v57 = vld [vmem:[%s12940_s3 + $0x58] sm:$0xf0] }
 0xbc8   :  { %v5512_v59 = vmul.f32 %v12679_v11, %v5499_v36  ;;  %v5513_v10 = vmul.f32 %v12679_v11, %v5501_v28  ;;  %v7071_v8 = vor.u32 %v7324_v57, %v7070_v40  ;;  %v7067_v36 = vor.u32 %v7323_v15, %v7066_v22  ;;  %v7122_v40 = vld [vmem:[%s12941_s4 + $0x8] sm:$0xf]  ;;  %v7337_v57 = vld [vmem:[%s12941_s4 + $0x18] sm:$0xf0] }
 0xbca   :  { %v5516_v18 = vadd.f32 %v5512_v59, %v5487_v52  ;;  %v5517_v27 = vadd.f32 %v5513_v10, %v5488_v47  ;;  %v7095_v52 = vor.u32 %v7330_v63, %v7094_v6  ;;  %v7058_v47 = vld [vmem:[%s12940_s3 + $0x8] sm:$0xf]  ;;  %v5835_v63 = vld [vmem:[%s12941_s4 + $0xc] sm:$0x3] }
 0xbce   :  { %v5525_v50 = vpop.permute.xlu0 %5524 }
 0xbcf   :  { %v5528_v25 = vsel %vm5526_vm5, %v12696_v14, %v5525_v50  ;;  %v5530_v2 = vsel %vm5526_vm5, %v5525_v50, %v12696_v14  ;;  %v7321_v50 = vld [vmem:[%s12940_s3 + $0x10] sm:$0xf0] }
 0xbd0   :  { %v5541_v34 = vmul.f32 %v5537_v17, %v5528_v25  ;;  %v5542_v11 = vmul.f32 %v5537_v17, %v5530_v2  ;;  %v7063_v17 = vor.u32 %v7322_v31, %v7062_v41  ;;  %v7090_v2 = vld [vmem:[%s12940_s3 + $0xc8] sm:$0xf] }
 0xbd2   :  { %v5545_v14 = vadd.f32 %v5541_v34, %v5516_v18  ;;  %v5546_v24 = vadd.f32 %v5542_v11, %v5517_v27  ;;  %v7059_v27 = vor.u32 %v7321_v50, %v7058_v47  ;;  %v7091_v11 = vor.u32 %v7329_v61, %v7090_v2 }
 0xbd4   :  { %v5549_v58 = vpack.c.bf16 %v5545_v14, %v12711_v4  ;;  %v5550_v30 = vpack.c.bf16 %v5546_v24, %v12713_v37  ;;  %v7327_v4 = vld [vmem:[%s12940_s3 + $0xa0] sm:$0xf0]  ;;  %v7114_v37 = vld [vmem:[%s12940_s3 + $0x158] sm:$0xf]  ;;  %s7618_s3 = smov 104  }
 0xbd5   :  { %v7083_v43 = vor.u32 %v7327_v4, %v7082_v45  ;;  %v7115_v33 = vor.u32 %v7335_v56, %v7114_v37  ;;  %5805 = vrot.lane.b32.xlu1 %v13577_v35, %s7618_s3  ;;  %5803 = vrot.lane.b32.xlu2 %v13578_v29, %s7618_s3  ;;  %v5812_v35 = vld [vmem:[%s12941_s4 + $0x10] sm:$0xf] }
 0xbd6   :  { %5575 = vmatpush.bf16.msrb.mxu2 %v5549_v58  ;;  %5589 = vmatpush.bf16.msrb.mxu3 %v5550_v30  ;;  %v5819_v29 = vsel %vm5817_vm12, %v5812_v35, 0 }
 0xbd9   :  { %7050 = vmatmul.msk.bf16.vlgmr.msrb.gmra.mxu2 %vm5564_vm7, %v7049_v38  ;;  %7051 = vmatmul.msk.bf16.vlgmr.msrb.gmra.mxu3 %vm5564_vm7, %v7049_v38 }
 0xbda   :  { %5750 = vmatpush.bf16.msra.mxu2 %v7087_v51  ;;  %5764 = vmatpush.bf16.msra.mxu3 %v7119_v20 }
 0xbde   :  { %5751 = vmatpush.bf16.msra.mxu2 %v7083_v43  ;;  %5765 = vmatpush.bf16.msra.mxu3 %v7115_v33 }
 0xbe2   :  { %5752 = vmatpush.bf16.msra.mxu2 %v7079_v55  ;;  %5766 = vmatpush.bf16.msra.mxu3 %v7111_v49 }
 0xbe6   :  { %5753 = vmatpush.bf16.msra.mxu2 %v7075_v3  ;;  %5767 = vmatpush.bf16.msra.mxu3 %v7107_v62 }
 0xbea   :  { %5754 = vmatpush.bf16.msra.mxu2 %v7071_v8  ;;  %5768 = vmatpush.bf16.msra.mxu3 %v7103_v44  ;;  %v7123_v8 = vor.u32 %v7337_v57, %v7122_v40 }
 0xbee   :  { %5755 = vmatpush.bf16.msra.mxu2 %v7067_v36  ;;  %5769 = vmatpush.bf16.msra.mxu3 %v7099_v9  ;;  %v7619_v9 = vmov 6  }
 0xbef   :  { %7437 = vset.pattern.permute.xlu2 %v7619_v9  ;;  %7438 = vset.pattern.permute.xlu0 %v7619_v9 }
 0xbf2   :  { %5756 = vmatpush.bf16.msra.mxu2 %v7063_v17  ;;  %5770 = vmatpush.bf16.msra.mxu3 %v7095_v52 }
 0xbf6   :  { %5757 = vmatpush.bf16.msra.mxu2 %v7059_v27  ;;  %5771 = vmatpush.bf16.msra.mxu3 %v7091_v11 }
 0xbfa   :  { %5828 = vmatpush.bf16.msrb.mxu3 %v5819_v29 }
 0xbff   :  { %v5553_v28 = vpop.permute.xlu0 %5552  ;;  %v5557_v34 = vpop.permute.xlu1 %5556 }
 0xc2f   :  { %v5804_v15 = vpop.permute.xlu2 %5803 }
 0xc47   :  { %v5806_v22 = vpop.permute.xlu1 %5805 }
 0xc5c   :  { %v5577_v54 = vpop.f32.mrf.mxu2  ;;  %v5591_v60 = vpop.f32.mrf.mxu3 }
 0xc5d   :  { %v5578_v59 = vadd.f32 %v5577_v54, %v5553_v28  ;;  %v5592_v10 = vadd.f32 %v5591_v60, %v5553_v28  ;;  %v5837_v28 = vld [vmem:[%s12938_s5] sm:$0xf] }
 0xc5e   :  { %5840 = vperm.xlu2 %7437, %v5837_v28  }
 0xc5f   :  { %v5600_v25 = vmin.f32 %v5578_v59, 0.0  ;;  %v5601_v18 = vmin.f32 %v5592_v10, 0.0  ;;  %vm5596_vm0 = vcmp.gt.f32.partialorder %v5578_v59, 0.0  ;;  %vm5597_vm9 = vcmp.gt.f32.partialorder %v5592_v10, 0.0 }
 0xc61   :  { %v5604_v46 = vmul.f32 1.442695, %v5600_v25  ;;  %v5606_v12 = vmul.f32 1.442695, %v5601_v18 }
 0xc63   :  { %7543 = vpow2.f32 %v5604_v46 }
 0xc64   :  { %v5579_v5 = vpop.f32.mrf.mxu2  ;;  %v5593_v14 = vpop.f32.mrf.mxu3  ;;  %7545 = vpow2.f32 %v5606_v12 }
 0xc65   :  { %v5580_v24 = vadd.f32 %v5579_v5, %v5557_v34  ;;  %v5594_v53 = vadd.f32 %v5593_v14, %v5557_v34 }
 0xc67   :  { %v5602_v7 = vmin.f32 %v5580_v24, 0.0  ;;  %v5603_v51 = vmin.f32 %v5594_v53, 0.0  ;;  %vm5598_vm8 = vcmp.gt.f32.partialorder %v5580_v24, 0.0  ;;  %vm5599_vm11 = vcmp.gt.f32.partialorder %v5594_v53, 0.0 }
 0xc69   :  { %v5608_v20 = vmul.f32 1.442695, %v5602_v7  ;;  %v5610_v58 = vmul.f32 1.442695, %v5603_v51  ;;  %v7544_v30 = vpop.eup %7543 }
 0xc6a   :  { %v7546_v38 = vpop.eup %7545  ;;  %v7052_v45 = vadd.f32 -1.0, %v7544_v30 }
 0xc6b   :  { %7547 = vpow2.f32 %v5608_v20  ;;  %v7053_v37 = vadd.f32 -1.0, %v7546_v38 }
 0xc6c   :  { %7549 = vpow2.f32 %v5610_v58  ;;  %v5616_v0 = vsel %vm5596_vm0, %v5578_v59, %v7052_v45 }
 0xc6d   :  { %v5617_v26 = vsel %vm5597_vm9, %v5592_v10, %v7053_v37 }
 0xc71   :  { %v7548_v4 = vpop.eup %7547 }
 0xc72   :  { %v7550_v43 = vpop.eup %7549  ;;  %v7054_v56 = vadd.f32 -1.0, %v7548_v4 }
 0xc73   :  { %v7055_v48 = vadd.f32 -1.0, %v7550_v43 }
 0xc74   :  { %v5618_v33 = vsel %vm5598_vm8, %v5580_v24, %v7054_v56 }
 0xc75   :  { %v5620_v23 = vpack.c.bf16 %v5618_v33, %v5616_v0  ;;  %v5619_v55 = vsel %vm5599_vm11, %v5594_v53, %v7055_v48 }
 0xc76   :  { %v5621_v49 = vpack.c.bf16 %v5619_v55, %v5617_v26 }
 0xc77   :  { %5758 = vmatmul.bf16.vlgmr.msra.gmra.mxu2 %v5620_v23 }
 0xc78   :  { %5772 = vmatmul.bf16.vlgmr.msra.gmra.mxu3 %v5621_v49 }
 0xcb8   :  { %v5841_v54 = vpop.permute.xlu2 %5840 }
 0xcfa   :  { %v5759_v21 = vpop.f32.mrf.mxu2 }
 0xcfb   :  { %v5773_v19 = vpop.f32.mrf.mxu3 }
 0xcfc   :  { %v5774_v39 = vadd.f32 %v5773_v19, %v5759_v21 }
 0xd02   :  { %v5761_v32 = vpop.f32.mrf.mxu2 }
 0xd03   :  { %v5775_v3 = vpop.f32.mrf.mxu3 }
 0xd04   :  { %v5776_v62 = vadd.f32 %v5775_v3, %v5761_v32 }
 0xd06   :  { %v5780_v42 = vpack.c.bf16 %v5776_v62, %v5774_v39 }
 0xd08   :  { %5796 = vmatpush.bf16.msrb.mxu2 %v5780_v42 }
 0xd0b   :  { %7124 = vmatmul.msk.bf16.vlgmr.msrb.gmra.mxu2 %vm5564_vm7, %v7123_v8 }
 0xd8e   :  { %v5798_v16 = vpop.f32.mrf.mxu2 }
 0xd8f   :  { %v5809_v1 = vmul.f32 %v5804_v15, %v5798_v16 }
 0xd96   :  { %v5800_v44 = vpop.f32.mrf.mxu2 }
 0xd97   :  { %v5810_v13 = vmul.f32 %v5806_v22, %v5800_v44 }
 0xd99   :  { %v5811_v36 = vpack.c.bf16 %v5810_v13, %v5809_v1 }
 0xd9b   :  { %7125 = vmatmul.msk.bf16.vlgmr.msrb.gmra.mxu3 %vm5813_vm15, %v5811_v36 }
 0xe1e   :  { %v5830_v41 = vpop.f32.mrf.mxu3 }
 0xe26   :  { %v5832_v31 = vpop.f32.mrf.mxu3 }
 0xe27   :  { %v5836_v6 = vpack.c.bf16 %v5832_v31, %v5830_v41 }
 0xe29   :  { %5853 = vmatpush.bf16.msra.mxu2 %v5836_v6 }
 0xe2c   :  { %7126 = vmatmul.msk.bf16.vlgmr.msra.gmra.mxu2 %vm5564_vm7, %v5835_v63 }
 0xeaf   :  { %v5855_v60 = vpop.f32.mrf.mxu2 }
 0xeb0   :  { %v5856_v59 = vadd.f32 %v5855_v60, %v5841_v54 }
 0xeb2   :  { %v5860_v10 = vsel %vm5859_vm3, %v5856_v59, -inf }
 0xeb3   :  { %v5861_v17 = vrot.slane %v5860_v10, 4 }
 0xeb5   :  { %v5862_v52 = vmax.f32 %v5860_v10, %v5861_v17 }
 0xeb7   :  { %v5863_v47 = vrot.slane %v5862_v52, 2  ;;  %v5857_v50 = vpop.f32.mrf.mxu2 }
 0xeb9   :  { %v5864_v25 = vmax.f32 %v5862_v52, %v5863_v47 }
 0xebb   :  { %v5865_v2 = vrot.slane %v5864_v25, 1 }
 0xebd   :  { %v5866_v61 = vmax.f32 %v5864_v25, %v5865_v2 }
 0xebf   :  { %v5867_v18 = vsub.f32 %v5856_v59, %v5866_v61 }
 0xec1   :  { %v5868_v27 = vmul.f32 1.442695, %v5867_v18 }
 0xec3   :  { %7551 = vpow2.f32 %v5868_v27 }
 0xec9   :  { %v7552_v34 = vpop.eup %7551 }
 0xeca   :  { %v5870_v11 = vsel %vm5859_vm3, %v7552_v34, 0.0 }
 0xecb   :  { %v5871_v46 = vrot.slane %v5870_v11, 4 }
 0xecd   :  { %v5872_v12 = vadd.f32 %v5871_v46, %v5870_v11 }
 0xecf   :  { %v5873_v5 = vrot.slane %v5872_v12, 2 }
 0xed1   :  { %v5874_v14 = vadd.f32 %v5873_v5, %v5872_v12 }
 0xed3   :  { %v5875_v24 = vrot.slane %v5874_v14, 1 }
 0xed5   :  { %v5876_v53 = vadd.f32 %v5875_v24, %v5874_v14 }
 0xed7   :  { %7553 = vlog2.f32 %v5876_v53 }
 0xedd   :  { %v7554_v7 = vpop.eup %7553 }
 0xede   :  { %v5878_v51 = vmul.f32 0.6931472, %v7554_v7 }
 0xee0   :  { %v5879_v20 = vadd.f32 %v5878_v51, %v5866_v61 }
 0xee2   :  { %v5880_v58 = vsub.f32 %v5856_v59, %v5879_v20 }
 0xee4   :  { %5881 = vst.msk [vmem:[%s12942_s6] sm:$0xf] %vm5859_vm3, %v5880_v58 }

</bundles_post_ra>
